<compile_context>
chip_gen: v5e
topology: v5e:2x2
jax: 0.10.0
libtpu: 0.0.40
codegen_flags: <defaults>
</compile_context>

<pallas_src>
import functools

import jax
import jax.numpy as jnp
from jax.experimental import pallas as pl
from jax.experimental.pallas import tpu as pltpu


def _round_up(x, m):
    return ((x + m - 1) // m) * m


# ----------------------------- Pallas kernel -------------------------------

def _residual_block_kernel(x_ref, w_ref, o_ref, pad_ref, acc_ref, *,
                           H, W, C, compute_dtype):
    """Fused ResidualBlock for one batch element.

    x_ref:   (1, H, W, C)              input tile (VMEM)
    w_ref:   (2, 9, C, C)              [conv1, conv2] weights, tap k = kh*3+kw,
                                       each (C_in, C_out), already compute_dtype
    o_ref:   (1, H, W, C)              output tile
    pad_ref: (H+2, Wp, C) compute_dtype   reflect-pad scratch (Wp = roundup(W+2, 8))
    acc_ref: (H*W, C) float32          conv accumulator scratch
    """
    hw = H * W

    def reflect_halo():
        # Halo derived from the already-written center region of pad_ref.
        # Rows first, then columns from the padded rows (covers corners).
        pad_ref[0:1, 1:W + 1, :] = pad_ref[2:3, 1:W + 1, :]              # top
        pad_ref[H + 1:H + 2, 1:W + 1, :] = pad_ref[H - 1:H, 1:W + 1, :]  # bottom
        pad_ref[0:H + 2, 0:1, :] = pad_ref[0:H + 2, 2:3, :]              # left
        pad_ref[0:H + 2, W + 1:W + 2, :] = pad_ref[0:H + 2, W - 1:W, :]  # right

    def conv3x3(conv_idx):
        """3x3 conv from pad_ref via 9 accumulating matmuls into acc_ref."""
        for k in range(9):
            kh, kw = k // 3, k % 3
            tap = pad_ref[kh:kh + H, kw:kw + W, :].reshape(hw, C)
            part = jnp.dot(tap, w_ref[conv_idx, k],
                           preferred_element_type=jnp.float32)   # (H*W, C) f32
            if k == 0:
                acc_ref[...] = part
            else:
                acc_ref[...] += part

    def in_stats():
        """One-pass per-channel mean / inverse-std over the H*W axis (biased)."""
        y = acc_ref[...]                                          # (H*W, C) f32
        s = jnp.sum(y, axis=0, keepdims=True)
        sq = jnp.sum(y * y, axis=0, keepdims=True)
        mean = s * (1.0 / hw)
        var = jnp.maximum(sq * (1.0 / hw) - mean * mean, 0.0)
        inv_std = jax.lax.rsqrt(var + 1e-5)
        return mean, inv_std

    # ---- conv1 -> IN -> ReLU  (bias omitted: cancelled by IN mean-sub) ----
    pad_ref[1:H + 1, 1:W + 1, :] = x_ref[0].astype(compute_dtype)
    reflect_halo()
    conv3x3(0)
    mean, inv_std = in_stats()
    h = jnp.maximum((acc_ref[...] - mean) * inv_std, 0.0)        # (H*W, C) f32

    # ---- reflect-pad(h) written straight into pad_ref, conv2 -> IN --------
    pad_ref[1:H + 1, 1:W + 1, :] = h.reshape(H, W, C).astype(compute_dtype)
    reflect_halo()
    conv3x3(1)
    mean, inv_std = in_stats()
    y = (acc_ref[...] - mean) * inv_std                          # (H*W, C) f32

    # ---- residual add (re-read the resident input block) ------------------
    out = y.reshape(1, H, W, C) + x_ref[...].astype(jnp.float32)
    o_ref[...] = out.astype(o_ref.dtype)


# ------------------------------- wrappers -----------------------------------

def _pack_weights(w1_oihw, w2_oihw, compute_dtype):
    """PyTorch OIHW (C, C, 3, 3) -> (2, 9, C_in, C_out), tap k = kh*3 + kw."""
    def one(w):
        # (C_out, C_in, 3, 3) -> (3, 3, C_in, C_out) -> (9, C_in, C_out)
        return jnp.transpose(w, (2, 3, 1, 0)).reshape(9, w.shape[1], w.shape[0])

    return jnp.stack([one(w1_oihw), one(w2_oihw)], axis=0).astype(compute_dtype)


def _vmem_budget_bytes(H, W, C, x_bytes, compute_bytes):
    wp = _round_up(W + 2, 8)
    img_io = H * W * C * x_bytes
    pad = (H + 2) * wp * C * compute_bytes
    acc = H * W * C * 4
    weights = 2 * 9 * C * C * compute_bytes
    temps = 4 * H * W * C * 4              # tap reshape copies / IN temporaries
    need = 4 * img_io + weights + pad + acc + temps + (4 << 20)
    try:
        cap = int(pltpu.get_tpu_info().vmem_capacity_bytes)
    except Exception:
        cap = 64 << 20                     # conservative (v7x-sized) fallback
    # Leave ~8 MiB headroom below physical VMEM for compiler internal scratch.
    return int(min(max(need, 16 << 20), cap - (8 << 20)))


def residual_block(x_nchw, params, *, compute_dtype=jnp.float32):
    """ResidualBlock forward; input/output in NCHW like the PyTorch module.

    params: {"w1": (C,C,3,3), "b1": (C,), "w2": (C,C,3,3), "b2": (C,)}
    Biases are accepted for interface parity but intentionally unused: with
    InstanceNorm2d(affine=False) immediately after each conv a per-channel
    constant bias cancels exactly.  compute_dtype=jnp.bfloat16 is recommended
    for production shapes on v6e/v7x; accumulation stays float32 either way.
    """
    N, C, H, W = x_nchw.shape
    assert H >= 2 and W >= 2, "reflect padding needs H >= 2 and W >= 2"

    x = jnp.transpose(x_nchw, (0, 2, 3, 1))                      # NCHW -> NHWC
    w = _pack_weights(params["w1"], params["w2"], compute_dtype)  # (2,9,C,C)

    wp = _round_up(W + 2, 8)
    kernel = functools.partial(_residual_block_kernel, H=H, W=W, C=C,
                               compute_dtype=compute_dtype)

    out = pl.pallas_call(
        kernel,
        out_shape=jax.ShapeDtypeStruct((N, H, W, C), x.dtype),
        grid_spec=pltpu.PrefetchScalarGridSpec(
            num_scalar_prefetch=0,
            grid=(N,),
            in_specs=[
                # Whole image per grid step (one batch element).
                pl.BlockSpec((1, H, W, C), lambda n: (n, 0, 0, 0)),
                # Constant index_map -> weights DMA'd once, VMEM-resident.
                pl.BlockSpec((2, 9, C, C), lambda n: (0, 0, 0, 0)),
            ],
            out_specs=pl.BlockSpec((1, H, W, C), lambda n: (n, 0, 0, 0)),
            scratch_shapes=[
                pltpu.VMEM((H + 2, wp, C), compute_dtype),   # reflect-pad scratch
                pltpu.VMEM((H * W, C), jnp.float32),         # conv accumulator
            ],
        ),
        compiler_params=pltpu.CompilerParams(
            dimension_semantics=("parallel",),
            vmem_limit_bytes=_vmem_budget_bytes(
                H, W, C, x.dtype.itemsize, jnp.dtype(compute_dtype).itemsize),
        ),
    )(x, w)
    return jnp.transpose(out, (0, 3, 1, 2))                      # NHWC -> NCHW


# --------------------------- pure-JAX reference ------------------------------

def _ref_conv_in(x_nchw, w, b, relu):
    xp = jnp.pad(x_nchw, ((0, 0), (0, 0), (1, 1), (1, 1)), mode="reflect")
    y = jax.lax.conv_general_dilated(
        xp, w, (1, 1), "VALID",
        dimension_numbers=("NCHW", "OIHW", "NCHW"))
    y = y + b[None, :, None, None]
    mean = y.mean(axis=(2, 3), keepdims=True)
    var = y.var(axis=(2, 3), keepdims=True)          # biased, like InstanceNorm
    y = (y - mean) / jnp.sqrt(var + 1e-5)
    return jnp.maximum(y, 0.0) if relu else y


def _ref_residual_block(x_nchw, params):
    h = _ref_conv_in(x_nchw, params["w1"], params["b1"], relu=True)
    r = _ref_conv_in(h, params["w2"], params["b2"], relu=False)
    return x_nchw + r


# ---------------------------------- main -------------------------------------

if __name__ == "__main__":
    N, C, H, W = 2, 4, 16, 16

    key = jax.random.PRNGKey(0)
    kx, kw1, kb1, kw2, kb2 = jax.random.split(key, 5)

    x = jax.random.normal(kx, (N, C, H, W), jnp.float32)

    fan_in = C * 3 * 3
    params = {
        "w1": jax.random.normal(kw1, (C, C, 3, 3), jnp.float32) / jnp.sqrt(fan_in),
        "b1": jax.random.normal(kb1, (C,), jnp.float32) * 0.1,
        "w2": jax.random.normal(kw2, (C, C, 3, 3), jnp.float32) / jnp.sqrt(fan_in),
        "b2": jax.random.normal(kb2, (C,), jnp.float32) * 0.1,
    }

    out = jax.block_until_ready(residual_block(x, params))
    ref = jax.block_until_ready(_ref_residual_block(x, params))

    assert out.shape == (N, C, H, W), out.shape
    # compute_dtype=f32 here; bf16 would need a looser tolerance.
    assert jnp.allclose(out, ref, rtol=1e-4, atol=1e-4), (
        float(jnp.max(jnp.abs(out - ref))))

    print("KERNEL_OK")
</pallas_src>

<mosaic_0001>
module attributes {stable_mosaic.version = 11 : i64} {
  func.func @_residual_block_kernel(%arg0: i32, %arg1: memref<1x16x16x4xf32, #tpu.memory_space<vmem>>, %arg2: memref<2x9x4x4xf32, #tpu.memory_space<vmem>>, %arg3: memref<1x16x16x4xf32, #tpu.memory_space<vmem>>, %arg4: memref<18x24x4xf32, #tpu.memory_space<vmem>>, %arg5: memref<256x4xf32, #tpu.memory_space<vmem>>) attributes {dimension_semantics = [#tpu.dimension_semantics<parallel>], iteration_bounds = array<i64: 2>, scalar_prefetch = 0 : i64, scratch_operands = 2 : i64, tpu.core_type = #tpu.core_type<tc>, window_params = [{transform_indices = @transform_0, window_bounds = array<i64: 1, 16, 16, 4>}, {pipeline_mode = #tpu.pipeline_mode<synchronous>, transform_indices = @transform_1, window_bounds = array<i64: 2, 9, 4, 4>}, {transform_indices = @transform_2, window_bounds = array<i64: 1, 16, 16, 4>}]} {
    %c0 = arith.constant 0 : index
    %c0_0 = arith.constant 0 : index
    %c0_1 = arith.constant 0 : index
    %c0_2 = arith.constant 0 : index
    %0 = vector.load %arg1[%c0, %c0_0, %c0_1, %c0_2] : memref<1x16x16x4xf32, #tpu.memory_space<vmem>>, vector<1x16x16x4xf32>
    %1 = vector.shape_cast %0 : vector<1x16x16x4xf32> to vector<16x16x4xf32>
    %c1 = arith.constant 1 : index
    %c1_3 = arith.constant 1 : index
    %c0_4 = arith.constant 0 : index
    %2 = vector.load %arg4[%c1, %c1_3, %c0_4] : memref<18x24x4xf32, #tpu.memory_space<vmem>>, vector<16x16x4xf32>
    tpu.vector_store %arg4[%c1, %c1_3, %c0_4], %1 {strides = array<i32>} : memref<18x24x4xf32, #tpu.memory_space<vmem>>, vector<16x16x4xf32>,
    %c2 = arith.constant 2 : index
    %c1_5 = arith.constant 1 : index
    %c0_6 = arith.constant 0 : index
    %3 = vector.load %arg4[%c2, %c1_5, %c0_6] : memref<18x24x4xf32, #tpu.memory_space<vmem>>, vector<1x16x4xf32>
    %c0_7 = arith.constant 0 : index
    %c1_8 = arith.constant 1 : index
    %c0_9 = arith.constant 0 : index
    %4 = vector.load %arg4[%c0_7, %c1_8, %c0_9] : memref<18x24x4xf32, #tpu.memory_space<vmem>>, vector<1x16x4xf32>
    tpu.vector_store %arg4[%c0_7, %c1_8, %c0_9], %3 {strides = array<i32>} : memref<18x24x4xf32, #tpu.memory_space<vmem>>, vector<1x16x4xf32>,
    %c15 = arith.constant 15 : index
    %c1_10 = arith.constant 1 : index
    %c0_11 = arith.constant 0 : index
    %5 = vector.load %arg4[%c15, %c1_10, %c0_11] : memref<18x24x4xf32, #tpu.memory_space<vmem>>, vector<1x16x4xf32>
    %c17 = arith.constant 17 : index
    %c1_12 = arith.constant 1 : index
    %c0_13 = arith.constant 0 : index
    %6 = vector.load %arg4[%c17, %c1_12, %c0_13] : memref<18x24x4xf32, #tpu.memory_space<vmem>>, vector<1x16x4xf32>
    tpu.vector_store %arg4[%c17, %c1_12, %c0_13], %5 {strides = array<i32>} : memref<18x24x4xf32, #tpu.memory_space<vmem>>, vector<1x16x4xf32>,
    %c0_14 = arith.constant 0 : index
    %c2_15 = arith.constant 2 : index
    %c0_16 = arith.constant 0 : index
    %7 = vector.load %arg4[%c0_14, %c2_15, %c0_16] : memref<18x24x4xf32, #tpu.memory_space<vmem>>, vector<18x1x4xf32>
    %c0_17 = arith.constant 0 : index
    %c0_18 = arith.constant 0 : index
    %c0_19 = arith.constant 0 : index
    %8 = vector.load %arg4[%c0_17, %c0_18, %c0_19] : memref<18x24x4xf32, #tpu.memory_space<vmem>>, vector<18x1x4xf32>
    tpu.vector_store %arg4[%c0_17, %c0_18, %c0_19], %7 {strides = array<i32>} : memref<18x24x4xf32, #tpu.memory_space<vmem>>, vector<18x1x4xf32>,
    %c0_20 = arith.constant 0 : index
    %c15_21 = arith.constant 15 : index
    %c0_22 = arith.constant 0 : index
    %9 = vector.load %arg4[%c0_20, %c15_21, %c0_22] : memref<18x24x4xf32, #tpu.memory_space<vmem>>, vector<18x1x4xf32>
    %c0_23 = arith.constant 0 : index
    %c17_24 = arith.constant 17 : index
    %c0_25 = arith.constant 0 : index
    %10 = vector.load %arg4[%c0_23, %c17_24, %c0_25] : memref<18x24x4xf32, #tpu.memory_space<vmem>>, vector<18x1x4xf32>
    tpu.vector_store %arg4[%c0_23, %c17_24, %c0_25], %9 {strides = array<i32>} : memref<18x24x4xf32, #tpu.memory_space<vmem>>, vector<18x1x4xf32>,
    %c0_26 = arith.constant 0 : index
    %c0_27 = arith.constant 0 : index
    %c0_28 = arith.constant 0 : index
    %11 = vector.load %arg4[%c0_26, %c0_27, %c0_28] : memref<18x24x4xf32, #tpu.memory_space<vmem>>, vector<16x16x4xf32>
    %12 = vector.shape_cast %11 : vector<16x16x4xf32> to vector<256x4xf32>
    %c0_29 = arith.constant 0 : index
    %c0_30 = arith.constant 0 : index
    %c0_31 = arith.constant 0 : index
    %c0_32 = arith.constant 0 : index
    %13 = vector.load %arg2[%c0_29, %c0_30, %c0_31, %c0_32] : memref<2x9x4x4xf32, #tpu.memory_space<vmem>>, vector<1x1x4x4xf32>
    %14 = vector.shape_cast %13 : vector<1x1x4x4xf32> to vector<4x4xf32>
    %cst = arith.constant dense<0.000000e+00> : vector<256x4xf32>
    %15 = tpu.matmul %12, %14, %cst {dimension_numbers = #tpu.dot_dimension_numbers<[1], [0], [0], [1], [0, 0, 1, 1], [], []>} : vector<256x4xf32>, vector<4x4xf32>, vector<256x4xf32> -> vector<256x4xf32>
    %c0_33 = arith.constant 0 : index
    %c0_34 = arith.constant 0 : index
    %16 = vector.load %arg5[%c0_33, %c0_34] : memref<256x4xf32, #tpu.memory_space<vmem>>, vector<256x4xf32>
    tpu.vector_store %arg5[%c0_33, %c0_34], %15 {strides = array<i32>} : memref<256x4xf32, #tpu.memory_space<vmem>>, vector<256x4xf32>,
    %c0_35 = arith.constant 0 : index
    %c1_36 = arith.constant 1 : index
    %c0_37 = arith.constant 0 : index
    %17 = vector.load %arg4[%c0_35, %c1_36, %c0_37] : memref<18x24x4xf32, #tpu.memory_space<vmem>>, vector<16x16x4xf32>
    %18 = vector.shape_cast %17 : vector<16x16x4xf32> to vector<256x4xf32>
    %c0_38 = arith.constant 0 : index
    %c1_39 = arith.constant 1 : index
    %c0_40 = arith.constant 0 : index
    %c0_41 = arith.constant 0 : index
    %19 = vector.load %arg2[%c0_38, %c1_39, %c0_40, %c0_41] : memref<2x9x4x4xf32, #tpu.memory_space<vmem>>, vector<1x1x4x4xf32>
    %20 = vector.shape_cast %19 : vector<1x1x4x4xf32> to vector<4x4xf32>
    %cst_42 = arith.constant dense<0.000000e+00> : vector<256x4xf32>
    %21 = tpu.matmul %18, %20, %cst_42 {dimension_numbers = #tpu.dot_dimension_numbers<[1], [0], [0], [1], [0, 0, 1, 1], [], []>} : vector<256x4xf32>, vector<4x4xf32>, vector<256x4xf32> -> vector<256x4xf32>
    %c0_43 = arith.constant 0 : index
    %c0_44 = arith.constant 0 : index
    %22 = vector.load %arg5[%c0_43, %c0_44] : memref<256x4xf32, #tpu.memory_space<vmem>>, vector<256x4xf32>
    %23 = arith.addf %22, %21 : vector<256x4xf32>
    %c0_45 = arith.constant 0 : index
    %c0_46 = arith.constant 0 : index
    %24 = vector.load %arg5[%c0_45, %c0_46] : memref<256x4xf32, #tpu.memory_space<vmem>>, vector<256x4xf32>
    tpu.vector_store %arg5[%c0_45, %c0_46], %23 {strides = array<i32>} : memref<256x4xf32, #tpu.memory_space<vmem>>, vector<256x4xf32>,
    %c0_47 = arith.constant 0 : index
    %c2_48 = arith.constant 2 : index
    %c0_49 = arith.constant 0 : index
    %25 = vector.load %arg4[%c0_47, %c2_48, %c0_49] : memref<18x24x4xf32, #tpu.memory_space<vmem>>, vector<16x16x4xf32>
    %26 = vector.shape_cast %25 : vector<16x16x4xf32> to vector<256x4xf32>
    %c0_50 = arith.constant 0 : index
    %c2_51 = arith.constant 2 : index
    %c0_52 = arith.constant 0 : index
    %c0_53 = arith.constant 0 : index
    %27 = vector.load %arg2[%c0_50, %c2_51, %c0_52, %c0_53] : memref<2x9x4x4xf32, #tpu.memory_space<vmem>>, vector<1x1x4x4xf32>
    %28 = vector.shape_cast %27 : vector<1x1x4x4xf32> to vector<4x4xf32>
    %cst_54 = arith.constant dense<0.000000e+00> : vector<256x4xf32>
    %29 = tpu.matmul %26, %28, %cst_54 {dimension_numbers = #tpu.dot_dimension_numbers<[1], [0], [0], [1], [0, 0, 1, 1], [], []>} : vector<256x4xf32>, vector<4x4xf32>, vector<256x4xf32> -> vector<256x4xf32>
    %c0_55 = arith.constant 0 : index
    %c0_56 = arith.constant 0 : index
    %30 = vector.load %arg5[%c0_55, %c0_56] : memref<256x4xf32, #tpu.memory_space<vmem>>, vector<256x4xf32>
    %31 = arith.addf %30, %29 : vector<256x4xf32>
    %c0_57 = arith.constant 0 : index
    %c0_58 = arith.constant 0 : index
    %32 = vector.load %arg5[%c0_57, %c0_58] : memref<256x4xf32, #tpu.memory_space<vmem>>, vector<256x4xf32>
    tpu.vector_store %arg5[%c0_57, %c0_58], %31 {strides = array<i32>} : memref<256x4xf32, #tpu.memory_space<vmem>>, vector<256x4xf32>,
    %c1_59 = arith.constant 1 : index
    %c0_60 = arith.constant 0 : index
    %c0_61 = arith.constant 0 : index
    %33 = vector.load %arg4[%c1_59, %c0_60, %c0_61] : memref<18x24x4xf32, #tpu.memory_space<vmem>>, vector<16x16x4xf32>
    %34 = vector.shape_cast %33 : vector<16x16x4xf32> to vector<256x4xf32>
    %c0_62 = arith.constant 0 : index
    %c3 = arith.constant 3 : index
    %c0_63 = arith.constant 0 : index
    %c0_64 = arith.constant 0 : index
    %35 = vector.load %arg2[%c0_62, %c3, %c0_63, %c0_64] : memref<2x9x4x4xf32, #tpu.memory_space<vmem>>, vector<1x1x4x4xf32>
    %36 = vector.shape_cast %35 : vector<1x1x4x4xf32> to vector<4x4xf32>
    %cst_65 = arith.constant dense<0.000000e+00> : vector<256x4xf32>
    %37 = tpu.matmul %34, %36, %cst_65 {dimension_numbers = #tpu.dot_dimension_numbers<[1], [0], [0], [1], [0, 0, 1, 1], [], []>} : vector<256x4xf32>, vector<4x4xf32>, vector<256x4xf32> -> vector<256x4xf32>
    %c0_66 = arith.constant 0 : index
    %c0_67 = arith.constant 0 : index
    %38 = vector.load %arg5[%c0_66, %c0_67] : memref<256x4xf32, #tpu.memory_space<vmem>>, vector<256x4xf32>
    %39 = arith.addf %38, %37 : vector<256x4xf32>
    %c0_68 = arith.constant 0 : index
    %c0_69 = arith.constant 0 : index
    %40 = vector.load %arg5[%c0_68, %c0_69] : memref<256x4xf32, #tpu.memory_space<vmem>>, vector<256x4xf32>
    tpu.vector_store %arg5[%c0_68, %c0_69], %39 {strides = array<i32>} : memref<256x4xf32, #tpu.memory_space<vmem>>, vector<256x4xf32>,
    %c1_70 = arith.constant 1 : index
    %c1_71 = arith.constant 1 : index
    %c0_72 = arith.constant 0 : index
    %41 = vector.load %arg4[%c1_70, %c1_71, %c0_72] : memref<18x24x4xf32, #tpu.memory_space<vmem>>, vector<16x16x4xf32>
    %42 = vector.shape_cast %41 : vector<16x16x4xf32> to vector<256x4xf32>
    %c0_73 = arith.constant 0 : index
    %c4 = arith.constant 4 : index
    %c0_74 = arith.constant 0 : index
    %c0_75 = arith.constant 0 : index
    %43 = vector.load %arg2[%c0_73, %c4, %c0_74, %c0_75] : memref<2x9x4x4xf32, #tpu.memory_space<vmem>>, vector<1x1x4x4xf32>
    %44 = vector.shape_cast %43 : vector<1x1x4x4xf32> to vector<4x4xf32>
    %cst_76 = arith.constant dense<0.000000e+00> : vector<256x4xf32>
    %45 = tpu.matmul %42, %44, %cst_76 {dimension_numbers = #tpu.dot_dimension_numbers<[1], [0], [0], [1], [0, 0, 1, 1], [], []>} : vector<256x4xf32>, vector<4x4xf32>, vector<256x4xf32> -> vector<256x4xf32>
    %c0_77 = arith.constant 0 : index
    %c0_78 = arith.constant 0 : index
    %46 = vector.load %arg5[%c0_77, %c0_78] : memref<256x4xf32, #tpu.memory_space<vmem>>, vector<256x4xf32>
    %47 = arith.addf %46, %45 : vector<256x4xf32>
    %c0_79 = arith.constant 0 : index
    %c0_80 = arith.constant 0 : index
    %48 = vector.load %arg5[%c0_79, %c0_80] : memref<256x4xf32, #tpu.memory_space<vmem>>, vector<256x4xf32>
    tpu.vector_store %arg5[%c0_79, %c0_80], %47 {strides = array<i32>} : memref<256x4xf32, #tpu.memory_space<vmem>>, vector<256x4xf32>,
    %c1_81 = arith.constant 1 : index
    %c2_82 = arith.constant 2 : index
    %c0_83 = arith.constant 0 : index
    %49 = vector.load %arg4[%c1_81, %c2_82, %c0_83] : memref<18x24x4xf32, #tpu.memory_space<vmem>>, vector<16x16x4xf32>
    %50 = vector.shape_cast %49 : vector<16x16x4xf32> to vector<256x4xf32>
    %c0_84 = arith.constant 0 : index
    %c5 = arith.constant 5 : index
    %c0_85 = arith.constant 0 : index
    %c0_86 = arith.constant 0 : index
    %51 = vector.load %arg2[%c0_84, %c5, %c0_85, %c0_86] : memref<2x9x4x4xf32, #tpu.memory_space<vmem>>, vector<1x1x4x4xf32>
    %52 = vector.shape_cast %51 : vector<1x1x4x4xf32> to vector<4x4xf32>
    %cst_87 = arith.constant dense<0.000000e+00> : vector<256x4xf32>
    %53 = tpu.matmul %50, %52, %cst_87 {dimension_numbers = #tpu.dot_dimension_numbers<[1], [0], [0], [1], [0, 0, 1, 1], [], []>} : vector<256x4xf32>, vector<4x4xf32>, vector<256x4xf32> -> vector<256x4xf32>
    %c0_88 = arith.constant 0 : index
    %c0_89 = arith.constant 0 : index
    %54 = vector.load %arg5[%c0_88, %c0_89] : memref<256x4xf32, #tpu.memory_space<vmem>>, vector<256x4xf32>
    %55 = arith.addf %54, %53 : vector<256x4xf32>
    %c0_90 = arith.constant 0 : index
    %c0_91 = arith.constant 0 : index
    %56 = vector.load %arg5[%c0_90, %c0_91] : memref<256x4xf32, #tpu.memory_space<vmem>>, vector<256x4xf32>
    tpu.vector_store %arg5[%c0_90, %c0_91], %55 {strides = array<i32>} : memref<256x4xf32, #tpu.memory_space<vmem>>, vector<256x4xf32>,
    %c2_92 = arith.constant 2 : index
    %c0_93 = arith.constant 0 : index
    %c0_94 = arith.constant 0 : index
    %57 = vector.load %arg4[%c2_92, %c0_93, %c0_94] : memref<18x24x4xf32, #tpu.memory_space<vmem>>, vector<16x16x4xf32>
    %58 = vector.shape_cast %57 : vector<16x16x4xf32> to vector<256x4xf32>
    %c0_95 = arith.constant 0 : index
    %c6 = arith.constant 6 : index
    %c0_96 = arith.constant 0 : index
    %c0_97 = arith.constant 0 : index
    %59 = vector.load %arg2[%c0_95, %c6, %c0_96, %c0_97] : memref<2x9x4x4xf32, #tpu.memory_space<vmem>>, vector<1x1x4x4xf32>
    %60 = vector.shape_cast %59 : vector<1x1x4x4xf32> to vector<4x4xf32>
    %cst_98 = arith.constant dense<0.000000e+00> : vector<256x4xf32>
    %61 = tpu.matmul %58, %60, %cst_98 {dimension_numbers = #tpu.dot_dimension_numbers<[1], [0], [0], [1], [0, 0, 1, 1], [], []>} : vector<256x4xf32>, vector<4x4xf32>, vector<256x4xf32> -> vector<256x4xf32>
    %c0_99 = arith.constant 0 : index
    %c0_100 = arith.constant 0 : index
    %62 = vector.load %arg5[%c0_99, %c0_100] : memref<256x4xf32, #tpu.memory_space<vmem>>, vector<256x4xf32>
    %63 = arith.addf %62, %61 : vector<256x4xf32>
    %c0_101 = arith.constant 0 : index
    %c0_102 = arith.constant 0 : index
    %64 = vector.load %arg5[%c0_101, %c0_102] : memref<256x4xf32, #tpu.memory_space<vmem>>, vector<256x4xf32>
    tpu.vector_store %arg5[%c0_101, %c0_102], %63 {strides = array<i32>} : memref<256x4xf32, #tpu.memory_space<vmem>>, vector<256x4xf32>,
    %c2_103 = arith.constant 2 : index
    %c1_104 = arith.constant 1 : index
    %c0_105 = arith.constant 0 : index
    %65 = vector.load %arg4[%c2_103, %c1_104, %c0_105] : memref<18x24x4xf32, #tpu.memory_space<vmem>>, vector<16x16x4xf32>
    %66 = vector.shape_cast %65 : vector<16x16x4xf32> to vector<256x4xf32>
    %c0_106 = arith.constant 0 : index
    %c7 = arith.constant 7 : index
    %c0_107 = arith.constant 0 : index
    %c0_108 = arith.constant 0 : index
    %67 = vector.load %arg2[%c0_106, %c7, %c0_107, %c0_108] : memref<2x9x4x4xf32, #tpu.memory_space<vmem>>, vector<1x1x4x4xf32>
    %68 = vector.shape_cast %67 : vector<1x1x4x4xf32> to vector<4x4xf32>
    %cst_109 = arith.constant dense<0.000000e+00> : vector<256x4xf32>
    %69 = tpu.matmul %66, %68, %cst_109 {dimension_numbers = #tpu.dot_dimension_numbers<[1], [0], [0], [1], [0, 0, 1, 1], [], []>} : vector<256x4xf32>, vector<4x4xf32>, vector<256x4xf32> -> vector<256x4xf32>
    %c0_110 = arith.constant 0 : index
    %c0_111 = arith.constant 0 : index
    %70 = vector.load %arg5[%c0_110, %c0_111] : memref<256x4xf32, #tpu.memory_space<vmem>>, vector<256x4xf32>
    %71 = arith.addf %70, %69 : vector<256x4xf32>
    %c0_112 = arith.constant 0 : index
    %c0_113 = arith.constant 0 : index
    %72 = vector.load %arg5[%c0_112, %c0_113] : memref<256x4xf32, #tpu.memory_space<vmem>>, vector<256x4xf32>
    tpu.vector_store %arg5[%c0_112, %c0_113], %71 {strides = array<i32>} : memref<256x4xf32, #tpu.memory_space<vmem>>, vector<256x4xf32>,
    %c2_114 = arith.constant 2 : index
    %c2_115 = arith.constant 2 : index
    %c0_116 = arith.constant 0 : index
    %73 = vector.load %arg4[%c2_114, %c2_115, %c0_116] : memref<18x24x4xf32, #tpu.memory_space<vmem>>, vector<16x16x4xf32>
    %74 = vector.shape_cast %73 : vector<16x16x4xf32> to vector<256x4xf32>
    %c0_117 = arith.constant 0 : index
    %c8 = arith.constant 8 : index
    %c0_118 = arith.constant 0 : index
    %c0_119 = arith.constant 0 : index
    %75 = vector.load %arg2[%c0_117, %c8, %c0_118, %c0_119] : memref<2x9x4x4xf32, #tpu.memory_space<vmem>>, vector<1x1x4x4xf32>
    %76 = vector.shape_cast %75 : vector<1x1x4x4xf32> to vector<4x4xf32>
    %cst_120 = arith.constant dense<0.000000e+00> : vector<256x4xf32>
    %77 = tpu.matmul %74, %76, %cst_120 {dimension_numbers = #tpu.dot_dimension_numbers<[1], [0], [0], [1], [0, 0, 1, 1], [], []>} : vector<256x4xf32>, vector<4x4xf32>, vector<256x4xf32> -> vector<256x4xf32>
    %c0_121 = arith.constant 0 : index
    %c0_122 = arith.constant 0 : index
    %78 = vector.load %arg5[%c0_121, %c0_122] : memref<256x4xf32, #tpu.memory_space<vmem>>, vector<256x4xf32>
    %79 = arith.addf %78, %77 : vector<256x4xf32>
    %c0_123 = arith.constant 0 : index
    %c0_124 = arith.constant 0 : index
    %80 = vector.load %arg5[%c0_123, %c0_124] : memref<256x4xf32, #tpu.memory_space<vmem>>, vector<256x4xf32>
    tpu.vector_store %arg5[%c0_123, %c0_124], %79 {strides = array<i32>} : memref<256x4xf32, #tpu.memory_space<vmem>>, vector<256x4xf32>,
    %c0_125 = arith.constant 0 : index
    %c0_126 = arith.constant 0 : index
    %81 = vector.load %arg5[%c0_125, %c0_126] : memref<256x4xf32, #tpu.memory_space<vmem>>, vector<256x4xf32>
    %cst_127 = arith.constant dense<0.000000e+00> : vector<4xf32>
    %82 = vector.multi_reduction <add>, %81, %cst_127 [0] : vector<256x4xf32> to vector<4xf32>
    %83 = vector.shape_cast %82 : vector<4xf32> to vector<1x4xf32>
    %84 = arith.mulf %81, %81 : vector<256x4xf32>
    %cst_128 = arith.constant dense<0.000000e+00> : vector<4xf32>
    %85 = vector.multi_reduction <add>, %84, %cst_128 [0] : vector<256x4xf32> to vector<4xf32>
    %86 = vector.shape_cast %85 : vector<4xf32> to vector<1x4xf32>
    %cst_129 = arith.constant 3.906250e-03 : f32
    %87 = vector.broadcast %cst_129 : f32 to vector<1x4xf32>
    %88 = arith.mulf %83, %87 : vector<1x4xf32>
    %cst_130 = arith.constant 3.906250e-03 : f32
    %89 = vector.broadcast %cst_130 : f32 to vector<1x4xf32>
    %90 = arith.mulf %86, %89 : vector<1x4xf32>
    %91 = arith.mulf %88, %88 : vector<1x4xf32>
    %92 = arith.subf %90, %91 : vector<1x4xf32>
    %cst_131 = arith.constant 0.000000e+00 : f32
    %93 = vector.broadcast %cst_131 : f32 to vector<1x4xf32>
    %94 = arith.maximumf %92, %93 : vector<1x4xf32>
    %cst_132 = arith.constant 9.99999974E-6 : f32
    %95 = vector.broadcast %cst_132 : f32 to vector<1x4xf32>
    %96 = arith.addf %94, %95 : vector<1x4xf32>
    %97 = math.rsqrt %96 : vector<1x4xf32>
    %c0_133 = arith.constant 0 : index
    %c0_134 = arith.constant 0 : index
    %98 = vector.load %arg5[%c0_133, %c0_134] : memref<256x4xf32, #tpu.memory_space<vmem>>, vector<256x4xf32>
    %99 = vector.broadcast %88 : vector<1x4xf32> to vector<256x4xf32>
    %100 = arith.subf %98, %99 : vector<256x4xf32>
    %101 = vector.broadcast %97 : vector<1x4xf32> to vector<256x4xf32>
    %102 = arith.mulf %100, %101 : vector<256x4xf32>
    %cst_135 = arith.constant 0.000000e+00 : f32
    %103 = vector.broadcast %cst_135 : f32 to vector<256x4xf32>
    %104 = arith.maximumf %102, %103 : vector<256x4xf32>
    %105 = vector.shape_cast %104 : vector<256x4xf32> to vector<16x16x4xf32>
    %c1_136 = arith.constant 1 : index
    %c1_137 = arith.constant 1 : index
    %c0_138 = arith.constant 0 : index
    %106 = vector.load %arg4[%c1_136, %c1_137, %c0_138] : memref<18x24x4xf32, #tpu.memory_space<vmem>>, vector<16x16x4xf32>
    tpu.vector_store %arg4[%c1_136, %c1_137, %c0_138], %105 {strides = array<i32>} : memref<18x24x4xf32, #tpu.memory_space<vmem>>, vector<16x16x4xf32>,
    %c2_139 = arith.constant 2 : index
    %c1_140 = arith.constant 1 : index
    %c0_141 = arith.constant 0 : index
    %107 = vector.load %arg4[%c2_139, %c1_140, %c0_141] : memref<18x24x4xf32, #tpu.memory_space<vmem>>, vector<1x16x4xf32>
    %c0_142 = arith.constant 0 : index
    %c1_143 = arith.constant 1 : index
    %c0_144 = arith.constant 0 : index
    %108 = vector.load %arg4[%c0_142, %c1_143, %c0_144] : memref<18x24x4xf32, #tpu.memory_space<vmem>>, vector<1x16x4xf32>
    tpu.vector_store %arg4[%c0_142, %c1_143, %c0_144], %107 {strides = array<i32>} : memref<18x24x4xf32, #tpu.memory_space<vmem>>, vector<1x16x4xf32>,
    %c15_145 = arith.constant 15 : index
    %c1_146 = arith.constant 1 : index
    %c0_147 = arith.constant 0 : index
    %109 = vector.load %arg4[%c15_145, %c1_146, %c0_147] : memref<18x24x4xf32, #tpu.memory_space<vmem>>, vector<1x16x4xf32>
    %c17_148 = arith.constant 17 : index
    %c1_149 = arith.constant 1 : index
    %c0_150 = arith.constant 0 : index
    %110 = vector.load %arg4[%c17_148, %c1_149, %c0_150] : memref<18x24x4xf32, #tpu.memory_space<vmem>>, vector<1x16x4xf32>
    tpu.vector_store %arg4[%c17_148, %c1_149, %c0_150], %109 {strides = array<i32>} : memref<18x24x4xf32, #tpu.memory_space<vmem>>, vector<1x16x4xf32>,
    %c0_151 = arith.constant 0 : index
    %c2_152 = arith.constant 2 : index
    %c0_153 = arith.constant 0 : index
    %111 = vector.load %arg4[%c0_151, %c2_152, %c0_153] : memref<18x24x4xf32, #tpu.memory_space<vmem>>, vector<18x1x4xf32>
    %c0_154 = arith.constant 0 : index
    %c0_155 = arith.constant 0 : index
    %c0_156 = arith.constant 0 : index
    %112 = vector.load %arg4[%c0_154, %c0_155, %c0_156] : memref<18x24x4xf32, #tpu.memory_space<vmem>>, vector<18x1x4xf32>
    tpu.vector_store %arg4[%c0_154, %c0_155, %c0_156], %111 {strides = array<i32>} : memref<18x24x4xf32, #tpu.memory_space<vmem>>, vector<18x1x4xf32>,
    %c0_157 = arith.constant 0 : index
    %c15_158 = arith.constant 15 : index
    %c0_159 = arith.constant 0 : index
    %113 = vector.load %arg4[%c0_157, %c15_158, %c0_159] : memref<18x24x4xf32, #tpu.memory_space<vmem>>, vector<18x1x4xf32>
    %c0_160 = arith.constant 0 : index
    %c17_161 = arith.constant 17 : index
    %c0_162 = arith.constant 0 : index
    %114 = vector.load %arg4[%c0_160, %c17_161, %c0_162] : memref<18x24x4xf32, #tpu.memory_space<vmem>>, vector<18x1x4xf32>
    tpu.vector_store %arg4[%c0_160, %c17_161, %c0_162], %113 {strides = array<i32>} : memref<18x24x4xf32, #tpu.memory_space<vmem>>, vector<18x1x4xf32>,
    %c0_163 = arith.constant 0 : index
    %c0_164 = arith.constant 0 : index
    %c0_165 = arith.constant 0 : index
    %115 = vector.load %arg4[%c0_163, %c0_164, %c0_165] : memref<18x24x4xf32, #tpu.memory_space<vmem>>, vector<16x16x4xf32>
    %116 = vector.shape_cast %115 : vector<16x16x4xf32> to vector<256x4xf32>
    %c1_166 = arith.constant 1 : index
    %c0_167 = arith.constant 0 : index
    %c0_168 = arith.constant 0 : index
    %c0_169 = arith.constant 0 : index
    %117 = vector.load %arg2[%c1_166, %c0_167, %c0_168, %c0_169] : memref<2x9x4x4xf32, #tpu.memory_space<vmem>>, vector<1x1x4x4xf32>
    %118 = vector.shape_cast %117 : vector<1x1x4x4xf32> to vector<4x4xf32>
    %cst_170 = arith.constant dense<0.000000e+00> : vector<256x4xf32>
    %119 = tpu.matmul %116, %118, %cst_170 {dimension_numbers = #tpu.dot_dimension_numbers<[1], [0], [0], [1], [0, 0, 1, 1], [], []>} : vector<256x4xf32>, vector<4x4xf32>, vector<256x4xf32> -> vector<256x4xf32>
    %c0_171 = arith.constant 0 : index
    %c0_172 = arith.constant 0 : index
    %120 = vector.load %arg5[%c0_171, %c0_172] : memref<256x4xf32, #tpu.memory_space<vmem>>, vector<256x4xf32>
    tpu.vector_store %arg5[%c0_171, %c0_172], %119 {strides = array<i32>} : memref<256x4xf32, #tpu.memory_space<vmem>>, vector<256x4xf32>,
    %c0_173 = arith.constant 0 : index
    %c1_174 = arith.constant 1 : index
    %c0_175 = arith.constant 0 : index
    %121 = vector.load %arg4[%c0_173, %c1_174, %c0_175] : memref<18x24x4xf32, #tpu.memory_space<vmem>>, vector<16x16x4xf32>
    %122 = vector.shape_cast %121 : vector<16x16x4xf32> to vector<256x4xf32>
    %c1_176 = arith.constant 1 : index
    %c1_177 = arith.constant 1 : index
    %c0_178 = arith.constant 0 : index
    %c0_179 = arith.constant 0 : index
    %123 = vector.load %arg2[%c1_176, %c1_177, %c0_178, %c0_179] : memref<2x9x4x4xf32, #tpu.memory_space<vmem>>, vector<1x1x4x4xf32>
    %124 = vector.shape_cast %123 : vector<1x1x4x4xf32> to vector<4x4xf32>
    %cst_180 = arith.constant dense<0.000000e+00> : vector<256x4xf32>
    %125 = tpu.matmul %122, %124, %cst_180 {dimension_numbers = #tpu.dot_dimension_numbers<[1], [0], [0], [1], [0, 0, 1, 1], [], []>} : vector<256x4xf32>, vector<4x4xf32>, vector<256x4xf32> -> vector<256x4xf32>
    %c0_181 = arith.constant 0 : index
    %c0_182 = arith.constant 0 : index
    %126 = vector.load %arg5[%c0_181, %c0_182] : memref<256x4xf32, #tpu.memory_space<vmem>>, vector<256x4xf32>
    %127 = arith.addf %126, %125 : vector<256x4xf32>
    %c0_183 = arith.constant 0 : index
    %c0_184 = arith.constant 0 : index
    %128 = vector.load %arg5[%c0_183, %c0_184] : memref<256x4xf32, #tpu.memory_space<vmem>>, vector<256x4xf32>
    tpu.vector_store %arg5[%c0_183, %c0_184], %127 {strides = array<i32>} : memref<256x4xf32, #tpu.memory_space<vmem>>, vector<256x4xf32>,
    %c0_185 = arith.constant 0 : index
    %c2_186 = arith.constant 2 : index
    %c0_187 = arith.constant 0 : index
    %129 = vector.load %arg4[%c0_185, %c2_186, %c0_187] : memref<18x24x4xf32, #tpu.memory_space<vmem>>, vector<16x16x4xf32>
    %130 = vector.shape_cast %129 : vector<16x16x4xf32> to vector<256x4xf32>
    %c1_188 = arith.constant 1 : index
    %c2_189 = arith.constant 2 : index
    %c0_190 = arith.constant 0 : index
    %c0_191 = arith.constant 0 : index
    %131 = vector.load %arg2[%c1_188, %c2_189, %c0_190, %c0_191] : memref<2x9x4x4xf32, #tpu.memory_space<vmem>>, vector<1x1x4x4xf32>
    %132 = vector.shape_cast %131 : vector<1x1x4x4xf32> to vector<4x4xf32>
    %cst_192 = arith.constant dense<0.000000e+00> : vector<256x4xf32>
    %133 = tpu.matmul %130, %132, %cst_192 {dimension_numbers = #tpu.dot_dimension_numbers<[1], [0], [0], [1], [0, 0, 1, 1], [], []>} : vector<256x4xf32>, vector<4x4xf32>, vector<256x4xf32> -> vector<256x4xf32>
    %c0_193 = arith.constant 0 : index
    %c0_194 = arith.constant 0 : index
    %134 = vector.load %arg5[%c0_193, %c0_194] : memref<256x4xf32, #tpu.memory_space<vmem>>, vector<256x4xf32>
    %135 = arith.addf %134, %133 : vector<256x4xf32>
    %c0_195 = arith.constant 0 : index
    %c0_196 = arith.constant 0 : index
    %136 = vector.load %arg5[%c0_195, %c0_196] : memref<256x4xf32, #tpu.memory_space<vmem>>, vector<256x4xf32>
    tpu.vector_store %arg5[%c0_195, %c0_196], %135 {strides = array<i32>} : memref<256x4xf32, #tpu.memory_space<vmem>>, vector<256x4xf32>,
    %c1_197 = arith.constant 1 : index
    %c0_198 = arith.constant 0 : index
    %c0_199 = arith.constant 0 : index
    %137 = vector.load %arg4[%c1_197, %c0_198, %c0_199] : memref<18x24x4xf32, #tpu.memory_space<vmem>>, vector<16x16x4xf32>
    %138 = vector.shape_cast %137 : vector<16x16x4xf32> to vector<256x4xf32>
    %c1_200 = arith.constant 1 : index
    %c3_201 = arith.constant 3 : index
    %c0_202 = arith.constant 0 : index
    %c0_203 = arith.constant 0 : index
    %139 = vector.load %arg2[%c1_200, %c3_201, %c0_202, %c0_203] : memref<2x9x4x4xf32, #tpu.memory_space<vmem>>, vector<1x1x4x4xf32>
    %140 = vector.shape_cast %139 : vector<1x1x4x4xf32> to vector<4x4xf32>
    %cst_204 = arith.constant dense<0.000000e+00> : vector<256x4xf32>
    %141 = tpu.matmul %138, %140, %cst_204 {dimension_numbers = #tpu.dot_dimension_numbers<[1], [0], [0], [1], [0, 0, 1, 1], [], []>} : vector<256x4xf32>, vector<4x4xf32>, vector<256x4xf32> -> vector<256x4xf32>
    %c0_205 = arith.constant 0 : index
    %c0_206 = arith.constant 0 : index
    %142 = vector.load %arg5[%c0_205, %c0_206] : memref<256x4xf32, #tpu.memory_space<vmem>>, vector<256x4xf32>
    %143 = arith.addf %142, %141 : vector<256x4xf32>
    %c0_207 = arith.constant 0 : index
    %c0_208 = arith.constant 0 : index
    %144 = vector.load %arg5[%c0_207, %c0_208] : memref<256x4xf32, #tpu.memory_space<vmem>>, vector<256x4xf32>
    tpu.vector_store %arg5[%c0_207, %c0_208], %143 {strides = array<i32>} : memref<256x4xf32, #tpu.memory_space<vmem>>, vector<256x4xf32>,
    %c1_209 = arith.constant 1 : index
    %c1_210 = arith.constant 1 : index
    %c0_211 = arith.constant 0 : index
    %145 = vector.load %arg4[%c1_209, %c1_210, %c0_211] : memref<18x24x4xf32, #tpu.memory_space<vmem>>, vector<16x16x4xf32>
    %146 = vector.shape_cast %145 : vector<16x16x4xf32> to vector<256x4xf32>
    %c1_212 = arith.constant 1 : index
    %c4_213 = arith.constant 4 : index
    %c0_214 = arith.constant 0 : index
    %c0_215 = arith.constant 0 : index
    %147 = vector.load %arg2[%c1_212, %c4_213, %c0_214, %c0_215] : memref<2x9x4x4xf32, #tpu.memory_space<vmem>>, vector<1x1x4x4xf32>
    %148 = vector.shape_cast %147 : vector<1x1x4x4xf32> to vector<4x4xf32>
    %cst_216 = arith.constant dense<0.000000e+00> : vector<256x4xf32>
    %149 = tpu.matmul %146, %148, %cst_216 {dimension_numbers = #tpu.dot_dimension_numbers<[1], [0], [0], [1], [0, 0, 1, 1], [], []>} : vector<256x4xf32>, vector<4x4xf32>, vector<256x4xf32> -> vector<256x4xf32>
    %c0_217 = arith.constant 0 : index
    %c0_218 = arith.constant 0 : index
    %150 = vector.load %arg5[%c0_217, %c0_218] : memref<256x4xf32, #tpu.memory_space<vmem>>, vector<256x4xf32>
    %151 = arith.addf %150, %149 : vector<256x4xf32>
    %c0_219 = arith.constant 0 : index
    %c0_220 = arith.constant 0 : index
    %152 = vector.load %arg5[%c0_219, %c0_220] : memref<256x4xf32, #tpu.memory_space<vmem>>, vector<256x4xf32>
    tpu.vector_store %arg5[%c0_219, %c0_220], %151 {strides = array<i32>} : memref<256x4xf32, #tpu.memory_space<vmem>>, vector<256x4xf32>,
    %c1_221 = arith.constant 1 : index
    %c2_222 = arith.constant 2 : index
    %c0_223 = arith.constant 0 : index
    %153 = vector.load %arg4[%c1_221, %c2_222, %c0_223] : memref<18x24x4xf32, #tpu.memory_space<vmem>>, vector<16x16x4xf32>
    %154 = vector.shape_cast %153 : vector<16x16x4xf32> to vector<256x4xf32>
    %c1_224 = arith.constant 1 : index
    %c5_225 = arith.constant 5 : index
    %c0_226 = arith.constant 0 : index
    %c0_227 = arith.constant 0 : index
    %155 = vector.load %arg2[%c1_224, %c5_225, %c0_226, %c0_227] : memref<2x9x4x4xf32, #tpu.memory_space<vmem>>, vector<1x1x4x4xf32>
    %156 = vector.shape_cast %155 : vector<1x1x4x4xf32> to vector<4x4xf32>
    %cst_228 = arith.constant dense<0.000000e+00> : vector<256x4xf32>
    %157 = tpu.matmul %154, %156, %cst_228 {dimension_numbers = #tpu.dot_dimension_numbers<[1], [0], [0], [1], [0, 0, 1, 1], [], []>} : vector<256x4xf32>, vector<4x4xf32>, vector<256x4xf32> -> vector<256x4xf32>
    %c0_229 = arith.constant 0 : index
    %c0_230 = arith.constant 0 : index
    %158 = vector.load %arg5[%c0_229, %c0_230] : memref<256x4xf32, #tpu.memory_space<vmem>>, vector<256x4xf32>
    %159 = arith.addf %158, %157 : vector<256x4xf32>
    %c0_231 = arith.constant 0 : index
    %c0_232 = arith.constant 0 : index
    %160 = vector.load %arg5[%c0_231, %c0_232] : memref<256x4xf32, #tpu.memory_space<vmem>>, vector<256x4xf32>
    tpu.vector_store %arg5[%c0_231, %c0_232], %159 {strides = array<i32>} : memref<256x4xf32, #tpu.memory_space<vmem>>, vector<256x4xf32>,
    %c2_233 = arith.constant 2 : index
    %c0_234 = arith.constant 0 : index
    %c0_235 = arith.constant 0 : index
    %161 = vector.load %arg4[%c2_233, %c0_234, %c0_235] : memref<18x24x4xf32, #tpu.memory_space<vmem>>, vector<16x16x4xf32>
    %162 = vector.shape_cast %161 : vector<16x16x4xf32> to vector<256x4xf32>
    %c1_236 = arith.constant 1 : index
    %c6_237 = arith.constant 6 : index
    %c0_238 = arith.constant 0 : index
    %c0_239 = arith.constant 0 : index
    %163 = vector.load %arg2[%c1_236, %c6_237, %c0_238, %c0_239] : memref<2x9x4x4xf32, #tpu.memory_space<vmem>>, vector<1x1x4x4xf32>
    %164 = vector.shape_cast %163 : vector<1x1x4x4xf32> to vector<4x4xf32>
    %cst_240 = arith.constant dense<0.000000e+00> : vector<256x4xf32>
    %165 = tpu.matmul %162, %164, %cst_240 {dimension_numbers = #tpu.dot_dimension_numbers<[1], [0], [0], [1], [0, 0, 1, 1], [], []>} : vector<256x4xf32>, vector<4x4xf32>, vector<256x4xf32> -> vector<256x4xf32>
    %c0_241 = arith.constant 0 : index
    %c0_242 = arith.constant 0 : index
    %166 = vector.load %arg5[%c0_241, %c0_242] : memref<256x4xf32, #tpu.memory_space<vmem>>, vector<256x4xf32>
    %167 = arith.addf %166, %165 : vector<256x4xf32>
    %c0_243 = arith.constant 0 : index
    %c0_244 = arith.constant 0 : index
    %168 = vector.load %arg5[%c0_243, %c0_244] : memref<256x4xf32, #tpu.memory_space<vmem>>, vector<256x4xf32>
    tpu.vector_store %arg5[%c0_243, %c0_244], %167 {strides = array<i32>} : memref<256x4xf32, #tpu.memory_space<vmem>>, vector<256x4xf32>,
    %c2_245 = arith.constant 2 : index
    %c1_246 = arith.constant 1 : index
    %c0_247 = arith.constant 0 : index
    %169 = vector.load %arg4[%c2_245, %c1_246, %c0_247] : memref<18x24x4xf32, #tpu.memory_space<vmem>>, vector<16x16x4xf32>
    %170 = vector.shape_cast %169 : vector<16x16x4xf32> to vector<256x4xf32>
    %c1_248 = arith.constant 1 : index
    %c7_249 = arith.constant 7 : index
    %c0_250 = arith.constant 0 : index
    %c0_251 = arith.constant 0 : index
    %171 = vector.load %arg2[%c1_248, %c7_249, %c0_250, %c0_251] : memref<2x9x4x4xf32, #tpu.memory_space<vmem>>, vector<1x1x4x4xf32>
    %172 = vector.shape_cast %171 : vector<1x1x4x4xf32> to vector<4x4xf32>
    %cst_252 = arith.constant dense<0.000000e+00> : vector<256x4xf32>
    %173 = tpu.matmul %170, %172, %cst_252 {dimension_numbers = #tpu.dot_dimension_numbers<[1], [0], [0], [1], [0, 0, 1, 1], [], []>} : vector<256x4xf32>, vector<4x4xf32>, vector<256x4xf32> -> vector<256x4xf32>
    %c0_253 = arith.constant 0 : index
    %c0_254 = arith.constant 0 : index
    %174 = vector.load %arg5[%c0_253, %c0_254] : memref<256x4xf32, #tpu.memory_space<vmem>>, vector<256x4xf32>
    %175 = arith.addf %174, %173 : vector<256x4xf32>
    %c0_255 = arith.constant 0 : index
    %c0_256 = arith.constant 0 : index
    %176 = vector.load %arg5[%c0_255, %c0_256] : memref<256x4xf32, #tpu.memory_space<vmem>>, vector<256x4xf32>
    tpu.vector_store %arg5[%c0_255, %c0_256], %175 {strides = array<i32>} : memref<256x4xf32, #tpu.memory_space<vmem>>, vector<256x4xf32>,
    %c2_257 = arith.constant 2 : index
    %c2_258 = arith.constant 2 : index
    %c0_259 = arith.constant 0 : index
    %177 = vector.load %arg4[%c2_257, %c2_258, %c0_259] : memref<18x24x4xf32, #tpu.memory_space<vmem>>, vector<16x16x4xf32>
    %178 = vector.shape_cast %177 : vector<16x16x4xf32> to vector<256x4xf32>
    %c1_260 = arith.constant 1 : index
    %c8_261 = arith.constant 8 : index
    %c0_262 = arith.constant 0 : index
    %c0_263 = arith.constant 0 : index
    %179 = vector.load %arg2[%c1_260, %c8_261, %c0_262, %c0_263] : memref<2x9x4x4xf32, #tpu.memory_space<vmem>>, vector<1x1x4x4xf32>
    %180 = vector.shape_cast %179 : vector<1x1x4x4xf32> to vector<4x4xf32>
    %cst_264 = arith.constant dense<0.000000e+00> : vector<256x4xf32>
    %181 = tpu.matmul %178, %180, %cst_264 {dimension_numbers = #tpu.dot_dimension_numbers<[1], [0], [0], [1], [0, 0, 1, 1], [], []>} : vector<256x4xf32>, vector<4x4xf32>, vector<256x4xf32> -> vector<256x4xf32>
    %c0_265 = arith.constant 0 : index
    %c0_266 = arith.constant 0 : index
    %182 = vector.load %arg5[%c0_265, %c0_266] : memref<256x4xf32, #tpu.memory_space<vmem>>, vector<256x4xf32>
    %183 = arith.addf %182, %181 : vector<256x4xf32>
    %c0_267 = arith.constant 0 : index
    %c0_268 = arith.constant 0 : index
    %184 = vector.load %arg5[%c0_267, %c0_268] : memref<256x4xf32, #tpu.memory_space<vmem>>, vector<256x4xf32>
    tpu.vector_store %arg5[%c0_267, %c0_268], %183 {strides = array<i32>} : memref<256x4xf32, #tpu.memory_space<vmem>>, vector<256x4xf32>,
    %c0_269 = arith.constant 0 : index
    %c0_270 = arith.constant 0 : index
    %185 = vector.load %arg5[%c0_269, %c0_270] : memref<256x4xf32, #tpu.memory_space<vmem>>, vector<256x4xf32>
    %cst_271 = arith.constant dense<0.000000e+00> : vector<4xf32>
    %186 = vector.multi_reduction <add>, %185, %cst_271 [0] : vector<256x4xf32> to vector<4xf32>
    %187 = vector.shape_cast %186 : vector<4xf32> to vector<1x4xf32>
    %188 = arith.mulf %185, %185 : vector<256x4xf32>
    %cst_272 = arith.constant dense<0.000000e+00> : vector<4xf32>
    %189 = vector.multi_reduction <add>, %188, %cst_272 [0] : vector<256x4xf32> to vector<4xf32>
    %190 = vector.shape_cast %189 : vector<4xf32> to vector<1x4xf32>
    %cst_273 = arith.constant 3.906250e-03 : f32
    %191 = vector.broadcast %cst_273 : f32 to vector<1x4xf32>
    %192 = arith.mulf %187, %191 : vector<1x4xf32>
    %cst_274 = arith.constant 3.906250e-03 : f32
    %193 = vector.broadcast %cst_274 : f32 to vector<1x4xf32>
    %194 = arith.mulf %190, %193 : vector<1x4xf32>
    %195 = arith.mulf %192, %192 : vector<1x4xf32>
    %196 = arith.subf %194, %195 : vector<1x4xf32>
    %cst_275 = arith.constant 0.000000e+00 : f32
    %197 = vector.broadcast %cst_275 : f32 to vector<1x4xf32>
    %198 = arith.maximumf %196, %197 : vector<1x4xf32>
    %cst_276 = arith.constant 9.99999974E-6 : f32
    %199 = vector.broadcast %cst_276 : f32 to vector<1x4xf32>
    %200 = arith.addf %198, %199 : vector<1x4xf32>
    %201 = math.rsqrt %200 : vector<1x4xf32>
    %c0_277 = arith.constant 0 : index
    %c0_278 = arith.constant 0 : index
    %202 = vector.load %arg5[%c0_277, %c0_278] : memref<256x4xf32, #tpu.memory_space<vmem>>, vector<256x4xf32>
    %203 = vector.broadcast %192 : vector<1x4xf32> to vector<256x4xf32>
    %204 = arith.subf %202, %203 : vector<256x4xf32>
    %205 = vector.broadcast %201 : vector<1x4xf32> to vector<256x4xf32>
    %206 = arith.mulf %204, %205 : vector<256x4xf32>
    %207 = vector.shape_cast %206 : vector<256x4xf32> to vector<1x16x16x4xf32>
    %c0_279 = arith.constant 0 : index
    %c0_280 = arith.constant 0 : index
    %c0_281 = arith.constant 0 : index
    %c0_282 = arith.constant 0 : index
    %208 = vector.load %arg1[%c0_279, %c0_280, %c0_281, %c0_282] : memref<1x16x16x4xf32, #tpu.memory_space<vmem>>, vector<1x16x16x4xf32>
    %209 = arith.addf %207, %208 : vector<1x16x16x4xf32>
    %c0_283 = arith.constant 0 : index
    %c0_284 = arith.constant 0 : index
    %c0_285 = arith.constant 0 : index
    %c0_286 = arith.constant 0 : index
    %210 = vector.load %arg3[%c0_283, %c0_284, %c0_285, %c0_286] : memref<1x16x16x4xf32, #tpu.memory_space<vmem>>, vector<1x16x16x4xf32>
    tpu.vector_store %arg3[%c0_283, %c0_284, %c0_285, %c0_286], %209 {strides = array<i32>} : memref<1x16x16x4xf32, #tpu.memory_space<vmem>>, vector<1x16x16x4xf32>,
    return
  }
  func.func @transform_0(%arg0: i32) -> (i32, i32, i32, i32) {
    %c0_i32 = arith.constant 0 : i32
    %c0_i32_0 = arith.constant 0 : i32
    %c0_i32_1 = arith.constant 0 : i32
    %c0_i32_2 = arith.constant 0 : i32
    return %arg0, %c0_i32, %c0_i32_0, %c0_i32_1 : i32, i32, i32, i32
  }
  func.func @transform_1(%arg0: i32) -> (i32, i32, i32, i32) {
    %c0_i32 = arith.constant 0 : i32
    %c0_i32_0 = arith.constant 0 : i32
    %c0_i32_1 = arith.constant 0 : i32
    %c0_i32_2 = arith.constant 0 : i32
    %c0_i32_3 = arith.constant 0 : i32
    return %c0_i32, %c0_i32_0, %c0_i32_1, %c0_i32_2 : i32, i32, i32, i32
  }
  func.func @transform_2(%arg0: i32) -> (i32, i32, i32, i32) {
    %c0_i32 = arith.constant 0 : i32
    %c0_i32_0 = arith.constant 0 : i32
    %c0_i32_1 = arith.constant 0 : i32
    %c0_i32_2 = arith.constant 0 : i32
    return %arg0, %c0_i32, %c0_i32_0, %c0_i32_1 : i32, i32, i32, i32
  }
}

</mosaic_0001>

<bundles_post_ra>
// kernel: tpu_custom_call.1
= control target key start
LH: loop header
LB: loop body
LE: loop exit
PB: predicated region body
PF: predicated region fallthrough
CT: control target
= control target key end

     0   :  { %s7842_s9 = smov 0   ;;  %s10485_s0 = inlined_call_operand.vmem [shape: f32[2,16,16,4], index: 0, kind: input, shape index: {}]   ;;  %s10486_s1 = inlined_call_operand.vmem [shape: f32[2,9,4,4], index: 1, kind: input, shape index: {}]   ;;  %s10487_s2 = inlined_call_operand.vmem [shape: f32[2,16,16,4], index: 2, kind: output, shape index: {}]  }
   0x1 LB: > { %s7181_s10 = sadd.s32 4294967295, %s7825_s9   ;;  %p7185_p0 = scmp.ge.s32.totalorder %s7825_s9, 1  ;;  %s7825_s9 = sphi %s7842_s9, %s12_s9  }
   0x2   : > { %p112_p1 = scmp.lt.s32.totalorder %s7825_s9, 3 }
   0x4   : > { %p113_p2 = pnand %p7185_p0, %p112_p1 }
   0x5   : > { %p134_p3 = scmp.lt.s32.totalorder (!%p113_p2), %s7181_s10, 1 }
   0x6   : > { %116 = sbr.rel (%p113_p2) target bundleno = 1896 (0x768), region = 28 }
   0xb   : > { %v326_v0 = vld [vmem:[%s10486_s1] sm:$0xf]  ;;  %vm423_vm0 = vcmask 1043456   ;;  %v7257_v1 = vld [vmem:[%s10486_s1 + $0x8] sm:$0xf]  ;;  %s10489_s10 = smov (!%p134_p3, %s7181_s10), 1 }
   0xc   : > { %7805 = vmatpush.msk.msra.mxu2 %vm423_vm0, %v326_v0  ;;  %v7223_v2 = vld [vmem:[%s10486_s1 + $0x4] sm:$0xf]  ;;  %v7291_v3 = vld [vmem:[%s10486_s1 + $0xc] sm:$0xf]  ;;  %7190 = vmatpush.msk.msra.mxu0 %vm423_vm0, %v326_v0  ;;  %s7803_s19 = sshll.u32 %s10489_s10, 8  ;;  %vm177_vm1 = vcmask 31744  }
   0xd   : > { %7806 = vmatpush.msk.msra.mxu3 %vm423_vm0, %v7223_v2  ;;  %7224 = vmatpush.msk.msra.mxu1 %vm423_vm0, %v7223_v2  ;;  %s7876_s22 = scalar_lea.vmem %s10485_s0, %s7803_s19  ;;  %vm239_vm2 = vcmask 24576   ;;  %v7325_v13 = vld [vmem:[%s10486_s1 + $0x10] sm:$0xf]  ;;  %s10311_s29 = scalar_lea.vmem %s10487_s2, %s7803_s19 }
   0xe   : > { %7258 = vmatpush.msk.msrb.mxu2 %vm423_vm0, %v7257_v1  ;;  %v158_v4 = vld [vmem:[%s7876_s22 + $0x70] sm:$0xff]  ;;  %v159_v5 = vld [vmem:[%s7876_s22 + $0x78] sm:$0xff]  ;;  %v160_v6 = vld [vmem:[%s7876_s22 + $0x80] sm:$0xff]  ;;  %7326 = vmatpush.msk.msrb.mxu0 %vm423_vm0, %v7325_v13 }
   0xf   : > { %7292 = vmatpush.msk.msrb.mxu3 %vm423_vm0, %v7291_v3  ;;  %192 = vst.msk [vmem:[#allocation2 + $0xc1] sm:$0xff] %vm177_vm1, %v158_v4  ;;  %v161_v7 = vld [vmem:[%s7876_s22 + $0x88] sm:$0xff]  ;;  %v146_v8 = vld [vmem:[%s7876_s22 + $0x10] sm:$0xff]  ;;  %v147_v10 = vld [vmem:[%s7876_s22 + $0x18] sm:$0xff] }
  0x10   : > { %193 = vst.msk [vmem:[#allocation2 + $0xc9] sm:$0xff] %vm177_vm1, %v159_v5  ;;  %v162_v9 = vld [vmem:[%s7876_s22 + $0x90] sm:$0xff]  ;;  %v144_v15 = vld [vmem:[%s7876_s22] sm:$0xff]  ;;  %v163_v21 = vld [vmem:[%s7876_s22 + $0x98] sm:$0xff] }
  0x11   : > { %194 = vst.msk [vmem:[#allocation2 + $0xd9] sm:$0xff] %vm177_vm1, %v160_v6  ;;  %v164_v22 = vld [vmem:[%s7876_s22 + $0xa0] sm:$0xff]  ;;  %v145_v30 = vld [vmem:[%s7876_s22 + $0x8] sm:$0xff]  ;;  %v166_v35 = vld [vmem:[%s7876_s22 + $0xb0] sm:$0xff] }
  0x12   : > { %195 = vst.msk [vmem:[#allocation2 + $0xe1] sm:$0xff] %vm177_vm1, %v161_v7  ;;  %v165_v34 = vld [vmem:[%s7876_s22 + $0xa8] sm:$0xff]  ;;  %v148_v44 = vld [vmem:[%s7876_s22 + $0x20] sm:$0xff]  ;;  %v167_v47 = vld [vmem:[%s7876_s22 + $0xb8] sm:$0xff] }
  0x13   : > { %180 = vst.msk [vmem:[#allocation2 + $0x31] sm:$0xff] %vm177_vm1, %v146_v8  ;;  %v168_v48 = vld [vmem:[%s7876_s22 + $0xc0] sm:$0xff]  ;;  %v149_v55 = vld [vmem:[%s7876_s22 + $0x28] sm:$0xff]  ;;  %v150_v56 = vld [vmem:[%s7876_s22 + $0x30] sm:$0xff] }
  0x14   : > { %196 = vst.msk [vmem:[#allocation2 + $0xf1] sm:$0xff] %vm177_vm1, %v162_v9  ;;  %v169_v59 = vld [vmem:[%s7876_s22 + $0xc8] sm:$0xff]  ;;  %v170_v60 = vld [vmem:[%s7876_s22 + $0xd0] sm:$0xff]  ;;  %v151_v5 = vld [vmem:[%s7876_s22 + $0x38] sm:$0xff] }
  0x15   : > { %181 = vst.msk [vmem:[#allocation2 + $0x39] sm:$0xff] %vm177_vm1, %v147_v10  ;;  %v152_v6 = vld [vmem:[%s7876_s22 + $0x40] sm:$0xff]  ;;  %v171_v9 = vld [vmem:[%s7876_s22 + $0xd8] sm:$0xff] }
  0x16   : > { %v229_v11 = vld [vmem:[#allocation2 + $0xc2] sm:$0x1]  ;;  %178 = vst.msk [vmem:[#allocation2 + $0x19] sm:$0xff] %vm177_vm1, %v144_v15 }
  0x17   : > { %v588_v12 = vld [vmem:[#allocation2 + $0xc1] sm:$0xff]  ;;  %248 = vst.msk [vmem:[#allocation2 + $0xc0] sm:$0x1] %vm239_vm2, %v229_v11  ;;  %v589_v18 = vld [vmem:[#allocation2 + $0xc9] sm:$0xff] }
  0x18   : > { %7241 = vmatmul.msk.f32.vlgmr.msra.gmra.mxu3 %vm177_vm1, %v588_v12  ;;  %v230_v14 = vld [vmem:[#allocation2 + $0xda] sm:$0x1]  ;;  %197 = vst.msk [vmem:[#allocation2 + $0xf9] sm:$0xff] %vm177_vm1, %v163_v21  ;;  %v311_v26 = vld [vmem:[#allocation2 + $0xc8] sm:$0xff]  ;;  %v172_v10 = vld [vmem:[%s7876_s22 + $0xe0] sm:$0xff] }
  0x19   : > { %249 = vst.msk [vmem:[#allocation2 + $0xd8] sm:$0x1] %vm239_vm2, %v230_v14  ;;  %v590_v27 = vld [vmem:[#allocation2 + $0xd9] sm:$0xff]  ;;  %v591_v33 = vld [vmem:[#allocation2 + $0xe1] sm:$0xff] }
  0x1a   : > { %v7900_v16 = vld [vmem:[#allocation2 + $0x31] sm:$0xff]  ;;  %198 = vst.msk [vmem:[#allocation2 + $0x109] sm:$0xff] %vm177_vm1, %v164_v22  ;;  %v313_v39 = vld [vmem:[#allocation2 + $0xe0] sm:$0xff]  ;;  %v153_v21 = vld [vmem:[%s7876_s22 + $0x48] sm:$0xff] }
  0x1b   : > { %213 = vst.msk [vmem:[#allocation2 + $0x1] sm:$0xff] %vm177_vm1, %v7900_v16  ;;  %v231_v17 = vld [vmem:[#allocation2 + $0xf2] sm:$0x1] }
  0x1c   : > { %250 = vst.msk [vmem:[#allocation2 + $0xf0] sm:$0x1] %vm239_vm2, %v231_v17  ;;  %v7906_v19 = vld [vmem:[#allocation2 + $0x39] sm:$0xff]  ;;  %v223_v38 = vld [vmem:[#allocation2 + $0x32] sm:$0x1] }
  0x1d   : > { %214 = vst.msk [vmem:[#allocation2 + $0x9] sm:$0xff] %vm177_vm1, %v7906_v19  ;;  %v222_v23 = vld [vmem:[#allocation2 + $0x1a] sm:$0x1]  ;;  %v592_v40 = vld [vmem:[#allocation2 + $0xf1] sm:$0xff] }
  0x1e   : > { %v310_v20 = vld [vmem:[#allocation2 + $0xc0] sm:$0xff]  ;;  %241 = vst.msk [vmem:[#allocation2 + $0x18] sm:$0x1] %vm239_vm2, %v222_v23  ;;  %v7982_v61 = vld [vmem:[#allocation2 + $0x38] sm:$0xff]  ;;  %v154_v22 = vld [vmem:[%s7876_s22 + $0x50] sm:$0xff] }
  0x1f   : > { %7207 = vmatmul.msk.f32.vlgmr.msra.gmra.mxu2 %vm177_vm1, %v310_v20  ;;  %179 = vst.msk [vmem:[#allocation2 + $0x21] sm:$0xff] %vm177_vm1, %v145_v30  ;;  %v7931_v37 = vld [vmem:[#allocation2 + $0x19] sm:$0xff] }
  0x20   : > { %7242 = vmatmul.msk.f32.gmra.mxu3 %vm177_vm1, %v589_v18  ;;  %v312_v32 = vld [vmem:[#allocation2 + $0xd8] sm:$0xff]  ;;  %199 = vst.msk [vmem:[#allocation2 + $0x111] sm:$0xff] %vm177_vm1, %v165_v34  ;;  %v156_v34 = vld [vmem:[%s7876_s22 + $0x60] sm:$0xff] }
  0x21   : > { %v232_v28 = vld [vmem:[#allocation2 + $0x10a] sm:$0x1]  ;;  %200 = vst.msk [vmem:[#allocation2 + $0x121] sm:$0xff] %vm177_vm1, %v166_v35  ;;  %v593_v46 = vld [vmem:[#allocation2 + $0xf9] sm:$0xff] }
  0x22   : > { %v221_v24 = vld [vmem:[#allocation2 + $0x2] sm:$0x1]  ;;  %251 = vst.msk [vmem:[#allocation2 + $0x108] sm:$0x1] %vm239_vm2, %v232_v28  ;;  %v315_v51 = vld [vmem:[#allocation2 + $0xf8] sm:$0xff]  ;;  %v594_v52 = vld [vmem:[#allocation2 + $0x109] sm:$0xff] }
  0x23   : > { %v572_v25 = vld [vmem:[#allocation2 + $0x1] sm:$0xff]  ;;  %240 = vst.msk [vmem:[#allocation2] sm:$0x1] %vm239_vm2, %v221_v24  ;;  %v314_v45 = vld [vmem:[#allocation2 + $0xf0] sm:$0xff] }
  0x24   : > { %7225 = vmatmul.msk.f32.vlgmr.msra.gmra.mxu1 %vm177_vm1, %v572_v25  ;;  %v573_v29 = vld [vmem:[#allocation2 + $0x9] sm:$0xff]  ;;  %242 = vst.msk [vmem:[#allocation2 + $0x30] sm:$0x1] %vm239_vm2, %v223_v38 }
  0x25   : > { %v295_v36 = vld [vmem:[#allocation2 + $0x8] sm:$0xff]  ;;  %v7940_v42 = vld [vmem:[#allocation2 + $0x18] sm:$0xff]  ;;  %182 = vst.msk [vmem:[#allocation2 + $0x49] sm:$0xff] %vm177_vm1, %v148_v44 }
  0x26   : > { %v7942_v43 = vld [vmem:[#allocation2 + $0x21] sm:$0xff]  ;;  %201 = vst.msk [vmem:[#allocation2 + $0x129] sm:$0xff] %vm177_vm1, %v167_v47  ;;  %v258_v38 = vld [vmem:[#allocation2 + $0xf] sm:$0x1]  ;;  %v7427_v47 = vld [vmem:[%s10486_s1 + $0x1c] sm:$0xf] }
  0x27   : > { %7208 = vmatmul.msk.f32.gmra.mxu2 %vm177_vm1, %v311_v26  ;;  %v7956_v49 = vld [vmem:[#allocation2 + $0x20] sm:$0xff]  ;;  %202 = vst.msk [vmem:[#allocation2 + $0x139] sm:$0xff] %vm177_vm1, %v168_v48  ;;  %v595_v58 = vld [vmem:[#allocation2 + $0x111] sm:$0xff]  ;;  %v173_v25 = vld [vmem:[%s7876_s22 + $0xe8] sm:$0xff]  ;;  %7428 = vmatpush.msk.msra.mxu3 %vm423_vm0, %v7427_v47 }
  0x28   : > { %7243 = vmatmul.msk.f32.gmra.mxu3 %vm177_vm1, %v590_v27  ;;  %v233_v41 = vld [vmem:[#allocation2 + $0x122] sm:$0x1]  ;;  %183 = vst.msk [vmem:[#allocation2 + $0x51] sm:$0xff] %vm177_vm1, %v149_v55  ;;  %v317_v0 = vld [vmem:[#allocation2 + $0x110] sm:$0xff]  ;;  %v259_v55 = vld [vmem:[#allocation2 + $0x27] sm:$0x1] }
  0x29   : > { %252 = vst.msk [vmem:[#allocation2 + $0x120] sm:$0x1] %vm239_vm2, %v233_v41  ;;  %v316_v57 = vld [vmem:[#allocation2 + $0x108] sm:$0xff] }
  0x2a   : > { %v294_v31 = vld [vmem:[#allocation2] sm:$0xff]  ;;  %184 = vst.msk [vmem:[#allocation2 + $0x61] sm:$0xff] %vm177_vm1, %v150_v56 }
  0x2b   : > { %7191 = vmatmul.msk.f32.vlgmr.msra.gmra.mxu0 %vm177_vm1, %v294_v31  ;;  %v7966_v54 = vld [vmem:[#allocation2 + $0x30] sm:$0xff]  ;;  %203 = vst.msk [vmem:[#allocation2 + $0x141] sm:$0xff] %vm177_vm1, %v169_v59  ;;  %v596_v1 = vld [vmem:[#allocation2 + $0x121] sm:$0xff] }
  0x2c   : > { %7226 = vmatmul.msk.f32.gmra.mxu1 %vm177_vm1, %v573_v29  ;;  %v224_v50 = vld [vmem:[#allocation2 + $0x4a] sm:$0x1]  ;;  %204 = vst.msk [vmem:[#allocation2 + $0x151] sm:$0xff] %vm177_vm1, %v170_v60  ;;  %v7461_v59 = vld [vmem:[%s10486_s1 + $0x20] sm:$0xf] }
  0x2d   : > { %243 = vst.msk [vmem:[#allocation2 + $0x48] sm:$0x1] %vm239_vm2, %v224_v50  ;;  %v7984_v62 = vld [vmem:[#allocation2 + $0x49] sm:$0xff]  ;;  %7462 = vmatpush.msk.msra.mxu0 %vm423_vm0, %v7461_v59 }
  0x2e   : > { %v234_v53 = vld [vmem:[#allocation2 + $0x13a] sm:$0x1]  ;;  %185 = vst.msk [vmem:[#allocation2 + $0x69] sm:$0xff] %vm177_vm1, %v151_v5  ;;  %v597_v8 = vld [vmem:[#allocation2 + $0x129] sm:$0xff] }
  0x2f   : > { %7209 = vmatmul.msk.f32.gmra.mxu2 %vm177_vm1, %v312_v32  ;;  %253 = vst.msk [vmem:[#allocation2 + $0x138] sm:$0x1] %vm239_vm2, %v234_v53  ;;  %v7996_v4 = vld [vmem:[#allocation2 + $0x51] sm:$0xff]  ;;  %v319_v14 = vld [vmem:[#allocation2 + $0x128] sm:$0xff]  ;;  %v598_v15 = vld [vmem:[#allocation2 + $0x139] sm:$0xff] }
  0x30   : > { %7244 = vmatmul.msk.f32.gmra.mxu3 %vm177_vm1, %v591_v33  ;;  %186 = vst.msk [vmem:[#allocation2 + $0x79] sm:$0xff] %vm177_vm1, %v152_v6  ;;  %v318_v7 = vld [vmem:[#allocation2 + $0x120] sm:$0xff]  ;;  %v8012_v11 = vld [vmem:[#allocation2 + $0x50] sm:$0xff]  ;;  %v155_v33 = vld [vmem:[%s7876_s22 + $0x58] sm:$0xff] }
  0x31   : > { %v225_v63 = vld [vmem:[#allocation2 + $0x62] sm:$0x1]  ;;  %205 = vst.msk [vmem:[#allocation2 + $0x159] sm:$0xff] %vm177_vm1, %v171_v9  ;;  %v7359_v6 = vld [vmem:[%s10486_s1 + $0x14] sm:$0xf] }
  0x32   : > { %244 = vst.msk [vmem:[#allocation2 + $0x60] sm:$0x1] %vm239_vm2, %v225_v63  ;;  %v8014_v12 = vld [vmem:[#allocation2 + $0x61] sm:$0xff]  ;;  %7360 = vmatpush.msk.msrb.mxu1 %vm423_vm0, %v7359_v6 }
  0x33   : > { %7192 = vmatmul.msk.f32.gmra.mxu0 %vm177_vm1, %v295_v36  ;;  %v235_v3 = vld [vmem:[#allocation2 + $0x152] sm:$0x1]  ;;  %206 = vst.msk [vmem:[#allocation2 + $0x169] sm:$0xff] %vm177_vm1, %v172_v10  ;;  %v599_v24 = vld [vmem:[#allocation2 + $0x141] sm:$0xff] }
  0x34   : > { %7227 = vmatmul.msk.f32.gmra.mxu1 %vm177_vm1, %v7931_v37  ;;  %v7994_v2 = vld [vmem:[#allocation2 + $0x48] sm:$0xff]  ;;  %254 = vst.msk [vmem:[#allocation2 + $0x150] sm:$0x1] %vm239_vm2, %v235_v3  ;;  %v321_v29 = vld [vmem:[#allocation2 + $0x140] sm:$0xff]  ;;  %v600_v30 = vld [vmem:[#allocation2 + $0x151] sm:$0xff] }
  0x35   : > { %v8026_v20 = vld [vmem:[#allocation2 + $0x69] sm:$0xff]  ;;  %187 = vst.msk [vmem:[#allocation2 + $0x81] sm:$0xff] %vm177_vm1, %v153_v21  ;;  %v260_v3 = vld [vmem:[#allocation2 + $0x3f] sm:$0x1] }
  0x36   : > { %188 = vst.msk [vmem:[#allocation2 + $0x91] sm:$0xff] %vm177_vm1, %v154_v22  ;;  %v320_v23 = vld [vmem:[#allocation2 + $0x138] sm:$0xff]  ;;  %v8041_v26 = vld [vmem:[#allocation2 + $0x68] sm:$0xff] }
  0x37   : > { %7210 = vmatmul.msk.f32.gmra.mxu2 %vm177_vm1, %v313_v39  ;;  %v226_v13 = vld [vmem:[#allocation2 + $0x7a] sm:$0x1]  ;;  %207 = vst.msk [vmem:[#allocation2 + $0x171] sm:$0xff] %vm177_vm1, %v173_v25 }
  0x38   : > { %7245 = vmatmul.msk.f32.gmra.mxu3 %vm177_vm1, %v592_v40  ;;  %245 = vst.msk [vmem:[#allocation2 + $0x78] sm:$0x1] %vm239_vm2, %v226_v13  ;;  %v8043_v27 = vld [vmem:[#allocation2 + $0x79] sm:$0xff] }
  0x39   : > { %v8024_v17 = vld [vmem:[#allocation2 + $0x60] sm:$0xff]  ;;  %189 = vst.msk [vmem:[#allocation2 + $0x99] sm:$0xff] %vm177_vm1, %v155_v33  ;;  %v7393_v39 = vld [vmem:[%s10486_s1 + $0x18] sm:$0xf] }
  0x3a   : > { %v236_v18 = vld [vmem:[#allocation2 + $0x16a] sm:$0x1]  ;;  %190 = vst.msk [vmem:[#allocation2 + $0xa9] sm:$0xff] %vm177_vm1, %v156_v34  ;;  %v601_v36 = vld [vmem:[#allocation2 + $0x159] sm:$0xff]  ;;  %7394 = vmatpush.msk.msra.mxu2 %vm423_vm0, %v7393_v39 }
  0x3b   : > { %7193 = vmatmul.msk.f32.gmra.mxu0 %vm177_vm1, %v7940_v42  ;;  %255 = vst.msk [vmem:[#allocation2 + $0x168] sm:$0x1] %vm239_vm2, %v236_v18  ;;  %v322_v35 = vld [vmem:[#allocation2 + $0x150] sm:$0xff] }
  0x3c   : > { %7228 = vmatmul.msk.f32.gmra.mxu1 %vm177_vm1, %v7942_v43  ;;  %v8054_v32 = vld [vmem:[#allocation2 + $0x81] sm:$0xff]  ;;  %276 = vst.msk [vmem:[#allocation2 + $0x11] sm:$0x1] %vm239_vm2, %v258_v38 }
  0x3d   : > { %v227_v28 = vld [vmem:[#allocation2 + $0x92] sm:$0x1]  ;;  %v8070_v40 = vld [vmem:[#allocation2 + $0x80] sm:$0xff]  ;;  %277 = vst.msk [vmem:[#allocation2 + $0x29] sm:$0x1] %vm239_vm2, %v259_v55 }
  0x3e   : > { %246 = vst.msk [vmem:[#allocation2 + $0x90] sm:$0x1] %vm239_vm2, %v227_v28  ;;  %v8073_v41 = vld [vmem:[#allocation2 + $0x91] sm:$0xff] }
  0x3f   : > { %7211 = vmatmul.msk.f32.gmra.mxu2 %vm177_vm1, %v314_v45  ;;  %v8052_v31 = vld [vmem:[#allocation2 + $0x78] sm:$0xff]  ;;  %278 = vst.msk [vmem:[#allocation2 + $0x41] sm:$0x1] %vm239_vm2, %v260_v3 }
  0x40   : > { %7246 = vmatmul.msk.f32.gmra.mxu3 %vm177_vm1, %v593_v46  ;;  %v323_v45 = vld [vmem:[#allocation2 + $0x158] sm:$0xff]  ;;  %v602_v46 = vld [vmem:[#allocation2 + $0x169] sm:$0xff] }
  0x41   : > { %v228_v44 = vld [vmem:[#allocation2 + $0xaa] sm:$0x1]  ;;  %v8087_v50 = vld [vmem:[#allocation2 + $0x99] sm:$0xff]  ;;  %v603_v53 = vld [vmem:[#allocation2 + $0x171] sm:$0xff] }
  0x42   : > { %247 = vst.msk [vmem:[#allocation2 + $0xa8] sm:$0x1] %vm239_vm2, %v228_v44  ;;  %v8099_v56 = vld [vmem:[#allocation2 + $0x98] sm:$0xff] }
  0x43   : > { %7194 = vmatmul.msk.f32.gmra.mxu0 %vm177_vm1, %v7956_v49 }
  0x44   : > { %7229 = vmatmul.msk.f32.gmra.mxu1 %vm177_vm1, %v7900_v16  ;;  %v917_v18 = vld [vmem:[#allocation2 + $0x22] sm:$0xff] }
  0x45   : > { %v8085_v48 = vld [vmem:[#allocation2 + $0x90] sm:$0xff] }
  0x47   : > { %7212 = vmatmul.msk.f32.gmra.mxu2 %vm177_vm1, %v315_v51  ;;  %v157_v51 = vld [vmem:[%s7876_s22 + $0x68] sm:$0xff] }
  0x48   : > { %7247 = vmatmul.msk.f32.gmra.mxu3 %vm177_vm1, %v594_v52  ;;  %191 = vst.msk [vmem:[#allocation2 + $0xb1] sm:$0xff] %vm177_vm1, %v157_v51  ;;  %v324_v52 = vld [vmem:[#allocation2 + $0x168] sm:$0xff] }
  0x49   : > { %v8113_v60 = vld [vmem:[#allocation2 + $0xa8] sm:$0xff] }
  0x4b   : > { %7195 = vmatmul.msk.f32.gmra.mxu0 %vm177_vm1, %v7966_v54 }
  0x4c   : > { %7230 = vmatmul.msk.f32.gmra.mxu1 %vm177_vm1, %v7906_v19 }
  0x4f   : > { %7213 = vmatmul.msk.f32.gmra.mxu2 %vm177_vm1, %v316_v57  ;;  %v8101_v57 = vld [vmem:[#allocation2 + $0xa9] sm:$0xff]  ;;  %v8115_v63 = vld [vmem:[#allocation2 + $0xb1] sm:$0xff] }
  0x50   : > { %7248 = vmatmul.msk.f32.gmra.mxu3 %vm177_vm1, %v595_v58  ;;  %v325_v58 = vld [vmem:[#allocation2 + $0x170] sm:$0xff] }
  0x53   : > { %7196 = vmatmul.msk.f32.gmra.mxu0 %vm177_vm1, %v7982_v61 }
  0x54   : > { %7231 = vmatmul.msk.f32.gmra.mxu1 %vm177_vm1, %v7984_v62 }
  0x57   : > { %7214 = vmatmul.msk.f32.gmra.mxu2 %vm177_vm1, %v317_v0 }
  0x58   : > { %7249 = vmatmul.msk.f32.gmra.mxu3 %vm177_vm1, %v596_v1  ;;  %v914_v1 = vld [vmem:[#allocation2 + $0x2] sm:$0xff] }
  0x5b   : > { %7197 = vmatmul.msk.f32.gmra.mxu0 %vm177_vm1, %v7994_v2 }
  0x5c   : > { %7232 = vmatmul.msk.f32.gmra.mxu1 %vm177_vm1, %v7996_v4 }
  0x5f   : > { %7215 = vmatmul.msk.f32.gmra.mxu2 %vm177_vm1, %v318_v7 }
  0x60   : > { %7250 = vmatmul.msk.f32.gmra.mxu3 %vm177_vm1, %v597_v8  ;;  %v916_v8 = vld [vmem:[#allocation2 + $0x1a] sm:$0xff] }
  0x63   : > { %7198 = vmatmul.msk.f32.gmra.mxu0 %vm177_vm1, %v8012_v11 }
  0x64   : > { %7233 = vmatmul.msk.f32.gmra.mxu1 %vm177_vm1, %v8014_v12 }
  0x67   : > { %7216 = vmatmul.msk.f32.gmra.mxu2 %vm177_vm1, %v319_v14 }
  0x68   : > { %7251 = vmatmul.msk.f32.gmra.mxu3 %vm177_vm1, %v598_v15 }
  0x6b   : > { %7199 = vmatmul.msk.f32.gmra.mxu0 %vm177_vm1, %v8024_v17 }
  0x6c   : > { %7234 = vmatmul.msk.f32.gmra.mxu1 %vm177_vm1, %v8026_v20 }
  0x6f   : > { %7217 = vmatmul.msk.f32.gmra.mxu2 %vm177_vm1, %v320_v23  ;;  %v261_v23 = vld [vmem:[#allocation2 + $0x57] sm:$0x1] }
  0x70   : > { %7252 = vmatmul.msk.f32.gmra.mxu3 %vm177_vm1, %v599_v24  ;;  %279 = vst.msk [vmem:[#allocation2 + $0x59] sm:$0x1] %vm239_vm2, %v261_v23 }
  0x73   : > { %7200 = vmatmul.msk.f32.gmra.mxu0 %vm177_vm1, %v8041_v26 }
  0x74   : > { %7235 = vmatmul.msk.f32.gmra.mxu1 %vm177_vm1, %v8043_v27 }
  0x77   : > { %7218 = vmatmul.msk.f32.gmra.mxu2 %vm177_vm1, %v321_v29 }
  0x78   : > { %7253 = vmatmul.msk.f32.gmra.mxu3 %vm177_vm1, %v600_v30  ;;  %v918_v30 = vld [vmem:[#allocation2 + $0x32] sm:$0xff] }
  0x7b   : > { %7201 = vmatmul.msk.f32.gmra.mxu0 %vm177_vm1, %v8052_v31 }
  0x7c   : > { %7236 = vmatmul.msk.f32.gmra.mxu1 %vm177_vm1, %v8054_v32 }
  0x7f   : > { %7219 = vmatmul.msk.f32.gmra.mxu2 %vm177_vm1, %v322_v35 }
  0x80   : > { %7254 = vmatmul.msk.f32.gmra.mxu3 %vm177_vm1, %v601_v36 }
  0x83   : > { %7202 = vmatmul.msk.f32.gmra.mxu0 %vm177_vm1, %v8070_v40 }
  0x84   : > { %7237 = vmatmul.msk.f32.gmra.mxu1 %vm177_vm1, %v8073_v41 }
  0x87   : > { %7220 = vmatmul.msk.f32.gmra.mxu2 %vm177_vm1, %v323_v45 }
  0x88   : > { %7255 = vmatmul.msk.f32.gmra.mxu3 %vm177_vm1, %v602_v46 }
  0x8b   : > { %7203 = vmatmul.msk.f32.gmra.mxu0 %vm177_vm1, %v8085_v48 }
  0x8c   : > { %7238 = vmatmul.msk.f32.gmra.mxu1 %vm177_vm1, %v8087_v50 }
  0x8f   : > { %7221 = vmatmul.msk.f32.gmra.mxu2 %vm177_vm1, %v324_v52 }
  0x90   : > { %7256 = vmatmul.msk.f32.gmra.mxu3 %vm177_vm1, %v603_v53 }
  0x93   : > { %7204 = vmatmul.msk.f32.gmra.mxu0 %vm177_vm1, %v8099_v56 }
  0x94   : > { %7239 = vmatmul.msk.f32.gmra.mxu1 %vm177_vm1, %v8101_v57 }
  0x97   : > { %7222 = vmatmul.msk.f32.gmra.mxu2 %vm177_vm1, %v325_v58  ;;  %v920_v58 = vld [vmem:[#allocation2 + $0x4a] sm:$0xff] }
  0x98   : > { %7293 = vmatmul.msk.f32.vlgmr.msrb.gmra.mxu3 %vm177_vm1, %v7940_v42  ;;  %v8126_v42 = vld [vmem:[#allocation2 + $0xb0] sm:$0xff] }
  0x9b   : > { %v770_v0 = vpop.f32.mrf.mxu3  ;;  %7205 = vmatmul.msk.f32.gmra.mxu0 %vm177_vm1, %v8113_v60 }
  0x9c   : > { %7240 = vmatmul.msk.f32.gmra.mxu1 %vm177_vm1, %v8115_v63 }
  0x9f   : > { %7259 = vmatmul.msk.f32.vlgmr.msrb.gmra.mxu2 %vm177_vm1, %v914_v1 }
  0xa0   : > { %7294 = vmatmul.msk.f32.gmra.mxu3 %vm177_vm1, %v7956_v49  ;;  %v915_v49 = vld [vmem:[#allocation2 + $0xa] sm:$0xff] }
  0xa1   : > { %v722_v5 = vpop.f32.mrf.mxu1 }
  0xa2   : > { %v492_v7 = vpop.f32.mrf.mxu2 }
  0xa3   : > { %v773_v9 = vpop.f32.mrf.mxu3  ;;  %556 = vst.msk [vmem:[#allocation3 + $0x80] sm:$0xff] %vm177_vm1, %v492_v7  ;;  %7206 = vmatmul.msk.f32.gmra.mxu0 %vm177_vm1, %v8126_v42 }
  0xa4   : > { %7361 = vmatmul.msk.f32.vlgmr.msrb.gmra.mxu1 %vm177_vm1, %v916_v8 }
  0xa7   : > { %7260 = vmatmul.msk.f32.gmra.mxu2 %vm177_vm1, %v915_v49 }
  0xa8   : > { %7295 = vmatmul.msk.f32.gmra.mxu3 %vm177_vm1, %v7966_v54  ;;  %v444_v10 = vpop.f32.mrf.mxu0 }
  0xa9   : > { %v725_v13 = vpop.f32.mrf.mxu1  ;;  %540 = vst.msk [vmem:[#allocation3] sm:$0xff] %vm177_vm1, %v444_v10 }
  0xaa   : > { %v495_v14 = vpop.f32.mrf.mxu2  ;;  %v834_v15 = vld [vmem:[#allocation3 + $0x80] sm:$0xff] }
  0xab   : > { %v776_v21 = vpop.f32.mrf.mxu3  ;;  %557 = vst.msk [vmem:[#allocation3 + $0x88] sm:$0xff] %vm177_vm1, %v495_v14  ;;  %v866_v22 = vadd.f32 %v834_v15, %v770_v0  ;;  %7327 = vmatmul.msk.f32.vlgmr.msrb.gmra.mxu0 %vm177_vm1, %v7931_v37 }
  0xac   : > { %7362 = vmatmul.msk.f32.gmra.mxu1 %vm177_vm1, %v917_v18 }
  0xad   : > { %898 = vst.msk [vmem:[#allocation3 + $0x80] sm:$0xff] %vm177_vm1, %v866_v22 }
  0xaf   : > { %7261 = vmatmul.msk.f32.gmra.mxu2 %vm177_vm1, %v916_v8 }
  0xb0   : > { %7296 = vmatmul.msk.f32.gmra.mxu3 %vm177_vm1, %v7982_v61  ;;  %v447_v54 = vpop.f32.mrf.mxu0  ;;  %v818_v24 = vld [vmem:[#allocation3] sm:$0xff] }
  0xb1   : > { %v728_v25 = vpop.f32.mrf.mxu1  ;;  %541 = vst.msk [vmem:[#allocation3 + $0x8] sm:$0xff] %vm177_vm1, %v447_v54  ;;  %v850_v28 = vadd.f32 %v818_v24, %v722_v5 }
  0xb2   : > { %v498_v29 = vpop.f32.mrf.mxu2  ;;  %v835_v37 = vld [vmem:[#allocation3 + $0x88] sm:$0xff] }
  0xb3   : > { %v779_v33 = vpop.f32.mrf.mxu3  ;;  %558 = vst.msk [vmem:[#allocation3 + $0x90] sm:$0xff] %vm177_vm1, %v498_v29  ;;  %v867_v34 = vadd.f32 %v835_v37, %v773_v9  ;;  %7328 = vmatmul.msk.f32.gmra.mxu0 %vm177_vm1, %v7942_v43  ;;  %v919_v43 = vld [vmem:[#allocation2 + $0x3a] sm:$0xff] }
  0xb4   : > { %7363 = vmatmul.msk.f32.gmra.mxu1 %vm177_vm1, %v918_v30  ;;  %882 = vst.msk [vmem:[#allocation3] sm:$0xff] %vm177_vm1, %v850_v28 }
  0xb5   : > { %899 = vst.msk [vmem:[#allocation3 + $0x88] sm:$0xff] %vm177_vm1, %v867_v34 }
  0xb7   : > { %7262 = vmatmul.msk.f32.gmra.mxu2 %vm177_vm1, %v917_v18  ;;  %v922_v18 = vld [vmem:[#allocation2 + $0x62] sm:$0xff] }
  0xb8   : > { %7297 = vmatmul.msk.f32.gmra.mxu3 %vm177_vm1, %v7994_v2  ;;  %v450_v61 = vpop.f32.mrf.mxu0  ;;  %v819_v35 = vld [vmem:[#allocation3 + $0x8] sm:$0xff]  ;;  %v262_v2 = vld [vmem:[#allocation2 + $0x6f] sm:$0x1] }
  0xb9   : > { %v731_v36 = vpop.f32.mrf.mxu1  ;;  %542 = vst.msk [vmem:[#allocation3 + $0x10] sm:$0xff] %vm177_vm1, %v450_v61  ;;  %v851_v38 = vadd.f32 %v819_v35, %v725_v13 }
  0xba   : > { %v501_v39 = vpop.f32.mrf.mxu2  ;;  %v836_v44 = vld [vmem:[#allocation3 + $0x90] sm:$0xff]  ;;  %280 = vst.msk [vmem:[#allocation2 + $0x71] sm:$0x1] %vm239_vm2, %v262_v2 }
  0xbb   : > { %v782_v45 = vpop.f32.mrf.mxu3  ;;  %559 = vst.msk [vmem:[#allocation3 + $0x98] sm:$0xff] %vm177_vm1, %v501_v39  ;;  %v868_v46 = vadd.f32 %v836_v44, %v776_v21  ;;  %7329 = vmatmul.msk.f32.gmra.mxu0 %vm177_vm1, %v7900_v16 }
  0xbc   : > { %7364 = vmatmul.msk.f32.gmra.mxu1 %vm177_vm1, %v919_v43  ;;  %883 = vst.msk [vmem:[#allocation3 + $0x8] sm:$0xff] %vm177_vm1, %v851_v38 }
  0xbd   : > { %900 = vst.msk [vmem:[#allocation3 + $0x90] sm:$0xff] %vm177_vm1, %v868_v46 }
  0xbf   : > { %7263 = vmatmul.msk.f32.gmra.mxu2 %vm177_vm1, %v918_v30 }
  0xc0   : > { %7298 = vmatmul.msk.f32.gmra.mxu3 %vm177_vm1, %v8012_v11  ;;  %v453_v47 = vpop.f32.mrf.mxu0  ;;  %v820_v51 = vld [vmem:[#allocation3 + $0x10] sm:$0xff] }
  0xc1   : > { %v734_v52 = vpop.f32.mrf.mxu1  ;;  %543 = vst.msk [vmem:[#allocation3 + $0x18] sm:$0xff] %vm177_vm1, %v453_v47  ;;  %v852_v16 = vadd.f32 %v820_v51, %v728_v25 }
  0xc2   : > { %v504_v53 = vpop.f32.mrf.mxu2  ;;  %v837_v55 = vld [vmem:[#allocation3 + $0x98] sm:$0xff] }
  0xc3   : > { %v785_v59 = vpop.f32.mrf.mxu3  ;;  %560 = vst.msk [vmem:[#allocation3 + $0xa0] sm:$0xff] %vm177_vm1, %v504_v53  ;;  %v869_v0 = vadd.f32 %v837_v55, %v779_v33  ;;  %7330 = vmatmul.msk.f32.gmra.mxu0 %vm177_vm1, %v7906_v19  ;;  %v921_v19 = vld [vmem:[#allocation2 + $0x52] sm:$0xff] }
  0xc4   : > { %7365 = vmatmul.msk.f32.gmra.mxu1 %vm177_vm1, %v920_v58  ;;  %884 = vst.msk [vmem:[#allocation3 + $0x10] sm:$0xff] %vm177_vm1, %v852_v16 }
  0xc5   : > { %901 = vst.msk [vmem:[#allocation3 + $0x98] sm:$0xff] %vm177_vm1, %v869_v0 }
  0xc7   : > { %7264 = vmatmul.msk.f32.gmra.mxu2 %vm177_vm1, %v919_v43 }
  0xc8   : > { %7299 = vmatmul.msk.f32.gmra.mxu3 %vm177_vm1, %v8024_v17  ;;  %v456_v11 = vpop.f32.mrf.mxu0  ;;  %v821_v1 = vld [vmem:[#allocation3 + $0x18] sm:$0xff]  ;;  %v263_v17 = vld [vmem:[#allocation2 + $0x87] sm:$0x1] }
  0xc9   : > { %v737_v3 = vpop.f32.mrf.mxu1  ;;  %544 = vst.msk [vmem:[#allocation3 + $0x20] sm:$0xff] %vm177_vm1, %v456_v11  ;;  %v853_v5 = vadd.f32 %v821_v1, %v731_v36  ;;  %v924_v36 = vld [vmem:[#allocation2 + $0x7a] sm:$0xff] }
  0xca   : > { %v507_v6 = vpop.f32.mrf.mxu2  ;;  %v838_v7 = vld [vmem:[#allocation3 + $0xa0] sm:$0xff]  ;;  %281 = vst.msk [vmem:[#allocation2 + $0x89] sm:$0x1] %vm239_vm2, %v263_v17 }
  0xcb   : > { %v788_v8 = vpop.f32.mrf.mxu3  ;;  %561 = vst.msk [vmem:[#allocation3 + $0xa8] sm:$0xff] %vm177_vm1, %v507_v6  ;;  %v870_v9 = vadd.f32 %v838_v7, %v782_v45  ;;  %7331 = vmatmul.msk.f32.gmra.mxu0 %vm177_vm1, %v7984_v62 }
  0xcc   : > { %7366 = vmatmul.msk.f32.gmra.mxu1 %vm177_vm1, %v921_v19  ;;  %885 = vst.msk [vmem:[#allocation3 + $0x18] sm:$0xff] %vm177_vm1, %v853_v5 }
  0xcd   : > { %902 = vst.msk [vmem:[#allocation3 + $0xa0] sm:$0xff] %vm177_vm1, %v870_v9 }
  0xcf   : > { %7265 = vmatmul.msk.f32.gmra.mxu2 %vm177_vm1, %v920_v58 }
  0xd0   : > { %7300 = vmatmul.msk.f32.gmra.mxu3 %vm177_vm1, %v8041_v26  ;;  %v459_v49 = vpop.f32.mrf.mxu0  ;;  %v822_v10 = vld [vmem:[#allocation3 + $0x20] sm:$0xff] }
  0xd1   : > { %v740_v13 = vpop.f32.mrf.mxu1  ;;  %545 = vst.msk [vmem:[#allocation3 + $0x28] sm:$0xff] %vm177_vm1, %v459_v49  ;;  %v854_v62 = vadd.f32 %v822_v10, %v734_v52 }
  0xd2   : > { %v510_v14 = vpop.f32.mrf.mxu2  ;;  %v839_v15 = vld [vmem:[#allocation3 + $0xa8] sm:$0xff] }
  0xd3   : > { %v791_v21 = vpop.f32.mrf.mxu3  ;;  %562 = vst.msk [vmem:[#allocation3 + $0xb0] sm:$0xff] %vm177_vm1, %v510_v14  ;;  %v871_v22 = vadd.f32 %v839_v15, %v785_v59  ;;  %7332 = vmatmul.msk.f32.gmra.mxu0 %vm177_vm1, %v7996_v4  ;;  %v923_v4 = vld [vmem:[#allocation2 + $0x6a] sm:$0xff]  ;;  %v926_v59 = vld [vmem:[#allocation2 + $0x92] sm:$0xff] }
  0xd4   : > { %7367 = vmatmul.msk.f32.gmra.mxu1 %vm177_vm1, %v922_v18  ;;  %886 = vst.msk [vmem:[#allocation3 + $0x20] sm:$0xff] %vm177_vm1, %v854_v62  ;;  %v928_v62 = vld [vmem:[#allocation2 + $0xaa] sm:$0xff] }
  0xd5   : > { %903 = vst.msk [vmem:[#allocation3 + $0xa8] sm:$0xff] %vm177_vm1, %v871_v22 }
  0xd7   : > { %7266 = vmatmul.msk.f32.gmra.mxu2 %vm177_vm1, %v921_v19 }
  0xd8   : > { %7301 = vmatmul.msk.f32.gmra.mxu3 %vm177_vm1, %v8052_v31  ;;  %v462_v26 = vpop.f32.mrf.mxu0  ;;  %v823_v23 = vld [vmem:[#allocation3 + $0x28] sm:$0xff] }
  0xd9   : > { %v743_v54 = vpop.f32.mrf.mxu1  ;;  %546 = vst.msk [vmem:[#allocation3 + $0x30] sm:$0xff] %vm177_vm1, %v462_v26  ;;  %v855_v24 = vadd.f32 %v823_v23, %v737_v3  ;;  %v264_v31 = vld [vmem:[#allocation2 + $0x9f] sm:$0x1] }
  0xda   : > { %v513_v25 = vpop.f32.mrf.mxu2  ;;  %v840_v28 = vld [vmem:[#allocation3 + $0xb0] sm:$0xff]  ;;  %282 = vst.msk [vmem:[#allocation2 + $0xa1] sm:$0x1] %vm239_vm2, %v264_v31 }
  0xdb   : > { %v794_v29 = vpop.f32.mrf.mxu3  ;;  %563 = vst.msk [vmem:[#allocation3 + $0xb8] sm:$0xff] %vm177_vm1, %v513_v25  ;;  %v872_v37 = vadd.f32 %v840_v28, %v788_v8  ;;  %7333 = vmatmul.msk.f32.gmra.mxu0 %vm177_vm1, %v8014_v12  ;;  %v1271_v28 = vld [vmem:[#allocation2 + $0xc8] sm:$0xff] }
  0xdc   : > { %7368 = vmatmul.msk.f32.gmra.mxu1 %vm177_vm1, %v923_v4  ;;  %887 = vst.msk [vmem:[#allocation3 + $0x28] sm:$0xff] %vm177_vm1, %v855_v24 }
  0xdd   : > { %904 = vst.msk [vmem:[#allocation3 + $0xb0] sm:$0xff] %vm177_vm1, %v872_v37 }
  0xdf   : > { %7267 = vmatmul.msk.f32.gmra.mxu2 %vm177_vm1, %v922_v18 }
  0xe0   : > { %7302 = vmatmul.msk.f32.gmra.mxu3 %vm177_vm1, %v8070_v40  ;;  %v465_v30 = vpop.f32.mrf.mxu0  ;;  %v824_v33 = vld [vmem:[#allocation3 + $0x30] sm:$0xff] }
  0xe1   : > { %v746_v34 = vpop.f32.mrf.mxu1  ;;  %547 = vst.msk [vmem:[#allocation3 + $0x38] sm:$0xff] %vm177_vm1, %v465_v30  ;;  %v856_v12 = vadd.f32 %v824_v33, %v740_v13 }
  0xe2   : > { %v516_v61 = vpop.f32.mrf.mxu2  ;;  %v841_v35 = vld [vmem:[#allocation3 + $0xb8] sm:$0xff] }
  0xe3   : > { %v797_v38 = vpop.f32.mrf.mxu3  ;;  %564 = vst.msk [vmem:[#allocation3 + $0xc0] sm:$0xff] %vm177_vm1, %v516_v61  ;;  %v873_v39 = vadd.f32 %v841_v35, %v791_v21  ;;  %7334 = vmatmul.msk.f32.gmra.mxu0 %vm177_vm1, %v8026_v20  ;;  %v925_v20 = vld [vmem:[#allocation2 + $0x82] sm:$0xff]  ;;  %v1272_v35 = vld [vmem:[#allocation2 + $0xd8] sm:$0xff] }
  0xe4   : > { %7369 = vmatmul.msk.f32.gmra.mxu1 %vm177_vm1, %v924_v36  ;;  %888 = vst.msk [vmem:[#allocation3 + $0x30] sm:$0xff] %vm177_vm1, %v856_v12 }
  0xe5   : > { %905 = vst.msk [vmem:[#allocation3 + $0xb8] sm:$0xff] %vm177_vm1, %v873_v39  ;;  %v1612_v39 = vld [vmem:[#allocation2 + $0xc1] sm:$0xff] }
  0xe7   : > { %7268 = vmatmul.msk.f32.gmra.mxu2 %vm177_vm1, %v923_v4  ;;  %v267_v4 = vld [vmem:[#allocation2 + $0xe7] sm:$0x1] }
  0xe8   : > { %7303 = vmatmul.msk.f32.gmra.mxu3 %vm177_vm1, %v8085_v48  ;;  %v468_v40 = vpop.f32.mrf.mxu0  ;;  %v825_v44 = vld [vmem:[#allocation3 + $0x38] sm:$0xff]  ;;  %v265_v48 = vld [vmem:[#allocation2 + $0xb7] sm:$0x1]  ;;  %285 = vst.msk [vmem:[#allocation2 + $0xe9] sm:$0x1] %vm239_vm2, %v267_v4 }
  0xe9   : > { %v749_v43 = vpop.f32.mrf.mxu1  ;;  %548 = vst.msk [vmem:[#allocation3 + $0x40] sm:$0xff] %vm177_vm1, %v468_v40  ;;  %v857_v45 = vadd.f32 %v825_v44, %v743_v54  ;;  %v1616_v4 = vld [vmem:[#allocation2 + $0xf1] sm:$0xff] }
  0xea   : > { %v519_v46 = vpop.f32.mrf.mxu2  ;;  %v842_v2 = vld [vmem:[#allocation3 + $0xc0] sm:$0xff]  ;;  %283 = vst.msk [vmem:[#allocation2 + $0xb9] sm:$0x1] %vm239_vm2, %v265_v48 }
  0xeb   : > { %v800_v47 = vpop.f32.mrf.mxu3  ;;  %565 = vst.msk [vmem:[#allocation3 + $0xc8] sm:$0xff] %vm177_vm1, %v519_v46  ;;  %v874_v51 = vadd.f32 %v842_v2, %v794_v29  ;;  %7335 = vmatmul.msk.f32.gmra.mxu0 %vm177_vm1, %v8043_v27 }
  0xec   : > { %7370 = vmatmul.msk.f32.gmra.mxu1 %vm177_vm1, %v925_v20  ;;  %889 = vst.msk [vmem:[#allocation3 + $0x38] sm:$0xff] %vm177_vm1, %v857_v45 }
  0xed   : > { %906 = vst.msk [vmem:[#allocation3 + $0xc0] sm:$0xff] %vm177_vm1, %v874_v51 }
  0xef   : > { %7269 = vmatmul.msk.f32.gmra.mxu2 %vm177_vm1, %v924_v36 }
  0xf0   : > { %7304 = vmatmul.msk.f32.gmra.mxu3 %vm177_vm1, %v8099_v56  ;;  %v471_v52 = vpop.f32.mrf.mxu0  ;;  %v826_v16 = vld [vmem:[#allocation3 + $0x40] sm:$0xff] }
  0xf1   : > { %v752_v53 = vpop.f32.mrf.mxu1  ;;  %549 = vst.msk [vmem:[#allocation3 + $0x48] sm:$0xff] %vm177_vm1, %v471_v52  ;;  %v858_v27 = vadd.f32 %v826_v16, %v746_v34  ;;  %v930_v34 = vld [vmem:[#allocation2 + $0xc2] sm:$0xff] }
  0xf2   : > { %v522_v55 = vpop.f32.mrf.mxu2  ;;  %v843_v58 = vld [vmem:[#allocation3 + $0xc8] sm:$0xff]  ;;  %v1613_v52 = vld [vmem:[#allocation2 + $0xc9] sm:$0xff] }
  0xf3   : > { %v803_v0 = vpop.f32.mrf.mxu3  ;;  %566 = vst.msk [vmem:[#allocation3 + $0xd0] sm:$0xff] %vm177_vm1, %v522_v55  ;;  %v875_v11 = vadd.f32 %v843_v58, %v797_v38  ;;  %7336 = vmatmul.msk.f32.gmra.mxu0 %vm177_vm1, %v8054_v32  ;;  %v927_v32 = vld [vmem:[#allocation2 + $0x9a] sm:$0xff]  ;;  %v1160_v58 = vld [vmem:[#allocation3] sm:$0xff] }
  0xf4   : > { %7371 = vmatmul.msk.f32.gmra.mxu1 %vm177_vm1, %v926_v59  ;;  %890 = vst.msk [vmem:[#allocation3 + $0x40] sm:$0xff] %vm177_vm1, %v858_v27 }
  0xf5   : > { %907 = vst.msk [vmem:[#allocation3 + $0xc8] sm:$0xff] %vm177_vm1, %v875_v11 }
  0xf7   : > { %7270 = vmatmul.msk.f32.gmra.mxu2 %vm177_vm1, %v925_v20  ;;  %v1273_v20 = vld [vmem:[#allocation2 + $0xe0] sm:$0xff] }
  0xf8   : > { %7305 = vmatmul.msk.f32.gmra.mxu3 %vm177_vm1, %v8113_v60  ;;  %v474_v56 = vpop.f32.mrf.mxu0  ;;  %v827_v1 = vld [vmem:[#allocation3 + $0x48] sm:$0xff]  ;;  %v266_v60 = vld [vmem:[#allocation2 + $0xcf] sm:$0x1] }
  0xf9   : > { %v755_v3 = vpop.f32.mrf.mxu1  ;;  %550 = vst.msk [vmem:[#allocation3 + $0x50] sm:$0xff] %vm177_vm1, %v474_v56  ;;  %v859_v5 = vadd.f32 %v827_v1, %v749_v43  ;;  %v1274_v1 = vld [vmem:[#allocation2 + $0xf0] sm:$0xff] }
  0xfa   : > { %v525_v6 = vpop.f32.mrf.mxu2  ;;  %v844_v7 = vld [vmem:[#allocation3 + $0xd0] sm:$0xff]  ;;  %284 = vst.msk [vmem:[#allocation2 + $0xd1] sm:$0x1] %vm239_vm2, %v266_v60 }
  0xfb   : > { %v806_v19 = vpop.f32.mrf.mxu3  ;;  %567 = vst.msk [vmem:[#allocation3 + $0xd8] sm:$0xff] %vm177_vm1, %v525_v6  ;;  %v876_v8 = vadd.f32 %v844_v7, %v800_v47  ;;  %7337 = vmatmul.msk.f32.gmra.mxu0 %vm177_vm1, %v8073_v41  ;;  %v268_v47 = vld [vmem:[#allocation2 + $0xff] sm:$0x1]  ;;  %v933_v60 = vld [vmem:[#allocation2 + $0xe2] sm:$0xff] }
  0xfc   : > { %7372 = vmatmul.msk.f32.gmra.mxu1 %vm177_vm1, %v927_v32  ;;  %891 = vst.msk [vmem:[#allocation3 + $0x48] sm:$0xff] %vm177_vm1, %v859_v5  ;;  %v1614_v6 = vld [vmem:[#allocation2 + $0xd9] sm:$0xff] }
  0xfd   : > { %908 = vst.msk [vmem:[#allocation3 + $0xd0] sm:$0xff] %vm177_vm1, %v876_v8  ;;  %v1161_v8 = vld [vmem:[#allocation3 + $0x8] sm:$0xff] }
  0xfe   : > { %286 = vst.msk [vmem:[#allocation2 + $0x101] sm:$0x1] %vm239_vm2, %v268_v47 }
  0xff   : > { %7271 = vmatmul.msk.f32.gmra.mxu2 %vm177_vm1, %v926_v59  ;;  %v932_v59 = vld [vmem:[#allocation2 + $0xda] sm:$0xff] }
 0x100   : > { %7306 = vmatmul.msk.f32.gmra.mxu3 %vm177_vm1, %v8126_v42  ;;  %v477_v9 = vpop.f32.mrf.mxu0  ;;  %v828_v17 = vld [vmem:[#allocation3 + $0x50] sm:$0xff] }
 0x101   : > { %v758_v49 = vpop.f32.mrf.mxu1  ;;  %551 = vst.msk [vmem:[#allocation3 + $0x58] sm:$0xff] %vm177_vm1, %v477_v9  ;;  %v860_v41 = vadd.f32 %v828_v17, %v752_v53  ;;  %v1270_v42 = vld [vmem:[#allocation2 + $0xc0] sm:$0xff]  ;;  %v931_v45 = vld [vmem:[#allocation2 + $0xca] sm:$0xff] }
 0x102   : > { %v528_v10 = vpop.f32.mrf.mxu2  ;;  %v845_v13 = vld [vmem:[#allocation3 + $0xd8] sm:$0xff] }
 0x103   : > { %v809_v14 = vpop.f32.mrf.mxu3  ;;  %568 = vst.msk [vmem:[#allocation3 + $0xe0] sm:$0xff] %vm177_vm1, %v528_v10  ;;  %v877_v15 = vadd.f32 %v845_v13, %v803_v0  ;;  %7338 = vmatmul.msk.f32.gmra.mxu0 %vm177_vm1, %v8087_v50  ;;  %v929_v50 = vld [vmem:[#allocation2 + $0xb2] sm:$0xff] }
 0x104   : > { %7373 = vmatmul.msk.f32.gmra.mxu1 %vm177_vm1, %v928_v62  ;;  %892 = vst.msk [vmem:[#allocation3 + $0x50] sm:$0xff] %vm177_vm1, %v860_v41  ;;  %v269_v13 = vld [vmem:[#allocation2 + $0x117] sm:$0x1] }
 0x105   : > { %909 = vst.msk [vmem:[#allocation3 + $0xd8] sm:$0xff] %vm177_vm1, %v877_v15 }
 0x106   : > { %287 = vst.msk [vmem:[#allocation2 + $0x119] sm:$0x1] %vm239_vm2, %v269_v13 }
 0x107   : > { %7272 = vmatmul.msk.f32.gmra.mxu2 %vm177_vm1, %v927_v32 }
 0x108   : > { %7307 = vmatmul.msk.f32.gmra.mxu3 %vm177_vm1, %v1270_v42  ;;  %v480_v18 = vpop.f32.mrf.mxu0  ;;  %v829_v21 = vld [vmem:[#allocation3 + $0x58] sm:$0xff] }
 0x109   : > { %v761_v22 = vpop.f32.mrf.mxu1  ;;  %552 = vst.msk [vmem:[#allocation3 + $0x60] sm:$0xff] %vm177_vm1, %v480_v18  ;;  %v861_v26 = vadd.f32 %v829_v21, %v755_v3  ;;  %v1162_v18 = vld [vmem:[#allocation3 + $0x10] sm:$0xff]  ;;  %v934_v21 = vld [vmem:[#allocation2 + $0xf2] sm:$0xff] }
 0x10a   : > { %v531_v23 = vpop.f32.mrf.mxu2  ;;  %v846_v54 = vld [vmem:[#allocation3 + $0xe0] sm:$0xff] }
 0x10b   : > { %v812_v24 = vpop.f32.mrf.mxu3  ;;  %569 = vst.msk [vmem:[#allocation3 + $0xe8] sm:$0xff] %vm177_vm1, %v531_v23  ;;  %v878_v25 = vadd.f32 %v846_v54, %v806_v19  ;;  %7339 = vmatmul.msk.f32.gmra.mxu0 %vm177_vm1, %v8101_v57  ;;  %v1276_v54 = vld [vmem:[#allocation2 + $0x108] sm:$0xff] }
 0x10c   : > { %7374 = vmatmul.msk.f32.gmra.mxu1 %vm177_vm1, %v929_v50  ;;  %893 = vst.msk [vmem:[#allocation3 + $0x58] sm:$0xff] %vm177_vm1, %v861_v26 }
 0x10d   : > { %910 = vst.msk [vmem:[#allocation3 + $0xe0] sm:$0xff] %vm177_vm1, %v878_v25 }
 0x10f   : > { %7273 = vmatmul.msk.f32.gmra.mxu2 %vm177_vm1, %v928_v62 }
 0x110   : > { %7308 = vmatmul.msk.f32.gmra.mxu3 %vm177_vm1, %v1271_v28  ;;  %v483_v29 = vpop.f32.mrf.mxu0  ;;  %v830_v37 = vld [vmem:[#allocation3 + $0x60] sm:$0xff] }
 0x111   : > { %v764_v31 = vpop.f32.mrf.mxu1  ;;  %553 = vst.msk [vmem:[#allocation3 + $0x68] sm:$0xff] %vm177_vm1, %v483_v29  ;;  %v862_v57 = vadd.f32 %v830_v37, %v758_v49  ;;  %v1275_v49 = vld [vmem:[#allocation2 + $0xf8] sm:$0xff] }
 0x112   : > { %v534_v30 = vpop.f32.mrf.mxu2  ;;  %v847_v33 = vld [vmem:[#allocation3 + $0xe8] sm:$0xff] }
 0x113   : > { %v815_v12 = vpop.f32.mrf.mxu3  ;;  %570 = vst.msk [vmem:[#allocation3 + $0xf0] sm:$0xff] %vm177_vm1, %v534_v30  ;;  %v879_v61 = vadd.f32 %v847_v33, %v809_v14  ;;  %7340 = vmatmul.msk.f32.gmra.mxu0 %vm177_vm1, %v8115_v63  ;;  %v1615_v14 = vld [vmem:[#allocation2 + $0xe1] sm:$0xff] }
 0x114   : > { %7375 = vmatmul.msk.f32.gmra.mxu1 %vm177_vm1, %v930_v34  ;;  %894 = vst.msk [vmem:[#allocation3 + $0x60] sm:$0xff] %vm177_vm1, %v862_v57  ;;  %v935_v57 = vld [vmem:[#allocation2 + $0xfa] sm:$0xff] }
 0x115   : > { %911 = vst.msk [vmem:[#allocation3 + $0xe8] sm:$0xff] %vm177_vm1, %v879_v61 }
 0x117   : > { %7274 = vmatmul.msk.f32.gmra.mxu2 %vm177_vm1, %v929_v50 }
 0x118   : > { %7309 = vmatmul.msk.f32.gmra.mxu3 %vm177_vm1, %v1272_v35  ;;  %v486_v36 = vpop.f32.mrf.mxu0  ;;  %v831_v38 = vld [vmem:[#allocation3 + $0x68] sm:$0xff] }
 0x119   : > { %554 = vst.msk [vmem:[#allocation3 + $0x70] sm:$0xff] %vm177_vm1, %v486_v36  ;;  %v863_v40 = vadd.f32 %v831_v38, %v761_v22  ;;  %v767_v44 = vpop.f32.mrf.mxu1  ;;  %v270_v38 = vld [vmem:[#allocation2 + $0x12f] sm:$0x1] }
 0x11a   : > { %v537_v43 = vpop.f32.mrf.mxu2  ;;  %v848_v63 = vld [vmem:[#allocation3 + $0xf0] sm:$0xff]  ;;  %288 = vst.msk [vmem:[#allocation2 + $0x131] sm:$0x1] %vm239_vm2, %v270_v38 }
 0x11b   : > { %v1406_v46 = vpop.f32.mrf.mxu3  ;;  %571 = vst.msk [vmem:[#allocation3 + $0xf8] sm:$0xff] %vm177_vm1, %v537_v43  ;;  %v880_v2 = vadd.f32 %v848_v63, %v812_v24  ;;  %7341 = vmatmul.msk.f32.gmra.mxu0 %vm177_vm1, %v1612_v39 }
 0x11c   : > { %7376 = vmatmul.msk.f32.gmra.mxu1 %vm177_vm1, %v931_v45  ;;  %895 = vst.msk [vmem:[#allocation3 + $0x68] sm:$0xff] %vm177_vm1, %v863_v40  ;;  %v1617_v40 = vld [vmem:[#allocation2 + $0xf9] sm:$0xff] }
 0x11d   : > { %912 = vst.msk [vmem:[#allocation3 + $0xf0] sm:$0xff] %vm177_vm1, %v880_v2  ;;  %v936_v2 = vld [vmem:[#allocation2 + $0x10a] sm:$0xff] }
 0x11f   : > { %7275 = vmatmul.msk.f32.gmra.mxu2 %vm177_vm1, %v930_v34 }
 0x120   : > { %7310 = vmatmul.msk.f32.gmra.mxu3 %vm177_vm1, %v1273_v20  ;;  %v489_v51 = vpop.f32.mrf.mxu0  ;;  %v832_v48 = vld [vmem:[#allocation3 + $0x70] sm:$0xff] }
 0x121   : > { %555 = vst.msk [vmem:[#allocation3 + $0x78] sm:$0xff] %vm177_vm1, %v489_v51  ;;  %v864_v16 = vadd.f32 %v832_v48, %v764_v31  ;;  %v8292_v53 = vpop.f32.mrf.mxu1  ;;  %v1163_v31 = vld [vmem:[#allocation3 + $0x18] sm:$0xff]  ;;  %v1278_v48 = vld [vmem:[#allocation2 + $0x120] sm:$0xff] }
 0x122   : > { %v849_v27 = vld [vmem:[#allocation3 + $0xf8] sm:$0xff]  ;;  %v1064_v55 = vpop.f32.mrf.mxu2 }
 0x123   : > { %v1409_v0 = vpop.f32.mrf.mxu3  ;;  %v881_v11 = vadd.f32 %v849_v27, %v815_v12  ;;  %v1192_v56 = vadd.f32 %v1160_v58, %v1064_v55  ;;  %896 = vst.msk [vmem:[#allocation3 + $0x70] sm:$0xff] %vm177_vm1, %v864_v16  ;;  %7342 = vmatmul.msk.f32.gmra.mxu0 %vm177_vm1, %v1613_v52  ;;  %v1277_v12 = vld [vmem:[#allocation2 + $0x110] sm:$0xff] }
 0x124   : > { %7377 = vmatmul.msk.f32.gmra.mxu1 %vm177_vm1, %v932_v59  ;;  %v1618_v58 = vld [vmem:[#allocation2 + $0x109] sm:$0xff] }
 0x125   : > { %913 = vst.msk [vmem:[#allocation3 + $0xf8] sm:$0xff] %vm177_vm1, %v881_v11 }
 0x126   : > { %1224 = vst.msk [vmem:[#allocation3] sm:$0xff] %vm177_vm1, %v1192_v56  ;;  %v1165_v56 = vld [vmem:[#allocation3 + $0x28] sm:$0xff] }
 0x127   : > { %7276 = vmatmul.msk.f32.gmra.mxu2 %vm177_vm1, %v931_v45 }
 0x128   : > { %7311 = vmatmul.msk.f32.gmra.mxu3 %vm177_vm1, %v1274_v1  ;;  %v833_v3 = vld [vmem:[#allocation3 + $0x78] sm:$0xff]  ;;  %v1748_v5 = vpop.f32.mrf.mxu0  ;;  %v937_v1 = vld [vmem:[#allocation2 + $0x112] sm:$0xff] }
 0x129   : > { %v865_v7 = vadd.f32 %v833_v3, %v767_v44  ;;  %v8301_v32 = vpop.f32.mrf.mxu1 }
 0x12a   : > { %v1067_v19 = vpop.f32.mrf.mxu2 }
 0x12b   : > { %v1412_v9 = vpop.f32.mrf.mxu3  ;;  %v1193_v17 = vadd.f32 %v1161_v8, %v1067_v19  ;;  %897 = vst.msk [vmem:[#allocation3 + $0x78] sm:$0xff] %vm177_vm1, %v865_v7  ;;  %7343 = vmatmul.msk.f32.gmra.mxu0 %vm177_vm1, %v1614_v6  ;;  %v1279_v7 = vld [vmem:[#allocation2 + $0x128] sm:$0xff] }
 0x12c   : > { %7378 = vmatmul.msk.f32.gmra.mxu1 %vm177_vm1, %v933_v60 }
 0x12d   : > { %1225 = vst.msk [vmem:[#allocation3 + $0x8] sm:$0xff] %vm177_vm1, %v1193_v17  ;;  %v1502_v41 = vld [vmem:[#allocation3] sm:$0xff] }
 0x12e   : > { %v1534_v10 = vadd.f32 %v1502_v41, %v1406_v46  ;;  %v1164_v46 = vld [vmem:[#allocation3 + $0x20] sm:$0xff] }
 0x12f   : > { %7277 = vmatmul.msk.f32.gmra.mxu2 %vm177_vm1, %v932_v59 }
 0x130   : > { %7312 = vmatmul.msk.f32.gmra.mxu3 %vm177_vm1, %v1275_v49  ;;  %1566 = vst.msk [vmem:[#allocation3] sm:$0xff] %vm177_vm1, %v1534_v10  ;;  %v1751_v62 = vpop.f32.mrf.mxu0  ;;  %v1619_v49 = vld [vmem:[#allocation2 + $0x111] sm:$0xff] }
 0x131   : > { %v8310_v15 = vpop.f32.mrf.mxu1 }
 0x132   : > { %v1070_v42 = vpop.f32.mrf.mxu2 }
 0x133   : > { %v1415_v22 = vpop.f32.mrf.mxu3  ;;  %v1194_v26 = vadd.f32 %v1162_v18, %v1070_v42  ;;  %7344 = vmatmul.msk.f32.gmra.mxu0 %vm177_vm1, %v1615_v14  ;;  %v938_v14 = vld [vmem:[#allocation2 + $0x122] sm:$0xff] }
 0x134   : > { %7379 = vmatmul.msk.f32.gmra.mxu1 %vm177_vm1, %v934_v21  ;;  %v1503_v23 = vld [vmem:[#allocation3 + $0x8] sm:$0xff] }
 0x135   : > { %1226 = vst.msk [vmem:[#allocation3 + $0x10] sm:$0xff] %vm177_vm1, %v1194_v26  ;;  %v1535_v50 = vadd.f32 %v1503_v23, %v1409_v0 }
 0x137   : > { %1567 = vst.msk [vmem:[#allocation3 + $0x8] sm:$0xff] %vm177_vm1, %v1535_v50  ;;  %v1844_v24 = vld [vmem:[#allocation3] sm:$0xff]  ;;  %7278 = vmatmul.msk.f32.gmra.mxu2 %vm177_vm1, %v933_v60  ;;  %v271_v60 = vld [vmem:[#allocation2 + $0x147] sm:$0x1] }
 0x138   : > { %7313 = vmatmul.msk.f32.gmra.mxu3 %vm177_vm1, %v1276_v54  ;;  %v1876_v25 = vadd.f32 %v1844_v24, %v1748_v5  ;;  %v1754_v28 = vpop.f32.mrf.mxu0  ;;  %289 = vst.msk [vmem:[#allocation2 + $0x149] sm:$0x1] %vm239_vm2, %v271_v60  ;;  %v1620_v24 = vld [vmem:[#allocation2 + $0x121] sm:$0xff] }
 0x139   : > { %v8319_v29 = vpop.f32.mrf.mxu1 }
 0x13a   : > { %1908 = vst.msk [vmem:[#allocation3] sm:$0xff] %vm177_vm1, %v1876_v25  ;;  %v1073_v37 = vpop.f32.mrf.mxu2 }
 0x13b   : > { %v1418_v30 = vpop.f32.mrf.mxu3  ;;  %v1195_v33 = vadd.f32 %v1163_v31, %v1073_v37  ;;  %7345 = vmatmul.msk.f32.gmra.mxu0 %vm177_vm1, %v1616_v4  ;;  %v1167_v37 = vld [vmem:[#allocation3 + $0x38] sm:$0xff] }
 0x13c   : > { %7380 = vmatmul.msk.f32.gmra.mxu1 %vm177_vm1, %v935_v57  ;;  %v1504_v34 = vld [vmem:[#allocation3 + $0x10] sm:$0xff]  ;;  %v939_v31 = vld [vmem:[#allocation2 + $0x12a] sm:$0xff] }
 0x13d   : > { %1227 = vst.msk [vmem:[#allocation3 + $0x18] sm:$0xff] %vm177_vm1, %v1195_v33  ;;  %v1536_v61 = vadd.f32 %v1504_v34, %v1412_v9  ;;  %v1281_v34 = vld [vmem:[#allocation2 + $0x140] sm:$0xff] }
 0x13e   : > { %v1845_v35 = vld [vmem:[#allocation3 + $0x8] sm:$0xff] }
 0x13f   : > { %1568 = vst.msk [vmem:[#allocation3 + $0x10] sm:$0xff] %vm177_vm1, %v1536_v61  ;;  %v1877_v36 = vadd.f32 %v1845_v35, %v1751_v62  ;;  %7279 = vmatmul.msk.f32.gmra.mxu2 %vm177_vm1, %v934_v21  ;;  %v1166_v62 = vld [vmem:[#allocation3 + $0x30] sm:$0xff]  ;;  %v272_v35 = vld [vmem:[#allocation2 + $0x15f] sm:$0x1] }
 0x140   : > { %7314 = vmatmul.msk.f32.gmra.mxu3 %vm177_vm1, %v1277_v12  ;;  %v1757_v39 = vpop.f32.mrf.mxu0  ;;  %290 = vst.msk [vmem:[#allocation2 + $0x161] sm:$0x1] %vm239_vm2, %v272_v35 }
 0x141   : > { %1909 = vst.msk [vmem:[#allocation3 + $0x8] sm:$0xff] %vm177_vm1, %v1877_v36  ;;  %v2186_v44 = vld [vmem:[#allocation3] sm:$0xff]  ;;  %v8330_v43 = vpop.f32.mrf.mxu1 }
 0x142   : > { %v2218_v63 = vadd.f32 %v2186_v44, %v8292_v53  ;;  %v1076_v45 = vpop.f32.mrf.mxu2 }
 0x143   : > { %v1421_v20 = vpop.f32.mrf.mxu3  ;;  %v1196_v47 = vadd.f32 %v1164_v46, %v1076_v45  ;;  %7346 = vmatmul.msk.f32.gmra.mxu0 %vm177_vm1, %v1617_v40  ;;  %v1168_v45 = vld [vmem:[#allocation3 + $0x40] sm:$0xff]  ;;  %v940_v46 = vld [vmem:[#allocation2 + $0x13a] sm:$0xff] }
 0x144   : > { %7381 = vmatmul.msk.f32.gmra.mxu1 %vm177_vm1, %v936_v2  ;;  %2250 = vst.msk [vmem:[#allocation3] sm:$0xff] %vm177_vm1, %v2218_v63  ;;  %v1505_v51 = vld [vmem:[#allocation3 + $0x18] sm:$0xff] }
 0x145   : > { %1228 = vst.msk [vmem:[#allocation3 + $0x20] sm:$0xff] %vm177_vm1, %v1196_v47  ;;  %v1537_v52 = vadd.f32 %v1505_v51, %v1415_v22  ;;  %v1280_v22 = vld [vmem:[#allocation2 + $0x138] sm:$0xff]  ;;  %v1282_v51 = vld [vmem:[#allocation2 + $0x150] sm:$0xff] }
 0x146   : > { %v1846_v16 = vld [vmem:[#allocation3 + $0x10] sm:$0xff] }
 0x147   : > { %1569 = vst.msk [vmem:[#allocation3 + $0x18] sm:$0xff] %vm177_vm1, %v1537_v52  ;;  %v1878_v53 = vadd.f32 %v1846_v16, %v1754_v28  ;;  %7280 = vmatmul.msk.f32.gmra.mxu2 %vm177_vm1, %v935_v57 }
 0x148   : > { %7315 = vmatmul.msk.f32.gmra.mxu3 %vm177_vm1, %v1278_v48  ;;  %v2187_v27 = vld [vmem:[#allocation3 + $0x8] sm:$0xff]  ;;  %v1760_v55 = vpop.f32.mrf.mxu0 }
 0x149   : > { %1910 = vst.msk [vmem:[#allocation3 + $0x10] sm:$0xff] %vm177_vm1, %v1878_v53  ;;  %v2219_v59 = vadd.f32 %v2187_v27, %v8301_v32  ;;  %v8342_v0 = vpop.f32.mrf.mxu1  ;;  %v1622_v27 = vld [vmem:[#allocation2 + $0x139] sm:$0xff] }
 0x14a   : > { %v1079_v11 = vpop.f32.mrf.mxu2 }
 0x14b   : > { %v1424_v3 = vpop.f32.mrf.mxu3  ;;  %2251 = vst.msk [vmem:[#allocation3 + $0x8] sm:$0xff] %vm177_vm1, %v2219_v59  ;;  %v1197_v5 = vadd.f32 %v1165_v56, %v1079_v11  ;;  %7347 = vmatmul.msk.f32.gmra.mxu0 %vm177_vm1, %v1618_v58  ;;  %v174_v59 = vld [vmem:[%s7876_s22 + $0xf0] sm:$0xff]  ;;  %v1169_v56 = vld [vmem:[#allocation3 + $0x48] sm:$0xff] }
 0x14c   : > { %7382 = vmatmul.msk.f32.gmra.mxu1 %vm177_vm1, %v937_v1  ;;  %v1506_v6 = vld [vmem:[#allocation3 + $0x20] sm:$0xff]  ;;  %208 = vst.msk [vmem:[#allocation2 + $0x181] sm:$0xff] %vm177_vm1, %v174_v59 }
 0x14d   : > { %1229 = vst.msk [vmem:[#allocation3 + $0x28] sm:$0xff] %vm177_vm1, %v1197_v5  ;;  %v1538_v19 = vadd.f32 %v1506_v6, %v1418_v30 }
 0x14e   : > { %v1847_v8 = vld [vmem:[#allocation3 + $0x18] sm:$0xff] }
 0x14f   : > { %1570 = vst.msk [vmem:[#allocation3 + $0x20] sm:$0xff] %vm177_vm1, %v1538_v19  ;;  %v1879_v32 = vadd.f32 %v1847_v8, %v1757_v39  ;;  %7281 = vmatmul.msk.f32.gmra.mxu2 %vm177_vm1, %v936_v2  ;;  %v1621_v39 = vld [vmem:[#allocation2 + $0x129] sm:$0xff] }
 0x150   : > { %7316 = vmatmul.msk.f32.gmra.mxu3 %vm177_vm1, %v1279_v7  ;;  %v2188_v9 = vld [vmem:[#allocation3 + $0x10] sm:$0xff]  ;;  %v1763_v17 = vpop.f32.mrf.mxu0  ;;  %v1283_v7 = vld [vmem:[#allocation2 + $0x158] sm:$0xff] }
 0x151   : > { %1911 = vst.msk [vmem:[#allocation3 + $0x18] sm:$0xff] %vm177_vm1, %v1879_v32  ;;  %v2220_v41 = vadd.f32 %v2188_v9, %v8310_v15  ;;  %v8354_v10 = vpop.f32.mrf.mxu1  ;;  %v273_v32 = vld [vmem:[#allocation2 + $0x177] sm:$0x1] }
 0x152   : > { %v1082_v13 = vpop.f32.mrf.mxu2  ;;  %291 = vst.msk [vmem:[#allocation2 + $0x179] sm:$0x1] %vm239_vm2, %v273_v32 }
 0x153   : > { %v1427_v42 = vpop.f32.mrf.mxu3  ;;  %2252 = vst.msk [vmem:[#allocation3 + $0x10] sm:$0xff] %vm177_vm1, %v2220_v41  ;;  %v1198_v18 = vadd.f32 %v1166_v62, %v1082_v13  ;;  %7348 = vmatmul.msk.f32.gmra.mxu0 %vm177_vm1, %v1619_v49  ;;  %v237_v13 = vld [vmem:[#allocation2 + $0x182] sm:$0x1] }
 0x154   : > { %7383 = vmatmul.msk.f32.gmra.mxu1 %vm177_vm1, %v938_v14  ;;  %v1507_v21 = vld [vmem:[#allocation3 + $0x28] sm:$0xff]  ;;  %256 = vst.msk [vmem:[#allocation2 + $0x180] sm:$0x1] %vm239_vm2, %v237_v13  ;;  %v1174_v13 = vld [vmem:[#allocation3 + $0x70] sm:$0xff] }
 0x155   : > { %1230 = vst.msk [vmem:[#allocation3 + $0x30] sm:$0xff] %vm177_vm1, %v1198_v18  ;;  %v1539_v26 = vadd.f32 %v1507_v21, %v1421_v20 }
 0x156   : > { %v1848_v23 = vld [vmem:[#allocation3 + $0x20] sm:$0xff] }
 0x157   : > { %1571 = vst.msk [vmem:[#allocation3 + $0x28] sm:$0xff] %vm177_vm1, %v1539_v26  ;;  %v1880_v15 = vadd.f32 %v1848_v23, %v1760_v55  ;;  %7282 = vmatmul.msk.f32.gmra.mxu2 %vm177_vm1, %v937_v1  ;;  %v941_v1 = vld [vmem:[#allocation2 + $0x142] sm:$0xff] }
 0x158   : > { %7317 = vmatmul.msk.f32.gmra.mxu3 %vm177_vm1, %v1280_v22  ;;  %v2189_v54 = vld [vmem:[#allocation3 + $0x18] sm:$0xff]  ;;  %v1766_v50 = vpop.f32.mrf.mxu0 }
 0x159   : > { %1912 = vst.msk [vmem:[#allocation3 + $0x20] sm:$0xff] %vm177_vm1, %v1880_v15  ;;  %v2221_v25 = vadd.f32 %v2189_v54, %v8319_v29  ;;  %v8365_v28 = vpop.f32.mrf.mxu1  ;;  %v1284_v26 = vld [vmem:[#allocation2 + $0x168] sm:$0xff] }
 0x15a   : > { %v1085_v4 = vpop.f32.mrf.mxu2 }
 0x15b   : > { %v1430_v57 = vpop.f32.mrf.mxu3  ;;  %2253 = vst.msk [vmem:[#allocation3 + $0x18] sm:$0xff] %vm177_vm1, %v2221_v25  ;;  %v1199_v30 = vadd.f32 %v1167_v37, %v1085_v4  ;;  %7349 = vmatmul.msk.f32.gmra.mxu0 %vm177_vm1, %v1620_v24  ;;  %v1624_v24 = vld [vmem:[#allocation2 + $0x151] sm:$0xff] }
 0x15c   : > { %7384 = vmatmul.msk.f32.gmra.mxu1 %vm177_vm1, %v939_v31  ;;  %v1508_v33 = vld [vmem:[#allocation3 + $0x30] sm:$0xff]  ;;  %v175_v37 = vld [vmem:[%s7876_s22 + $0xf8] sm:$0xff] }
 0x15d   : > { %1231 = vst.msk [vmem:[#allocation3 + $0x38] sm:$0xff] %vm177_vm1, %v1199_v30  ;;  %v1540_v12 = vadd.f32 %v1508_v33, %v1424_v3  ;;  %v943_v30 = vld [vmem:[#allocation2 + $0x15a] sm:$0xff] }
 0x15e   : > { %v1849_v61 = vld [vmem:[#allocation3 + $0x28] sm:$0xff]  ;;  %209 = vst.msk [vmem:[#allocation2 + $0x189] sm:$0xff] %vm177_vm1, %v175_v37  ;;  %v1175_v37 = vld [vmem:[#allocation3 + $0x78] sm:$0xff] }
 0x15f   : > { %1572 = vst.msk [vmem:[#allocation3 + $0x30] sm:$0xff] %vm177_vm1, %v1540_v12  ;;  %v1881_v29 = vadd.f32 %v1849_v61, %v1763_v17  ;;  %7283 = vmatmul.msk.f32.gmra.mxu2 %vm177_vm1, %v938_v14  ;;  %v1623_v17 = vld [vmem:[#allocation2 + $0x141] sm:$0xff]  ;;  %v1285_v61 = vld [vmem:[#allocation2 + $0x170] sm:$0xff] }
 0x160   : > { %7318 = vmatmul.msk.f32.gmra.mxu3 %vm177_vm1, %v1281_v34  ;;  %v2190_v36 = vld [vmem:[#allocation3 + $0x20] sm:$0xff]  ;;  %v1769_v38 = vpop.f32.mrf.mxu0  ;;  %v1170_v14 = vld [vmem:[#allocation3 + $0x50] sm:$0xff] }
 0x161   : > { %1913 = vst.msk [vmem:[#allocation3 + $0x28] sm:$0xff] %vm177_vm1, %v1881_v29  ;;  %v2222_v40 = vadd.f32 %v2190_v36, %v8330_v43  ;;  %v8377_v44 = vpop.f32.mrf.mxu1 }
 0x162   : > { %v1088_v63 = vpop.f32.mrf.mxu2 }
 0x163   : > { %v1433_v2 = vpop.f32.mrf.mxu3  ;;  %2254 = vst.msk [vmem:[#allocation3 + $0x20] sm:$0xff] %vm177_vm1, %v2222_v40  ;;  %v1200_v20 = vadd.f32 %v1168_v45, %v1088_v63  ;;  %7350 = vmatmul.msk.f32.gmra.mxu0 %vm177_vm1, %v1621_v39  ;;  %v1625_v39 = vld [vmem:[#allocation2 + $0x159] sm:$0xff] }
 0x164   : > { %7385 = vmatmul.msk.f32.gmra.mxu1 %vm177_vm1, %v940_v46  ;;  %v1509_v47 = vld [vmem:[#allocation3 + $0x38] sm:$0xff] }
 0x165   : > { %1232 = vst.msk [vmem:[#allocation3 + $0x40] sm:$0xff] %vm177_vm1, %v1200_v20  ;;  %v1541_v48 = vadd.f32 %v1509_v47, %v1427_v42  ;;  %v942_v42 = vld [vmem:[#allocation2 + $0x152] sm:$0xff] }
 0x166   : > { %v1850_v43 = vld [vmem:[#allocation3 + $0x30] sm:$0xff] }
 0x167   : > { %1573 = vst.msk [vmem:[#allocation3 + $0x38] sm:$0xff] %vm177_vm1, %v1541_v48  ;;  %v1882_v52 = vadd.f32 %v1850_v43, %v1766_v50  ;;  %7284 = vmatmul.msk.f32.gmra.mxu2 %vm177_vm1, %v939_v31  ;;  %v1286_v48 = vld [vmem:[#allocation2 + $0x180] sm:$0xff] }
 0x168   : > { %7319 = vmatmul.msk.f32.gmra.mxu3 %vm177_vm1, %v1282_v51  ;;  %v2191_v16 = vld [vmem:[#allocation3 + $0x28] sm:$0xff]  ;;  %v1772_v53 = vpop.f32.mrf.mxu0 }
 0x169   : > { %1914 = vst.msk [vmem:[#allocation3 + $0x30] sm:$0xff] %vm177_vm1, %v1882_v52  ;;  %v2223_v55 = vadd.f32 %v2191_v16, %v8342_v0  ;;  %v8388_v58 = vpop.f32.mrf.mxu1 }
 0x16a   : > { %v1091_v11 = vpop.f32.mrf.mxu2 }
 0x16b   : > { %v1436_v3 = vpop.f32.mrf.mxu3  ;;  %2255 = vst.msk [vmem:[#allocation3 + $0x28] sm:$0xff] %vm177_vm1, %v2223_v55  ;;  %v1201_v5 = vadd.f32 %v1169_v56, %v1091_v11  ;;  %7351 = vmatmul.msk.f32.gmra.mxu0 %vm177_vm1, %v1622_v27  ;;  %v1626_v27 = vld [vmem:[#allocation2 + $0x169] sm:$0xff]  ;;  %v1173_v56 = vld [vmem:[#allocation3 + $0x68] sm:$0xff] }
 0x16c   : > { %7386 = vmatmul.msk.f32.gmra.mxu1 %vm177_vm1, %v941_v1  ;;  %v1510_v6 = vld [vmem:[#allocation3 + $0x40] sm:$0xff] }
 0x16d   : > { %1233 = vst.msk [vmem:[#allocation3 + $0x48] sm:$0xff] %vm177_vm1, %v1201_v5  ;;  %v1542_v0 = vadd.f32 %v1510_v6, %v1430_v57  ;;  %v1171_v57 = vld [vmem:[#allocation3 + $0x58] sm:$0xff] }
 0x16e   : > { %v1851_v19 = vld [vmem:[#allocation3 + $0x38] sm:$0xff] }
 0x16f   : > { %1574 = vst.msk [vmem:[#allocation3 + $0x40] sm:$0xff] %vm177_vm1, %v1542_v0  ;;  %v1883_v8 = vadd.f32 %v1851_v19, %v1769_v38  ;;  %7285 = vmatmul.msk.f32.gmra.mxu2 %vm177_vm1, %v940_v46  ;;  %v1172_v46 = vld [vmem:[#allocation3 + $0x60] sm:$0xff] }
 0x170   : > { %7320 = vmatmul.msk.f32.gmra.mxu3 %vm177_vm1, %v1283_v7  ;;  %v2192_v60 = vld [vmem:[#allocation3 + $0x30] sm:$0xff]  ;;  %v1775_v9 = vpop.f32.mrf.mxu0  ;;  %v1287_v7 = vld [vmem:[#allocation2 + $0x188] sm:$0xff] }
 0x171   : > { %1915 = vst.msk [vmem:[#allocation3 + $0x38] sm:$0xff] %vm177_vm1, %v1883_v8  ;;  %v2224_v49 = vadd.f32 %v2192_v60, %v8354_v10  ;;  %v8402_v41 = vpop.f32.mrf.mxu1  ;;  %v1627_v60 = vld [vmem:[#allocation2 + $0x171] sm:$0xff] }
 0x172   : > { %v1094_v62 = vpop.f32.mrf.mxu2 }
 0x173   : > { %v1439_v18 = vpop.f32.mrf.mxu3  ;;  %2256 = vst.msk [vmem:[#allocation3 + $0x30] sm:$0xff] %vm177_vm1, %v2224_v49  ;;  %v1202_v21 = vadd.f32 %v1170_v14, %v1094_v62  ;;  %7352 = vmatmul.msk.f32.gmra.mxu0 %vm177_vm1, %v1623_v17 }
 0x174   : > { %7387 = vmatmul.msk.f32.gmra.mxu1 %vm177_vm1, %v942_v42  ;;  %v1511_v22 = vld [vmem:[#allocation3 + $0x48] sm:$0xff] }
 0x175   : > { %1234 = vst.msk [vmem:[#allocation3 + $0x50] sm:$0xff] %vm177_vm1, %v1202_v21  ;;  %v1543_v10 = vadd.f32 %v1511_v22, %v1433_v2  ;;  %v944_v2 = vld [vmem:[#allocation2 + $0x16a] sm:$0xff] }
 0x176   : > { %v1852_v23 = vld [vmem:[#allocation3 + $0x40] sm:$0xff] }
 0x177   : > { %1575 = vst.msk [vmem:[#allocation3 + $0x48] sm:$0xff] %vm177_vm1, %v1543_v10  ;;  %v1884_v15 = vadd.f32 %v1852_v23, %v1772_v53  ;;  %7286 = vmatmul.msk.f32.gmra.mxu2 %vm177_vm1, %v941_v1  ;;  %v945_v1 = vld [vmem:[#allocation2 + $0x172] sm:$0xff] }
 0x178   : > { %7321 = vmatmul.msk.f32.gmra.mxu3 %vm177_vm1, %v1284_v26  ;;  %v2193_v54 = vld [vmem:[#allocation3 + $0x38] sm:$0xff]  ;;  %v1778_v50 = vpop.f32.mrf.mxu0  ;;  %v2624_v22 = vld [vmem:[#allocation2 + $0x31] sm:$0xff] }
 0x179   : > { %1916 = vst.msk [vmem:[#allocation3 + $0x40] sm:$0xff] %vm177_vm1, %v1884_v15  ;;  %v2225_v25 = vadd.f32 %v2193_v54, %v8365_v28  ;;  %v8414_v4 = vpop.f32.mrf.mxu1  ;;  %v1628_v54 = vld [vmem:[#allocation2 + $0x181] sm:$0xff] }
 0x17a   : > { %v1097_v31 = vpop.f32.mrf.mxu2 }
 0x17b   : > { %v1442_v33 = vpop.f32.mrf.mxu3  ;;  %2257 = vst.msk [vmem:[#allocation3 + $0x38] sm:$0xff] %vm177_vm1, %v2225_v25  ;;  %v1203_v34 = vadd.f32 %v1171_v57, %v1097_v31  ;;  %7353 = vmatmul.msk.f32.gmra.mxu0 %vm177_vm1, %v1624_v24 }
 0x17c   : > { %7388 = vmatmul.msk.f32.gmra.mxu1 %vm177_vm1, %v943_v30  ;;  %v1512_v12 = vld [vmem:[#allocation3 + $0x50] sm:$0xff] }
 0x17d   : > { %1235 = vst.msk [vmem:[#allocation3 + $0x58] sm:$0xff] %vm177_vm1, %v1203_v34  ;;  %v1544_v28 = vadd.f32 %v1512_v12, %v1436_v3  ;;  %v2282_v34 = vld [vmem:[#allocation2 + $0x30] sm:$0xff]  ;;  %v2625_v12 = vld [vmem:[#allocation2 + $0x39] sm:$0xff] }
 0x17e   : > { %v1853_v29 = vld [vmem:[#allocation3 + $0x48] sm:$0xff] }
 0x17f   : > { %1576 = vst.msk [vmem:[#allocation3 + $0x50] sm:$0xff] %vm177_vm1, %v1544_v28  ;;  %v1885_v35 = vadd.f32 %v1853_v29, %v1775_v9  ;;  %7287 = vmatmul.msk.f32.gmra.mxu2 %vm177_vm1, %v942_v42  ;;  %v1970_v42 = vld [vmem:[#allocation2 + $0x182] sm:$0xff] }
 0x180   : > { %7322 = vmatmul.msk.f32.gmra.mxu3 %vm177_vm1, %v1285_v61  ;;  %v2194_v36 = vld [vmem:[#allocation3 + $0x40] sm:$0xff]  ;;  %v1781_v38 = vpop.f32.mrf.mxu0 }
 0x181   : > { %1917 = vst.msk [vmem:[#allocation3 + $0x48] sm:$0xff] %vm177_vm1, %v1885_v35  ;;  %v2226_v40 = vadd.f32 %v2194_v36, %v8377_v44  ;;  %v8427_v63 = vpop.f32.mrf.mxu1  ;;  %v1629_v36 = vld [vmem:[#allocation2 + $0x189] sm:$0xff] }
 0x182   : > { %v1100_v45 = vpop.f32.mrf.mxu2 }
 0x183   : > { %v1445_v20 = vpop.f32.mrf.mxu3  ;;  %2258 = vst.msk [vmem:[#allocation3 + $0x40] sm:$0xff] %vm177_vm1, %v2226_v40  ;;  %v1204_v47 = vadd.f32 %v1172_v46, %v1100_v45  ;;  %7354 = vmatmul.msk.f32.gmra.mxu0 %vm177_vm1, %v1625_v39  ;;  %v1176_v45 = vld [vmem:[#allocation3 + $0x80] sm:$0xff] }
 0x184   : > { %7389 = vmatmul.msk.f32.gmra.mxu1 %vm177_vm1, %v944_v2  ;;  %v1513_v51 = vld [vmem:[#allocation3 + $0x58] sm:$0xff] }
 0x185   : > { %1236 = vst.msk [vmem:[#allocation3 + $0x60] sm:$0xff] %vm177_vm1, %v1204_v47  ;;  %v1545_v43 = vadd.f32 %v1513_v51, %v1439_v18  ;;  %v274_v18 = vld [vmem:[#allocation2 + $0x18f] sm:$0x1]  ;;  %v2283_v47 = vld [vmem:[#allocation2 + $0x38] sm:$0xff] }
 0x186   : > { %v1854_v52 = vld [vmem:[#allocation3 + $0x50] sm:$0xff]  ;;  %292 = vst.msk [vmem:[#allocation2 + $0x191] sm:$0x1] %vm239_vm2, %v274_v18  ;;  %v2626_v51 = vld [vmem:[#allocation2 + $0x49] sm:$0xff] }
 0x187   : > { %1577 = vst.msk [vmem:[#allocation3 + $0x58] sm:$0xff] %vm177_vm1, %v1545_v43  ;;  %v1886_v44 = vadd.f32 %v1854_v52, %v1778_v50  ;;  %7288 = vmatmul.msk.f32.gmra.mxu2 %vm177_vm1, %v943_v30  ;;  %v2628_v18 = vld [vmem:[#allocation2 + $0x61] sm:$0xff] }
 0x188   : > { %7323 = vmatmul.msk.f32.gmra.mxu3 %vm177_vm1, %v1286_v48  ;;  %v2195_v16 = vld [vmem:[#allocation3 + $0x48] sm:$0xff]  ;;  %v1784_v53 = vpop.f32.mrf.mxu0 }
 0x189   : > { %1918 = vst.msk [vmem:[#allocation3 + $0x50] sm:$0xff] %vm177_vm1, %v1886_v44  ;;  %v2227_v55 = vadd.f32 %v2195_v16, %v8388_v58  ;;  %v8438_v59 = vpop.f32.mrf.mxu1  ;;  %v2966_v16 = vld [vmem:[#allocation2 + $0x32] sm:$0xff] }
 0x18a   : > { %v1103_v11 = vpop.f32.mrf.mxu2 }
 0x18b   : > { %v1448_v3 = vpop.f32.mrf.mxu3  ;;  %2259 = vst.msk [vmem:[#allocation3 + $0x48] sm:$0xff] %vm177_vm1, %v2227_v55  ;;  %v1205_v5 = vadd.f32 %v1173_v56, %v1103_v11  ;;  %7355 = vmatmul.msk.f32.gmra.mxu0 %vm177_vm1, %v1626_v27  ;;  %v1177_v11 = vld [vmem:[#allocation3 + $0x88] sm:$0xff] }
 0x18c   : > { %7390 = vmatmul.msk.f32.gmra.mxu1 %vm177_vm1, %v945_v1  ;;  %v1514_v6 = vld [vmem:[#allocation3 + $0x60] sm:$0xff] }
 0x18d   : > { %1237 = vst.msk [vmem:[#allocation3 + $0x68] sm:$0xff] %vm177_vm1, %v1205_v5  ;;  %v1546_v0 = vadd.f32 %v1514_v6, %v1442_v33  ;;  %v1971_v30 = vld [vmem:[#allocation2 + $0x18a] sm:$0xff] }
 0x18e   : > { %v1855_v19 = vld [vmem:[#allocation3 + $0x58] sm:$0xff]  ;;  %v2627_v6 = vld [vmem:[#allocation2 + $0x51] sm:$0xff] }
 0x18f   : > { %1578 = vst.msk [vmem:[#allocation3 + $0x60] sm:$0xff] %vm177_vm1, %v1546_v0  ;;  %v1887_v58 = vadd.f32 %v1855_v19, %v1781_v38  ;;  %7289 = vmatmul.msk.f32.gmra.mxu2 %vm177_vm1, %v944_v2  ;;  %v2284_v5 = vld [vmem:[#allocation2 + $0x48] sm:$0xff] }
 0x190   : > { %7324 = vmatmul.msk.f32.gmra.mxu3 %vm177_vm1, %v1287_v7  ;;  %v2196_v8 = vld [vmem:[#allocation3 + $0x50] sm:$0xff]  ;;  %v1787_v32 = vpop.f32.mrf.mxu0 }
 0x191   : > { %1919 = vst.msk [vmem:[#allocation3 + $0x58] sm:$0xff] %vm177_vm1, %v1887_v58  ;;  %v2228_v9 = vadd.f32 %v2196_v8, %v8402_v41  ;;  %v8449_v17 = vpop.f32.mrf.mxu1  ;;  %v2967_v8 = vld [vmem:[#allocation2 + $0x3a] sm:$0xff] }
 0x192   : > { %v1106_v49 = vpop.f32.mrf.mxu2 }
 0x193   : > { %v1451_v62 = vpop.f32.mrf.mxu3  ;;  %2260 = vst.msk [vmem:[#allocation3 + $0x50] sm:$0xff] %vm177_vm1, %v2228_v9  ;;  %v1206_v14 = vadd.f32 %v1174_v13, %v1106_v49  ;;  %7356 = vmatmul.msk.f32.gmra.mxu0 %vm177_vm1, %v1627_v60  ;;  %v1178_v9 = vld [vmem:[#allocation3 + $0x90] sm:$0xff] }
 0x194   : > { %v1515_v21 = vld [vmem:[#allocation3 + $0x68] sm:$0xff]  ;;  %7391 = vmatmul.msk.f32.gmra.mxu1 %vm177_vm1, %v1970_v42  ;;  %v2285_v42 = vld [vmem:[#allocation2 + $0x50] sm:$0xff] }
 0x195   : > { %1238 = vst.msk [vmem:[#allocation3 + $0x70] sm:$0xff] %vm177_vm1, %v1206_v14  ;;  %v1547_v41 = vadd.f32 %v1515_v21, %v1445_v20 }
 0x196   : > { %v1856_v26 = vld [vmem:[#allocation3 + $0x60] sm:$0xff] }
 0x197   : > { %1579 = vst.msk [vmem:[#allocation3 + $0x68] sm:$0xff] %vm177_vm1, %v1547_v41  ;;  %v1888_v10 = vadd.f32 %v1856_v26, %v1784_v53  ;;  %7290 = vmatmul.msk.f32.gmra.mxu2 %vm177_vm1, %v945_v1 }
 0x198   : > { %7429 = vmatmul.msk.f32.vlgmr.msra.gmra.mxu3 %vm177_vm1, %v2624_v22  ;;  %v2197_v23 = vld [vmem:[#allocation3 + $0x58] sm:$0xff]  ;;  %v1790_v15 = vpop.f32.mrf.mxu0 }
 0x199   : > { %1920 = vst.msk [vmem:[#allocation3 + $0x60] sm:$0xff] %vm177_vm1, %v1888_v10  ;;  %v2229_v50 = vadd.f32 %v2197_v23, %v8414_v4  ;;  %v8461_v24 = vpop.f32.mrf.mxu1  ;;  %v2968_v10 = vld [vmem:[#allocation2 + $0x4a] sm:$0xff] }
 0x19a   : > { %v1109_v25 = vpop.f32.mrf.mxu2 }
 0x19b   : > { %v1454_v31 = vpop.f32.mrf.mxu3  ;;  %2261 = vst.msk [vmem:[#allocation3 + $0x58] sm:$0xff] %vm177_vm1, %v2229_v50  ;;  %v1207_v57 = vadd.f32 %v1175_v37, %v1109_v25  ;;  %7357 = vmatmul.msk.f32.gmra.mxu0 %vm177_vm1, %v1628_v54  ;;  %v1179_v54 = vld [vmem:[#allocation3 + $0x98] sm:$0xff] }
 0x19c   : > { %v1516_v33 = vld [vmem:[#allocation3 + $0x70] sm:$0xff]  ;;  %7392 = vmatmul.msk.f32.gmra.mxu1 %vm177_vm1, %v1971_v30 }
 0x19d   : > { %1239 = vst.msk [vmem:[#allocation3 + $0x78] sm:$0xff] %vm177_vm1, %v1207_v57  ;;  %v1548_v61 = vadd.f32 %v1516_v33, %v1448_v3  ;;  %v2629_v57 = vld [vmem:[#allocation2 + $0x69] sm:$0xff] }
 0x19e   : > { %v1857_v4 = vld [vmem:[#allocation3 + $0x68] sm:$0xff] }
 0x19f   : > { %1580 = vst.msk [vmem:[#allocation3 + $0x70] sm:$0xff] %vm177_vm1, %v1548_v61  ;;  %v1889_v28 = vadd.f32 %v1857_v4, %v1787_v32  ;;  %7395 = vmatmul.msk.f32.vlgmr.msra.gmra.mxu2 %vm177_vm1, %v2282_v34  ;;  %v2969_v4 = vld [vmem:[#allocation2 + $0x52] sm:$0xff] }
 0x1a0   : > { %7430 = vmatmul.msk.f32.gmra.mxu3 %vm177_vm1, %v2625_v12  ;;  %v2198_v29 = vld [vmem:[#allocation3 + $0x60] sm:$0xff]  ;;  %v1793_v35 = vpop.f32.mrf.mxu0 }
 0x1a1   : > { %1921 = vst.msk [vmem:[#allocation3 + $0x68] sm:$0xff] %vm177_vm1, %v1889_v28  ;;  %v2230_v38 = vadd.f32 %v2198_v29, %v8427_v63  ;;  %v8472_v39 = vpop.f32.mrf.mxu1 }
 0x1a2   : > { %v1112_v40 = vpop.f32.mrf.mxu2 }
 0x1a3   : > { %v1457_v46 = vpop.f32.mrf.mxu3  ;;  %2262 = vst.msk [vmem:[#allocation3 + $0x60] sm:$0xff] %vm177_vm1, %v2230_v38  ;;  %v1208_v2 = vadd.f32 %v1176_v45, %v1112_v40  ;;  %7358 = vmatmul.msk.f32.gmra.mxu0 %vm177_vm1, %v1629_v36  ;;  %v2287_v45 = vld [vmem:[#allocation2 + $0x68] sm:$0xff] }
 0x1a4   : > { %v1517_v20 = vld [vmem:[#allocation3 + $0x78] sm:$0xff] }
 0x1a5   : > { %1240 = vst.msk [vmem:[#allocation3 + $0x80] sm:$0xff] %vm177_vm1, %v1208_v2  ;;  %v1549_v48 = vadd.f32 %v1517_v20, %v1451_v62 }
 0x1a6   : > { %v1858_v43 = vld [vmem:[#allocation3 + $0x70] sm:$0xff] }
 0x1a7   : > { %1581 = vst.msk [vmem:[#allocation3 + $0x78] sm:$0xff] %vm177_vm1, %v1549_v48  ;;  %v1890_v63 = vadd.f32 %v1858_v43, %v1790_v15  ;;  %7396 = vmatmul.msk.f32.gmra.mxu2 %vm177_vm1, %v2283_v47  ;;  %v2970_v43 = vld [vmem:[#allocation2 + $0x62] sm:$0xff] }
 0x1a8   : > { %7431 = vmatmul.msk.f32.gmra.mxu3 %vm177_vm1, %v2626_v51  ;;  %v2199_v52 = vld [vmem:[#allocation3 + $0x68] sm:$0xff]  ;;  %v1796_v44 = vpop.f32.mrf.mxu0 }
 0x1a9   : > { %1922 = vst.msk [vmem:[#allocation3 + $0x70] sm:$0xff] %vm177_vm1, %v1890_v63  ;;  %v2231_v53 = vadd.f32 %v2199_v52, %v8438_v59  ;;  %v8482_v27 = vpop.f32.mrf.mxu1 }
 0x1aa   : > { %v1115_v55 = vpop.f32.mrf.mxu2 }
 0x1ab   : > { %v1460_v56 = vpop.f32.mrf.mxu3  ;;  %2263 = vst.msk [vmem:[#allocation3 + $0x68] sm:$0xff] %vm177_vm1, %v2231_v53  ;;  %v1209_v1 = vadd.f32 %v1177_v11, %v1115_v55  ;;  %7463 = vmatmul.msk.f32.vlgmr.msra.gmra.mxu0 %vm177_vm1, %v2966_v16  ;;  %v2288_v11 = vld [vmem:[#allocation2 + $0x78] sm:$0xff] }
 0x1ac   : > { %v1518_v3 = vld [vmem:[#allocation3 + $0x80] sm:$0xff] }
 0x1ad   : > { %1241 = vst.msk [vmem:[#allocation3 + $0x88] sm:$0xff] %vm177_vm1, %v1209_v1  ;;  %v1550_v7 = vadd.f32 %v1518_v3, %v1454_v31  ;;  %v2286_v31 = vld [vmem:[#allocation2 + $0x60] sm:$0xff] }
 0x1ae   : > { %v1859_v0 = vld [vmem:[#allocation3 + $0x78] sm:$0xff] }
 0x1af   : > { %1582 = vst.msk [vmem:[#allocation3 + $0x80] sm:$0xff] %vm177_vm1, %v1550_v7  ;;  %v1891_v59 = vadd.f32 %v1859_v0, %v1793_v35  ;;  %7397 = vmatmul.msk.f32.gmra.mxu2 %vm177_vm1, %v2284_v5  ;;  %v1180_v35 = vld [vmem:[#allocation3 + $0xa0] sm:$0xff] }
 0x1b0   : > { %7432 = vmatmul.msk.f32.gmra.mxu3 %vm177_vm1, %v2627_v6  ;;  %v2200_v19 = vld [vmem:[#allocation3 + $0x70] sm:$0xff]  ;;  %v1799_v58 = vpop.f32.mrf.mxu0  ;;  %v2971_v7 = vld [vmem:[#allocation2 + $0x6a] sm:$0xff] }
 0x1b1   : > { %1923 = vst.msk [vmem:[#allocation3 + $0x78] sm:$0xff] %vm177_vm1, %v1891_v59  ;;  %v2232_v32 = vadd.f32 %v2200_v19, %v8449_v17  ;;  %v8494_v62 = vpop.f32.mrf.mxu1 }
 0x1b2   : > { %v1118_v60 = vpop.f32.mrf.mxu2 }
 0x1b3   : > { %v1463_v49 = vpop.f32.mrf.mxu3  ;;  %2264 = vst.msk [vmem:[#allocation3 + $0x70] sm:$0xff] %vm177_vm1, %v2232_v32  ;;  %v1210_v13 = vadd.f32 %v1178_v9, %v1118_v60  ;;  %7464 = vmatmul.msk.f32.gmra.mxu0 %vm177_vm1, %v2967_v8  ;;  %v2289_v9 = vld [vmem:[#allocation2 + $0x80] sm:$0xff] }
 0x1b4   : > { %v1519_v14 = vld [vmem:[#allocation3 + $0x88] sm:$0xff] }
 0x1b5   : > { %1242 = vst.msk [vmem:[#allocation3 + $0x90] sm:$0xff] %vm177_vm1, %v1210_v13  ;;  %v1551_v21 = vadd.f32 %v1519_v14, %v1457_v46  ;;  %v2630_v46 = vld [vmem:[#allocation2 + $0x79] sm:$0xff] }
 0x1b6   : > { %v1860_v22 = vld [vmem:[#allocation3 + $0x80] sm:$0xff] }
 0x1b7   : > { %1583 = vst.msk [vmem:[#allocation3 + $0x88] sm:$0xff] %vm177_vm1, %v1551_v21  ;;  %v1892_v17 = vadd.f32 %v1860_v22, %v1796_v44  ;;  %7398 = vmatmul.msk.f32.gmra.mxu2 %vm177_vm1, %v2285_v42  ;;  %v1181_v44 = vld [vmem:[#allocation3 + $0xa8] sm:$0xff] }
 0x1b8   : > { %7433 = vmatmul.msk.f32.gmra.mxu3 %vm177_vm1, %v2628_v18  ;;  %v2201_v41 = vld [vmem:[#allocation3 + $0x78] sm:$0xff]  ;;  %v1802_v26 = vpop.f32.mrf.mxu0  ;;  %v2972_v21 = vld [vmem:[#allocation2 + $0x7a] sm:$0xff] }
 0x1b9   : > { %1924 = vst.msk [vmem:[#allocation3 + $0x80] sm:$0xff] %vm177_vm1, %v1892_v17  ;;  %v2233_v23 = vadd.f32 %v2201_v41, %v8461_v24  ;;  %v8505_v33 = vpop.f32.mrf.mxu1  ;;  %v1183_v41 = vld [vmem:[#allocation3 + $0xb8] sm:$0xff] }
 0x1ba   : > { %v1121_v15 = vpop.f32.mrf.mxu2 }
 0x1bb   : > { %v1466_v50 = vpop.f32.mrf.mxu3  ;;  %2265 = vst.msk [vmem:[#allocation3 + $0x78] sm:$0xff] %vm177_vm1, %v2233_v23  ;;  %v1211_v25 = vadd.f32 %v1179_v54, %v1121_v15  ;;  %7465 = vmatmul.msk.f32.gmra.mxu0 %vm177_vm1, %v2968_v10  ;;  %v2290_v54 = vld [vmem:[#allocation2 + $0x90] sm:$0xff] }
 0x1bc   : > { %v1520_v37 = vld [vmem:[#allocation3 + $0x90] sm:$0xff] }
 0x1bd   : > { %1243 = vst.msk [vmem:[#allocation3 + $0x98] sm:$0xff] %vm177_vm1, %v1211_v25  ;;  %v1552_v30 = vadd.f32 %v1520_v37, %v1460_v56  ;;  %v2631_v56 = vld [vmem:[#allocation2 + $0x81] sm:$0xff] }
 0x1be   : > { %v1861_v34 = vld [vmem:[#allocation3 + $0x88] sm:$0xff] }
 0x1bf   : > { %1584 = vst.msk [vmem:[#allocation3 + $0x90] sm:$0xff] %vm177_vm1, %v1552_v30  ;;  %v1893_v24 = vadd.f32 %v1861_v34, %v1799_v58  ;;  %7399 = vmatmul.msk.f32.gmra.mxu2 %vm177_vm1, %v2286_v31  ;;  %v1182_v58 = vld [vmem:[#allocation3 + $0xb0] sm:$0xff] }
 0x1c0   : > { %7434 = vmatmul.msk.f32.gmra.mxu3 %vm177_vm1, %v2629_v57  ;;  %v2202_v12 = vld [vmem:[#allocation3 + $0x80] sm:$0xff]  ;;  %v1805_v61 = vpop.f32.mrf.mxu0 }
 0x1c1   : > { %1925 = vst.msk [vmem:[#allocation3 + $0x88] sm:$0xff] %vm177_vm1, %v1893_v24  ;;  %v2234_v28 = vadd.f32 %v2202_v12, %v8472_v39  ;;  %v8518_v39 = vpop.f32.mrf.mxu1  ;;  %v1184_v12 = vld [vmem:[#allocation3 + $0xc0] sm:$0xff] }
 0x1c2   : > { %v1124_v29 = vpop.f32.mrf.mxu2 }
 0x1c3   : > { %v1469_v36 = vpop.f32.mrf.mxu3  ;;  %2266 = vst.msk [vmem:[#allocation3 + $0x80] sm:$0xff] %vm177_vm1, %v2234_v28  ;;  %v1212_v38 = vadd.f32 %v1180_v35, %v1124_v29  ;;  %7466 = vmatmul.msk.f32.gmra.mxu0 %vm177_vm1, %v2969_v4  ;;  %v2291_v29 = vld [vmem:[#allocation2 + $0x98] sm:$0xff]  ;;  %v2634_v35 = vld [vmem:[#allocation2 + $0xa9] sm:$0xff] }
 0x1c4   : > { %v1521_v40 = vld [vmem:[#allocation3 + $0x98] sm:$0xff] }
 0x1c5   : > { %1244 = vst.msk [vmem:[#allocation3 + $0xa0] sm:$0xff] %vm177_vm1, %v1212_v38  ;;  %v1553_v2 = vadd.f32 %v1521_v40, %v1463_v49  ;;  %v2632_v49 = vld [vmem:[#allocation2 + $0x91] sm:$0xff] }
 0x1c6   : > { %v1862_v20 = vld [vmem:[#allocation3 + $0x90] sm:$0xff] }
 0x1c7   : > { %1585 = vst.msk [vmem:[#allocation3 + $0x98] sm:$0xff] %vm177_vm1, %v1553_v2  ;;  %v1894_v47 = vadd.f32 %v1862_v20, %v1802_v26  ;;  %7400 = vmatmul.msk.f32.gmra.mxu2 %vm177_vm1, %v2287_v45  ;;  %v2974_v20 = vld [vmem:[#allocation2 + $0x92] sm:$0xff] }
 0x1c8   : > { %7435 = vmatmul.msk.f32.gmra.mxu3 %vm177_vm1, %v2630_v46  ;;  %v2203_v51 = vld [vmem:[#allocation3 + $0x88] sm:$0xff]  ;;  %v1808_v48 = vpop.f32.mrf.mxu0 }
 0x1c9   : > { %1926 = vst.msk [vmem:[#allocation3 + $0x90] sm:$0xff] %vm177_vm1, %v1894_v47  ;;  %v2235_v63 = vadd.f32 %v2203_v51, %v8482_v27  ;;  %v8530_v59 = vpop.f32.mrf.mxu1  ;;  %v1185_v51 = vld [vmem:[#allocation3 + $0xc8] sm:$0xff] }
 0x1ca   : > { %v1127_v52 = vpop.f32.mrf.mxu2 }
 0x1cb   : > { %v1472_v16 = vpop.f32.mrf.mxu3  ;;  %2267 = vst.msk [vmem:[#allocation3 + $0x88] sm:$0xff] %vm177_vm1, %v2235_v63  ;;  %v1213_v53 = vadd.f32 %v1181_v44, %v1127_v52  ;;  %7467 = vmatmul.msk.f32.gmra.mxu0 %vm177_vm1, %v2970_v43  ;;  %v2292_v52 = vld [vmem:[#allocation2 + $0xa8] sm:$0xff]  ;;  %v2635_v44 = vld [vmem:[#allocation2 + $0xb1] sm:$0xff] }
 0x1cc   : > { %v1522_v55 = vld [vmem:[#allocation3 + $0xa0] sm:$0xff] }
 0x1cd   : > { %1245 = vst.msk [vmem:[#allocation3 + $0xa8] sm:$0xff] %vm177_vm1, %v1213_v53  ;;  %v1554_v1 = vadd.f32 %v1522_v55, %v1466_v50  ;;  %v2633_v50 = vld [vmem:[#allocation2 + $0x99] sm:$0xff] }
 0x1ce   : > { %v1863_v3 = vld [vmem:[#allocation3 + $0x98] sm:$0xff] }
 0x1cf   : > { %1586 = vst.msk [vmem:[#allocation3 + $0xa0] sm:$0xff] %vm177_vm1, %v1554_v1  ;;  %v1895_v5 = vadd.f32 %v1863_v3, %v1805_v61  ;;  %7401 = vmatmul.msk.f32.gmra.mxu2 %vm177_vm1, %v2288_v11  ;;  %v2975_v3 = vld [vmem:[#allocation2 + $0x9a] sm:$0xff] }
 0x1d0   : > { %7436 = vmatmul.msk.f32.gmra.mxu3 %vm177_vm1, %v2631_v56  ;;  %v2204_v27 = vld [vmem:[#allocation3 + $0x90] sm:$0xff]  ;;  %v1811_v6 = vpop.f32.mrf.mxu0 }
 0x1d1   : > { %1927 = vst.msk [vmem:[#allocation3 + $0x98] sm:$0xff] %vm177_vm1, %v1895_v5  ;;  %v2236_v0 = vadd.f32 %v2204_v27, %v8494_v62  ;;  %v2156_v23 = vpop.f32.mrf.mxu1 }
 0x1d2   : > { %v1130_v19 = vpop.f32.mrf.mxu2 }
 0x1d3   : > { %v1475_v8 = vpop.f32.mrf.mxu3  ;;  %2268 = vst.msk [vmem:[#allocation3 + $0x90] sm:$0xff] %vm177_vm1, %v2236_v0  ;;  %v1214_v32 = vadd.f32 %v1182_v58, %v1130_v19  ;;  %7468 = vmatmul.msk.f32.gmra.mxu0 %vm177_vm1, %v2971_v7  ;;  %v2293_v19 = vld [vmem:[#allocation2 + $0xb0] sm:$0xff]  ;;  %v2636_v58 = vld [vmem:[#allocation2 + $0xc1] sm:$0xff] }
 0x1d4   : > { %v1523_v60 = vld [vmem:[#allocation3 + $0xa8] sm:$0xff] }
 0x1d5   : > { %1246 = vst.msk [vmem:[#allocation3 + $0xb0] sm:$0xff] %vm177_vm1, %v1214_v32  ;;  %v1555_v13 = vadd.f32 %v1523_v60, %v1469_v36 }
 0x1d6   : > { %v1864_v14 = vld [vmem:[#allocation3 + $0xa0] sm:$0xff] }
 0x1d7   : > { %1587 = vst.msk [vmem:[#allocation3 + $0xa8] sm:$0xff] %vm177_vm1, %v1555_v13  ;;  %v1896_v62 = vadd.f32 %v1864_v14, %v1808_v48  ;;  %7402 = vmatmul.msk.f32.gmra.mxu2 %vm177_vm1, %v2289_v9  ;;  %v2976_v13 = vld [vmem:[#allocation2 + $0xaa] sm:$0xff] }
 0x1d8   : > { %7437 = vmatmul.msk.f32.gmra.mxu3 %vm177_vm1, %v2632_v49  ;;  %v2205_v42 = vld [vmem:[#allocation3 + $0x98] sm:$0xff]  ;;  %v1814_v18 = vpop.f32.mrf.mxu0 }
 0x1d9   : > { %1928 = vst.msk [vmem:[#allocation3 + $0xa0] sm:$0xff] %vm177_vm1, %v1896_v62  ;;  %v2237_v22 = vadd.f32 %v2205_v42, %v8505_v33  ;;  %v2973_v33 = vld [vmem:[#allocation2 + $0x82] sm:$0xff]  ;;  %v2159_v38 = vpop.f32.mrf.mxu1 }
 0x1da   : > { %v1133_v17 = vpop.f32.mrf.mxu2 }
 0x1db   : > { %v1478_v26 = vpop.f32.mrf.mxu3  ;;  %2269 = vst.msk [vmem:[#allocation3 + $0x98] sm:$0xff] %vm177_vm1, %v2237_v22  ;;  %v1215_v10 = vadd.f32 %v1183_v41, %v1133_v17  ;;  %7469 = vmatmul.msk.f32.gmra.mxu0 %vm177_vm1, %v2972_v21  ;;  %v2294_v41 = vld [vmem:[#allocation2 + $0xc0] sm:$0xff] }
 0x1dc   : > { %v1524_v15 = vld [vmem:[#allocation3 + $0xb0] sm:$0xff] }
 0x1dd   : > { %1247 = vst.msk [vmem:[#allocation3 + $0xb8] sm:$0xff] %vm177_vm1, %v1215_v10  ;;  %v1556_v25 = vadd.f32 %v1524_v15, %v1472_v16 }
 0x1de   : > { %v1865_v37 = vld [vmem:[#allocation3 + $0xa8] sm:$0xff] }
 0x1df   : > { %1588 = vst.msk [vmem:[#allocation3 + $0xb0] sm:$0xff] %vm177_vm1, %v1556_v25  ;;  %v1897_v31 = vadd.f32 %v1865_v37, %v1811_v6  ;;  %7403 = vmatmul.msk.f32.gmra.mxu2 %vm177_vm1, %v2290_v54  ;;  %v1186_v6 = vld [vmem:[#allocation3 + $0xd0] sm:$0xff]  ;;  %v2977_v25 = vld [vmem:[#allocation2 + $0xb2] sm:$0xff] }
 0x1e0   : > { %7438 = vmatmul.msk.f32.gmra.mxu3 %vm177_vm1, %v2633_v50  ;;  %v2206_v57 = vld [vmem:[#allocation3 + $0xa0] sm:$0xff]  ;;  %v1817_v30 = vpop.f32.mrf.mxu0 }
 0x1e1   : > { %1929 = vst.msk [vmem:[#allocation3 + $0xa8] sm:$0xff] %vm177_vm1, %v1897_v31  ;;  %v2238_v34 = vadd.f32 %v2206_v57, %v8518_v39  ;;  %v2162_v11 = vpop.f32.mrf.mxu1  ;;  %v1188_v57 = vld [vmem:[#allocation3 + $0xe0] sm:$0xff] }
 0x1e2   : > { %v1136_v24 = vpop.f32.mrf.mxu2 }
 0x1e3   : > { %v1481_v61 = vpop.f32.mrf.mxu3  ;;  %2270 = vst.msk [vmem:[#allocation3 + $0xa0] sm:$0xff] %vm177_vm1, %v2238_v34  ;;  %v1216_v4 = vadd.f32 %v1184_v12, %v1136_v24  ;;  %7470 = vmatmul.msk.f32.gmra.mxu0 %vm177_vm1, %v2973_v33  ;;  %v2295_v12 = vld [vmem:[#allocation2 + $0xc8] sm:$0xff] }
 0x1e4   : > { %v1525_v28 = vld [vmem:[#allocation3 + $0xb8] sm:$0xff] }
 0x1e5   : > { %1248 = vst.msk [vmem:[#allocation3 + $0xc0] sm:$0xff] %vm177_vm1, %v1216_v4  ;;  %v1557_v36 = vadd.f32 %v1525_v28, %v1475_v8 }
 0x1e6   : > { %v1866_v40 = vld [vmem:[#allocation3 + $0xb0] sm:$0xff] }
 0x1e7   : > { %1589 = vst.msk [vmem:[#allocation3 + $0xb8] sm:$0xff] %vm177_vm1, %v1557_v36  ;;  %v1898_v45 = vadd.f32 %v1866_v40, %v1814_v18  ;;  %7404 = vmatmul.msk.f32.gmra.mxu2 %vm177_vm1, %v2291_v29  ;;  %v1187_v18 = vld [vmem:[#allocation3 + $0xd8] sm:$0xff] }
 0x1e8   : > { %7439 = vmatmul.msk.f32.gmra.mxu3 %vm177_vm1, %v2634_v35  ;;  %v2207_v46 = vld [vmem:[#allocation3 + $0xa8] sm:$0xff]  ;;  %v1820_v2 = vpop.f32.mrf.mxu0 }
 0x1e9   : > { %1930 = vst.msk [vmem:[#allocation3 + $0xb0] sm:$0xff] %vm177_vm1, %v1898_v45  ;;  %v2239_v47 = vadd.f32 %v2207_v46, %v8530_v59  ;;  %v2165_v62 = vpop.f32.mrf.mxu1  ;;  %v1189_v46 = vld [vmem:[#allocation3 + $0xe8] sm:$0xff] }
 0x1ea   : > { %v1139_v39 = vpop.f32.mrf.mxu2 }
 0x1eb   : > { %v1484_v48 = vpop.f32.mrf.mxu3  ;;  %2271 = vst.msk [vmem:[#allocation3 + $0xa8] sm:$0xff] %vm177_vm1, %v2239_v47  ;;  %v1217_v43 = vadd.f32 %v1185_v51, %v1139_v39  ;;  %7471 = vmatmul.msk.f32.gmra.mxu0 %vm177_vm1, %v2974_v20  ;;  %v2296_v39 = vld [vmem:[#allocation2 + $0xd8] sm:$0xff]  ;;  %v2639_v51 = vld [vmem:[#allocation2 + $0xe1] sm:$0xff] }
 0x1ec   : > { %v1526_v63 = vld [vmem:[#allocation3 + $0xc0] sm:$0xff] }
 0x1ed   : > { %1249 = vst.msk [vmem:[#allocation3 + $0xc8] sm:$0xff] %vm177_vm1, %v1217_v43  ;;  %v1558_v16 = vadd.f32 %v1526_v63, %v1478_v26  ;;  %v2637_v26 = vld [vmem:[#allocation2 + $0xc9] sm:$0xff] }
 0x1ee   : > { %v1867_v53 = vld [vmem:[#allocation3 + $0xb8] sm:$0xff] }
 0x1ef   : > { %1590 = vst.msk [vmem:[#allocation3 + $0xc0] sm:$0xff] %vm177_vm1, %v1558_v16  ;;  %v1899_v55 = vadd.f32 %v1867_v53, %v1817_v30  ;;  %7405 = vmatmul.msk.f32.gmra.mxu2 %vm177_vm1, %v2292_v52  ;;  %v2979_v53 = vld [vmem:[#allocation2 + $0xca] sm:$0xff] }
 0x1f0   : > { %7440 = vmatmul.msk.f32.gmra.mxu3 %vm177_vm1, %v2635_v44  ;;  %v2208_v56 = vld [vmem:[#allocation3 + $0xb0] sm:$0xff]  ;;  %v1823_v1 = vpop.f32.mrf.mxu0 }
 0x1f1   : > { %1931 = vst.msk [vmem:[#allocation3 + $0xb8] sm:$0xff] %vm177_vm1, %v1899_v55  ;;  %v2240_v5 = vadd.f32 %v2208_v56, %v2156_v23  ;;  %v2168_v34 = vpop.f32.mrf.mxu1  ;;  %v1190_v56 = vld [vmem:[#allocation3 + $0xf0] sm:$0xff] }
 0x1f2   : > { %v1142_v27 = vpop.f32.mrf.mxu2 }
 0x1f3   : > { %v1487_v7 = vpop.f32.mrf.mxu3  ;;  %2272 = vst.msk [vmem:[#allocation3 + $0xb0] sm:$0xff] %vm177_vm1, %v2240_v5  ;;  %v1218_v0 = vadd.f32 %v1186_v6, %v1142_v27  ;;  %7472 = vmatmul.msk.f32.gmra.mxu0 %vm177_vm1, %v2975_v3  ;;  %v2297_v27 = vld [vmem:[#allocation2 + $0xe0] sm:$0xff]  ;;  %v2640_v6 = vld [vmem:[#allocation2 + $0xf1] sm:$0xff] }
 0x1f4   : > { %v1527_v59 = vld [vmem:[#allocation3 + $0xc8] sm:$0xff] }
 0x1f5   : > { %1250 = vst.msk [vmem:[#allocation3 + $0xd0] sm:$0xff] %vm177_vm1, %v1218_v0  ;;  %v1559_v8 = vadd.f32 %v1527_v59, %v1481_v61  ;;  %v2638_v61 = vld [vmem:[#allocation2 + $0xd9] sm:$0xff] }
 0x1f6   : > { %v1868_v32 = vld [vmem:[#allocation3 + $0xc0] sm:$0xff] }
 0x1f7   : > { %1591 = vst.msk [vmem:[#allocation3 + $0xc8] sm:$0xff] %vm177_vm1, %v1559_v8  ;;  %v1900_v60 = vadd.f32 %v1868_v32, %v1820_v2  ;;  %7406 = vmatmul.msk.f32.gmra.mxu2 %vm177_vm1, %v2293_v19  ;;  %v2980_v32 = vld [vmem:[#allocation2 + $0xda] sm:$0xff] }
 0x1f8   : > { %7441 = vmatmul.msk.f32.gmra.mxu3 %vm177_vm1, %v2636_v58  ;;  %v2209_v9 = vld [vmem:[#allocation3 + $0xb8] sm:$0xff]  ;;  %v1826_v49 = vpop.f32.mrf.mxu0 }
 0x1f9   : > { %1932 = vst.msk [vmem:[#allocation3 + $0xc0] sm:$0xff] %vm177_vm1, %v1900_v60  ;;  %v2241_v14 = vadd.f32 %v2209_v9, %v2159_v38  ;;  %v2978_v38 = vld [vmem:[#allocation2 + $0xc2] sm:$0xff]  ;;  %v2171_v43 = vpop.f32.mrf.mxu1 }
 0x1fa   : > { %v1145_v42 = vpop.f32.mrf.mxu2 }
 0x1fb   : > { %v1490_v21 = vpop.f32.mrf.mxu3  ;;  %2273 = vst.msk [vmem:[#allocation3 + $0xb8] sm:$0xff] %vm177_vm1, %v2241_v14  ;;  %v1219_v22 = vadd.f32 %v1187_v18, %v1145_v42  ;;  %7473 = vmatmul.msk.f32.gmra.mxu0 %vm177_vm1, %v2976_v13  ;;  %v2298_v42 = vld [vmem:[#allocation2 + $0xf0] sm:$0xff]  ;;  %v2641_v18 = vld [vmem:[#allocation2 + $0xf9] sm:$0xff] }
 0x1fc   : > { %v1528_v17 = vld [vmem:[#allocation3 + $0xd0] sm:$0xff] }
 0x1fd   : > { %1251 = vst.msk [vmem:[#allocation3 + $0xd8] sm:$0xff] %vm177_vm1, %v1219_v22  ;;  %v1560_v10 = vadd.f32 %v1528_v17, %v1484_v48 }
 0x1fe   : > { %v1869_v23 = vld [vmem:[#allocation3 + $0xc8] sm:$0xff] }
 0x1ff   : > { %1592 = vst.msk [vmem:[#allocation3 + $0xd0] sm:$0xff] %vm177_vm1, %v1560_v10  ;;  %v1901_v15 = vadd.f32 %v1869_v23, %v1823_v1  ;;  %7407 = vmatmul.msk.f32.gmra.mxu2 %vm177_vm1, %v2294_v41  ;;  %v2981_v10 = vld [vmem:[#allocation2 + $0xe2] sm:$0xff] }
 0x200   : > { %7442 = vmatmul.msk.f32.gmra.mxu3 %vm177_vm1, %v2637_v26  ;;  %v2210_v54 = vld [vmem:[#allocation3 + $0xc0] sm:$0xff]  ;;  %v1829_v50 = vpop.f32.mrf.mxu0 }
 0x201   : > { %1933 = vst.msk [vmem:[#allocation3 + $0xc8] sm:$0xff] %vm177_vm1, %v1901_v15  ;;  %v2242_v37 = vadd.f32 %v2210_v54, %v2162_v11  ;;  %v2174_v19 = vpop.f32.mrf.mxu1 }
 0x202   : > { %v1148_v31 = vpop.f32.mrf.mxu2 }
 0x203   : > { %v1493_v30 = vpop.f32.mrf.mxu3  ;;  %2274 = vst.msk [vmem:[#allocation3 + $0xc0] sm:$0xff] %vm177_vm1, %v2242_v37  ;;  %v1220_v33 = vadd.f32 %v1188_v57, %v1148_v31  ;;  %7474 = vmatmul.msk.f32.gmra.mxu0 %vm177_vm1, %v2977_v25  ;;  %v2299_v57 = vld [vmem:[#allocation2 + $0xf8] sm:$0xff] }
 0x204   : > { %v1529_v24 = vld [vmem:[#allocation3 + $0xd8] sm:$0xff] }
 0x205   : > { %1252 = vst.msk [vmem:[#allocation3 + $0xe0] sm:$0xff] %vm177_vm1, %v1220_v33  ;;  %v1561_v4 = vadd.f32 %v1529_v24, %v1487_v7 }
 0x206   : > { %v1870_v28 = vld [vmem:[#allocation3 + $0xd0] sm:$0xff] }
 0x207   : > { %1593 = vst.msk [vmem:[#allocation3 + $0xd8] sm:$0xff] %vm177_vm1, %v1561_v4  ;;  %v1902_v29 = vadd.f32 %v1870_v28, %v1826_v49  ;;  %7408 = vmatmul.msk.f32.gmra.mxu2 %vm177_vm1, %v2295_v12  ;;  %v1191_v49 = vld [vmem:[#allocation3 + $0xf8] sm:$0xff]  ;;  %v2982_v4 = vld [vmem:[#allocation2 + $0xf2] sm:$0xff] }
 0x208   : > { %7443 = vmatmul.msk.f32.gmra.mxu3 %vm177_vm1, %v2638_v61  ;;  %v2211_v35 = vld [vmem:[#allocation3 + $0xc8] sm:$0xff]  ;;  %v1832_v36 = vpop.f32.mrf.mxu0 }
 0x209   : > { %1934 = vst.msk [vmem:[#allocation3 + $0xd0] sm:$0xff] %vm177_vm1, %v1902_v29  ;;  %v2243_v40 = vadd.f32 %v2211_v35, %v2165_v62  ;;  %v2177_v15 = vpop.f32.mrf.mxu1  ;;  %v2529_v35 = vld [vmem:[#allocation3 + $0x8] sm:$0xff] }
 0x20a   : > { %v1151_v45 = vpop.f32.mrf.mxu2 }
 0x20b   : > { %v1496_v2 = vpop.f32.mrf.mxu3  ;;  %2275 = vst.msk [vmem:[#allocation3 + $0xc8] sm:$0xff] %vm177_vm1, %v2243_v40  ;;  %v1221_v20 = vadd.f32 %v1189_v46, %v1151_v45  ;;  %7475 = vmatmul.msk.f32.gmra.mxu0 %vm177_vm1, %v2978_v38  ;;  %v2300_v45 = vld [vmem:[#allocation2 + $0x108] sm:$0xff] }
 0x20c   : > { %v1530_v47 = vld [vmem:[#allocation3 + $0xe0] sm:$0xff] }
 0x20d   : > { %1253 = vst.msk [vmem:[#allocation3 + $0xe8] sm:$0xff] %vm177_vm1, %v1221_v20  ;;  %v1562_v48 = vadd.f32 %v1530_v47, %v1490_v21 }
 0x20e   : > { %v1871_v63 = vld [vmem:[#allocation3 + $0xd8] sm:$0xff] }
 0x20f   : > { %1594 = vst.msk [vmem:[#allocation3 + $0xe0] sm:$0xff] %vm177_vm1, %v1562_v48  ;;  %v1903_v52 = vadd.f32 %v1871_v63, %v1829_v50  ;;  %7409 = vmatmul.msk.f32.gmra.mxu2 %vm177_vm1, %v2296_v39  ;;  %v2528_v50 = vld [vmem:[#allocation3] sm:$0xff] }
 0x210   : > { %7444 = vmatmul.msk.f32.gmra.mxu3 %vm177_vm1, %v2639_v51  ;;  %v2212_v44 = vld [vmem:[#allocation3 + $0xd0] sm:$0xff]  ;;  %v1835_v16 = vpop.f32.mrf.mxu0 }
 0x211   : > { %1935 = vst.msk [vmem:[#allocation3 + $0xd8] sm:$0xff] %vm177_vm1, %v1903_v52  ;;  %v2244_v55 = vadd.f32 %v2212_v44, %v2168_v34  ;;  %v2180_v46 = vpop.f32.mrf.mxu1  ;;  %v2530_v44 = vld [vmem:[#allocation3 + $0x10] sm:$0xff] }
 0x212   : > { %v1154_v11 = vpop.f32.mrf.mxu2 }
 0x213   : > { %v1499_v1 = vpop.f32.mrf.mxu3  ;;  %2276 = vst.msk [vmem:[#allocation3 + $0xd0] sm:$0xff] %vm177_vm1, %v2244_v55  ;;  %v1222_v3 = vadd.f32 %v1190_v56, %v1154_v11  ;;  %7476 = vmatmul.msk.f32.gmra.mxu0 %vm177_vm1, %v2979_v53  ;;  %v2301_v11 = vld [vmem:[#allocation2 + $0x110] sm:$0xff]  ;;  %v2644_v56 = vld [vmem:[#allocation2 + $0x121] sm:$0xff] }
 0x214   : > { %v1531_v5 = vld [vmem:[#allocation3 + $0xe8] sm:$0xff] }
 0x215   : > { %1254 = vst.msk [vmem:[#allocation3 + $0xf0] sm:$0xff] %vm177_vm1, %v1222_v3  ;;  %v1563_v7 = vadd.f32 %v1531_v5, %v1493_v30  ;;  %v2642_v30 = vld [vmem:[#allocation2 + $0x109] sm:$0xff] }
 0x216   : > { %v1872_v0 = vld [vmem:[#allocation3 + $0xe0] sm:$0xff] }
 0x217   : > { %1595 = vst.msk [vmem:[#allocation3 + $0xe8] sm:$0xff] %vm177_vm1, %v1563_v7  ;;  %v1904_v59 = vadd.f32 %v1872_v0, %v1832_v36  ;;  %7410 = vmatmul.msk.f32.gmra.mxu2 %vm177_vm1, %v2297_v27  ;;  %v2984_v0 = vld [vmem:[#allocation2 + $0x10a] sm:$0xff] }
 0x218   : > { %7445 = vmatmul.msk.f32.gmra.mxu3 %vm177_vm1, %v2640_v6  ;;  %v2213_v58 = vld [vmem:[#allocation3 + $0xd8] sm:$0xff]  ;;  %v1838_v8 = vpop.f32.mrf.mxu0 }
 0x219   : > { %1936 = vst.msk [vmem:[#allocation3 + $0xe0] sm:$0xff] %vm177_vm1, %v1904_v59  ;;  %v2245_v60 = vadd.f32 %v2213_v58, %v2171_v43  ;;  %v2983_v43 = vld [vmem:[#allocation2 + $0xfa] sm:$0xff]  ;;  %v2183_v5 = vpop.f32.mrf.mxu1  ;;  %v2531_v58 = vld [vmem:[#allocation3 + $0x18] sm:$0xff] }
 0x21a   : > { %v1157_v9 = vpop.f32.mrf.mxu2 }
 0x21b   : > { %v2774_v13 = vpop.f32.mrf.mxu3  ;;  %2277 = vst.msk [vmem:[#allocation3 + $0xd8] sm:$0xff] %vm177_vm1, %v2245_v60  ;;  %v1223_v14 = vadd.f32 %v1191_v49, %v1157_v9  ;;  %7477 = vmatmul.msk.f32.gmra.mxu0 %vm177_vm1, %v2980_v32  ;;  %v2302_v9 = vld [vmem:[#allocation2 + $0x120] sm:$0xff]  ;;  %v2645_v49 = vld [vmem:[#allocation2 + $0x129] sm:$0xff] }
 0x21c   : > { %v1532_v62 = vld [vmem:[#allocation3 + $0xf0] sm:$0xff] }
 0x21d   : > { %1255 = vst.msk [vmem:[#allocation3 + $0xf8] sm:$0xff] %vm177_vm1, %v1223_v14  ;;  %v1564_v21 = vadd.f32 %v1532_v62, %v1496_v2  ;;  %v2643_v2 = vld [vmem:[#allocation2 + $0x111] sm:$0xff] }
 0x21e   : > { %v1873_v22 = vld [vmem:[#allocation3 + $0xe8] sm:$0xff] }
 0x21f   : > { %1596 = vst.msk [vmem:[#allocation3 + $0xf0] sm:$0xff] %vm177_vm1, %v1564_v21  ;;  %v1905_v17 = vadd.f32 %v1873_v22, %v1835_v16  ;;  %7411 = vmatmul.msk.f32.gmra.mxu2 %vm177_vm1, %v2298_v42  ;;  %v2532_v22 = vld [vmem:[#allocation3 + $0x20] sm:$0xff] }
 0x220   : > { %7446 = vmatmul.msk.f32.gmra.mxu3 %vm177_vm1, %v2641_v18  ;;  %v2214_v41 = vld [vmem:[#allocation3 + $0xe0] sm:$0xff]  ;;  %v1841_v26 = vpop.f32.mrf.mxu0 }
 0x221   : > { %1937 = vst.msk [vmem:[#allocation3 + $0xe8] sm:$0xff] %vm177_vm1, %v1905_v17  ;;  %v2246_v23 = vadd.f32 %v2214_v41, %v2174_v19  ;;  %v2985_v18 = vld [vmem:[#allocation2 + $0x112] sm:$0xff] }
 0x222   : > { %v2432_v54 = vpop.f32.mrf.mxu2 }
 0x223   : > { %v2777_v25 = vpop.f32.mrf.mxu3  ;;  %2278 = vst.msk [vmem:[#allocation3 + $0xe0] sm:$0xff] %vm177_vm1, %v2246_v23  ;;  %v2560_v37 = vadd.f32 %v2528_v50, %v2432_v54  ;;  %7478 = vmatmul.msk.f32.gmra.mxu0 %vm177_vm1, %v2981_v10  ;;  %v2303_v10 = vld [vmem:[#allocation2 + $0x128] sm:$0xff]  ;;  %v2646_v23 = vld [vmem:[#allocation2 + $0x139] sm:$0xff] }
 0x224   : > { %v1533_v31 = vld [vmem:[#allocation3 + $0xf8] sm:$0xff] }
 0x225   : > { %2592 = vst.msk [vmem:[#allocation3] sm:$0xff] %vm177_vm1, %v2560_v37  ;;  %v1565_v33 = vadd.f32 %v1533_v31, %v1499_v1  ;;  %v2986_v37 = vld [vmem:[#allocation2 + $0x122] sm:$0xff] }
 0x226   : > { %v1874_v34 = vld [vmem:[#allocation3 + $0xf0] sm:$0xff] }
 0x227   : > { %1597 = vst.msk [vmem:[#allocation3 + $0xf8] sm:$0xff] %vm177_vm1, %v1565_v33  ;;  %v1906_v24 = vadd.f32 %v1874_v34, %v1838_v8  ;;  %7412 = vmatmul.msk.f32.gmra.mxu2 %vm177_vm1, %v2299_v57  ;;  %v2533_v57 = vld [vmem:[#allocation3 + $0x28] sm:$0xff] }
 0x228   : > { %7447 = vmatmul.msk.f32.gmra.mxu3 %vm177_vm1, %v2642_v30  ;;  %v2215_v12 = vld [vmem:[#allocation3 + $0xe8] sm:$0xff]  ;;  %v3116_v61 = vpop.f32.mrf.mxu0 }
 0x229   : > { %1938 = vst.msk [vmem:[#allocation3 + $0xf0] sm:$0xff] %vm177_vm1, %v1906_v24  ;;  %v2247_v28 = vadd.f32 %v2215_v12, %v2177_v15  ;;  %v2304_v24 = vld [vmem:[#allocation2 + $0x138] sm:$0xff]  ;;  %v2647_v12 = vld [vmem:[#allocation2 + $0x141] sm:$0xff] }
 0x22a   : > { %v2435_v29 = vpop.f32.mrf.mxu2 }
 0x22b   : > { %v2780_v36 = vpop.f32.mrf.mxu3  ;;  %2279 = vst.msk [vmem:[#allocation3 + $0xe8] sm:$0xff] %vm177_vm1, %v2247_v28  ;;  %v2561_v38 = vadd.f32 %v2529_v35, %v2435_v29  ;;  %7479 = vmatmul.msk.f32.gmra.mxu0 %vm177_vm1, %v2982_v4  ;;  %v2987_v35 = vld [vmem:[#allocation2 + $0x12a] sm:$0xff] }
 0x22c   : > { %v2870_v40 = vld [vmem:[#allocation3] sm:$0xff] }
 0x22d   : > { %2593 = vst.msk [vmem:[#allocation3 + $0x8] sm:$0xff] %vm177_vm1, %v2561_v38  ;;  %v2902_v20 = vadd.f32 %v2870_v40, %v2774_v13  ;;  %v2534_v38 = vld [vmem:[#allocation3 + $0x30] sm:$0xff] }
 0x22e   : > { %v1875_v47 = vld [vmem:[#allocation3 + $0xf8] sm:$0xff] }
 0x22f   : > { %2934 = vst.msk [vmem:[#allocation3] sm:$0xff] %vm177_vm1, %v2902_v20  ;;  %v1907_v39 = vadd.f32 %v1875_v47, %v1841_v26  ;;  %7413 = vmatmul.msk.f32.gmra.mxu2 %vm177_vm1, %v2300_v45  ;;  %v2648_v20 = vld [vmem:[#allocation2 + $0x151] sm:$0xff] }
 0x230   : > { %7448 = vmatmul.msk.f32.gmra.mxu3 %vm177_vm1, %v2643_v2  ;;  %v2216_v51 = vld [vmem:[#allocation3 + $0xf0] sm:$0xff]  ;;  %v3119_v48 = vpop.f32.mrf.mxu0 }
 0x231   : > { %1939 = vst.msk [vmem:[#allocation3 + $0xf8] sm:$0xff] %vm177_vm1, %v1907_v39  ;;  %v2248_v63 = vadd.f32 %v2216_v51, %v2180_v46  ;;  %v2305_v2 = vld [vmem:[#allocation2 + $0x140] sm:$0xff] }
 0x232   : > { %v2438_v52 = vpop.f32.mrf.mxu2 }
 0x233   : > { %v2783_v16 = vpop.f32.mrf.mxu3  ;;  %2280 = vst.msk [vmem:[#allocation3 + $0xf0] sm:$0xff] %vm177_vm1, %v2248_v63  ;;  %v2562_v53 = vadd.f32 %v2530_v44, %v2438_v52  ;;  %7480 = vmatmul.msk.f32.gmra.mxu0 %vm177_vm1, %v2983_v43  ;;  %v2988_v43 = vld [vmem:[#allocation2 + $0x13a] sm:$0xff]  ;;  %v2650_v63 = vld [vmem:[#allocation2 + $0x169] sm:$0xff] }
 0x234   : > { %v2871_v55 = vld [vmem:[#allocation3 + $0x8] sm:$0xff]  ;;  %v2535_v44 = vld [vmem:[#allocation3 + $0x38] sm:$0xff]  ;;  %219 = vst.msk [vmem:[#allocation2 + $0x199] sm:$0xff] %vm177_vm1, %v2650_v63 }
 0x235   : > { %2594 = vst.msk [vmem:[#allocation3 + $0x10] sm:$0xff] %vm177_vm1, %v2562_v53  ;;  %v2903_v1 = vadd.f32 %v2871_v55, %v2777_v25 }
 0x236   : > { %v3212_v3 = vld [vmem:[#allocation3] sm:$0xff] }
 0x237   : > { %2935 = vst.msk [vmem:[#allocation3 + $0x8] sm:$0xff] %vm177_vm1, %v2903_v1  ;;  %v3244_v27 = vadd.f32 %v3212_v3, %v3116_v61  ;;  %7414 = vmatmul.msk.f32.gmra.mxu2 %vm177_vm1, %v2301_v11  ;;  %v2306_v11 = vld [vmem:[#allocation2 + $0x150] sm:$0xff] }
 0x238   : > { %7449 = vmatmul.msk.f32.gmra.mxu3 %vm177_vm1, %v2644_v56  ;;  %v2217_v6 = vld [vmem:[#allocation3 + $0xf8] sm:$0xff]  ;;  %v3122_v7 = vpop.f32.mrf.mxu0  ;;  %v2649_v56 = vld [vmem:[#allocation2 + $0x159] sm:$0xff] }
 0x239   : > { %3276 = vst.msk [vmem:[#allocation3] sm:$0xff] %vm177_vm1, %v3244_v27  ;;  %v2249_v59 = vadd.f32 %v2217_v6, %v2183_v5  ;;  %v2989_v6 = vld [vmem:[#allocation2 + $0x142] sm:$0xff] }
 0x23a   : > { %v2441_v19 = vpop.f32.mrf.mxu2 }
 0x23b   : > { %v2786_v8 = vpop.f32.mrf.mxu3  ;;  %2281 = vst.msk [vmem:[#allocation3 + $0xf8] sm:$0xff] %vm177_vm1, %v2249_v59  ;;  %v2563_v32 = vadd.f32 %v2531_v58, %v2441_v19  ;;  %7481 = vmatmul.msk.f32.gmra.mxu0 %vm177_vm1, %v2984_v0  ;;  %v2536_v59 = vld [vmem:[#allocation3 + $0x40] sm:$0xff] }
 0x23c   : > { %v2872_v60 = vld [vmem:[#allocation3 + $0x10] sm:$0xff] }
 0x23d   : > { %2595 = vst.msk [vmem:[#allocation3 + $0x18] sm:$0xff] %vm177_vm1, %v2563_v32  ;;  %v2904_v13 = vadd.f32 %v2872_v60, %v2780_v36  ;;  %v2307_v32 = vld [vmem:[#allocation2 + $0x158] sm:$0xff] }
 0x23e   : > { %v3213_v14 = vld [vmem:[#allocation3 + $0x8] sm:$0xff] }
 0x23f   : > { %2936 = vst.msk [vmem:[#allocation3 + $0x10] sm:$0xff] %vm177_vm1, %v2904_v13  ;;  %v3245_v62 = vadd.f32 %v3213_v14, %v3119_v48  ;;  %7415 = vmatmul.msk.f32.gmra.mxu2 %vm177_vm1, %v2302_v9  ;;  %v238_v13 = vld [vmem:[#allocation2 + $0x19a] sm:$0x1] }
 0x240   : > { %7450 = vmatmul.msk.f32.gmra.mxu3 %vm177_vm1, %v2645_v49  ;;  %v3125_v42 = vpop.f32.mrf.mxu0  ;;  %257 = vst.msk [vmem:[#allocation2 + $0x198] sm:$0x1] %vm239_vm2, %v238_v13 }
 0x241   : > { %3277 = vst.msk [vmem:[#allocation3 + $0x8] sm:$0xff] %vm177_vm1, %v3245_v62  ;;  %v2990_v62 = vld [vmem:[#allocation2 + $0x152] sm:$0xff] }
 0x242   : > { %v2444_v21 = vpop.f32.mrf.mxu2 }
 0x243   : > { %v2789_v17 = vpop.f32.mrf.mxu3  ;;  %v2564_v41 = vadd.f32 %v2532_v22, %v2444_v21  ;;  %7482 = vmatmul.msk.f32.gmra.mxu0 %vm177_vm1, %v2985_v18  ;;  %v2537_v18 = vld [vmem:[#allocation3 + $0x48] sm:$0xff] }
 0x244   : > { %v2873_v26 = vld [vmem:[#allocation3 + $0x18] sm:$0xff] }
 0x245   : > { %2596 = vst.msk [vmem:[#allocation3 + $0x20] sm:$0xff] %vm177_vm1, %v2564_v41  ;;  %v2905_v15 = vadd.f32 %v2873_v26, %v2783_v16  ;;  %v2308_v41 = vld [vmem:[#allocation2 + $0x168] sm:$0xff]  ;;  %v7495_v26 = vld [vmem:[%s10486_s1 + $0x24] sm:$0xf] }
 0x246   : > { %v3214_v54 = vld [vmem:[#allocation3 + $0x10] sm:$0xff]  ;;  %7496 = vmatpush.msk.msra.mxu1 %vm423_vm0, %v7495_v26 }
 0x247   : > { %2937 = vst.msk [vmem:[#allocation3 + $0x18] sm:$0xff] %vm177_vm1, %v2905_v15  ;;  %v3246_v50 = vadd.f32 %v3214_v54, %v3122_v7  ;;  %7416 = vmatmul.msk.f32.gmra.mxu2 %vm177_vm1, %v2303_v10  ;;  %v2651_v7 = vld [vmem:[#allocation2 + $0x171] sm:$0xff] }
 0x248   : > { %7451 = vmatmul.msk.f32.gmra.mxu3 %vm177_vm1, %v2646_v23  ;;  %v3128_v25 = vpop.f32.mrf.mxu0  ;;  %220 = vst.msk [vmem:[#allocation2 + $0x1a1] sm:$0xff] %vm177_vm1, %v2651_v7 }
 0x249   : > { %3278 = vst.msk [vmem:[#allocation3 + $0x10] sm:$0xff] %vm177_vm1, %v3246_v50  ;;  %v2991_v50 = vld [vmem:[#allocation2 + $0x15a] sm:$0xff] }
 0x24a   : > { %v2447_v31 = vpop.f32.mrf.mxu2 }
 0x24b   : > { %v2792_v30 = vpop.f32.mrf.mxu3  ;;  %v2565_v33 = vadd.f32 %v2533_v57, %v2447_v31  ;;  %7483 = vmatmul.msk.f32.gmra.mxu0 %vm177_vm1, %v2986_v37  ;;  %v2538_v37 = vld [vmem:[#allocation3 + $0x50] sm:$0xff] }
 0x24c   : > { %v2874_v34 = vld [vmem:[#allocation3 + $0x20] sm:$0xff] }
 0x24d   : > { %2597 = vst.msk [vmem:[#allocation3 + $0x28] sm:$0xff] %vm177_vm1, %v2565_v33  ;;  %v2906_v61 = vadd.f32 %v2874_v34, %v2786_v8  ;;  %v2309_v33 = vld [vmem:[#allocation2 + $0x170] sm:$0xff]  ;;  %v2652_v34 = vld [vmem:[#allocation2 + $0x181] sm:$0xff] }
 0x24e   : > { %v3215_v4 = vld [vmem:[#allocation3 + $0x18] sm:$0xff] }
 0x24f   : > { %2938 = vst.msk [vmem:[#allocation3 + $0x20] sm:$0xff] %vm177_vm1, %v2906_v61  ;;  %v3247_v28 = vadd.f32 %v3215_v4, %v3125_v42  ;;  %7417 = vmatmul.msk.f32.gmra.mxu2 %vm177_vm1, %v2304_v24 }
 0x250   : > { %7452 = vmatmul.msk.f32.gmra.mxu3 %vm177_vm1, %v2647_v12  ;;  %v3131_v29 = vpop.f32.mrf.mxu0 }
 0x251   : > { %3279 = vst.msk [vmem:[#allocation3 + $0x18] sm:$0xff] %vm177_vm1, %v3247_v28  ;;  %v2992_v28 = vld [vmem:[#allocation2 + $0x16a] sm:$0xff] }
 0x252   : > { %v2450_v36 = vpop.f32.mrf.mxu2 }
 0x253   : > { %v2795_v40 = vpop.f32.mrf.mxu3  ;;  %v2566_v45 = vadd.f32 %v2534_v38, %v2450_v36  ;;  %7484 = vmatmul.msk.f32.gmra.mxu0 %vm177_vm1, %v2987_v35  ;;  %v2539_v35 = vld [vmem:[#allocation3 + $0x58] sm:$0xff] }
 0x254   : > { %v2875_v46 = vld [vmem:[#allocation3 + $0x28] sm:$0xff] }
 0x255   : > { %2598 = vst.msk [vmem:[#allocation3 + $0x30] sm:$0xff] %vm177_vm1, %v2566_v45  ;;  %v2907_v47 = vadd.f32 %v2875_v46, %v2789_v17  ;;  %v2310_v45 = vld [vmem:[#allocation2 + $0x180] sm:$0xff]  ;;  %v2653_v46 = vld [vmem:[#allocation2 + $0x189] sm:$0xff] }
 0x256   : > { %v3216_v39 = vld [vmem:[#allocation3 + $0x20] sm:$0xff] }
 0x257   : > { %2939 = vst.msk [vmem:[#allocation3 + $0x28] sm:$0xff] %vm177_vm1, %v2907_v47  ;;  %v3248_v51 = vadd.f32 %v3216_v39, %v3128_v25  ;;  %7418 = vmatmul.msk.f32.gmra.mxu2 %vm177_vm1, %v2305_v2 }
 0x258   : > { %7453 = vmatmul.msk.f32.gmra.mxu3 %vm177_vm1, %v2648_v20  ;;  %v3134_v48 = vpop.f32.mrf.mxu0 }
 0x259   : > { %3280 = vst.msk [vmem:[#allocation3 + $0x20] sm:$0xff] %vm177_vm1, %v3248_v51  ;;  %v2993_v51 = vld [vmem:[#allocation2 + $0x172] sm:$0xff] }
 0x25a   : > { %v2453_v52 = vpop.f32.mrf.mxu2 }
 0x25b   : > { %v2798_v16 = vpop.f32.mrf.mxu3  ;;  %v2567_v53 = vadd.f32 %v2535_v44, %v2453_v52  ;;  %7485 = vmatmul.msk.f32.gmra.mxu0 %vm177_vm1, %v2988_v43  ;;  %v2540_v43 = vld [vmem:[#allocation3 + $0x60] sm:$0xff] }
 0x25c   : > { %v2876_v55 = vld [vmem:[#allocation3 + $0x30] sm:$0xff] }
 0x25d   : > { %2599 = vst.msk [vmem:[#allocation3 + $0x38] sm:$0xff] %vm177_vm1, %v2567_v53  ;;  %v2908_v1 = vadd.f32 %v2876_v55, %v2792_v30  ;;  %v2654_v53 = vld [vmem:[#allocation2 + $0x199] sm:$0xff] }
 0x25e   : > { %v3217_v3 = vld [vmem:[#allocation3 + $0x28] sm:$0xff] }
 0x25f   : > { %2940 = vst.msk [vmem:[#allocation3 + $0x30] sm:$0xff] %vm177_vm1, %v2908_v1  ;;  %v3249_v5 = vadd.f32 %v3217_v3, %v3131_v29  ;;  %7419 = vmatmul.msk.f32.gmra.mxu2 %vm177_vm1, %v2306_v11  ;;  %v2994_v3 = vld [vmem:[#allocation2 + $0x182] sm:$0xff] }
 0x260   : > { %7454 = vmatmul.msk.f32.gmra.mxu3 %vm177_vm1, %v2649_v56  ;;  %v3137_v27 = vpop.f32.mrf.mxu0 }
 0x261   : > { %3281 = vst.msk [vmem:[#allocation3 + $0x28] sm:$0xff] %vm177_vm1, %v3249_v5  ;;  %v275_v5 = vld [vmem:[#allocation2 + $0x1a7] sm:$0x1] }
 0x262   : > { %v2456_v0 = vpop.f32.mrf.mxu2  ;;  %293 = vst.msk [vmem:[#allocation2 + $0x1a9] sm:$0x1] %vm239_vm2, %v275_v5 }
 0x263   : > { %v2801_v19 = vpop.f32.mrf.mxu3  ;;  %v2568_v58 = vadd.f32 %v2536_v59, %v2456_v0  ;;  %7486 = vmatmul.msk.f32.gmra.mxu0 %vm177_vm1, %v2989_v6  ;;  %v2541_v6 = vld [vmem:[#allocation3 + $0x68] sm:$0xff] }
 0x264   : > { %v2877_v8 = vld [vmem:[#allocation3 + $0x38] sm:$0xff] }
 0x265   : > { %2600 = vst.msk [vmem:[#allocation3 + $0x40] sm:$0xff] %vm177_vm1, %v2568_v58  ;;  %v2909_v60 = vadd.f32 %v2877_v8, %v2795_v40  ;;  %v2655_v58 = vld [vmem:[#allocation2 + $0x1a1] sm:$0xff] }
 0x266   : > { %v3218_v9 = vld [vmem:[#allocation3 + $0x30] sm:$0xff] }
 0x267   : > { %2941 = vst.msk [vmem:[#allocation3 + $0x38] sm:$0xff] %vm177_vm1, %v2909_v60  ;;  %v3250_v49 = vadd.f32 %v3218_v9, %v3134_v48  ;;  %7420 = vmatmul.msk.f32.gmra.mxu2 %vm177_vm1, %v2307_v32 }
 0x268   : > { %7455 = vmatmul.msk.f32.gmra.mxu3 %vm177_vm1, %v2650_v63  ;;  %v3140_v14 = vpop.f32.mrf.mxu0 }
 0x269   : > { %3282 = vst.msk [vmem:[#allocation3 + $0x30] sm:$0xff] %vm177_vm1, %v3250_v49  ;;  %v2995_v49 = vld [vmem:[#allocation2 + $0x18a] sm:$0xff] }
 0x26a   : > { %v2459_v42 = vpop.f32.mrf.mxu2 }
 0x26b   : > { %v2804_v21 = vpop.f32.mrf.mxu3  ;;  %v2569_v22 = vadd.f32 %v2537_v18, %v2459_v42  ;;  %7487 = vmatmul.msk.f32.gmra.mxu0 %vm177_vm1, %v2990_v62 }
 0x26c   : > { %v2878_v17 = vld [vmem:[#allocation3 + $0x40] sm:$0xff] }
 0x26d   : > { %2601 = vst.msk [vmem:[#allocation3 + $0x48] sm:$0xff] %vm177_vm1, %v2569_v22  ;;  %v2910_v10 = vadd.f32 %v2878_v17, %v2798_v16  ;;  %v2311_v16 = vld [vmem:[#allocation2 + $0x188] sm:$0xff] }
 0x26e   : > { %v3219_v23 = vld [vmem:[#allocation3 + $0x38] sm:$0xff] }
 0x26f   : > { %2942 = vst.msk [vmem:[#allocation3 + $0x40] sm:$0xff] %vm177_vm1, %v2910_v10  ;;  %v3251_v15 = vadd.f32 %v3219_v23, %v3137_v27  ;;  %7421 = vmatmul.msk.f32.gmra.mxu2 %vm177_vm1, %v2308_v41  ;;  %v2996_v10 = vld [vmem:[#allocation2 + $0x19a] sm:$0xff] }
 0x270   : > { %7456 = vmatmul.msk.f32.gmra.mxu3 %vm177_vm1, %v2651_v7  ;;  %v3143_v54 = vpop.f32.mrf.mxu0 }
 0x271   : > { %3283 = vst.msk [vmem:[#allocation3 + $0x38] sm:$0xff] %vm177_vm1, %v3251_v15  ;;  %v2543_v15 = vld [vmem:[#allocation3 + $0x78] sm:$0xff] }
 0x272   : > { %v2462_v25 = vpop.f32.mrf.mxu2 }
 0x273   : > { %v2807_v31 = vpop.f32.mrf.mxu3  ;;  %v2570_v57 = vadd.f32 %v2538_v37, %v2462_v25  ;;  %7488 = vmatmul.msk.f32.gmra.mxu0 %vm177_vm1, %v2991_v50 }
 0x274   : > { %v2879_v30 = vld [vmem:[#allocation3 + $0x48] sm:$0xff] }
 0x275   : > { %2602 = vst.msk [vmem:[#allocation3 + $0x50] sm:$0xff] %vm177_vm1, %v2570_v57  ;;  %v2911_v24 = vadd.f32 %v2879_v30, %v2801_v19  ;;  %v2312_v19 = vld [vmem:[#allocation2 + $0x198] sm:$0xff] }
 0x276   : > { %v3220_v12 = vld [vmem:[#allocation3 + $0x40] sm:$0xff] }
 0x277   : > { %2943 = vst.msk [vmem:[#allocation3 + $0x48] sm:$0xff] %vm177_vm1, %v2911_v24  ;;  %v3252_v61 = vadd.f32 %v3220_v12, %v3140_v14  ;;  %7422 = vmatmul.msk.f32.gmra.mxu2 %vm177_vm1, %v2309_v33  ;;  %v2542_v14 = vld [vmem:[#allocation3 + $0x70] sm:$0xff]  ;;  %v2544_v24 = vld [vmem:[#allocation3 + $0x80] sm:$0xff] }
 0x278   : > { %7457 = vmatmul.msk.f32.gmra.mxu3 %vm177_vm1, %v2652_v34  ;;  %v3146_v4 = vpop.f32.mrf.mxu0  ;;  %v2997_v33 = vld [vmem:[#allocation2 + $0x1a2] sm:$0xff] }
 0x279   : > { %3284 = vst.msk [vmem:[#allocation3 + $0x40] sm:$0xff] %vm177_vm1, %v3252_v61 }
 0x27a   : > { %v2465_v29 = vpop.f32.mrf.mxu2 }
 0x27b   : > { %v2810_v36 = vpop.f32.mrf.mxu3  ;;  %v2571_v38 = vadd.f32 %v2539_v35, %v2465_v29  ;;  %7489 = vmatmul.msk.f32.gmra.mxu0 %vm177_vm1, %v2992_v28 }
 0x27c   : > { %v2880_v40 = vld [vmem:[#allocation3 + $0x50] sm:$0xff] }
 0x27d   : > { %2603 = vst.msk [vmem:[#allocation3 + $0x58] sm:$0xff] %vm177_vm1, %v2571_v38  ;;  %v2912_v2 = vadd.f32 %v2880_v40, %v2804_v21  ;;  %v2313_v21 = vld [vmem:[#allocation2 + $0x1a0] sm:$0xff]  ;;  %v2545_v40 = vld [vmem:[#allocation3 + $0x88] sm:$0xff] }
 0x27e   : > { %v3221_v20 = vld [vmem:[#allocation3 + $0x48] sm:$0xff] }
 0x27f   : > { %2944 = vst.msk [vmem:[#allocation3 + $0x50] sm:$0xff] %vm177_vm1, %v2912_v2  ;;  %v3253_v47 = vadd.f32 %v3221_v20, %v3143_v54  ;;  %7423 = vmatmul.msk.f32.gmra.mxu2 %vm177_vm1, %v2310_v45 }
 0x280   : > { %7458 = vmatmul.msk.f32.gmra.mxu3 %vm177_vm1, %v2653_v46  ;;  %v3149_v39 = vpop.f32.mrf.mxu0 }
 0x281   : > { %3285 = vst.msk [vmem:[#allocation3 + $0x48] sm:$0xff] %vm177_vm1, %v3253_v47 }
 0x282   : > { %v2468_v48 = vpop.f32.mrf.mxu2 }
 0x283   : > { %v2813_v63 = vpop.f32.mrf.mxu3  ;;  %v2572_v52 = vadd.f32 %v2540_v43, %v2468_v48  ;;  %7490 = vmatmul.msk.f32.gmra.mxu0 %vm177_vm1, %v2993_v51  ;;  %v2546_v43 = vld [vmem:[#allocation3 + $0x90] sm:$0xff] }
 0x284   : > { %v2881_v44 = vld [vmem:[#allocation3 + $0x58] sm:$0xff] }
 0x285   : > { %2604 = vst.msk [vmem:[#allocation3 + $0x60] sm:$0xff] %vm177_vm1, %v2572_v52  ;;  %v2913_v55 = vadd.f32 %v2881_v44, %v2807_v31 }
 0x286   : > { %v3222_v11 = vld [vmem:[#allocation3 + $0x50] sm:$0xff] }
 0x287   : > { %2945 = vst.msk [vmem:[#allocation3 + $0x58] sm:$0xff] %vm177_vm1, %v2913_v55  ;;  %v3254_v56 = vadd.f32 %v3222_v11, %v3146_v4  ;;  %7424 = vmatmul.msk.f32.gmra.mxu2 %vm177_vm1, %v2311_v16 }
 0x288   : > { %7459 = vmatmul.msk.f32.gmra.mxu3 %vm177_vm1, %v2654_v53  ;;  %v3152_v1 = vpop.f32.mrf.mxu0 }
 0x289   : > { %3286 = vst.msk [vmem:[#allocation3 + $0x50] sm:$0xff] %vm177_vm1, %v3254_v56 }
 0x28a   : > { %v2471_v27 = vpop.f32.mrf.mxu2 }
 0x28b   : > { %v2816_v7 = vpop.f32.mrf.mxu3  ;;  %v2573_v0 = vadd.f32 %v2541_v6, %v2471_v27  ;;  %7491 = vmatmul.msk.f32.gmra.mxu0 %vm177_vm1, %v2994_v3 }
 0x28c   : > { %v2882_v59 = vld [vmem:[#allocation3 + $0x60] sm:$0xff] }
 0x28d   : > { %2605 = vst.msk [vmem:[#allocation3 + $0x68] sm:$0xff] %vm177_vm1, %v2573_v0  ;;  %v2914_v8 = vadd.f32 %v2882_v59, %v2810_v36 }
 0x28e   : > { %v3223_v32 = vld [vmem:[#allocation3 + $0x58] sm:$0xff] }
 0x28f   : > { %2946 = vst.msk [vmem:[#allocation3 + $0x60] sm:$0xff] %vm177_vm1, %v2914_v8  ;;  %v3255_v60 = vadd.f32 %v3223_v32, %v3149_v39  ;;  %7425 = vmatmul.msk.f32.gmra.mxu2 %vm177_vm1, %v2312_v19 }
 0x290   : > { %7460 = vmatmul.msk.f32.gmra.mxu3 %vm177_vm1, %v2655_v58  ;;  %v3155_v9 = vpop.f32.mrf.mxu0  ;;  %v2548_v58 = vld [vmem:[#allocation3 + $0xa0] sm:$0xff] }
 0x291   : > { %3287 = vst.msk [vmem:[#allocation3 + $0x58] sm:$0xff] %vm177_vm1, %v3255_v60 }
 0x292   : > { %v2474_v13 = vpop.f32.mrf.mxu2 }
 0x293   : > { %v2819_v62 = vpop.f32.mrf.mxu3  ;;  %v2574_v42 = vadd.f32 %v2542_v14, %v2474_v13  ;;  %7492 = vmatmul.msk.f32.gmra.mxu0 %vm177_vm1, %v2995_v49 }
 0x294   : > { %v2883_v18 = vld [vmem:[#allocation3 + $0x68] sm:$0xff] }
 0x295   : > { %2606 = vst.msk [vmem:[#allocation3 + $0x70] sm:$0xff] %vm177_vm1, %v2574_v42  ;;  %v2915_v22 = vadd.f32 %v2883_v18, %v2813_v63  ;;  %v2549_v42 = vld [vmem:[#allocation3 + $0xa8] sm:$0xff] }
 0x296   : > { %v3224_v17 = vld [vmem:[#allocation3 + $0x60] sm:$0xff] }
 0x297   : > { %2947 = vst.msk [vmem:[#allocation3 + $0x68] sm:$0xff] %vm177_vm1, %v2915_v22  ;;  %v3256_v41 = vadd.f32 %v3224_v17, %v3152_v1  ;;  %7426 = vmatmul.msk.f32.gmra.mxu2 %vm177_vm1, %v2313_v21  ;;  %v2547_v1 = vld [vmem:[#allocation3 + $0x98] sm:$0xff] }
 0x298   : > { %v3158_v26 = vpop.f32.mrf.mxu0 }
 0x299   : > { %3288 = vst.msk [vmem:[#allocation3 + $0x60] sm:$0xff] %vm177_vm1, %v3256_v41 }
 0x29a   : > { %v2477_v23 = vpop.f32.mrf.mxu2 }
 0x29b   : > { %v2822_v54 = vpop.f32.mrf.mxu3  ;;  %v2575_v50 = vadd.f32 %v2543_v15, %v2477_v23  ;;  %7493 = vmatmul.msk.f32.gmra.mxu0 %vm177_vm1, %v2996_v10  ;;  %v2550_v15 = vld [vmem:[#allocation3 + $0xb0] sm:$0xff] }
 0x29c   : > { %v2884_v25 = vld [vmem:[#allocation3 + $0x70] sm:$0xff] }
 0x29d   : > { %2607 = vst.msk [vmem:[#allocation3 + $0x78] sm:$0xff] %vm177_vm1, %v2575_v50  ;;  %v2916_v37 = vadd.f32 %v2884_v25, %v2816_v7 }
 0x29e   : > { %v3225_v31 = vld [vmem:[#allocation3 + $0x68] sm:$0xff] }
 0x29f   : > { %2948 = vst.msk [vmem:[#allocation3 + $0x70] sm:$0xff] %vm177_vm1, %v2916_v37  ;;  %v3257_v57 = vadd.f32 %v3225_v31, %v3155_v9 }
 0x2a0   : > { %v3161_v30 = vpop.f32.mrf.mxu0 }
 0x2a1   : > { %3289 = vst.msk [vmem:[#allocation3 + $0x68] sm:$0xff] %vm177_vm1, %v3257_v57 }
 0x2a2   : > { %v2480_v34 = vpop.f32.mrf.mxu2 }
 0x2a3   : > { %v2825_v12 = vpop.f32.mrf.mxu3  ;;  %v2576_v61 = vadd.f32 %v2544_v24, %v2480_v34  ;;  %7494 = vmatmul.msk.f32.gmra.mxu0 %vm177_vm1, %v2997_v33  ;;  %v2551_v34 = vld [vmem:[#allocation3 + $0xb8] sm:$0xff] }
 0x2a4   : > { %v2885_v4 = vld [vmem:[#allocation3 + $0x78] sm:$0xff] }
 0x2a5   : > { %2608 = vst.msk [vmem:[#allocation3 + $0x80] sm:$0xff] %vm177_vm1, %v2576_v61  ;;  %v2917_v28 = vadd.f32 %v2885_v4, %v2819_v62 }
 0x2a6   : > { %v3226_v29 = vld [vmem:[#allocation3 + $0x70] sm:$0xff] }
 0x2a7   : > { %2949 = vst.msk [vmem:[#allocation3 + $0x78] sm:$0xff] %vm177_vm1, %v2917_v28  ;;  %v3258_v35 = vadd.f32 %v3226_v29, %v3158_v26 }
 0x2a8   : > { %v3164_v36 = vpop.f32.mrf.mxu0 }
 0x2a9   : > { %3290 = vst.msk [vmem:[#allocation3 + $0x70] sm:$0xff] %vm177_vm1, %v3258_v35 }
 0x2aa   : > { %v2483_v38 = vpop.f32.mrf.mxu2 }
 0x2ab   : > { %v2828_v45 = vpop.f32.mrf.mxu3  ;;  %v2577_v46 = vadd.f32 %v2545_v40, %v2483_v38  ;;  %v2552_v38 = vld [vmem:[#allocation3 + $0xc0] sm:$0xff] }
 0x2ac   : > { %v2886_v2 = vld [vmem:[#allocation3 + $0x80] sm:$0xff] }
 0x2ad   : > { %2609 = vst.msk [vmem:[#allocation3 + $0x88] sm:$0xff] %vm177_vm1, %v2577_v46  ;;  %v2918_v20 = vadd.f32 %v2886_v2, %v2822_v54 }
 0x2ae   : > { %v3227_v47 = vld [vmem:[#allocation3 + $0x78] sm:$0xff] }
 0x2af   : > { %2950 = vst.msk [vmem:[#allocation3 + $0x80] sm:$0xff] %vm177_vm1, %v2918_v20  ;;  %v3259_v39 = vadd.f32 %v3227_v47, %v3161_v30 }
 0x2b0   : > { %v3167_v51 = vpop.f32.mrf.mxu0 }
 0x2b1   : > { %3291 = vst.msk [vmem:[#allocation3 + $0x78] sm:$0xff] %vm177_vm1, %v3259_v39 }
 0x2b2   : > { %v2486_v48 = vpop.f32.mrf.mxu2 }
 0x2b3   : > { %v2831_v63 = vpop.f32.mrf.mxu3  ;;  %v2578_v52 = vadd.f32 %v2546_v43, %v2486_v48  ;;  %v2553_v48 = vld [vmem:[#allocation3 + $0xc8] sm:$0xff] }
 0x2b4   : > { %v2887_v44 = vld [vmem:[#allocation3 + $0x88] sm:$0xff] }
 0x2b5   : > { %2610 = vst.msk [vmem:[#allocation3 + $0x90] sm:$0xff] %vm177_vm1, %v2578_v52  ;;  %v2919_v16 = vadd.f32 %v2887_v44, %v2825_v12 }
 0x2b6   : > { %v3228_v53 = vld [vmem:[#allocation3 + $0x80] sm:$0xff] }
 0x2b7   : > { %2951 = vst.msk [vmem:[#allocation3 + $0x88] sm:$0xff] %vm177_vm1, %v2919_v16  ;;  %v3260_v55 = vadd.f32 %v3228_v53, %v3164_v36 }
 0x2b8   : > { %v3170_v11 = vpop.f32.mrf.mxu0 }
 0x2b9   : > { %3292 = vst.msk [vmem:[#allocation3 + $0x80] sm:$0xff] %vm177_vm1, %v3260_v55 }
 0x2ba   : > { %v2489_v56 = vpop.f32.mrf.mxu2 }
 0x2bb   : > { %v2834_v3 = vpop.f32.mrf.mxu3  ;;  %v2579_v5 = vadd.f32 %v2547_v1, %v2489_v56  ;;  %v2554_v56 = vld [vmem:[#allocation3 + $0xd0] sm:$0xff] }
 0x2bc   : > { %v2888_v27 = vld [vmem:[#allocation3 + $0x90] sm:$0xff] }
 0x2bd   : > { %2611 = vst.msk [vmem:[#allocation3 + $0x98] sm:$0xff] %vm177_vm1, %v2579_v5  ;;  %v2920_v6 = vadd.f32 %v2888_v27, %v2828_v45  ;;  %v8742_v27 = vld [vmem:[#allocation3 + $0x8] sm:$0xff] }
 0x2be   : > { %v3229_v7 = vld [vmem:[#allocation3 + $0x88] sm:$0xff] }
 0x2bf   : > { %2952 = vst.msk [vmem:[#allocation3 + $0x90] sm:$0xff] %vm177_vm1, %v2920_v6  ;;  %v3261_v0 = vadd.f32 %v3229_v7, %v3167_v51  ;;  %v8744_v7 = vld [vmem:[#allocation3] sm:$0xff] }
 0x2c0   : > { %v3173_v59 = vpop.f32.mrf.mxu0 }
 0x2c1   : > { %3293 = vst.msk [vmem:[#allocation3 + $0x88] sm:$0xff] %vm177_vm1, %v3261_v0 }
 0x2c2   : > { %v2492_v19 = vpop.f32.mrf.mxu2 }
 0x2c3   : > { %v2837_v8 = vpop.f32.mrf.mxu3  ;;  %v2580_v32 = vadd.f32 %v2548_v58, %v2492_v19  ;;  %v3410_v19 = vmul.f32 %v8742_v27, %v8742_v27 }
 0x2c4   : > { %v2889_v60 = vld [vmem:[#allocation3 + $0x98] sm:$0xff] }
 0x2c5   : > { %2612 = vst.msk [vmem:[#allocation3 + $0xa0] sm:$0xff] %vm177_vm1, %v2580_v32  ;;  %v2921_v9 = vadd.f32 %v2889_v60, %v2831_v63  ;;  %v8754_v32 = vld [vmem:[#allocation3 + $0x18] sm:$0xff] }
 0x2c6   : > { %v3230_v49 = vld [vmem:[#allocation3 + $0x90] sm:$0xff] }
 0x2c7   : > { %2953 = vst.msk [vmem:[#allocation3 + $0x98] sm:$0xff] %vm177_vm1, %v2921_v9  ;;  %v3262_v13 = vadd.f32 %v3230_v49, %v3170_v11  ;;  %v2555_v9 = vld [vmem:[#allocation3 + $0xd8] sm:$0xff] }
 0x2c8   : > { %v3176_v14 = vpop.f32.mrf.mxu0 }
 0x2c9   : > { %3294 = vst.msk [vmem:[#allocation3 + $0x90] sm:$0xff] %vm177_vm1, %v3262_v13  ;;  %v3341_v13 = vsel %vm177_vm1, %v8742_v27, 0.0 }
 0x2ca   : > { %v2495_v62 = vpop.f32.mrf.mxu2 }
 0x2cb   : > { %v2840_v18 = vpop.f32.mrf.mxu3  ;;  %v2581_v21 = vadd.f32 %v2549_v42, %v2495_v62  ;;  %v3340_v42 = vsel %vm177_vm1, %v8744_v7, 0.0 }
 0x2cc   : > { %v2890_v22 = vld [vmem:[#allocation3 + $0xa0] sm:$0xff] }
 0x2cd   : > { %2613 = vst.msk [vmem:[#allocation3 + $0xa8] sm:$0xff] %vm177_vm1, %v2581_v21  ;;  %v2922_v17 = vadd.f32 %v2890_v22, %v2834_v3  ;;  %v3442_v22 = vsel %vm177_vm1, %v3410_v19, 0.0 }
 0x2ce   : > { %v3231_v41 = vld [vmem:[#allocation3 + $0x98] sm:$0xff] }
 0x2cf   : > { %2954 = vst.msk [vmem:[#allocation3 + $0xa0] sm:$0xff] %vm177_vm1, %v2922_v17  ;;  %v3263_v26 = vadd.f32 %v3231_v41, %v3173_v59  ;;  %v8747_v59 = vld [vmem:[#allocation3 + $0x10] sm:$0xff]  ;;  %v3412_v41 = vmul.f32 %v8754_v32, %v8754_v32 }
 0x2d0   : > { %v3179_v10 = vpop.f32.mrf.mxu0  ;;  %v3343_v17 = vsel %vm177_vm1, %v8747_v59, 0.0 }
 0x2d1   : > { %3295 = vst.msk [vmem:[#allocation3 + $0x98] sm:$0xff] %vm177_vm1, %v3263_v26 }
 0x2d2   : > { %v2498_v23 = vpop.f32.mrf.mxu2 }
 0x2d3   : > { %v2843_v54 = vpop.f32.mrf.mxu3  ;;  %v2582_v50 = vadd.f32 %v2550_v15, %v2498_v23  ;;  %v3342_v23 = vadd.f32 %v3341_v13, %v3340_v42  ;;  %v8771_v15 = vld [vmem:[#allocation3 + $0x28] sm:$0xff]  ;;  %v8818_v13 = vld [vmem:[#allocation3 + $0x58] sm:$0xff] }
 0x2d4   : > { %v2891_v25 = vld [vmem:[#allocation3 + $0xa8] sm:$0xff] }
 0x2d5   : > { %2614 = vst.msk [vmem:[#allocation3 + $0xb0] sm:$0xff] %vm177_vm1, %v2582_v50  ;;  %v2923_v37 = vadd.f32 %v2891_v25, %v2837_v8  ;;  %v3409_v8 = vmul.f32 %v8744_v7, %v8744_v7  ;;  %v3345_v25 = vsel %vm177_vm1, %v8754_v32, 0.0 }
 0x2d6   : > { %v3232_v31 = vld [vmem:[#allocation3 + $0xa0] sm:$0xff] }
 0x2d7   : > { %2955 = vst.msk [vmem:[#allocation3 + $0xa8] sm:$0xff] %vm177_vm1, %v2923_v37  ;;  %v3264_v57 = vadd.f32 %v3232_v31, %v3176_v14  ;;  %v3411_v14 = vmul.f32 %v8747_v59, %v8747_v59 }
 0x2d8   : > { %v3182_v30 = vpop.f32.mrf.mxu0 }
 0x2d9   : > { %3296 = vst.msk [vmem:[#allocation3 + $0xa0] sm:$0xff] %vm177_vm1, %v3264_v57  ;;  %v3444_v50 = vsel %vm177_vm1, %v3411_v14, 0.0 }
 0x2da   : > { %v2501_v33 = vpop.f32.mrf.mxu2 }
 0x2db   : > { %v2583_v24 = vadd.f32 %v2551_v34, %v2501_v33  ;;  %v2846_v12 = vpop.f32.mrf.mxu3  ;;  %v8779_v33 = vld [vmem:[#allocation3 + $0x30] sm:$0xff]  ;;  %v3446_v34 = vsel %vm177_vm1, %v3412_v41, 0.0 }
 0x2dc   : > { %v2892_v61 = vld [vmem:[#allocation3 + $0xb0] sm:$0xff] }
 0x2dd   : > { %2615 = vst.msk [vmem:[#allocation3 + $0xb8] sm:$0xff] %vm177_vm1, %v2583_v24  ;;  %v2924_v4 = vadd.f32 %v2892_v61, %v2840_v18  ;;  %v8762_v18 = vld [vmem:[#allocation3 + $0x20] sm:$0xff] }
 0x2de   : > { %v3233_v28 = vld [vmem:[#allocation3 + $0xa8] sm:$0xff]  ;;  %v3413_v37 = vmul.f32 %v8762_v18, %v8762_v18  ;;  %v3347_v24 = vsel %vm177_vm1, %v8762_v18, 0.0 }
 0x2df   : > { %2956 = vst.msk [vmem:[#allocation3 + $0xb0] sm:$0xff] %vm177_vm1, %v2924_v4  ;;  %v3265_v29 = vadd.f32 %v3233_v28, %v3179_v10  ;;  %v3441_v10 = vsel %vm177_vm1, %v3409_v8, 0.0  ;;  %v8787_v28 = vld [vmem:[#allocation3 + $0x38] sm:$0xff] }
 0x2e0   : > { %v3185_v35 = vpop.f32.mrf.mxu0  ;;  %v3443_v57 = vadd.f32 %v3442_v22, %v3441_v10 }
 0x2e1   : > { %3297 = vst.msk [vmem:[#allocation3 + $0xa8] sm:$0xff] %vm177_vm1, %v3265_v29 }
 0x2e2   : > { %v2504_v36 = vpop.f32.mrf.mxu2  ;;  %v3445_v61 = vadd.f32 %v3444_v50, %v3443_v57  ;;  %v3420_v50 = vmul.f32 %v8818_v13, %v8818_v13  ;;  %v8833_v57 = vld [vmem:[#allocation3 + $0x68] sm:$0xff] }
 0x2e3   : > { %v2584_v40 = vadd.f32 %v2552_v38, %v2504_v36  ;;  %v2849_v2 = vpop.f32.mrf.mxu3  ;;  %v3448_v36 = vsel %vm177_vm1, %v3413_v37, 0.0  ;;  %v3349_v38 = vsel %vm177_vm1, %v8771_v15, 0.0 }
 0x2e4   : > { %v2893_v45 = vld [vmem:[#allocation3 + $0xb8] sm:$0xff] }
 0x2e5   : > { %2616 = vst.msk [vmem:[#allocation3 + $0xc0] sm:$0xff] %vm177_vm1, %v2584_v40  ;;  %v2925_v46 = vadd.f32 %v2893_v45, %v2843_v54  ;;  %v3415_v40 = vmul.f32 %v8779_v33, %v8779_v33 }
 0x2e6   : > { %v3234_v20 = vld [vmem:[#allocation3 + $0xb0] sm:$0xff] }
 0x2e7   : > { %2957 = vst.msk [vmem:[#allocation3 + $0xb8] sm:$0xff] %vm177_vm1, %v2925_v46  ;;  %v3266_v47 = vadd.f32 %v3234_v20, %v3182_v30  ;;  %v3344_v30 = vadd.f32 %v3343_v17, %v3342_v23  ;;  %v3447_v46 = vadd.f32 %v3446_v34, %v3445_v61  ;;  %v8794_v20 = vld [vmem:[#allocation3 + $0x40] sm:$0xff]  ;;  %v3361_v61 = vsel %vm177_vm1, %v8818_v13, 0.0 }
 0x2e8   : > { %v3188_v39 = vpop.f32.mrf.mxu0 }
 0x2e9   : > { %3298 = vst.msk [vmem:[#allocation3 + $0xb0] sm:$0xff] %vm177_vm1, %v3266_v47  ;;  %v3346_v4 = vadd.f32 %v3345_v25, %v3344_v30 }
 0x2ea   : > { %v2507_v51 = vpop.f32.mrf.mxu2 }
 0x2eb   : > { %v2585_v43 = vadd.f32 %v2553_v48, %v2507_v51  ;;  %v2852_v53 = vpop.f32.mrf.mxu3 }
 0x2ec   : > { %v2894_v63 = vld [vmem:[#allocation3 + $0xc0] sm:$0xff] }
 0x2ed   : > { %2617 = vst.msk [vmem:[#allocation3 + $0xc8] sm:$0xff] %vm177_vm1, %v2585_v43  ;;  %v2926_v52 = vadd.f32 %v2894_v63, %v2846_v12  ;;  %v3414_v12 = vmul.f32 %v8771_v15, %v8771_v15  ;;  %v3351_v43 = vsel %vm177_vm1, %v8779_v33, 0.0  ;;  %v3416_v63 = vmul.f32 %v8787_v28, %v8787_v28 }
 0x2ee   : > { %v3235_v44 = vld [vmem:[#allocation3 + $0xb8] sm:$0xff] }
 0x2ef   : > { %2958 = vst.msk [vmem:[#allocation3 + $0xc0] sm:$0xff] %vm177_vm1, %v2926_v52  ;;  %v3267_v16 = vadd.f32 %v3235_v44, %v3185_v35  ;;  %v2556_v35 = vld [vmem:[#allocation3 + $0xe0] sm:$0xff]  ;;  %v3450_v48 = vsel %vm177_vm1, %v3414_v12, 0.0  ;;  %v3449_v44 = vadd.f32 %v3448_v36, %v3447_v46  ;;  %v3454_v19 = vsel %vm177_vm1, %v3416_v63, 0.0 }
 0x2f0   : > { %v3191_v55 = vpop.f32.mrf.mxu0  ;;  %v3422_v46 = vmul.f32 %v8833_v57, %v8833_v57  ;;  %v3365_v63 = vsel %vm177_vm1, %v8833_v57, 0.0 }
 0x2f1   : > { %3299 = vst.msk [vmem:[#allocation3 + $0xb8] sm:$0xff] %vm177_vm1, %v3267_v16 }
 0x2f2   : > { %v2510_v11 = vpop.f32.mrf.mxu2 }
 0x2f3   : > { %v2586_v1 = vadd.f32 %v2554_v56, %v2510_v11  ;;  %v2855_v58 = vpop.f32.mrf.mxu3  ;;  %v3452_v11 = vsel %vm177_vm1, %v3415_v40, 0.0  ;;  %v3353_v56 = vsel %vm177_vm1, %v8787_v28, 0.0  ;;  %v3462_v40 = vsel %vm177_vm1, %v3420_v50, 0.0 }
 0x2f4   : > { %v2895_v3 = vld [vmem:[#allocation3 + $0xc8] sm:$0xff] }
 0x2f5   : > { %2618 = vst.msk [vmem:[#allocation3 + $0xd0] sm:$0xff] %vm177_vm1, %v2586_v1  ;;  %v2927_v5 = vadd.f32 %v2895_v3, %v2849_v2  ;;  %v3348_v2 = vadd.f32 %v3347_v24, %v3346_v4  ;;  %v3417_v1 = vmul.f32 %v8794_v20, %v8794_v20 }
 0x2f6   : > { %v3236_v6 = vld [vmem:[#allocation3 + $0xc0] sm:$0xff] }
 0x2f7   : > { %2959 = vst.msk [vmem:[#allocation3 + $0xc8] sm:$0xff] %vm177_vm1, %v2927_v5  ;;  %v3268_v0 = vadd.f32 %v3236_v6, %v3188_v39  ;;  %v3350_v16 = vadd.f32 %v3349_v38, %v3348_v2  ;;  %v3451_v5 = vadd.f32 %v3450_v48, %v3449_v44  ;;  %v8841_v38 = vld [vmem:[#allocation3 + $0x70] sm:$0xff] }
 0x2f8   : > { %v3194_v49 = vpop.f32.mrf.mxu0 }
 0x2f9   : > { %3300 = vst.msk [vmem:[#allocation3 + $0xc0] sm:$0xff] %vm177_vm1, %v3268_v0  ;;  %v3352_v6 = vadd.f32 %v3351_v43, %v3350_v16  ;;  %v8810_v0 = vld [vmem:[#allocation3 + $0x50] sm:$0xff] }
 0x2fa   : > { %v2513_v60 = vpop.f32.mrf.mxu2 }
 0x2fb   : > { %v2587_v62 = vadd.f32 %v2555_v9, %v2513_v60  ;;  %v2858_v39 = vpop.f32.mrf.mxu3  ;;  %v3453_v60 = vadd.f32 %v3452_v11, %v3451_v5  ;;  %v3354_v9 = vadd.f32 %v3353_v56, %v3352_v6  ;;  %v8856_v11 = vld [vmem:[#allocation3 + $0x80] sm:$0xff] }
 0x2fc   : > { %v2896_v21 = vld [vmem:[#allocation3 + $0xd0] sm:$0xff] }
 0x2fd   : > { %2619 = vst.msk [vmem:[#allocation3 + $0xd8] sm:$0xff] %vm177_vm1, %v2587_v62  ;;  %v2928_v26 = vadd.f32 %v2896_v21, %v2852_v53  ;;  %v8802_v53 = vld [vmem:[#allocation3 + $0x48] sm:$0xff]  ;;  %v3456_v62 = vsel %vm177_vm1, %v3417_v1, 0.0  ;;  %v3419_v21 = vmul.f32 %v8810_v0, %v8810_v0  ;;  %v3455_v17 = vadd.f32 %v3454_v19, %v3453_v60 }
 0x2fe   : > { %v3237_v54 = vld [vmem:[#allocation3 + $0xc8] sm:$0xff]  ;;  %v3418_v8 = vmul.f32 %v8802_v53, %v8802_v53  ;;  %v3357_v42 = vsel %vm177_vm1, %v8802_v53, 0.0  ;;  %v3466_v1 = vsel %vm177_vm1, %v3422_v46, 0.0 }
 0x2ff   : > { %2960 = vst.msk [vmem:[#allocation3 + $0xd0] sm:$0xff] %vm177_vm1, %v2928_v26  ;;  %v3269_v31 = vadd.f32 %v3237_v54, %v3191_v55  ;;  %v8825_v26 = vld [vmem:[#allocation3 + $0x60] sm:$0xff]  ;;  %v3359_v54 = vsel %vm177_vm1, %v8810_v0, 0.0  ;;  %v3457_v37 = vadd.f32 %v3456_v62, %v3455_v17  ;;  %v3460_v12 = vsel %vm177_vm1, %v3419_v21, 0.0 }
 0x300   : > { %v3197_v51 = vpop.f32.mrf.mxu0  ;;  %v3458_v23 = vsel %vm177_vm1, %v3418_v8, 0.0  ;;  %v3421_v4 = vmul.f32 %v8825_v26, %v8825_v26  ;;  %v8864_v8 = vld [vmem:[#allocation3 + $0x88] sm:$0xff] }
 0x301   : > { %3301 = vst.msk [vmem:[#allocation3 + $0xc8] sm:$0xff] %vm177_vm1, %v3269_v31 }
 0x302   : > { %v2516_v29 = vpop.f32.mrf.mxu2  ;;  %v3464_v43 = vsel %vm177_vm1, %v3421_v4, 0.0 }
 0x303   : > { %v2588_v45 = vadd.f32 %v2556_v35, %v2516_v29  ;;  %v2861_v34 = vpop.f32.mrf.mxu3  ;;  %v3459_v35 = vadd.f32 %v3458_v23, %v3457_v37  ;;  %v3371_v23 = vsel %vm177_vm1, %v8856_v11, 0.0  ;;  %v8880_v37 = vld [vmem:[#allocation3 + $0x98] sm:$0xff] }
 0x304   : > { %v2897_v47 = vld [vmem:[#allocation3 + $0xd8] sm:$0xff]  ;;  %v3428_v46 = vmul.f32 %v8880_v37, %v8880_v37 }
 0x305   : > { %2620 = vst.msk [vmem:[#allocation3 + $0xe0] sm:$0xff] %vm177_vm1, %v2588_v45  ;;  %v2929_v52 = vadd.f32 %v2897_v47, %v2855_v58  ;;  %v3355_v58 = vsel %vm177_vm1, %v8794_v20, 0.0  ;;  %v3363_v45 = vsel %vm177_vm1, %v8825_v26, 0.0  ;;  %v3461_v2 = vadd.f32 %v3460_v12, %v3459_v35  ;;  %v8887_v35 = vld [vmem:[#allocation3 + $0xa0] sm:$0xff] }
 0x306   : > { %v3238_v55 = vld [vmem:[#allocation3 + $0xd0] sm:$0xff]  ;;  %v3356_v41 = vadd.f32 %v3355_v58, %v3354_v9 }
 0x307   : > { %2961 = vst.msk [vmem:[#allocation3 + $0xd8] sm:$0xff] %vm177_vm1, %v2929_v52  ;;  %v3270_v3 = vadd.f32 %v3238_v55, %v3194_v49  ;;  %v2557_v49 = vld [vmem:[#allocation3 + $0xe8] sm:$0xff]  ;;  %v3423_v52 = vmul.f32 %v8841_v38, %v8841_v38  ;;  %v3463_v16 = vadd.f32 %v3462_v40, %v3461_v2 }
 0x308   : > { %v3358_v31 = vadd.f32 %v3357_v42, %v3356_v41  ;;  %v3200_v24 = vpop.f32.mrf.mxu0 }
 0x309   : > { %3302 = vst.msk [vmem:[#allocation3 + $0xd0] sm:$0xff] %vm177_vm1, %v3270_v3  ;;  %v3367_v3 = vsel %vm177_vm1, %v8841_v38, 0.0  ;;  %v3465_v19 = vadd.f32 %v3464_v43, %v3463_v16  ;;  %v3468_v9 = vsel %vm177_vm1, %v3423_v52, 0.0  ;;  %v3377_v52 = vsel %vm177_vm1, %v8880_v37, 0.0 }
 0x30a   : > { %v2519_v14 = vpop.f32.mrf.mxu2  ;;  %v3360_v36 = vadd.f32 %v3359_v54, %v3358_v31  ;;  %v3426_v54 = vmul.f32 %v8864_v8, %v8864_v8 }
 0x30b   : > { %v2589_v22 = vadd.f32 %v2557_v49, %v2519_v14  ;;  %v3425_v49 = vmul.f32 %v8856_v11, %v8856_v11  ;;  %v3467_v42 = vadd.f32 %v3466_v1, %v3465_v19  ;;  %v2864_v17 = vpop.f32.mrf.mxu3  ;;  %v8903_v1 = vld [vmem:[#allocation3 + $0xb0] sm:$0xff] }
 0x30c   : > { %v2898_v10 = vld [vmem:[#allocation3 + $0xe0] sm:$0xff]  ;;  %v3362_v47 = vadd.f32 %v3361_v61, %v3360_v36  ;;  %v3474_v40 = vsel %vm177_vm1, %v3426_v54, 0.0  ;;  %v3383_v54 = vsel %vm177_vm1, %v8903_v1, 0.0 }
 0x30d   : > { %2621 = vst.msk [vmem:[#allocation3 + $0xe8] sm:$0xff] %vm177_vm1, %v2589_v22  ;;  %v2930_v25 = vadd.f32 %v2898_v10, %v2858_v39  ;;  %v8849_v39 = vld [vmem:[#allocation3 + $0x78] sm:$0xff]  ;;  %v8872_v22 = vld [vmem:[#allocation3 + $0x90] sm:$0xff]  ;;  %v3469_v50 = vadd.f32 %v3468_v9, %v3467_v42  ;;  %v3431_v42 = vmul.f32 %v8903_v1, %v8903_v1 }
 0x30e   : > { %v3239_v30 = vld [vmem:[#allocation3 + $0xd8] sm:$0xff]  ;;  %v3364_v55 = vadd.f32 %v3363_v45, %v3362_v47  ;;  %v3424_v5 = vmul.f32 %v8849_v39, %v8849_v39  ;;  %v3369_v14 = vsel %vm177_vm1, %v8849_v39, 0.0  ;;  %v3427_v12 = vmul.f32 %v8872_v22, %v8872_v22 }
 0x30f   : > { %2962 = vst.msk [vmem:[#allocation3 + $0xe0] sm:$0xff] %vm177_vm1, %v2930_v25  ;;  %v3271_v29 = vadd.f32 %v3239_v30, %v3197_v51  ;;  %v2558_v51 = vld [vmem:[#allocation3 + $0xf0] sm:$0xff]  ;;  %v2559_v30 = vld [vmem:[#allocation3 + $0xf8] sm:$0xff]  ;;  %v3375_v45 = vsel %vm177_vm1, %v8872_v22, 0.0 }
 0x310   : > { %v3366_v58 = vadd.f32 %v3365_v63, %v3364_v55  ;;  %v3203_v41 = vpop.f32.mrf.mxu0  ;;  %v3470_v10 = vsel %vm177_vm1, %v3424_v5, 0.0  ;;  %v3476_v63 = vsel %vm177_vm1, %v3427_v12, 0.0  ;;  %v3379_v5 = vsel %vm177_vm1, %v8887_v35, 0.0 }
 0x311   : > { %3303 = vst.msk [vmem:[#allocation3 + $0xd8] sm:$0xff] %vm177_vm1, %v3271_v29  ;;  %v3471_v4 = vadd.f32 %v3470_v10, %v3469_v50  ;;  %v3484_v12 = vsel %vm177_vm1, %v3431_v42, 0.0 }
 0x312   : > { %v2522_v48 = vpop.f32.mrf.mxu2  ;;  %v3368_v21 = vadd.f32 %v3367_v3, %v3366_v58  ;;  %v3478_v3 = vsel %vm177_vm1, %v3428_v46, 0.0 }
 0x313   : > { %v2590_v44 = vadd.f32 %v2558_v51, %v2522_v48  ;;  %v8895_v51 = vld [vmem:[#allocation3 + $0xa8] sm:$0xff]  ;;  %v2867_v9 = vpop.f32.mrf.mxu3 }
 0x314   : > { %v2899_v56 = vld [vmem:[#allocation3 + $0xe8] sm:$0xff]  ;;  %v3370_v25 = vadd.f32 %v3369_v14, %v3368_v21 }
 0x315   : > { %2622 = vst.msk [vmem:[#allocation3 + $0xf0] sm:$0xff] %vm177_vm1, %v2590_v44  ;;  %v2931_v6 = vadd.f32 %v2899_v56, %v2861_v34  ;;  %v3472_v34 = vsel %vm177_vm1, %v3425_v49, 0.0  ;;  %v3429_v44 = vmul.f32 %v8887_v35, %v8887_v35 }
 0x316   : > { %v3240_v60 = vld [vmem:[#allocation3 + $0xe0] sm:$0xff]  ;;  %v3372_v29 = vadd.f32 %v3371_v23, %v3370_v25  ;;  %v3473_v47 = vadd.f32 %v3472_v34, %v3471_v4  ;;  %v8925_v34 = vld [vmem:[#allocation3 + $0xc8] sm:$0xff] }
 0x317   : > { %2963 = vst.msk [vmem:[#allocation3 + $0xe8] sm:$0xff] %vm177_vm1, %v2931_v6  ;;  %v3272_v62 = vadd.f32 %v3240_v60, %v3200_v24  ;;  %v3373_v24 = vsel %vm177_vm1, %v8864_v8, 0.0  ;;  %v3430_v6 = vmul.f32 %v8895_v51, %v8895_v51  ;;  %v8911_v60 = vld [vmem:[#allocation3 + $0xb8] sm:$0xff]  ;;  %v3480_v49 = vsel %vm177_vm1, %v3429_v44, 0.0 }
 0x318   : > { %v3374_v48 = vadd.f32 %v3373_v24, %v3372_v29  ;;  %v3475_v55 = vadd.f32 %v3474_v40, %v3473_v47  ;;  %v3206_v14 = vpop.f32.mrf.mxu0  ;;  %v3432_v50 = vmul.f32 %v8911_v60, %v8911_v60  ;;  %v3434_v47 = vmul.f32 %v8925_v34, %v8925_v34 }
 0x319   : > { %3304 = vst.msk [vmem:[#allocation3 + $0xe0] sm:$0xff] %vm177_vm1, %v3272_v62  ;;  %v3381_v62 = vsel %vm177_vm1, %v8895_v51, 0.0  ;;  %v3482_v23 = vsel %vm177_vm1, %v3430_v6, 0.0  ;;  %v3389_v44 = vsel %vm177_vm1, %v8925_v34, 0.0 }
 0x31a   : > { %v2525_v31 = vpop.f32.mrf.mxu2  ;;  %v3376_v56 = vadd.f32 %v3375_v45, %v3374_v48  ;;  %v3477_v19 = vadd.f32 %v3476_v63, %v3475_v55  ;;  %v8933_v45 = vld [vmem:[#allocation3 + $0xd0] sm:$0xff]  ;;  %v3486_v46 = vsel %vm177_vm1, %v3432_v50, 0.0  ;;  %v8941_v63 = vld [vmem:[#allocation3 + $0xd8] sm:$0xff]  ;;  %v3490_v6 = vsel %vm177_vm1, %v3434_v47, 0.0 }
 0x31b   : > { %v2591_v61 = vadd.f32 %v2559_v30, %v2525_v31 }
 0x31c   : > { %v2900_v36 = vld [vmem:[#allocation3 + $0xf0] sm:$0xff]  ;;  %v3378_v58 = vadd.f32 %v3377_v52, %v3376_v56  ;;  %v3479_v21 = vadd.f32 %v3478_v3, %v3477_v19  ;;  %v3391_v19 = vsel %vm177_vm1, %v8933_v45, 0.0 }
 0x31d   : > { %2623 = vst.msk [vmem:[#allocation3 + $0xf8] sm:$0xff] %vm177_vm1, %v2591_v61  ;;  %v2932_v2 = vadd.f32 %v2900_v36, %v2864_v17  ;;  %v3385_v61 = vsel %vm177_vm1, %v8911_v60, 0.0 }
 0x31e   : > { %v3241_v43 = vld [vmem:[#allocation3 + $0xe8] sm:$0xff]  ;;  %v3380_v17 = vadd.f32 %v3379_v5, %v3378_v58  ;;  %v3481_v31 = vadd.f32 %v3480_v49, %v3479_v21  ;;  %v3436_v58 = vmul.f32 %v8941_v63, %v8941_v63  ;;  %v3393_v21 = vsel %vm177_vm1, %v8941_v63, 0.0 }
 0x31f   : > { %2964 = vst.msk [vmem:[#allocation3 + $0xf0] sm:$0xff] %vm177_vm1, %v2932_v2  ;;  %v3273_v16 = vadd.f32 %v3241_v43, %v3203_v41  ;;  %v8918_v41 = vld [vmem:[#allocation3 + $0xc0] sm:$0xff] }
 0x320   : > { %v3382_v30 = vadd.f32 %v3381_v62, %v3380_v17  ;;  %v3433_v4 = vmul.f32 %v8918_v41, %v8918_v41  ;;  %v3483_v36 = vadd.f32 %v3482_v23, %v3481_v31  ;;  %v3387_v2 = vsel %vm177_vm1, %v8918_v41, 0.0  ;;  %v8948_v3 = vld [vmem:[#allocation3 + $0xe0] sm:$0xff]  ;;  %v3209_v5 = vpop.f32.mrf.mxu0 }
 0x321   : > { %3305 = vst.msk [vmem:[#allocation3 + $0xe8] sm:$0xff] %vm177_vm1, %v3273_v16  ;;  %v3435_v16 = vmul.f32 %v8933_v45, %v8933_v45  ;;  %v3437_v17 = vmul.f32 %v8948_v3, %v8948_v3  ;;  %v3395_v31 = vsel %vm177_vm1, %v8948_v3, 0.0 }
 0x322   : > { %v3384_v40 = vadd.f32 %v3383_v54, %v3382_v30  ;;  %v3485_v48 = vadd.f32 %v3484_v12, %v3483_v36  ;;  %v3488_v52 = vsel %vm177_vm1, %v3433_v4, 0.0 }
 0x323   : > { %v3492_v42 = vsel %vm177_vm1, %v3435_v16, 0.0 }
 0x324   : > { %v2901_v10 = vld [vmem:[#allocation3 + $0xf8] sm:$0xff]  ;;  %v3386_v43 = vadd.f32 %v3385_v61, %v3384_v40  ;;  %v3487_v55 = vadd.f32 %v3486_v46, %v3485_v48  ;;  %v3496_v61 = vsel %vm177_vm1, %v3437_v17, 0.0 }
 0x325   : > { %v2933_v25 = vadd.f32 %v2901_v10, %v2867_v9 }
 0x326   : > { %v3242_v24 = vld [vmem:[#allocation3 + $0xf0] sm:$0xff]  ;;  %v3388_v56 = vadd.f32 %v3387_v2, %v3386_v43  ;;  %v3489_v9 = vadd.f32 %v3488_v52, %v3487_v55 }
 0x327   : > { %2965 = vst.msk [vmem:[#allocation3 + $0xf8] sm:$0xff] %vm177_vm1, %v2933_v25  ;;  %v3274_v29 = vadd.f32 %v3242_v24, %v3206_v14  ;;  %v3494_v25 = vsel %vm177_vm1, %v3436_v58, 0.0 }
 0x328   : > { %v3390_v14 = vadd.f32 %v3389_v44, %v3388_v56  ;;  %v8955_v49 = vld [vmem:[#allocation3 + $0xe8] sm:$0xff]  ;;  %v3491_v23 = vadd.f32 %v3490_v6, %v3489_v9 }
 0x329   : > { %3306 = vst.msk [vmem:[#allocation3 + $0xf0] sm:$0xff] %vm177_vm1, %v3274_v29  ;;  %v3438_v30 = vmul.f32 %v8955_v49, %v8955_v49  ;;  %v3397_v4 = vsel %vm177_vm1, %v8955_v49, 0.0 }
 0x32a   : > { %v3392_v54 = vadd.f32 %v3391_v19, %v3390_v14  ;;  %v3493_v24 = vadd.f32 %v3492_v42, %v3491_v23 }
 0x32b   : > { %v3498_v46 = vsel %vm177_vm1, %v3438_v30, 0.0 }
 0x32c   : > { %v3394_v12 = vadd.f32 %v3393_v21, %v3392_v54  ;;  %v3495_v36 = vadd.f32 %v3494_v25, %v3493_v24 }
 0x32e   : > { %v3243_v62 = vld [vmem:[#allocation3 + $0xf8] sm:$0xff]  ;;  %v3396_v40 = vadd.f32 %v3395_v31, %v3394_v12  ;;  %v3497_v47 = vadd.f32 %v3496_v61, %v3495_v36 }
 0x32f   : > { %v3275_v10 = vadd.f32 %v3243_v62, %v3209_v5  ;;  %v7529_v12 = vld [vmem:[%s10486_s1 + $0x28] sm:$0xf]  ;;  %v7563_v36 = vld [vmem:[%s10486_s1 + $0x2c] sm:$0xf] }
 0x330   : > { %v8962_v50 = vld [vmem:[#allocation3 + $0xf0] sm:$0xff]  ;;  %v3398_v48 = vadd.f32 %v3397_v4, %v3396_v40  ;;  %v3499_v52 = vadd.f32 %v3498_v46, %v3497_v47  ;;  %7530 = vmatpush.msk.msrb.mxu2 %vm423_vm0, %v7529_v12  ;;  %7564 = vmatpush.msk.msrb.mxu3 %vm423_vm0, %v7563_v36 }
 0x331   : > { %3307 = vst.msk [vmem:[#allocation3 + $0xf8] sm:$0xff] %vm177_vm1, %v3275_v10  ;;  %v3439_v29 = vmul.f32 %v8962_v50, %v8962_v50  ;;  %v3399_v2 = vsel %vm177_vm1, %v8962_v50, 0.0 }
 0x332   : > { %v3400_v44 = vadd.f32 %v3399_v2, %v3398_v48  ;;  %v7597_v2 = vld [vmem:[%s10486_s1 + $0x30] sm:$0xf] }
 0x333   : > { %v3500_v43 = vsel %vm177_vm1, %v3439_v29, 0.0  ;;  %7598 = vmatpush.msk.msrb.mxu0 %vm423_vm0, %v7597_v2 }
 0x334   : > { %v3501_v5 = vadd.f32 %v3500_v43, %v3499_v52 }
 0x338   : > { %v3339_v16 = vld [vmem:[#allocation3 + $0xf8] sm:$0xff] }
 0x339   : > { %v3401_v55 = vsel %vm177_vm1, %v3339_v16, 0.0  ;;  %v3440_v56 = vmul.f32 %v3339_v16, %v3339_v16 }
 0x33a   : > { %v3402_v6 = vadd.f32 %v3401_v55, %v3400_v44 }
 0x33b   : > { %v3502_v19 = vsel %vm177_vm1, %v3440_v56, 0.0 }
 0x33c   : > { %v3403_v58 = vrot.slane %v3402_v6, 4  ;;  %v3503_v9 = vadd.f32 %v3502_v19, %v3501_v5 }
 0x33e   : > { %v3404_v14 = vadd.f32 %v3403_v58, %v3402_v6  ;;  %v3504_v62 = vrot.slane %v3503_v9, 4 }
 0x340   : > { %v3405_v42 = vrot.slane %v3404_v14, 2  ;;  %v3505_v21 = vadd.f32 %v3504_v62, %v3503_v9 }
 0x342   : > { %v3406_v17 = vadd.f32 %v3405_v42, %v3404_v14  ;;  %v3506_v10 = vrot.slane %v3505_v21, 2 }
 0x344   : > { %v3407_v23 = vrot.slane %v3406_v17, 1  ;;  %v3507_v54 = vadd.f32 %v3506_v10, %v3505_v21 }
 0x346   : > { %v3408_v25 = vadd.f32 %v3407_v23, %v3406_v17  ;;  %v3508_v31 = vrot.slane %v3507_v54, 1 }
 0x348   : > { %v3509_v30 = vadd.f32 %v3508_v31, %v3507_v54  ;;  %v8981_v24 = vmul.f32 0.00390625, %v3408_v25 }
 0x34a   : > { %v3511_v61 = vmul.f32 0.00390625, %v3509_v30  ;;  %v3512_v4 = vmul.f32 %v8981_v24, %v8981_v24  ;;  %v3557_v56 = vsub.f32 %v3339_v16, %v8981_v24  ;;  %v3526_v58 = vsub.f32 %v8744_v7, %v8981_v24 }
 0x34b   : > { %v3527_v9 = vsub.f32 %v8742_v27, %v8981_v24  ;;  %v3528_v14 = vsub.f32 %v8747_v59, %v8981_v24  ;;  %v3529_v62 = vsub.f32 %v8754_v32, %v8981_v24  ;;  %v3530_v16 = vsub.f32 %v8762_v18, %v8981_v24 }
 0x34c   : > { %v3513_v29 = vsub.f32 %v3511_v61, %v3512_v4  ;;  %v3531_v27 = vsub.f32 %v8771_v15, %v8981_v24  ;;  %v3532_v59 = vsub.f32 %v8779_v33, %v8981_v24  ;;  %v3533_v18 = vsub.f32 %v8787_v28, %v8981_v24 }
 0x34d   : > { %v3534_v10 = vsub.f32 %v8794_v20, %v8981_v24  ;;  %v3535_v30 = vsub.f32 %v8802_v53, %v8981_v24  ;;  %v3536_v61 = vsub.f32 %v8810_v0, %v8981_v24  ;;  %v3537_v20 = vsub.f32 %v8818_v13, %v8981_v24 }
 0x34e   : > { %v3514_v40 = vmax.f32 %v3513_v29, 0.0  ;;  %v3538_v53 = vsub.f32 %v8825_v26, %v8981_v24  ;;  %v3539_v0 = vsub.f32 %v8833_v57, %v8981_v24  ;;  %v3540_v13 = vsub.f32 %v8841_v38, %v8981_v24 }
 0x34f   : > { %v3541_v26 = vsub.f32 %v8849_v39, %v8981_v24  ;;  %v3542_v57 = vsub.f32 %v8856_v11, %v8981_v24  ;;  %v3543_v38 = vsub.f32 %v8864_v8, %v8981_v24  ;;  %v3544_v39 = vsub.f32 %v8872_v22, %v8981_v24 }
 0x350   : > { %v3515_v46 = vadd.f32 1e-05, %v3514_v40  ;;  %v3545_v11 = vsub.f32 %v8880_v37, %v8981_v24  ;;  %v3546_v8 = vsub.f32 %v8887_v35, %v8981_v24  ;;  %v3547_v22 = vsub.f32 %v8895_v51, %v8981_v24 }
 0x351   : > { %v3548_v37 = vsub.f32 %v8903_v1, %v8981_v24  ;;  %v3549_v35 = vsub.f32 %v8911_v60, %v8981_v24  ;;  %v3550_v51 = vsub.f32 %v8918_v41, %v8981_v24  ;;  %v3551_v1 = vsub.f32 %v8925_v34, %v8981_v24  ;;  %v7631_v34 = vld [vmem:[%s10486_s1 + $0x34] sm:$0xf] }
 0x352   : > { %7815 = vrsqrt.f32 %v3515_v46  ;;  %vm3522_vm4 = vweird.f32 %v3515_v46  ;;  %v3552_v60 = vsub.f32 %v8933_v45, %v8981_v24  ;;  %v3553_v41 = vsub.f32 %v8941_v63, %v8981_v24  ;;  %7632 = vmatpush.msk.msrb.mxu1 %vm423_vm0, %v7631_v34 }
 0x353   : > { %v3554_v45 = vsub.f32 %v8948_v3, %v8981_v24  ;;  %v3555_v63 = vsub.f32 %v8955_v49, %v8981_v24 }
 0x358   : > { %v7816_v47 = vpop.eup %7815 }
 0x359   : > { %v3517_v48 = vmul.f32 %v7816_v47, %v3515_v46  ;;  %vm3523_vm3 = vweird.f32 %v7816_v47 }
 0x35a   : > { %vm3524_vm5 = vmor %vm3522_vm4, %vm3523_vm3 }
 0x35b   : > { %v3518_v43 = vmul.f32 %v7816_v47, %v3517_v48 }
 0x35d   : > { %v3519_v52 = vmul.f32 0.5, %v3518_v43 }
 0x35f   : > { %v3520_v44 = vsub.f32 1.5, %v3519_v52 }
 0x361   : > { %v3521_v55 = vmul.f32 %v7816_v47, %v3520_v44 }
 0x363   : > { %v8998_v5 = vsel %vm3524_vm5, %v7816_v47, %v3521_v55 }
 0x364   : > { %v3589_v6 = vmul.f32 %v3557_v56, %v8998_v5  ;;  %v3558_v42 = vmul.f32 %v3526_v58, %v8998_v5  ;;  %v3559_v21 = vmul.f32 %v3527_v9, %v8998_v5  ;;  %v3560_v7 = vmul.f32 %v3528_v14, %v8998_v5 }
 0x365   : > { %v3561_v17 = vmul.f32 %v3529_v62, %v8998_v5  ;;  %v3562_v32 = vmul.f32 %v3530_v16, %v8998_v5  ;;  %v3563_v23 = vmul.f32 %v3531_v27, %v8998_v5  ;;  %v3564_v54 = vmul.f32 %v3532_v59, %v8998_v5 }
 0x366   : > { %v3621_v19 = vmax.f32 %v3589_v6, 0.0  ;;  %v3590_v25 = vmax.f32 %v3558_v42, 0.0  ;;  %v3591_v31 = vmax.f32 %v3559_v21, 0.0  ;;  %v3592_v15 = vmax.f32 %v3560_v7, 0.0 }
 0x367   : > { %v3565_v33 = vmul.f32 %v3533_v18, %v8998_v5  ;;  %v3593_v12 = vmax.f32 %v3561_v17, 0.0  ;;  %v3566_v28 = vmul.f32 %v3534_v10, %v8998_v5  ;;  %v3594_v4 = vmax.f32 %v3562_v32, 0.0 }
 0x368   : > { %3653 = vst.msk [vmem:[#allocation2 + $0x189] sm:$0xff] %vm177_vm1, %v3621_v19  ;;  %v3567_v29 = vmul.f32 %v3535_v30, %v8998_v5  ;;  %v3595_v36 = vmax.f32 %v3563_v23, 0.0  ;;  %v3568_v40 = vmul.f32 %v3536_v61, %v8998_v5  ;;  %v3596_v46 = vmax.f32 %v3564_v54, 0.0 }
 0x369   : > { %3622 = vst.msk [vmem:[#allocation2 + $0x19] sm:$0xff] %vm177_vm1, %v3590_v25  ;;  %v3569_v2 = vmul.f32 %v3537_v20, %v8998_v5  ;;  %v3597_v47 = vmax.f32 %v3565_v33, 0.0  ;;  %v3570_v48 = vmul.f32 %v3538_v53, %v8998_v5  ;;  %v3598_v43 = vmax.f32 %v3566_v28, 0.0 }
 0x36a   : > { %3623 = vst.msk [vmem:[#allocation2 + $0x21] sm:$0xff] %vm177_vm1, %v3591_v31  ;;  %v3571_v52 = vmul.f32 %v3539_v0, %v8998_v5  ;;  %v3599_v44 = vmax.f32 %v3567_v29, 0.0  ;;  %v3572_v55 = vmul.f32 %v3540_v13, %v8998_v5  ;;  %v3600_v56 = vmax.f32 %v3568_v40, 0.0 }
 0x36b   : > { %3624 = vst.msk [vmem:[#allocation2 + $0x31] sm:$0xff] %vm177_vm1, %v3592_v15  ;;  %v3573_v6 = vmul.f32 %v3541_v26, %v8998_v5  ;;  %v3601_v19 = vmax.f32 %v3569_v2, 0.0  ;;  %v3574_v58 = vmul.f32 %v3542_v57, %v8998_v5  ;;  %v3602_v9 = vmax.f32 %v3570_v48, 0.0 }
 0x36c   : > { %3625 = vst.msk [vmem:[#allocation2 + $0x39] sm:$0xff] %vm177_vm1, %v3593_v12  ;;  %v3575_v14 = vmul.f32 %v3543_v38, %v8998_v5  ;;  %v3603_v62 = vmax.f32 %v3571_v52, 0.0  ;;  %v3576_v16 = vmul.f32 %v3544_v39, %v8998_v5  ;;  %v3604_v42 = vmax.f32 %v3572_v55, 0.0 }
 0x36d   : > { %3626 = vst.msk [vmem:[#allocation2 + $0x49] sm:$0xff] %vm177_vm1, %v3594_v4  ;;  %v3577_v21 = vmul.f32 %v3545_v11, %v8998_v5  ;;  %v3605_v7 = vmax.f32 %v3573_v6, 0.0  ;;  %v3578_v27 = vmul.f32 %v3546_v8, %v8998_v5  ;;  %v3606_v17 = vmax.f32 %v3574_v58, 0.0 }
 0x36e   : > { %3627 = vst.msk [vmem:[#allocation2 + $0x51] sm:$0xff] %vm177_vm1, %v3595_v36  ;;  %v3579_v59 = vmul.f32 %v3547_v22, %v8998_v5  ;;  %v3607_v32 = vmax.f32 %v3575_v14, 0.0  ;;  %v3580_v18 = vmul.f32 %v3548_v37, %v8998_v5  ;;  %v3608_v10 = vmax.f32 %v3576_v16, 0.0 }
 0x36f   : > { %3628 = vst.msk [vmem:[#allocation2 + $0x61] sm:$0xff] %vm177_vm1, %v3596_v46  ;;  %v3581_v23 = vmul.f32 %v3549_v35, %v8998_v5  ;;  %v3609_v54 = vmax.f32 %v3577_v21, 0.0  ;;  %v3582_v25 = vmul.f32 %v3550_v51, %v8998_v5  ;;  %v3610_v31 = vmax.f32 %v3578_v27, 0.0 }
 0x370   : > { %3629 = vst.msk [vmem:[#allocation2 + $0x69] sm:$0xff] %vm177_vm1, %v3597_v47  ;;  %v3583_v15 = vmul.f32 %v3551_v1, %v8998_v5  ;;  %v3611_v30 = vmax.f32 %v3579_v59, 0.0  ;;  %v3584_v33 = vmul.f32 %v3552_v60, %v8998_v5  ;;  %v3612_v12 = vmax.f32 %v3580_v18, 0.0  ;;  %v3663_v2 = vld [vmem:[#allocation2 + $0x1a] sm:$0x1] }
 0x371   : > { %3630 = vst.msk [vmem:[#allocation2 + $0x79] sm:$0xff] %vm177_vm1, %v3598_v43  ;;  %v3585_v61 = vmul.f32 %v3553_v41, %v8998_v5  ;;  %v3613_v28 = vmax.f32 %v3581_v23, 0.0  ;;  %v3556_v4 = vsub.f32 %v8962_v50, %v8981_v24  ;;  %v3586_v3 = vmul.f32 %v3554_v45, %v8998_v5  ;;  %v3699_v13 = vld [vmem:[#allocation2 + $0x27] sm:$0x1]  ;;  %v9169_v51 = vld [vmem:[#allocation2 + $0x19] sm:$0xff] }
 0x372   : > { %3631 = vst.msk [vmem:[#allocation2 + $0x81] sm:$0xff] %vm177_vm1, %v3599_v44  ;;  %v3614_v20 = vmax.f32 %v3582_v25, 0.0  ;;  %v3587_v29 = vmul.f32 %v3555_v63, %v8998_v5  ;;  %v3615_v36 = vmax.f32 %v3583_v15, 0.0  ;;  %v3616_v53 = vmax.f32 %v3584_v33, 0.0  ;;  %v3664_v47 = vld [vmem:[#allocation2 + $0x32] sm:$0x1] }
 0x373   : > { %3632 = vst.msk [vmem:[#allocation2 + $0x91] sm:$0xff] %vm177_vm1, %v3600_v56  ;;  %v3588_v49 = vmul.f32 %v3556_v4, %v8998_v5  ;;  %v3617_v40 = vmax.f32 %v3585_v61, 0.0  ;;  %v3618_v46 = vmax.f32 %v3586_v3, 0.0  ;;  %v9128_v5 = vld [vmem:[#allocation2 + $0x31] sm:$0xff]  ;;  %v9131_v0 = vld [vmem:[#allocation2 + $0x39] sm:$0xff] }
 0x374   : > { %3633 = vst.msk [vmem:[#allocation2 + $0x99] sm:$0xff] %vm177_vm1, %v3601_v19  ;;  %v3619_v50 = vmax.f32 %v3587_v29, 0.0  ;;  %v3665_v48 = vld [vmem:[#allocation2 + $0x4a] sm:$0x1]  ;;  %v3700_v43 = vld [vmem:[#allocation2 + $0x3f] sm:$0x1] }
 0x375   : > { %3634 = vst.msk [vmem:[#allocation2 + $0xa9] sm:$0xff] %vm177_vm1, %v3602_v9  ;;  %v3620_v24 = vmax.f32 %v3588_v49, 0.0  ;;  %v3701_v52 = vld [vmem:[#allocation2 + $0x57] sm:$0x1]  ;;  %v4697_v21 = vld [vmem:[#allocation2 + $0x20] sm:$0xff]  ;;  %v9202_v33 = vld [vmem:[#allocation2 + $0x38] sm:$0xff] }
 0x376   : > { %3635 = vst.msk [vmem:[#allocation2 + $0xb1] sm:$0xff] %vm177_vm1, %v3603_v62  ;;  %v3666_v26 = vld [vmem:[#allocation2 + $0x62] sm:$0x1]  ;;  %v3714_v3 = vld [vmem:[#allocation2 + $0x18f] sm:$0x1] }
 0x377   : > { %3636 = vst.msk [vmem:[#allocation2 + $0xc1] sm:$0xff] %vm177_vm1, %v3604_v42  ;;  %v3702_v19 = vld [vmem:[#allocation2 + $0x6f] sm:$0x1] }
 0x378   : > { %3637 = vst.msk [vmem:[#allocation2 + $0xc9] sm:$0xff] %vm177_vm1, %v3605_v7  ;;  %v3667_v44 = vld [vmem:[#allocation2 + $0x7a] sm:$0x1]  ;;  %v4360_v49 = vld [vmem:[#allocation2 + $0x4a] sm:$0xff] }
 0x379   : > { %3638 = vst.msk [vmem:[#allocation2 + $0xd9] sm:$0xff] %vm177_vm1, %v3606_v17  ;;  %v3703_v58 = vld [vmem:[#allocation2 + $0x87] sm:$0x1] }
 0x37a   : > { %3639 = vst.msk [vmem:[#allocation2 + $0xe1] sm:$0xff] %vm177_vm1, %v3607_v32  ;;  %v3668_v39 = vld [vmem:[#allocation2 + $0x92] sm:$0x1] }
 0x37b   : > { %3640 = vst.msk [vmem:[#allocation2 + $0xf1] sm:$0xff] %vm177_vm1, %v3608_v10  ;;  %v3704_v11 = vld [vmem:[#allocation2 + $0x9f] sm:$0x1] }
 0x37c   : > { %3641 = vst.msk [vmem:[#allocation2 + $0xf9] sm:$0xff] %vm177_vm1, %v3609_v54  ;;  %v3669_v9 = vld [vmem:[#allocation2 + $0xaa] sm:$0x1]  ;;  %v9175_v10 = vld [vmem:[#allocation2 + $0x1a] sm:$0xff] }
 0x37d   : > { %3642 = vst.msk [vmem:[#allocation2 + $0x109] sm:$0xff] %vm177_vm1, %v3610_v31  ;;  %v3705_v16 = vld [vmem:[#allocation2 + $0xb7] sm:$0x1] }
 0x37e   : > { %3643 = vst.msk [vmem:[#allocation2 + $0x111] sm:$0xff] %vm177_vm1, %v3611_v30  ;;  %v3670_v14 = vld [vmem:[#allocation2 + $0xc2] sm:$0x1] }
 0x37f   : > { %3644 = vst.msk [vmem:[#allocation2 + $0x121] sm:$0xff] %vm177_vm1, %v3612_v12  ;;  %v3706_v7 = vld [vmem:[#allocation2 + $0xcf] sm:$0x1]  ;;  %v9190_v30 = vld [vmem:[#allocation2 + $0x21] sm:$0xff]  ;;  %v9211_v12 = vld [vmem:[#allocation2 + $0x32] sm:$0xff] }
 0x380   : > { %3645 = vst.msk [vmem:[#allocation2 + $0x129] sm:$0xff] %vm177_vm1, %v3613_v28  ;;  %v3671_v22 = vld [vmem:[#allocation2 + $0xda] sm:$0x1] }
 0x381   : > { %3646 = vst.msk [vmem:[#allocation2 + $0x139] sm:$0xff] %vm177_vm1, %v3614_v20  ;;  %v3707_v27 = vld [vmem:[#allocation2 + $0xe7] sm:$0x1]  ;;  %v9235_v20 = vld [vmem:[#allocation2 + $0x50] sm:$0xff] }
 0x382   : > { %3647 = vst.msk [vmem:[#allocation2 + $0x141] sm:$0xff] %vm177_vm1, %v3615_v36  ;;  %v3672_v37 = vld [vmem:[#allocation2 + $0xf2] sm:$0x1]  ;;  %v9241_v36 = vld [vmem:[#allocation2 + $0x49] sm:$0xff] }
 0x383   : > { %3648 = vst.msk [vmem:[#allocation2 + $0x151] sm:$0xff] %vm177_vm1, %v3616_v53  ;;  %v3708_v35 = vld [vmem:[#allocation2 + $0xff] sm:$0x1] }
 0x384   : > { %3649 = vst.msk [vmem:[#allocation2 + $0x159] sm:$0xff] %vm177_vm1, %v3617_v40  ;;  %v3673_v17 = vld [vmem:[#allocation2 + $0x10a] sm:$0x1] }
 0x385   : > { %3650 = vst.msk [vmem:[#allocation2 + $0x169] sm:$0xff] %vm177_vm1, %v3618_v46  ;;  %v3709_v18 = vld [vmem:[#allocation2 + $0x117] sm:$0x1] }
 0x386   : > { %3651 = vst.msk [vmem:[#allocation2 + $0x171] sm:$0xff] %vm177_vm1, %v3619_v50  ;;  %v3674_v59 = vld [vmem:[#allocation2 + $0x122] sm:$0x1]  ;;  %v9250_v46 = vld [vmem:[#allocation2 + $0x51] sm:$0xff] }
 0x387   : > { %3652 = vst.msk [vmem:[#allocation2 + $0x181] sm:$0xff] %vm177_vm1, %v3620_v24  ;;  %v3710_v54 = vld [vmem:[#allocation2 + $0x12f] sm:$0x1] }
 0x388   : > { %3656 = vst.msk [vmem:[#allocation2 + $0x1] sm:$0xff] %vm177_vm1, %v9128_v5  ;;  %v3675_v1 = vld [vmem:[#allocation2 + $0x13a] sm:$0x1]  ;;  %v4703_v24 = vld [vmem:[#allocation2 + $0x68] sm:$0xff] }
 0x389   : > { %3657 = vst.msk [vmem:[#allocation2 + $0x9] sm:$0xff] %vm177_vm1, %v9131_v0  ;;  %v3711_v25 = vld [vmem:[#allocation2 + $0x147] sm:$0x1] }
 0x38a   : > { %3681 = vst.msk [vmem:[#allocation2 + $0x18] sm:$0x1] %vm239_vm2, %v3663_v2  ;;  %v3676_v60 = vld [vmem:[#allocation2 + $0x152] sm:$0x1] }
 0x38b   : > { %3682 = vst.msk [vmem:[#allocation2 + $0x30] sm:$0x1] %vm239_vm2, %v3664_v47  ;;  %v3712_v41 = vld [vmem:[#allocation2 + $0x15f] sm:$0x1]  ;;  %v4021_v47 = vld [vmem:[#allocation2 + $0x69] sm:$0xff] }
 0x38c   : > { %3717 = vst.msk [vmem:[#allocation2 + $0x29] sm:$0x1] %vm239_vm2, %v3699_v13  ;;  %v3677_v31 = vld [vmem:[#allocation2 + $0x16a] sm:$0x1] }
 0x38d   : > { %3683 = vst.msk [vmem:[#allocation2 + $0x48] sm:$0x1] %vm239_vm2, %v3665_v48  ;;  %v3713_v34 = vld [vmem:[#allocation2 + $0x177] sm:$0x1]  ;;  %v9219_v61 = vld [vmem:[#allocation2 + $0x169] sm:$0xff]  ;;  %v4705_v48 = vld [vmem:[#allocation2 + $0x80] sm:$0xff] }
 0x38e   : > { %3718 = vst.msk [vmem:[#allocation2 + $0x41] sm:$0x1] %vm239_vm2, %v3700_v43  ;;  %v3678_v15 = vld [vmem:[#allocation2 + $0x182] sm:$0x1]  ;;  %v9221_v28 = vld [vmem:[#allocation2 + $0x171] sm:$0xff]  ;;  %v4022_v43 = vld [vmem:[#allocation2 + $0x79] sm:$0xff] }
 0x38f   : > { %v4012_v57 = vld [vmem:[#allocation2 + $0x1] sm:$0xff]  ;;  %3684 = vst.msk [vmem:[#allocation2 + $0x60] sm:$0x1] %vm239_vm2, %v3666_v26 }
 0x390   : > { %v3662_v55 = vld [vmem:[#allocation2 + $0x2] sm:$0x1]  ;;  %7531 = vmatmul.msk.f32.vlgmr.msrb.gmra.mxu2 %vm177_vm1, %v4012_v57  ;;  %v3698_v38 = vld [vmem:[#allocation2 + $0xf] sm:$0x1]  ;;  %3719 = vst.msk [vmem:[#allocation2 + $0x59] sm:$0x1] %vm239_vm2, %v3701_v52 }
 0x391   : > { %v4354_v56 = vld [vmem:[#allocation2 + $0x2] sm:$0xff]  ;;  %3680 = vst.msk [vmem:[#allocation2] sm:$0x1] %vm239_vm2, %v3662_v55  ;;  %v9147_v6 = vld [vmem:[#allocation2 + $0x18] sm:$0xff] }
 0x392   : > { %7565 = vmatmul.msk.f32.vlgmr.msrb.gmra.mxu3 %vm177_vm1, %v4354_v56  ;;  %3716 = vst.msk [vmem:[#allocation2 + $0x11] sm:$0x1] %vm239_vm2, %v3698_v38  ;;  %7599 = vmatmul.msk.f32.vlgmr.msrb.gmra.mxu0 %vm177_vm1, %v9147_v6  ;;  %v4013_v8 = vld [vmem:[#allocation2 + $0x9] sm:$0xff]  ;;  %v4364_v26 = vld [vmem:[#allocation2 + $0x7a] sm:$0xff]  ;;  %v4024_v56 = vld [vmem:[#allocation2 + $0x91] sm:$0xff] }
 0x393   : > { %3685 = vst.msk [vmem:[#allocation2 + $0x78] sm:$0x1] %vm239_vm2, %v3667_v44  ;;  %v3735_v32 = vld [vmem:[#allocation2 + $0x8] sm:$0xff]  ;;  %v9180_v23 = vld [vmem:[#allocation2 + $0x30] sm:$0xff]  ;;  %v4707_v55 = vld [vmem:[#allocation2 + $0x98] sm:$0xff] }
 0x394   : > { %3720 = vst.msk [vmem:[#allocation2 + $0x71] sm:$0x1] %vm239_vm2, %v3702_v19  ;;  %v9197_v45 = vld [vmem:[#allocation2 + $0x22] sm:$0xff]  ;;  %v4366_v38 = vld [vmem:[#allocation2 + $0x92] sm:$0xff] }
 0x395   : > { %3686 = vst.msk [vmem:[#allocation2 + $0x90] sm:$0x1] %vm239_vm2, %v3668_v39  ;;  %v9215_v63 = vld [vmem:[#allocation2 + $0x48] sm:$0xff]  ;;  %v9231_v4 = vld [vmem:[#allocation2 + $0x3a] sm:$0xff] }
 0x396   : > { %3721 = vst.msk [vmem:[#allocation2 + $0x89] sm:$0x1] %vm239_vm2, %v3703_v58  ;;  %v4702_v53 = vld [vmem:[#allocation2 + $0x60] sm:$0xff]  ;;  %v4709_v58 = vld [vmem:[#allocation2 + $0xb0] sm:$0xff] }
 0x397   : > { %3687 = vst.msk [vmem:[#allocation2 + $0xa8] sm:$0x1] %vm239_vm2, %v3669_v9  ;;  %v4361_v50 = vld [vmem:[#allocation2 + $0x52] sm:$0xff]  ;;  %v4023_v44 = vld [vmem:[#allocation2 + $0x81] sm:$0xff]  ;;  %v4026_v9 = vld [vmem:[#allocation2 + $0xa9] sm:$0xff] }
 0x398   : > { %v3734_v62 = vld [vmem:[#allocation2] sm:$0xff]  ;;  %7532 = vmatmul.msk.f32.gmra.mxu2 %vm177_vm1, %v4013_v8  ;;  %3722 = vst.msk [vmem:[#allocation2 + $0xa1] sm:$0x1] %vm239_vm2, %v3704_v11  ;;  %v4368_v11 = vld [vmem:[#allocation2 + $0xaa] sm:$0xff] }
 0x399   : > { %7497 = vmatmul.msk.f32.vlgmr.msra.gmra.mxu1 %vm177_vm1, %v3734_v62  ;;  %v4355_v42 = vld [vmem:[#allocation2 + $0xa] sm:$0xff]  ;;  %3688 = vst.msk [vmem:[#allocation2 + $0xc0] sm:$0x1] %vm239_vm2, %v3670_v14  ;;  %v4025_v19 = vld [vmem:[#allocation2 + $0x99] sm:$0xff] }
 0x39a   : > { %7566 = vmatmul.msk.f32.gmra.mxu3 %vm177_vm1, %v4355_v42  ;;  %7600 = vmatmul.msk.f32.gmra.mxu0 %vm177_vm1, %v4697_v21  ;;  %3723 = vst.msk [vmem:[#allocation2 + $0xb9] sm:$0x1] %vm239_vm2, %v3705_v16  ;;  %v4704_v2 = vld [vmem:[#allocation2 + $0x78] sm:$0xff]  ;;  %v4711_v16 = vld [vmem:[#allocation2 + $0xc8] sm:$0xff] }
 0x39b   : > { %3689 = vst.msk [vmem:[#allocation2 + $0xd8] sm:$0x1] %vm239_vm2, %v3671_v22  ;;  %v4363_v13 = vld [vmem:[#allocation2 + $0x6a] sm:$0xff]  ;;  %v4028_v22 = vld [vmem:[#allocation2 + $0xc1] sm:$0xff] }
 0x39c   : > { %3724 = vst.msk [vmem:[#allocation2 + $0xd1] sm:$0x1] %vm239_vm2, %v3706_v7  ;;  %v4706_v52 = vld [vmem:[#allocation2 + $0x90] sm:$0xff] }
 0x39d   : > { %3690 = vst.msk [vmem:[#allocation2 + $0xf0] sm:$0x1] %vm239_vm2, %v3672_v37  ;;  %v4365_v57 = vld [vmem:[#allocation2 + $0x82] sm:$0xff]  ;;  %v4027_v62 = vld [vmem:[#allocation2 + $0xb1] sm:$0xff] }
 0x39e   : > { %3725 = vst.msk [vmem:[#allocation2 + $0xe9] sm:$0x1] %vm239_vm2, %v3707_v27 }
 0x39f   : > { %3691 = vst.msk [vmem:[#allocation2 + $0x108] sm:$0x1] %vm239_vm2, %v3673_v17  ;;  %v4367_v39 = vld [vmem:[#allocation2 + $0x9a] sm:$0xff] }
 0x3a0   : > { %7533 = vmatmul.msk.f32.gmra.mxu2 %vm177_vm1, %v9169_v51  ;;  %3726 = vst.msk [vmem:[#allocation2 + $0x101] sm:$0x1] %vm239_vm2, %v3708_v35  ;;  %v4710_v14 = vld [vmem:[#allocation2 + $0xc0] sm:$0xff] }
 0x3a1   : > { %7498 = vmatmul.msk.f32.gmra.mxu1 %vm177_vm1, %v3735_v32  ;;  %3692 = vst.msk [vmem:[#allocation2 + $0x120] sm:$0x1] %vm239_vm2, %v3674_v59  ;;  %v4369_v8 = vld [vmem:[#allocation2 + $0xb2] sm:$0xff]  ;;  %v4029_v59 = vld [vmem:[#allocation2 + $0xc9] sm:$0xff] }
 0x3a2   : > { %7567 = vmatmul.msk.f32.gmra.mxu3 %vm177_vm1, %v9175_v10  ;;  %7601 = vmatmul.msk.f32.gmra.mxu0 %vm177_vm1, %v9180_v23  ;;  %3727 = vst.msk [vmem:[#allocation2 + $0x119] sm:$0x1] %vm239_vm2, %v3709_v18  ;;  %v4712_v7 = vld [vmem:[#allocation2 + $0xd8] sm:$0xff]  ;;  %v4713_v18 = vld [vmem:[#allocation2 + $0xe0] sm:$0xff] }
 0x3a3   : > { %3693 = vst.msk [vmem:[#allocation2 + $0x138] sm:$0x1] %vm239_vm2, %v3675_v1  ;;  %v4371_v32 = vld [vmem:[#allocation2 + $0xca] sm:$0xff] }
 0x3a4   : > { %3728 = vst.msk [vmem:[#allocation2 + $0x131] sm:$0x1] %vm239_vm2, %v3710_v54 }
 0x3a5   : > { %3694 = vst.msk [vmem:[#allocation2 + $0x150] sm:$0x1] %vm239_vm2, %v3676_v60 }
 0x3a6   : > { %3729 = vst.msk [vmem:[#allocation2 + $0x149] sm:$0x1] %vm239_vm2, %v3711_v25 }
 0x3a7   : > { %3695 = vst.msk [vmem:[#allocation2 + $0x168] sm:$0x1] %vm239_vm2, %v3677_v31 }
 0x3a8   : > { %7534 = vmatmul.msk.f32.gmra.mxu2 %vm177_vm1, %v9190_v30  ;;  %3730 = vst.msk [vmem:[#allocation2 + $0x161] sm:$0x1] %vm239_vm2, %v3712_v41 }
 0x3a9   : > { %7499 = vmatmul.msk.f32.gmra.mxu1 %vm177_vm1, %v9147_v6  ;;  %3696 = vst.msk [vmem:[#allocation2 + $0x180] sm:$0x1] %vm239_vm2, %v3678_v15  ;;  %v4708_v6 = vld [vmem:[#allocation2 + $0xa8] sm:$0xff]  ;;  %v4030_v15 = vld [vmem:[#allocation2 + $0xd9] sm:$0xff] }
 0x3aa   : > { %7568 = vmatmul.msk.f32.gmra.mxu3 %vm177_vm1, %v9197_v45  ;;  %7602 = vmatmul.msk.f32.gmra.mxu0 %vm177_vm1, %v9202_v33  ;;  %3731 = vst.msk [vmem:[#allocation2 + $0x179] sm:$0x1] %vm239_vm2, %v3713_v34  ;;  %v4372_v34 = vld [vmem:[#allocation2 + $0xda] sm:$0xff] }
 0x3ab   : > { %3660 = vst.msk [vmem:[#allocation2 + $0x199] sm:$0xff] %vm177_vm1, %v9219_v61 }
 0x3ac   : > { %3661 = vst.msk [vmem:[#allocation2 + $0x1a1] sm:$0xff] %vm177_vm1, %v9221_v28 }
 0x3ad   : > { %3732 = vst.msk [vmem:[#allocation2 + $0x191] sm:$0x1] %vm239_vm2, %v3714_v3  ;;  %v4714_v3 = vld [vmem:[#allocation2 + $0xf0] sm:$0xff] }
 0x3b0   : > { %7535 = vmatmul.msk.f32.gmra.mxu2 %vm177_vm1, %v9128_v5  ;;  %v9258_v5 = vld [vmem:[#allocation2 + $0x61] sm:$0xff] }
 0x3b1   : > { %7500 = vmatmul.msk.f32.gmra.mxu1 %vm177_vm1, %v4697_v21  ;;  %v4370_v21 = vld [vmem:[#allocation2 + $0xc2] sm:$0xff] }
 0x3b2   : > { %7569 = vmatmul.msk.f32.gmra.mxu3 %vm177_vm1, %v9211_v12  ;;  %7603 = vmatmul.msk.f32.gmra.mxu0 %vm177_vm1, %v9215_v63  ;;  %v3679_v29 = vld [vmem:[#allocation2 + $0x19a] sm:$0x1] }
 0x3b3   : > { %3697 = vst.msk [vmem:[#allocation2 + $0x198] sm:$0x1] %vm239_vm2, %v3679_v29  ;;  %v3715_v40 = vld [vmem:[#allocation2 + $0x1a7] sm:$0x1] }
 0x3b4   : > { %3733 = vst.msk [vmem:[#allocation2 + $0x1a9] sm:$0x1] %vm239_vm2, %v3715_v40 }
 0x3b8   : > { %7536 = vmatmul.msk.f32.gmra.mxu2 %vm177_vm1, %v9131_v0  ;;  %v4362_v0 = vld [vmem:[#allocation2 + $0x62] sm:$0xff] }
 0x3b9   : > { %7501 = vmatmul.msk.f32.gmra.mxu1 %vm177_vm1, %v9180_v23 }
 0x3ba   : > { %7570 = vmatmul.msk.f32.gmra.mxu3 %vm177_vm1, %v9231_v4  ;;  %7604 = vmatmul.msk.f32.gmra.mxu0 %vm177_vm1, %v9235_v20 }
 0x3c0   : > { %7537 = vmatmul.msk.f32.gmra.mxu2 %vm177_vm1, %v9241_v36 }
 0x3c1   : > { %7502 = vmatmul.msk.f32.gmra.mxu1 %vm177_vm1, %v9202_v33 }
 0x3c2   : > { %7571 = vmatmul.msk.f32.gmra.mxu3 %vm177_vm1, %v4360_v49  ;;  %7605 = vmatmul.msk.f32.gmra.mxu0 %vm177_vm1, %v4702_v53 }
 0x3c8   : > { %7538 = vmatmul.msk.f32.gmra.mxu2 %vm177_vm1, %v9250_v46 }
 0x3c9   : > { %7503 = vmatmul.msk.f32.gmra.mxu1 %vm177_vm1, %v9215_v63 }
 0x3ca   : > { %7572 = vmatmul.msk.f32.gmra.mxu3 %vm177_vm1, %v4361_v50  ;;  %7606 = vmatmul.msk.f32.gmra.mxu0 %vm177_vm1, %v4703_v24 }
 0x3d0   : > { %7539 = vmatmul.msk.f32.gmra.mxu2 %vm177_vm1, %v9258_v5 }
 0x3d1   : > { %7504 = vmatmul.msk.f32.gmra.mxu1 %vm177_vm1, %v9235_v20 }
 0x3d2   : > { %7573 = vmatmul.msk.f32.gmra.mxu3 %vm177_vm1, %v4362_v0  ;;  %7607 = vmatmul.msk.f32.gmra.mxu0 %vm177_vm1, %v4704_v2 }
 0x3d8   : > { %7540 = vmatmul.msk.f32.gmra.mxu2 %vm177_vm1, %v4021_v47 }
 0x3d9   : > { %7505 = vmatmul.msk.f32.gmra.mxu1 %vm177_vm1, %v4702_v53 }
 0x3da   : > { %7574 = vmatmul.msk.f32.gmra.mxu3 %vm177_vm1, %v4363_v13  ;;  %7608 = vmatmul.msk.f32.gmra.mxu0 %vm177_vm1, %v4705_v48  ;;  %v4373_v13 = vld [vmem:[#allocation2 + $0xe2] sm:$0xff] }
 0x3e0   : > { %7541 = vmatmul.msk.f32.gmra.mxu2 %vm177_vm1, %v4022_v43 }
 0x3e1   : > { %7506 = vmatmul.msk.f32.gmra.mxu1 %vm177_vm1, %v4703_v24 }
 0x3e2   : > { %7575 = vmatmul.msk.f32.gmra.mxu3 %vm177_vm1, %v4364_v26  ;;  %7609 = vmatmul.msk.f32.gmra.mxu0 %vm177_vm1, %v4706_v52 }
 0x3e8   : > { %7542 = vmatmul.msk.f32.gmra.mxu2 %vm177_vm1, %v4023_v44 }
 0x3e9   : > { %7507 = vmatmul.msk.f32.gmra.mxu1 %vm177_vm1, %v4704_v2  ;;  %v4031_v2 = vld [vmem:[#allocation2 + $0xe1] sm:$0xff] }
 0x3ea   : > { %7576 = vmatmul.msk.f32.gmra.mxu3 %vm177_vm1, %v4365_v57  ;;  %7610 = vmatmul.msk.f32.gmra.mxu0 %vm177_vm1, %v4707_v55 }
 0x3f0   : > { %7543 = vmatmul.msk.f32.gmra.mxu2 %vm177_vm1, %v4024_v56 }
 0x3f1   : > { %7508 = vmatmul.msk.f32.gmra.mxu1 %vm177_vm1, %v4705_v48  ;;  %v4715_v48 = vld [vmem:[#allocation2 + $0xf8] sm:$0xff] }
 0x3f2   : > { %7577 = vmatmul.msk.f32.gmra.mxu3 %vm177_vm1, %v4366_v38  ;;  %7611 = vmatmul.msk.f32.gmra.mxu0 %vm177_vm1, %v4708_v6  ;;  %v4032_v38 = vld [vmem:[#allocation2 + $0xf1] sm:$0xff] }
 0x3f8   : > { %7544 = vmatmul.msk.f32.gmra.mxu2 %vm177_vm1, %v4025_v19  ;;  %v4374_v19 = vld [vmem:[#allocation2 + $0xf2] sm:$0xff] }
 0x3f9   : > { %7509 = vmatmul.msk.f32.gmra.mxu1 %vm177_vm1, %v4706_v52 }
 0x3fa   : > { %7578 = vmatmul.msk.f32.gmra.mxu3 %vm177_vm1, %v4367_v39  ;;  %7612 = vmatmul.msk.f32.gmra.mxu0 %vm177_vm1, %v4709_v58  ;;  %v4716_v39 = vld [vmem:[#allocation2 + $0x108] sm:$0xff] }
 0x400   : > { %7545 = vmatmul.msk.f32.gmra.mxu2 %vm177_vm1, %v4026_v9 }
 0x401   : > { %7510 = vmatmul.msk.f32.gmra.mxu1 %vm177_vm1, %v4707_v55 }
 0x402   : > { %7579 = vmatmul.msk.f32.gmra.mxu3 %vm177_vm1, %v4368_v11  ;;  %7613 = vmatmul.msk.f32.gmra.mxu0 %vm177_vm1, %v4710_v14 }
 0x408   : > { %7546 = vmatmul.msk.f32.gmra.mxu2 %vm177_vm1, %v4027_v62 }
 0x409   : > { %7511 = vmatmul.msk.f32.gmra.mxu1 %vm177_vm1, %v4708_v6 }
 0x40a   : > { %7580 = vmatmul.msk.f32.gmra.mxu3 %vm177_vm1, %v4369_v8  ;;  %7614 = vmatmul.msk.f32.gmra.mxu0 %vm177_vm1, %v4711_v16 }
 0x40f   : > { %v9294_v42 = vpop.f32.mrf.mxu0 }
 0x410   : > { %7547 = vmatmul.msk.f32.gmra.mxu2 %vm177_vm1, %v4028_v22 }
 0x411   : > { %7512 = vmatmul.msk.f32.gmra.mxu1 %vm177_vm1, %v4709_v58 }
 0x412   : > { %7581 = vmatmul.msk.f32.gmra.mxu3 %vm177_vm1, %v4370_v21  ;;  %7615 = vmatmul.msk.f32.gmra.mxu0 %vm177_vm1, %v4712_v7 }
 0x413   : > { %v4162_v37 = vpop.f32.mrf.mxu2 }
 0x415   : > { %v4504_v27 = vpop.f32.mrf.mxu3 }
 0x416   : > { %v3884_v17 = vpop.f32.mrf.mxu1 }
 0x417   : > { %3980 = vst.msk [vmem:[#allocation3] sm:$0xff] %vm177_vm1, %v3884_v17  ;;  %v9301_v35 = vpop.f32.mrf.mxu0 }
 0x418   : > { %7548 = vmatmul.msk.f32.gmra.mxu2 %vm177_vm1, %v4029_v59 }
 0x419   : > { %7513 = vmatmul.msk.f32.gmra.mxu1 %vm177_vm1, %v4710_v14 }
 0x41a   : > { %7582 = vmatmul.msk.f32.gmra.mxu3 %vm177_vm1, %v4371_v32  ;;  %7616 = vmatmul.msk.f32.gmra.mxu0 %vm177_vm1, %v4713_v18 }
 0x41b   : > { %v4165_v1 = vpop.f32.mrf.mxu2 }
 0x41d   : > { %v4507_v54 = vpop.f32.mrf.mxu3 }
 0x41e   : > { %v4258_v60 = vld [vmem:[#allocation3] sm:$0xff]  ;;  %v3887_v25 = vpop.f32.mrf.mxu1 }
 0x41f   : > { %v4290_v31 = vadd.f32 %v4258_v60, %v4162_v37  ;;  %3981 = vst.msk [vmem:[#allocation3 + $0x8] sm:$0xff] %vm177_vm1, %v3887_v25  ;;  %v9308_v41 = vpop.f32.mrf.mxu0 }
 0x420   : > { %7549 = vmatmul.msk.f32.gmra.mxu2 %vm177_vm1, %v4030_v15  ;;  %v4034_v15 = vld [vmem:[#allocation2 + $0x109] sm:$0xff] }
 0x421   : > { %4322 = vst.msk [vmem:[#allocation3] sm:$0xff] %vm177_vm1, %v4290_v31  ;;  %7514 = vmatmul.msk.f32.gmra.mxu1 %vm177_vm1, %v4711_v16 }
 0x422   : > { %7583 = vmatmul.msk.f32.gmra.mxu3 %vm177_vm1, %v4372_v34  ;;  %7617 = vmatmul.msk.f32.gmra.mxu0 %vm177_vm1, %v4714_v3 }
 0x423   : > { %v4168_v29 = vpop.f32.mrf.mxu2 }
 0x425   : > { %v4510_v49 = vpop.f32.mrf.mxu3 }
 0x426   : > { %v4259_v53 = vld [vmem:[#allocation3 + $0x8] sm:$0xff]  ;;  %v3890_v40 = vpop.f32.mrf.mxu1 }
 0x427   : > { %v4291_v50 = vadd.f32 %v4259_v53, %v4165_v1  ;;  %3982 = vst.msk [vmem:[#allocation3 + $0x10] sm:$0xff] %vm177_vm1, %v3890_v40  ;;  %v9316_v0 = vpop.f32.mrf.mxu0 }
 0x428   : > { %v4600_v24 = vld [vmem:[#allocation3] sm:$0xff]  ;;  %7550 = vmatmul.msk.f32.gmra.mxu2 %vm177_vm1, %v4031_v2 }
 0x429   : > { %v4632_v47 = vadd.f32 %v4600_v24, %v4504_v27  ;;  %4323 = vst.msk [vmem:[#allocation3 + $0x8] sm:$0xff] %vm177_vm1, %v4291_v50  ;;  %7515 = vmatmul.msk.f32.gmra.mxu1 %vm177_vm1, %v4712_v7  ;;  %v4033_v7 = vld [vmem:[#allocation2 + $0xf9] sm:$0xff] }
 0x42a   : > { %7584 = vmatmul.msk.f32.gmra.mxu3 %vm177_vm1, %v4373_v13  ;;  %7618 = vmatmul.msk.f32.gmra.mxu0 %vm177_vm1, %v4715_v48  ;;  %v4375_v27 = vld [vmem:[#allocation2 + $0xfa] sm:$0xff] }
 0x42b   : > { %4664 = vst.msk [vmem:[#allocation3] sm:$0xff] %vm177_vm1, %v4632_v47  ;;  %v4171_v43 = vpop.f32.mrf.mxu2 }
 0x42d   : > { %v4513_v26 = vpop.f32.mrf.mxu3 }
 0x42e   : > { %v4260_v52 = vld [vmem:[#allocation3 + $0x10] sm:$0xff]  ;;  %v3893_v44 = vpop.f32.mrf.mxu1 }
 0x42f   : > { %v4292_v57 = vadd.f32 %v4260_v52, %v4168_v29  ;;  %3983 = vst.msk [vmem:[#allocation3 + $0x18] sm:$0xff] %vm177_vm1, %v3893_v44  ;;  %v9325_v56 = vpop.f32.mrf.mxu0 }
 0x430   : > { %v4601_v55 = vld [vmem:[#allocation3 + $0x8] sm:$0xff]  ;;  %7551 = vmatmul.msk.f32.gmra.mxu2 %vm177_vm1, %v4032_v38 }
 0x431   : > { %v4633_v6 = vadd.f32 %v4601_v55, %v4507_v54  ;;  %4324 = vst.msk [vmem:[#allocation3 + $0x10] sm:$0xff] %vm177_vm1, %v4292_v57  ;;  %7516 = vmatmul.msk.f32.gmra.mxu1 %vm177_vm1, %v4713_v18 }
 0x432   : > { %7585 = vmatmul.msk.f32.gmra.mxu3 %vm177_vm1, %v4374_v19  ;;  %7619 = vmatmul.msk.f32.gmra.mxu0 %vm177_vm1, %v4716_v39  ;;  %v4942_v9 = vld [vmem:[#allocation3] sm:$0xff] }
 0x433   : > { %4665 = vst.msk [vmem:[#allocation3 + $0x8] sm:$0xff] %vm177_vm1, %v4633_v6  ;;  %v4174_v58 = vpop.f32.mrf.mxu2  ;;  %v4974_v14 = vadd.f32 %v4942_v9, %v9294_v42  ;;  %v4717_v42 = vld [vmem:[#allocation2 + $0x110] sm:$0xff]  ;;  %v4036_v9 = vld [vmem:[#allocation2 + $0x121] sm:$0xff] }
 0x435   : > { %v4516_v11 = vpop.f32.mrf.mxu3  ;;  %5006 = vst.msk [vmem:[#allocation3] sm:$0xff] %vm177_vm1, %v4974_v14  ;;  %v4378_v14 = vld [vmem:[#allocation2 + $0x122] sm:$0xff] }
 0x436   : > { %v4261_v62 = vld [vmem:[#allocation3 + $0x18] sm:$0xff]  ;;  %v3896_v8 = vpop.f32.mrf.mxu1 }
 0x437   : > { %v4293_v16 = vadd.f32 %v4261_v62, %v4171_v43  ;;  %3984 = vst.msk [vmem:[#allocation3 + $0x20] sm:$0xff] %vm177_vm1, %v3896_v8  ;;  %v9335_v21 = vpop.f32.mrf.mxu0  ;;  %v4720_v62 = vld [vmem:[#allocation2 + $0x138] sm:$0xff] }
 0x438   : > { %v4602_v22 = vld [vmem:[#allocation3 + $0x10] sm:$0xff]  ;;  %7552 = vmatmul.msk.f32.gmra.mxu2 %vm177_vm1, %v4033_v7 }
 0x439   : > { %v4634_v37 = vadd.f32 %v4602_v22, %v4510_v49  ;;  %4325 = vst.msk [vmem:[#allocation3 + $0x18] sm:$0xff] %vm177_vm1, %v4293_v16  ;;  %7517 = vmatmul.msk.f32.gmra.mxu1 %vm177_vm1, %v4714_v3  ;;  %v4376_v3 = vld [vmem:[#allocation2 + $0x10a] sm:$0xff] }
 0x43a   : > { %7586 = vmatmul.msk.f32.gmra.mxu3 %vm177_vm1, %v4375_v27  ;;  %7620 = vmatmul.msk.f32.gmra.mxu0 %vm177_vm1, %v4717_v42  ;;  %v4943_v59 = vld [vmem:[#allocation3 + $0x8] sm:$0xff] }
 0x43b   : > { %4666 = vst.msk [vmem:[#allocation3 + $0x10] sm:$0xff] %vm177_vm1, %v4634_v37  ;;  %v4177_v17 = vpop.f32.mrf.mxu2  ;;  %v4975_v18 = vadd.f32 %v4943_v59, %v9301_v35  ;;  %v4718_v35 = vld [vmem:[#allocation2 + $0x120] sm:$0xff] }
 0x43d   : > { %v4519_v32 = vpop.f32.mrf.mxu3  ;;  %5007 = vst.msk [vmem:[#allocation3 + $0x8] sm:$0xff] %vm177_vm1, %v4975_v18  ;;  %v4379_v18 = vld [vmem:[#allocation2 + $0x12a] sm:$0xff] }
 0x43e   : > { %v4262_v1 = vld [vmem:[#allocation3 + $0x20] sm:$0xff]  ;;  %v3899_v54 = vpop.f32.mrf.mxu1 }
 0x43f   : > { %v4294_v60 = vadd.f32 %v4262_v1, %v4174_v58  ;;  %3985 = vst.msk [vmem:[#allocation3 + $0x28] sm:$0xff] %vm177_vm1, %v3899_v54  ;;  %v9346_v31 = vpop.f32.mrf.mxu0  ;;  %v4721_v1 = vld [vmem:[#allocation2 + $0x140] sm:$0xff] }
 0x440   : > { %v4603_v25 = vld [vmem:[#allocation3 + $0x18] sm:$0xff]  ;;  %7553 = vmatmul.msk.f32.gmra.mxu2 %vm177_vm1, %v4034_v15 }
 0x441   : > { %v4635_v34 = vadd.f32 %v4603_v25, %v4513_v26  ;;  %4326 = vst.msk [vmem:[#allocation3 + $0x20] sm:$0xff] %vm177_vm1, %v4294_v60  ;;  %7518 = vmatmul.msk.f32.gmra.mxu1 %vm177_vm1, %v4715_v48  ;;  %v4035_v48 = vld [vmem:[#allocation2 + $0x111] sm:$0xff] }
 0x442   : > { %7587 = vmatmul.msk.f32.gmra.mxu3 %vm177_vm1, %v4376_v3  ;;  %7621 = vmatmul.msk.f32.gmra.mxu0 %vm177_vm1, %v4718_v35  ;;  %v4944_v49 = vld [vmem:[#allocation3 + $0x10] sm:$0xff]  ;;  %v4377_v26 = vld [vmem:[#allocation2 + $0x112] sm:$0xff] }
 0x443   : > { %4667 = vst.msk [vmem:[#allocation3 + $0x18] sm:$0xff] %vm177_vm1, %v4635_v34  ;;  %v4180_v29 = vpop.f32.mrf.mxu2  ;;  %v4976_v40 = vadd.f32 %v4944_v49, %v9308_v41  ;;  %v4719_v41 = vld [vmem:[#allocation2 + $0x128] sm:$0xff]  ;;  %v4380_v49 = vld [vmem:[#allocation2 + $0x13a] sm:$0xff] }
 0x445   : > { %v4522_v53 = vpop.f32.mrf.mxu3  ;;  %5008 = vst.msk [vmem:[#allocation3 + $0x10] sm:$0xff] %vm177_vm1, %v4976_v40  ;;  %v4722_v40 = vld [vmem:[#allocation2 + $0x150] sm:$0xff] }
 0x446   : > { %v4263_v50 = vld [vmem:[#allocation3 + $0x28] sm:$0xff]  ;;  %v3902_v24 = vpop.f32.mrf.mxu1 }
 0x447   : > { %v4295_v2 = vadd.f32 %v4263_v50, %v4177_v17  ;;  %3986 = vst.msk [vmem:[#allocation3 + $0x30] sm:$0xff] %vm177_vm1, %v3902_v24  ;;  %v9357_v13 = vpop.f32.mrf.mxu0  ;;  %v4037_v17 = vld [vmem:[#allocation2 + $0x129] sm:$0xff]  ;;  %v7665_v24 = vld [vmem:[%s10486_s1 + $0x38] sm:$0xf] }
 0x448   : > { %v4604_v47 = vld [vmem:[#allocation3 + $0x20] sm:$0xff]  ;;  %7554 = vmatmul.msk.f32.gmra.mxu2 %vm177_vm1, %v4035_v48 }
 0x449   : > { %v4636_v43 = vadd.f32 %v4604_v47, %v4516_v11  ;;  %4327 = vst.msk [vmem:[#allocation3 + $0x28] sm:$0xff] %vm177_vm1, %v4295_v2  ;;  %7519 = vmatmul.msk.f32.gmra.mxu1 %vm177_vm1, %v4716_v39  ;;  %7666 = vmatpush.msk.msra.mxu2 %vm423_vm0, %v7665_v24 }
 0x44a   : > { %7588 = vmatmul.msk.f32.gmra.mxu3 %vm177_vm1, %v4377_v26  ;;  %7622 = vmatmul.msk.f32.gmra.mxu0 %vm177_vm1, %v4719_v41  ;;  %v4945_v38 = vld [vmem:[#allocation3 + $0x18] sm:$0xff] }
 0x44b   : > { %4668 = vst.msk [vmem:[#allocation3 + $0x20] sm:$0xff] %vm177_vm1, %v4636_v43  ;;  %v4183_v52 = vpop.f32.mrf.mxu2  ;;  %v4977_v19 = vadd.f32 %v4945_v38, %v9316_v0 }
 0x44d   : > { %v4525_v44 = vpop.f32.mrf.mxu3  ;;  %5009 = vst.msk [vmem:[#allocation3 + $0x18] sm:$0xff] %vm177_vm1, %v4977_v19 }
 0x44e   : > { %v4264_v57 = vld [vmem:[#allocation3 + $0x30] sm:$0xff]  ;;  %v3905_v55 = vpop.f32.mrf.mxu1 }
 0x44f   : > { %v4296_v6 = vadd.f32 %v4264_v57, %v4180_v29  ;;  %3987 = vst.msk [vmem:[#allocation3 + $0x38] sm:$0xff] %vm177_vm1, %v3905_v55  ;;  %v9368_v58 = vpop.f32.mrf.mxu0  ;;  %v4381_v57 = vld [vmem:[#allocation2 + $0x142] sm:$0xff]  ;;  %v4723_v55 = vld [vmem:[#allocation2 + $0x158] sm:$0xff] }
 0x450   : > { %v4605_v39 = vld [vmem:[#allocation3 + $0x28] sm:$0xff]  ;;  %7555 = vmatmul.msk.f32.gmra.mxu2 %vm177_vm1, %v4036_v9 }
 0x451   : > { %v4637_v11 = vadd.f32 %v4605_v39, %v4519_v32  ;;  %4328 = vst.msk [vmem:[#allocation3 + $0x30] sm:$0xff] %vm177_vm1, %v4296_v6  ;;  %7520 = vmatmul.msk.f32.gmra.mxu1 %vm177_vm1, %v4717_v42 }
 0x452   : > { %7589 = vmatmul.msk.f32.gmra.mxu3 %vm177_vm1, %v4378_v14  ;;  %7623 = vmatmul.msk.f32.gmra.mxu0 %vm177_vm1, %v4720_v62  ;;  %v4946_v37 = vld [vmem:[#allocation3 + $0x20] sm:$0xff] }
 0x453   : > { %4669 = vst.msk [vmem:[#allocation3 + $0x28] sm:$0xff] %vm177_vm1, %v4637_v11  ;;  %v4186_v0 = vpop.f32.mrf.mxu2  ;;  %v4978_v59 = vadd.f32 %v4946_v37, %v9325_v56 }
 0x455   : > { %v4528_v8 = vpop.f32.mrf.mxu3  ;;  %5010 = vst.msk [vmem:[#allocation3 + $0x20] sm:$0xff] %vm177_vm1, %v4978_v59 }
 0x456   : > { %v4265_v16 = vld [vmem:[#allocation3 + $0x38] sm:$0xff]  ;;  %v3908_v22 = vpop.f32.mrf.mxu1 }
 0x457   : > { %v4297_v7 = vadd.f32 %v4265_v16, %v4183_v52  ;;  %3988 = vst.msk [vmem:[#allocation3 + $0x40] sm:$0xff] %vm177_vm1, %v3908_v22  ;;  %v9378_v42 = vpop.f32.mrf.mxu0  ;;  %v4039_v52 = vld [vmem:[#allocation2 + $0x141] sm:$0xff] }
 0x458   : > { %v4606_v27 = vld [vmem:[#allocation3 + $0x30] sm:$0xff]  ;;  %7556 = vmatmul.msk.f32.gmra.mxu2 %vm177_vm1, %v4037_v17  ;;  %v4724_v22 = vld [vmem:[#allocation2 + $0x168] sm:$0xff] }
 0x459   : > { %v4638_v32 = vadd.f32 %v4606_v27, %v4522_v53  ;;  %4329 = vst.msk [vmem:[#allocation3 + $0x38] sm:$0xff] %vm177_vm1, %v4297_v7  ;;  %7521 = vmatmul.msk.f32.gmra.mxu1 %vm177_vm1, %v4718_v35  ;;  %v4038_v35 = vld [vmem:[#allocation2 + $0x139] sm:$0xff] }
 0x45a   : > { %7590 = vmatmul.msk.f32.gmra.mxu3 %vm177_vm1, %v4379_v18  ;;  %7624 = vmatmul.msk.f32.gmra.mxu0 %vm177_vm1, %v4721_v1  ;;  %v4947_v53 = vld [vmem:[#allocation3 + $0x28] sm:$0xff] }
 0x45b   : > { %4670 = vst.msk [vmem:[#allocation3 + $0x30] sm:$0xff] %vm177_vm1, %v4638_v32  ;;  %v4189_v54 = vpop.f32.mrf.mxu2  ;;  %v4979_v50 = vadd.f32 %v4947_v53, %v9335_v21  ;;  %v7699_v7 = vld [vmem:[%s10486_s1 + $0x3c] sm:$0xf] }
 0x45c   : > { %7700 = vmatpush.msk.msra.mxu3 %vm423_vm0, %v7699_v7 }
 0x45d   : > { %v4531_v60 = vpop.f32.mrf.mxu3  ;;  %5011 = vst.msk [vmem:[#allocation3 + $0x28] sm:$0xff] %vm177_vm1, %v4979_v50 }
 0x45e   : > { %v4266_v56 = vld [vmem:[#allocation3 + $0x40] sm:$0xff]  ;;  %v3911_v25 = vpop.f32.mrf.mxu1 }
 0x45f   : > { %v4298_v15 = vadd.f32 %v4266_v56, %v4186_v0  ;;  %3989 = vst.msk [vmem:[#allocation3 + $0x48] sm:$0xff] %vm177_vm1, %v3911_v25  ;;  %v9389_v3 = vpop.f32.mrf.mxu0  ;;  %v4041_v56 = vld [vmem:[#allocation2 + $0x159] sm:$0xff] }
 0x460   : > { %v4607_v34 = vld [vmem:[#allocation3 + $0x38] sm:$0xff]  ;;  %7557 = vmatmul.msk.f32.gmra.mxu2 %vm177_vm1, %v4038_v35 }
 0x461   : > { %v4639_v29 = vadd.f32 %v4607_v34, %v4525_v44  ;;  %4330 = vst.msk [vmem:[#allocation3 + $0x40] sm:$0xff] %vm177_vm1, %v4298_v15  ;;  %7522 = vmatmul.msk.f32.gmra.mxu1 %vm177_vm1, %v4719_v41  ;;  %v4383_v15 = vld [vmem:[#allocation2 + $0x15a] sm:$0xff] }
 0x462   : > { %7591 = vmatmul.msk.f32.gmra.mxu3 %vm177_vm1, %v4380_v49  ;;  %7625 = vmatmul.msk.f32.gmra.mxu0 %vm177_vm1, %v4722_v40  ;;  %v4948_v38 = vld [vmem:[#allocation3 + $0x30] sm:$0xff] }
 0x463   : > { %4671 = vst.msk [vmem:[#allocation3 + $0x38] sm:$0xff] %vm177_vm1, %v4639_v29  ;;  %v4192_v2 = vpop.f32.mrf.mxu2  ;;  %v4980_v6 = vadd.f32 %v4948_v38, %v9346_v31  ;;  %v4382_v31 = vld [vmem:[#allocation2 + $0x152] sm:$0xff] }
 0x465   : > { %v4534_v47 = vpop.f32.mrf.mxu3  ;;  %5012 = vst.msk [vmem:[#allocation3 + $0x30] sm:$0xff] %vm177_vm1, %v4980_v6 }
 0x466   : > { %v4267_v48 = vld [vmem:[#allocation3 + $0x48] sm:$0xff]  ;;  %v3914_v43 = vpop.f32.mrf.mxu1 }
 0x467   : > { %v4299_v26 = vadd.f32 %v4267_v48, %v4189_v54  ;;  %3990 = vst.msk [vmem:[#allocation3 + $0x50] sm:$0xff] %vm177_vm1, %v3914_v43  ;;  %v9404_v41 = vpop.f32.mrf.mxu0  ;;  %v4384_v43 = vld [vmem:[#allocation2 + $0x16a] sm:$0xff] }
 0x468   : > { %v4608_v21 = vld [vmem:[#allocation3 + $0x40] sm:$0xff]  ;;  %7558 = vmatmul.msk.f32.gmra.mxu2 %vm177_vm1, %v4039_v52 }
 0x469   : > { %v4640_v44 = vadd.f32 %v4608_v21, %v4528_v8  ;;  %4331 = vst.msk [vmem:[#allocation3 + $0x48] sm:$0xff] %vm177_vm1, %v4299_v26  ;;  %7523 = vmatmul.msk.f32.gmra.mxu1 %vm177_vm1, %v4720_v62  ;;  %v4040_v8 = vld [vmem:[#allocation2 + $0x151] sm:$0xff]  ;;  %v7733_v26 = vld [vmem:[%s10486_s1 + $0x40] sm:$0xf] }
 0x46a   : > { %7592 = vmatmul.msk.f32.gmra.mxu3 %vm177_vm1, %v4381_v57  ;;  %7626 = vmatmul.msk.f32.gmra.mxu0 %vm177_vm1, %v4723_v55  ;;  %v4949_v27 = vld [vmem:[#allocation3 + $0x38] sm:$0xff] }
 0x46b   : > { %4672 = vst.msk [vmem:[#allocation3 + $0x40] sm:$0xff] %vm177_vm1, %v4640_v44  ;;  %v4195_v19 = vpop.f32.mrf.mxu2  ;;  %v4981_v59 = vadd.f32 %v4949_v27, %v9357_v13  ;;  %v4725_v13 = vld [vmem:[#allocation2 + $0x170] sm:$0xff]  ;;  %7734 = vmatpush.msk.msra.mxu0 %vm423_vm0, %v7733_v26 }
 0x46d   : > { %v4537_v39 = vpop.f32.mrf.mxu3  ;;  %5013 = vst.msk [vmem:[#allocation3 + $0x38] sm:$0xff] %vm177_vm1, %v4981_v59 }
 0x46e   : > { %v4268_v9 = vld [vmem:[#allocation3 + $0x50] sm:$0xff]  ;;  %v3917_v11 = vpop.f32.mrf.mxu1 }
 0x46f   : > { %v4300_v14 = vadd.f32 %v4268_v9, %v4192_v2  ;;  %3991 = vst.msk [vmem:[#allocation3 + $0x58] sm:$0xff] %vm177_vm1, %v3917_v11  ;;  %v9415_v0 = vpop.f32.mrf.mxu0  ;;  %v4043_v9 = vld [vmem:[#allocation2 + $0x171] sm:$0xff] }
 0x470   : > { %v4609_v62 = vld [vmem:[#allocation3 + $0x48] sm:$0xff]  ;;  %7559 = vmatmul.msk.f32.gmra.mxu2 %vm177_vm1, %v4040_v8 }
 0x471   : > { %v4641_v16 = vadd.f32 %v4609_v62, %v4531_v60  ;;  %4332 = vst.msk [vmem:[#allocation3 + $0x50] sm:$0xff] %vm177_vm1, %v4300_v14  ;;  %7524 = vmatmul.msk.f32.gmra.mxu1 %vm177_vm1, %v4721_v1  ;;  %v4385_v14 = vld [vmem:[#allocation2 + $0x172] sm:$0xff]  ;;  %v4727_v62 = vld [vmem:[#allocation2 + $0x188] sm:$0xff] }
 0x472   : > { %7593 = vmatmul.msk.f32.gmra.mxu3 %vm177_vm1, %v4382_v31  ;;  %7627 = vmatmul.msk.f32.gmra.mxu0 %vm177_vm1, %v4724_v22  ;;  %v4950_v29 = vld [vmem:[#allocation3 + $0x40] sm:$0xff] }
 0x473   : > { %4673 = vst.msk [vmem:[#allocation3 + $0x48] sm:$0xff] %vm177_vm1, %v4641_v16  ;;  %v4198_v37 = vpop.f32.mrf.mxu2  ;;  %v4982_v50 = vadd.f32 %v4950_v29, %v9368_v58  ;;  %v4726_v58 = vld [vmem:[#allocation2 + $0x180] sm:$0xff] }
 0x475   : > { %v4540_v17 = vpop.f32.mrf.mxu3  ;;  %5014 = vst.msk [vmem:[#allocation3 + $0x40] sm:$0xff] %vm177_vm1, %v4982_v50 }
 0x476   : > { %v4269_v32 = vld [vmem:[#allocation3 + $0x58] sm:$0xff]  ;;  %v3920_v18 = vpop.f32.mrf.mxu1 }
 0x477   : > { %v4301_v1 = vadd.f32 %v4269_v32, %v4195_v19  ;;  %3992 = vst.msk [vmem:[#allocation3 + $0x60] sm:$0xff] %vm177_vm1, %v3920_v18  ;;  %v9429_v60 = vpop.f32.mrf.mxu0  ;;  %v6064_v18 = vld [vmem:[#allocation2 + $0x31] sm:$0xff] }
 0x478   : > { %v4610_v54 = vld [vmem:[#allocation3 + $0x50] sm:$0xff]  ;;  %7560 = vmatmul.msk.f32.gmra.mxu2 %vm177_vm1, %v4041_v56 }
 0x479   : > { %v4642_v25 = vadd.f32 %v4610_v54, %v4534_v47  ;;  %4333 = vst.msk [vmem:[#allocation3 + $0x58] sm:$0xff] %vm177_vm1, %v4301_v1  ;;  %7525 = vmatmul.msk.f32.gmra.mxu1 %vm177_vm1, %v4722_v40  ;;  %v4042_v47 = vld [vmem:[#allocation2 + $0x169] sm:$0xff] }
 0x47a   : > { %7594 = vmatmul.msk.f32.gmra.mxu3 %vm177_vm1, %v4383_v15  ;;  %7628 = vmatmul.msk.f32.gmra.mxu0 %vm177_vm1, %v4725_v13 }
 0x47b   : > { %4674 = vst.msk [vmem:[#allocation3 + $0x50] sm:$0xff] %vm177_vm1, %v4642_v25  ;;  %v4201_v34 = vpop.f32.mrf.mxu2 }
 0x47d   : > { %v4543_v35 = vpop.f32.mrf.mxu3 }
 0x47e   : > { %v4270_v49 = vld [vmem:[#allocation3 + $0x60] sm:$0xff]  ;;  %v3923_v53 = vpop.f32.mrf.mxu1 }
 0x47f   : > { %v4302_v24 = vadd.f32 %v4270_v49, %v4198_v37  ;;  %3993 = vst.msk [vmem:[#allocation3 + $0x68] sm:$0xff] %vm177_vm1, %v3923_v53  ;;  %v9440_v2 = vpop.f32.mrf.mxu0 }
 0x480   : > { %v4611_v40 = vld [vmem:[#allocation3 + $0x58] sm:$0xff]  ;;  %7561 = vmatmul.msk.f32.gmra.mxu2 %vm177_vm1, %v4042_v47 }
 0x481   : > { %v4643_v48 = vadd.f32 %v4611_v40, %v4537_v39  ;;  %4334 = vst.msk [vmem:[#allocation3 + $0x60] sm:$0xff] %vm177_vm1, %v4302_v24  ;;  %7526 = vmatmul.msk.f32.gmra.mxu1 %vm177_vm1, %v4723_v55  ;;  %v4951_v55 = vld [vmem:[#allocation3 + $0x48] sm:$0xff] }
 0x482   : > { %7595 = vmatmul.msk.f32.gmra.mxu3 %vm177_vm1, %v4384_v43  ;;  %7629 = vmatmul.msk.f32.gmra.mxu0 %vm177_vm1, %v4726_v58  ;;  %v4983_v6 = vadd.f32 %v4951_v55, %v9378_v42  ;;  %v7767_v42 = vld [vmem:[%s10486_s1 + $0x44] sm:$0xf] }
 0x483   : > { %4675 = vst.msk [vmem:[#allocation3 + $0x58] sm:$0xff] %vm177_vm1, %v4643_v48  ;;  %v4204_v21 = vpop.f32.mrf.mxu2  ;;  %7768 = vmatpush.msk.msra.mxu1 %vm423_vm0, %v7767_v42  ;;  %v4952_v37 = vld [vmem:[#allocation3 + $0x50] sm:$0xff] }
 0x484   : > { %5015 = vst.msk [vmem:[#allocation3 + $0x48] sm:$0xff] %vm177_vm1, %v4983_v6  ;;  %v4984_v59 = vadd.f32 %v4952_v37, %v9389_v3 }
 0x485   : > { %v4546_v52 = vpop.f32.mrf.mxu3 }
 0x486   : > { %v4271_v44 = vld [vmem:[#allocation3 + $0x68] sm:$0xff]  ;;  %v3926_v57 = vpop.f32.mrf.mxu1  ;;  %5016 = vst.msk [vmem:[#allocation3 + $0x50] sm:$0xff] %vm177_vm1, %v4984_v59 }
 0x487   : > { %v4303_v38 = vadd.f32 %v4271_v44, %v4201_v34  ;;  %3994 = vst.msk [vmem:[#allocation3 + $0x70] sm:$0xff] %vm177_vm1, %v3926_v57  ;;  %v9455_v39 = vpop.f32.mrf.mxu0 }
 0x488   : > { %v4612_v19 = vld [vmem:[#allocation3 + $0x60] sm:$0xff]  ;;  %7562 = vmatmul.msk.f32.gmra.mxu2 %vm177_vm1, %v4043_v9 }
 0x489   : > { %v4644_v11 = vadd.f32 %v4612_v19, %v4540_v17  ;;  %4335 = vst.msk [vmem:[#allocation3 + $0x68] sm:$0xff] %vm177_vm1, %v4303_v38  ;;  %7527 = vmatmul.msk.f32.gmra.mxu1 %vm177_vm1, %v4724_v22 }
 0x48a   : > { %7596 = vmatmul.msk.f32.gmra.mxu3 %vm177_vm1, %v4385_v14  ;;  %7630 = vmatmul.msk.f32.gmra.mxu0 %vm177_vm1, %v4727_v62 }
 0x48b   : > { %4676 = vst.msk [vmem:[#allocation3 + $0x60] sm:$0xff] %vm177_vm1, %v4644_v11  ;;  %v4207_v8 = vpop.f32.mrf.mxu2 }
 0x48d   : > { %v4549_v16 = vpop.f32.mrf.mxu3 }
 0x48e   : > { %v4272_v31 = vld [vmem:[#allocation3 + $0x70] sm:$0xff]  ;;  %v3929_v22 = vpop.f32.mrf.mxu1 }
 0x48f   : > { %v4304_v7 = vadd.f32 %v4272_v31, %v4204_v21  ;;  %3995 = vst.msk [vmem:[#allocation3 + $0x78] sm:$0xff] %vm177_vm1, %v3929_v22  ;;  %v9469_v17 = vpop.f32.mrf.mxu0  ;;  %v5042_v31 = vld [vmem:[#allocation2 + $0x49] sm:$0xff]  ;;  %v5385_v22 = vld [vmem:[#allocation2 + $0x52] sm:$0xff] }
 0x490   : > { %v4613_v27 = vld [vmem:[#allocation3 + $0x68] sm:$0xff]  ;;  %7667 = vmatmul.msk.f32.vlgmr.msra.gmra.mxu2 %vm177_vm1, %v9175_v10  ;;  %v4953_v10 = vld [vmem:[#allocation3 + $0x58] sm:$0xff] }
 0x491   : > { %v4645_v32 = vadd.f32 %v4613_v27, %v4543_v35  ;;  %4336 = vst.msk [vmem:[#allocation3 + $0x70] sm:$0xff] %vm177_vm1, %v4304_v7  ;;  %7528 = vmatmul.msk.f32.gmra.mxu1 %vm177_vm1, %v4725_v13  ;;  %v6065_v35 = vld [vmem:[#allocation2 + $0x39] sm:$0xff] }
 0x492   : > { %7701 = vmatmul.msk.f32.vlgmr.msra.gmra.mxu3 %vm177_vm1, %v9180_v23  ;;  %7735 = vmatmul.msk.f32.vlgmr.msra.gmra.mxu0 %vm177_vm1, %v6064_v18  ;;  %v4985_v23 = vadd.f32 %v4953_v10, %v9404_v41 }
 0x493   : > { %4677 = vst.msk [vmem:[#allocation3 + $0x68] sm:$0xff] %vm177_vm1, %v4645_v32  ;;  %v4210_v1 = vpop.f32.mrf.mxu2 }
 0x494   : > { %5017 = vst.msk [vmem:[#allocation3 + $0x58] sm:$0xff] %vm177_vm1, %v4985_v23 }
 0x495   : > { %v4552_v3 = vpop.f32.mrf.mxu3 }
 0x496   : > { %v4273_v54 = vld [vmem:[#allocation3 + $0x78] sm:$0xff]  ;;  %v3932_v56 = vpop.f32.mrf.mxu1 }
 0x497   : > { %v4305_v25 = vadd.f32 %v4273_v54, %v4207_v8  ;;  %3996 = vst.msk [vmem:[#allocation3 + $0x80] sm:$0xff] %vm177_vm1, %v3932_v56  ;;  %v9482_v13 = vpop.f32.mrf.mxu0 }
 0x498   : > { %v4614_v15 = vld [vmem:[#allocation3 + $0x70] sm:$0xff]  ;;  %7668 = vmatmul.msk.f32.gmra.mxu2 %vm177_vm1, %v9197_v45 }
 0x499   : > { %v4646_v34 = vadd.f32 %v4614_v15, %v4546_v52  ;;  %4337 = vst.msk [vmem:[#allocation3 + $0x78] sm:$0xff] %vm177_vm1, %v4305_v25  ;;  %7633 = vmatmul.msk.f32.vlgmr.msrb.gmra.mxu1 %vm177_vm1, %v9169_v51  ;;  %v5043_v25 = vld [vmem:[#allocation2 + $0x51] sm:$0xff]  ;;  %v5386_v15 = vld [vmem:[#allocation2 + $0x62] sm:$0xff] }
 0x49a   : > { %7702 = vmatmul.msk.f32.gmra.mxu3 %vm177_vm1, %v9202_v33  ;;  %7736 = vmatmul.msk.f32.gmra.mxu0 %vm177_vm1, %v6065_v35  ;;  %v4954_v33 = vld [vmem:[#allocation3 + $0x60] sm:$0xff] }
 0x49b   : > { %4678 = vst.msk [vmem:[#allocation3 + $0x70] sm:$0xff] %vm177_vm1, %v4646_v34  ;;  %v4213_v29 = vpop.f32.mrf.mxu2  ;;  %v4986_v40 = vadd.f32 %v4954_v33, %v9415_v0  ;;  %v6070_v34 = vld [vmem:[#allocation2 + $0x79] sm:$0xff]  ;;  %v5044_v33 = vld [vmem:[#allocation2 + $0x61] sm:$0xff] }
 0x49d   : > { %v4555_v49 = vpop.f32.mrf.mxu3  ;;  %5018 = vst.msk [vmem:[#allocation3 + $0x60] sm:$0xff] %vm177_vm1, %v4986_v40  ;;  %v5387_v40 = vld [vmem:[#allocation2 + $0x6a] sm:$0xff] }
 0x49e   : > { %v4274_v53 = vld [vmem:[#allocation3 + $0x80] sm:$0xff]  ;;  %v3935_v50 = vpop.f32.mrf.mxu1 }
 0x49f   : > { %v4306_v51 = vadd.f32 %v4274_v53, %v4210_v1  ;;  %3997 = vst.msk [vmem:[#allocation3 + $0x88] sm:$0xff] %vm177_vm1, %v3935_v50  ;;  %v9496_v24 = vpop.f32.mrf.mxu0 }
 0x4a0   : > { %v4615_v45 = vld [vmem:[#allocation3 + $0x78] sm:$0xff]  ;;  %7669 = vmatmul.msk.f32.gmra.mxu2 %vm177_vm1, %v9211_v12 }
 0x4a1   : > { %v4647_v41 = vadd.f32 %v4615_v45, %v4549_v16  ;;  %4338 = vst.msk [vmem:[#allocation3 + $0x80] sm:$0xff] %vm177_vm1, %v4306_v51  ;;  %7634 = vmatmul.msk.f32.gmra.mxu1 %vm177_vm1, %v9190_v30 }
 0x4a2   : > { %7703 = vmatmul.msk.f32.gmra.mxu3 %vm177_vm1, %v9215_v63  ;;  %7737 = vmatmul.msk.f32.gmra.mxu0 %vm177_vm1, %v9241_v36  ;;  %v4955_v36 = vld [vmem:[#allocation3 + $0x68] sm:$0xff] }
 0x4a3   : > { %4679 = vst.msk [vmem:[#allocation3 + $0x78] sm:$0xff] %vm177_vm1, %v4647_v41  ;;  %v4216_v47 = vpop.f32.mrf.mxu2  ;;  %v4987_v0 = vadd.f32 %v4955_v36, %v9429_v60  ;;  %v4956_v60 = vld [vmem:[#allocation3 + $0x70] sm:$0xff] }
 0x4a4   : > { %v4988_v19 = vadd.f32 %v4956_v60, %v9440_v2  ;;  %v6069_v2 = vld [vmem:[#allocation2 + $0x69] sm:$0xff] }
 0x4a5   : > { %v4558_v48 = vpop.f32.mrf.mxu3  ;;  %5019 = vst.msk [vmem:[#allocation3 + $0x68] sm:$0xff] %vm177_vm1, %v4987_v0 }
 0x4a6   : > { %v4275_v43 = vld [vmem:[#allocation3 + $0x88] sm:$0xff]  ;;  %v3938_v30 = vpop.f32.mrf.mxu1  ;;  %5020 = vst.msk [vmem:[#allocation3 + $0x70] sm:$0xff] %vm177_vm1, %v4988_v19 }
 0x4a7   : > { %v4307_v58 = vadd.f32 %v4275_v43, %v4213_v29  ;;  %3998 = vst.msk [vmem:[#allocation3 + $0x90] sm:$0xff] %vm177_vm1, %v3938_v30  ;;  %v9511_v26 = vpop.f32.mrf.mxu0 }
 0x4a8   : > { %v4616_v12 = vld [vmem:[#allocation3 + $0x80] sm:$0xff]  ;;  %7670 = vmatmul.msk.f32.gmra.mxu2 %vm177_vm1, %v9231_v4 }
 0x4a9   : > { %v4648_v63 = vadd.f32 %v4616_v12, %v4552_v3  ;;  %4339 = vst.msk [vmem:[#allocation3 + $0x88] sm:$0xff] %vm177_vm1, %v4307_v58  ;;  %7635 = vmatmul.msk.f32.gmra.mxu1 %vm177_vm1, %v6064_v18 }
 0x4aa   : > { %7704 = vmatmul.msk.f32.gmra.mxu3 %vm177_vm1, %v9235_v20  ;;  %7738 = vmatmul.msk.f32.gmra.mxu0 %vm177_vm1, %v9250_v46  ;;  %v5384_v20 = vld [vmem:[#allocation2 + $0x4a] sm:$0xff]  ;;  %v5726_v46 = vld [vmem:[#allocation2 + $0x60] sm:$0xff] }
 0x4ab   : > { %4680 = vst.msk [vmem:[#allocation3 + $0x80] sm:$0xff] %vm177_vm1, %v4648_v63  ;;  %v4219_v21 = vpop.f32.mrf.mxu2  ;;  %v4957_v37 = vld [vmem:[#allocation3 + $0x78] sm:$0xff] }
 0x4ac   : > { %v4989_v59 = vadd.f32 %v4957_v37, %v9455_v39  ;;  %v5728_v39 = vld [vmem:[#allocation2 + $0x78] sm:$0xff] }
 0x4ad   : > { %v4561_v52 = vpop.f32.mrf.mxu3 }
 0x4ae   : > { %v4276_v44 = vld [vmem:[#allocation3 + $0x90] sm:$0xff]  ;;  %v3941_v57 = vpop.f32.mrf.mxu1  ;;  %5021 = vst.msk [vmem:[#allocation3 + $0x78] sm:$0xff] %vm177_vm1, %v4989_v59 }
 0x4af   : > { %v4308_v55 = vadd.f32 %v4276_v44, %v4216_v47  ;;  %3999 = vst.msk [vmem:[#allocation3 + $0x98] sm:$0xff] %vm177_vm1, %v3941_v57  ;;  %v9525_v38 = vpop.f32.mrf.mxu0  ;;  %v5388_v44 = vld [vmem:[#allocation2 + $0x7a] sm:$0xff] }
 0x4b0   : > { %v4617_v4 = vld [vmem:[#allocation3 + $0x88] sm:$0xff]  ;;  %7671 = vmatmul.msk.f32.gmra.mxu2 %vm177_vm1, %v5384_v20 }
 0x4b1   : > { %v4649_v6 = vadd.f32 %v4617_v4, %v4555_v49  ;;  %4340 = vst.msk [vmem:[#allocation3 + $0x90] sm:$0xff] %vm177_vm1, %v4308_v55  ;;  %7636 = vmatmul.msk.f32.gmra.mxu1 %vm177_vm1, %v6065_v35  ;;  %v6072_v55 = vld [vmem:[#allocation2 + $0x91] sm:$0xff] }
 0x4b2   : > { %7705 = vmatmul.msk.f32.gmra.mxu3 %vm177_vm1, %v5726_v46  ;;  %7739 = vmatmul.msk.f32.gmra.mxu0 %vm177_vm1, %v9258_v5  ;;  %v5727_v5 = vld [vmem:[#allocation2 + $0x68] sm:$0xff]  ;;  %v4958_v23 = vld [vmem:[#allocation3 + $0x80] sm:$0xff] }
 0x4b3   : > { %4681 = vst.msk [vmem:[#allocation3 + $0x88] sm:$0xff] %vm177_vm1, %v4649_v6  ;;  %v4222_v9 = vpop.f32.mrf.mxu2  ;;  %v4990_v29 = vadd.f32 %v4958_v23, %v9469_v17  ;;  %v5729_v17 = vld [vmem:[#allocation2 + $0x80] sm:$0xff] }
 0x4b5   : > { %v4564_v11 = vpop.f32.mrf.mxu3  ;;  %5022 = vst.msk [vmem:[#allocation3 + $0x80] sm:$0xff] %vm177_vm1, %v4990_v29 }
 0x4b6   : > { %v4277_v14 = vld [vmem:[#allocation3 + $0x98] sm:$0xff]  ;;  %v3944_v62 = vpop.f32.mrf.mxu1 }
 0x4b7   : > { %v4309_v42 = vadd.f32 %v4277_v14, %v4219_v21  ;;  %4000 = vst.msk [vmem:[#allocation3 + $0xa0] sm:$0xff] %vm177_vm1, %v3944_v62  ;;  %v9537_v16 = vpop.f32.mrf.mxu0  ;;  %v5389_v62 = vld [vmem:[#allocation2 + $0x82] sm:$0xff] }
 0x4b8   : > { %v4618_v8 = vld [vmem:[#allocation3 + $0x90] sm:$0xff]  ;;  %7672 = vmatmul.msk.f32.gmra.mxu2 %vm177_vm1, %v5385_v22 }
 0x4b9   : > { %v4650_v7 = vadd.f32 %v4618_v8, %v4558_v48  ;;  %4341 = vst.msk [vmem:[#allocation3 + $0x98] sm:$0xff] %vm177_vm1, %v4309_v42  ;;  %7637 = vmatmul.msk.f32.gmra.mxu1 %vm177_vm1, %v5042_v31  ;;  %v6071_v48 = vld [vmem:[#allocation2 + $0x81] sm:$0xff]  ;;  %v6073_v8 = vld [vmem:[#allocation2 + $0x99] sm:$0xff] }
 0x4ba   : > { %7706 = vmatmul.msk.f32.gmra.mxu3 %vm177_vm1, %v5727_v5  ;;  %7740 = vmatmul.msk.f32.gmra.mxu0 %vm177_vm1, %v6069_v2  ;;  %v4959_v43 = vld [vmem:[#allocation3 + $0x88] sm:$0xff] }
 0x4bb   : > { %4682 = vst.msk [vmem:[#allocation3 + $0x90] sm:$0xff] %vm177_vm1, %v4650_v7  ;;  %v4225_v27 = vpop.f32.mrf.mxu2  ;;  %v4991_v58 = vadd.f32 %v4959_v43, %v9482_v13  ;;  %v5730_v13 = vld [vmem:[#allocation2 + $0x90] sm:$0xff] }
 0x4bd   : > { %v4567_v32 = vpop.f32.mrf.mxu3  ;;  %5023 = vst.msk [vmem:[#allocation3 + $0x88] sm:$0xff] %vm177_vm1, %v4991_v58  ;;  %v5392_v58 = vld [vmem:[#allocation2 + $0xaa] sm:$0xff] }
 0x4be   : > { %v4278_v18 = vld [vmem:[#allocation3 + $0xa0] sm:$0xff]  ;;  %v3947_v1 = vpop.f32.mrf.mxu1 }
 0x4bf   : > { %v4310_v3 = vadd.f32 %v4278_v18, %v4222_v9  ;;  %4001 = vst.msk [vmem:[#allocation3 + $0xa8] sm:$0xff] %vm177_vm1, %v3947_v1  ;;  %v9548_v56 = vpop.f32.mrf.mxu0  ;;  %v5390_v18 = vld [vmem:[#allocation2 + $0x92] sm:$0xff] }
 0x4c0   : > { %v4619_v54 = vld [vmem:[#allocation3 + $0x98] sm:$0xff]  ;;  %7673 = vmatmul.msk.f32.gmra.mxu2 %vm177_vm1, %v5386_v15 }
 0x4c1   : > { %v4651_v10 = vadd.f32 %v4619_v54, %v4561_v52  ;;  %4342 = vst.msk [vmem:[#allocation3 + $0xa0] sm:$0xff] %vm177_vm1, %v4310_v3  ;;  %7638 = vmatmul.msk.f32.gmra.mxu1 %vm177_vm1, %v5043_v25  ;;  %v5732_v3 = vld [vmem:[#allocation2 + $0xa8] sm:$0xff] }
 0x4c2   : > { %7707 = vmatmul.msk.f32.gmra.mxu3 %vm177_vm1, %v5728_v39  ;;  %7741 = vmatmul.msk.f32.gmra.mxu0 %vm177_vm1, %v6070_v34  ;;  %v4960_v4 = vld [vmem:[#allocation3 + $0x90] sm:$0xff] }
 0x4c3   : > { %4683 = vst.msk [vmem:[#allocation3 + $0x98] sm:$0xff] %vm177_vm1, %v4651_v10  ;;  %v4228_v35 = vpop.f32.mrf.mxu2  ;;  %v4992_v6 = vadd.f32 %v4960_v4, %v9496_v24  ;;  %v5731_v24 = vld [vmem:[#allocation2 + $0x98] sm:$0xff] }
 0x4c5   : > { %v4570_v49 = vpop.f32.mrf.mxu3  ;;  %5024 = vst.msk [vmem:[#allocation3 + $0x90] sm:$0xff] %vm177_vm1, %v4992_v6  ;;  %v5393_v6 = vld [vmem:[#allocation2 + $0xb2] sm:$0xff] }
 0x4c6   : > { %v4279_v53 = vld [vmem:[#allocation3 + $0xa8] sm:$0xff]  ;;  %v3950_v50 = vpop.f32.mrf.mxu1 }
 0x4c7   : > { %v4311_v51 = vadd.f32 %v4279_v53, %v4225_v27  ;;  %4002 = vst.msk [vmem:[#allocation3 + $0xb0] sm:$0xff] %vm177_vm1, %v3950_v50  ;;  %v9559_v41 = vpop.f32.mrf.mxu0  ;;  %v5733_v50 = vld [vmem:[#allocation2 + $0xb0] sm:$0xff] }
 0x4c8   : > { %v4620_v45 = vld [vmem:[#allocation3 + $0xa0] sm:$0xff]  ;;  %7674 = vmatmul.msk.f32.gmra.mxu2 %vm177_vm1, %v5387_v40 }
 0x4c9   : > { %v4652_v47 = vadd.f32 %v4620_v45, %v4564_v11  ;;  %4343 = vst.msk [vmem:[#allocation3 + $0xa8] sm:$0xff] %vm177_vm1, %v4311_v51  ;;  %7639 = vmatmul.msk.f32.gmra.mxu1 %vm177_vm1, %v5044_v33 }
 0x4ca   : > { %7708 = vmatmul.msk.f32.gmra.mxu3 %vm177_vm1, %v5729_v17  ;;  %7742 = vmatmul.msk.f32.gmra.mxu0 %vm177_vm1, %v6071_v48  ;;  %v4961_v22 = vld [vmem:[#allocation3 + $0x98] sm:$0xff] }
 0x4cb   : > { %4684 = vst.msk [vmem:[#allocation3 + $0xa0] sm:$0xff] %vm177_vm1, %v4652_v47  ;;  %v4231_v30 = vpop.f32.mrf.mxu2  ;;  %v4993_v5 = vadd.f32 %v4961_v22, %v9511_v26  ;;  %v6074_v26 = vld [vmem:[#allocation2 + $0xa9] sm:$0xff] }
 0x4cd   : > { %v4573_v12 = vpop.f32.mrf.mxu3  ;;  %5025 = vst.msk [vmem:[#allocation3 + $0x98] sm:$0xff] %vm177_vm1, %v4993_v5 }
 0x4ce   : > { %v4280_v63 = vld [vmem:[#allocation3 + $0xb0] sm:$0xff]  ;;  %v3953_v36 = vpop.f32.mrf.mxu1 }
 0x4cf   : > { %v4312_v0 = vadd.f32 %v4280_v63, %v4228_v35  ;;  %4003 = vst.msk [vmem:[#allocation3 + $0xb8] sm:$0xff] %vm177_vm1, %v3953_v36  ;;  %v9570_v52 = vpop.f32.mrf.mxu0  ;;  %v5734_v63 = vld [vmem:[#allocation2 + $0xc0] sm:$0xff] }
 0x4d0   : > { %v4621_v21 = vld [vmem:[#allocation3 + $0xa8] sm:$0xff]  ;;  %7675 = vmatmul.msk.f32.gmra.mxu2 %vm177_vm1, %v5388_v44 }
 0x4d1   : > { %v4653_v57 = vadd.f32 %v4621_v21, %v4567_v32  ;;  %4344 = vst.msk [vmem:[#allocation3 + $0xb0] sm:$0xff] %vm177_vm1, %v4312_v0  ;;  %7640 = vmatmul.msk.f32.gmra.mxu1 %vm177_vm1, %v6069_v2 }
 0x4d2   : > { %7709 = vmatmul.msk.f32.gmra.mxu3 %vm177_vm1, %v5730_v13  ;;  %7743 = vmatmul.msk.f32.gmra.mxu0 %vm177_vm1, %v6072_v55  ;;  %v4962_v25 = vld [vmem:[#allocation3 + $0xa0] sm:$0xff] }
 0x4d3   : > { %4685 = vst.msk [vmem:[#allocation3 + $0xa8] sm:$0xff] %vm177_vm1, %v4653_v57  ;;  %v4234_v20 = vpop.f32.mrf.mxu2  ;;  %v4994_v10 = vadd.f32 %v4962_v25, %v9525_v38  ;;  %v6075_v38 = vld [vmem:[#allocation2 + $0xb1] sm:$0xff] }
 0x4d4   : > { %v5395_v25 = vld [vmem:[#allocation2 + $0xca] sm:$0xff] }
 0x4d5   : > { %v4576_v46 = vpop.f32.mrf.mxu3  ;;  %5026 = vst.msk [vmem:[#allocation3 + $0xa0] sm:$0xff] %vm177_vm1, %v4994_v10 }
 0x4d6   : > { %v4281_v60 = vld [vmem:[#allocation3 + $0xb8] sm:$0xff]  ;;  %v3956_v19 = vpop.f32.mrf.mxu1 }
 0x4d7   : > { %v4313_v9 = vadd.f32 %v4281_v60, %v4231_v30  ;;  %4004 = vst.msk [vmem:[#allocation3 + $0xc0] sm:$0xff] %vm177_vm1, %v3956_v19  ;;  %v9581_v14 = vpop.f32.mrf.mxu0  ;;  %v5735_v60 = vld [vmem:[#allocation2 + $0xc8] sm:$0xff] }
 0x4d8   : > { %v4622_v11 = vld [vmem:[#allocation3 + $0xb0] sm:$0xff]  ;;  %7676 = vmatmul.msk.f32.gmra.mxu2 %vm177_vm1, %v5389_v62 }
 0x4d9   : > { %v4654_v42 = vadd.f32 %v4622_v11, %v4570_v49  ;;  %4345 = vst.msk [vmem:[#allocation3 + $0xb8] sm:$0xff] %vm177_vm1, %v4313_v9  ;;  %7641 = vmatmul.msk.f32.gmra.mxu1 %vm177_vm1, %v6070_v34  ;;  %v5391_v49 = vld [vmem:[#allocation2 + $0x9a] sm:$0xff] }
 0x4da   : > { %7710 = vmatmul.msk.f32.gmra.mxu3 %vm177_vm1, %v5731_v24  ;;  %7744 = vmatmul.msk.f32.gmra.mxu0 %vm177_vm1, %v6073_v8  ;;  %v4963_v45 = vld [vmem:[#allocation3 + $0xa8] sm:$0xff] }
 0x4db   : > { %4686 = vst.msk [vmem:[#allocation3 + $0xb0] sm:$0xff] %vm177_vm1, %v4654_v42  ;;  %v4237_v31 = vpop.f32.mrf.mxu2  ;;  %v4995_v40 = vadd.f32 %v4963_v45, %v9537_v16  ;;  %v6076_v16 = vld [vmem:[#allocation2 + $0xc1] sm:$0xff] }
 0x4dc   : > { %v5396_v45 = vld [vmem:[#allocation2 + $0xda] sm:$0xff] }
 0x4dd   : > { %v4579_v7 = vpop.f32.mrf.mxu3  ;;  %5027 = vst.msk [vmem:[#allocation3 + $0xa8] sm:$0xff] %vm177_vm1, %v4995_v40  ;;  %v5738_v40 = vld [vmem:[#allocation2 + $0xf0] sm:$0xff] }
 0x4de   : > { %v4282_v2 = vld [vmem:[#allocation3 + $0xc0] sm:$0xff]  ;;  %v3959_v37 = vpop.f32.mrf.mxu1 }
 0x4df   : > { %v4314_v27 = vadd.f32 %v4282_v2, %v4234_v20  ;;  %4005 = vst.msk [vmem:[#allocation3 + $0xc8] sm:$0xff] %vm177_vm1, %v3959_v37  ;;  %v9591_v32 = vpop.f32.mrf.mxu0  ;;  %v5736_v2 = vld [vmem:[#allocation2 + $0xd8] sm:$0xff] }
 0x4e0   : > { %v4623_v59 = vld [vmem:[#allocation3 + $0xb8] sm:$0xff]  ;;  %7677 = vmatmul.msk.f32.gmra.mxu2 %vm177_vm1, %v5390_v18 }
 0x4e1   : > { %v4655_v1 = vadd.f32 %v4623_v59, %v4573_v12  ;;  %4346 = vst.msk [vmem:[#allocation3 + $0xc0] sm:$0xff] %vm177_vm1, %v4314_v27  ;;  %7642 = vmatmul.msk.f32.gmra.mxu1 %vm177_vm1, %v6071_v48 }
 0x4e2   : > { %7711 = vmatmul.msk.f32.gmra.mxu3 %vm177_vm1, %v5732_v3  ;;  %7745 = vmatmul.msk.f32.gmra.mxu0 %vm177_vm1, %v6074_v26  ;;  %v4964_v0 = vld [vmem:[#allocation3 + $0xb0] sm:$0xff] }
 0x4e3   : > { %4687 = vst.msk [vmem:[#allocation3 + $0xb8] sm:$0xff] %vm177_vm1, %v4655_v1  ;;  %v4240_v54 = vpop.f32.mrf.mxu2  ;;  %v4996_v44 = vadd.f32 %v4964_v0, %v9548_v56  ;;  %v6077_v56 = vld [vmem:[#allocation2 + $0xc9] sm:$0xff] }
 0x4e5   : > { %v4582_v15 = vpop.f32.mrf.mxu3  ;;  %5028 = vst.msk [vmem:[#allocation3 + $0xb0] sm:$0xff] %vm177_vm1, %v4996_v44 }
 0x4e6   : > { %v4283_v39 = vld [vmem:[#allocation3 + $0xc8] sm:$0xff]  ;;  %v3962_v34 = vpop.f32.mrf.mxu1 }
 0x4e7   : > { %v4315_v23 = vadd.f32 %v4283_v39, %v4237_v31  ;;  %4006 = vst.msk [vmem:[#allocation3 + $0xd0] sm:$0xff] %vm177_vm1, %v3962_v34  ;;  %v9602_v29 = vpop.f32.mrf.mxu0  ;;  %v5737_v39 = vld [vmem:[#allocation2 + $0xe0] sm:$0xff] }
 0x4e8   : > { %v4624_v35 = vld [vmem:[#allocation3 + $0xc0] sm:$0xff]  ;;  %7678 = vmatmul.msk.f32.gmra.mxu2 %vm177_vm1, %v5391_v49 }
 0x4e9   : > { %v4656_v53 = vadd.f32 %v4624_v35, %v4576_v46  ;;  %4347 = vst.msk [vmem:[#allocation3 + $0xc8] sm:$0xff] %vm177_vm1, %v4315_v23  ;;  %7643 = vmatmul.msk.f32.gmra.mxu1 %vm177_vm1, %v6072_v55 }
 0x4ea   : > { %7712 = vmatmul.msk.f32.gmra.mxu3 %vm177_vm1, %v5733_v50  ;;  %7746 = vmatmul.msk.f32.gmra.mxu0 %vm177_vm1, %v6075_v38  ;;  %v4965_v11 = vld [vmem:[#allocation3 + $0xb8] sm:$0xff] }
 0x4eb   : > { %4688 = vst.msk [vmem:[#allocation3 + $0xc0] sm:$0xff] %vm177_vm1, %v4656_v53  ;;  %v4243_v51 = vpop.f32.mrf.mxu2  ;;  %v4997_v24 = vadd.f32 %v4965_v11, %v9559_v41  ;;  %v6078_v41 = vld [vmem:[#allocation2 + $0xd9] sm:$0xff] }
 0x4ed   : > { %v4585_v33 = vpop.f32.mrf.mxu3  ;;  %5029 = vst.msk [vmem:[#allocation3 + $0xb8] sm:$0xff] %vm177_vm1, %v4997_v24 }
 0x4ee   : > { %v4284_v47 = vld [vmem:[#allocation3 + $0xd0] sm:$0xff]  ;;  %v3965_v17 = vpop.f32.mrf.mxu1 }
 0x4ef   : > { %v4316_v48 = vadd.f32 %v4284_v47, %v4240_v54  ;;  %4007 = vst.msk [vmem:[#allocation3 + $0xd8] sm:$0xff] %vm177_vm1, %v3965_v17  ;;  %v9613_v30 = vpop.f32.mrf.mxu0  ;;  %v6080_v47 = vld [vmem:[#allocation2 + $0xf1] sm:$0xff] }
 0x4f0   : > { %v4625_v43 = vld [vmem:[#allocation3 + $0xc8] sm:$0xff]  ;;  %7679 = vmatmul.msk.f32.gmra.mxu2 %vm177_vm1, %v5392_v58 }
 0x4f1   : > { %v4657_v12 = vadd.f32 %v4625_v43, %v4579_v7  ;;  %4348 = vst.msk [vmem:[#allocation3 + $0xd0] sm:$0xff] %vm177_vm1, %v4316_v48  ;;  %7644 = vmatmul.msk.f32.gmra.mxu1 %vm177_vm1, %v6073_v8  ;;  %v5394_v7 = vld [vmem:[#allocation2 + $0xc2] sm:$0xff] }
 0x4f2   : > { %7713 = vmatmul.msk.f32.gmra.mxu3 %vm177_vm1, %v5734_v63  ;;  %7747 = vmatmul.msk.f32.gmra.mxu0 %vm177_vm1, %v6076_v16  ;;  %v4966_v59 = vld [vmem:[#allocation3 + $0xc0] sm:$0xff] }
 0x4f3   : > { %4689 = vst.msk [vmem:[#allocation3 + $0xc8] sm:$0xff] %vm177_vm1, %v4657_v12  ;;  %v4246_v36 = vpop.f32.mrf.mxu2  ;;  %v4998_v3 = vadd.f32 %v4966_v59, %v9570_v52  ;;  %v6079_v52 = vld [vmem:[#allocation2 + $0xe1] sm:$0xff]  ;;  %v5284_v12 = vld [vmem:[#allocation3] sm:$0xff] }
 0x4f5   : > { %v4588_v21 = vpop.f32.mrf.mxu3  ;;  %5030 = vst.msk [vmem:[#allocation3 + $0xc0] sm:$0xff] %vm177_vm1, %v4998_v3  ;;  %v5399_v3 = vld [vmem:[#allocation2 + $0xfa] sm:$0xff] }
 0x4f6   : > { %v4285_v57 = vld [vmem:[#allocation3 + $0xd8] sm:$0xff]  ;;  %v3968_v13 = vpop.f32.mrf.mxu1 }
 0x4f7   : > { %v4317_v55 = vadd.f32 %v4285_v57, %v4243_v51  ;;  %4008 = vst.msk [vmem:[#allocation3 + $0xe0] sm:$0xff] %vm177_vm1, %v3968_v13  ;;  %v9624_v20 = vpop.f32.mrf.mxu0  ;;  %v5739_v13 = vld [vmem:[#allocation2 + $0xf8] sm:$0xff] }
 0x4f8   : > { %v4626_v4 = vld [vmem:[#allocation3 + $0xd0] sm:$0xff]  ;;  %7680 = vmatmul.msk.f32.gmra.mxu2 %vm177_vm1, %v5393_v6 }
 0x4f9   : > { %v4658_v46 = vadd.f32 %v4626_v4, %v4582_v15  ;;  %4349 = vst.msk [vmem:[#allocation3 + $0xd8] sm:$0xff] %vm177_vm1, %v4317_v55  ;;  %7645 = vmatmul.msk.f32.gmra.mxu1 %vm177_vm1, %v6074_v26  ;;  %v6081_v55 = vld [vmem:[#allocation2 + $0xf9] sm:$0xff] }
 0x4fa   : > { %7714 = vmatmul.msk.f32.gmra.mxu3 %vm177_vm1, %v5735_v60  ;;  %7748 = vmatmul.msk.f32.gmra.mxu0 %vm177_vm1, %v6077_v56  ;;  %v4967_v53 = vld [vmem:[#allocation3 + $0xc8] sm:$0xff] }
 0x4fb   : > { %4690 = vst.msk [vmem:[#allocation3 + $0xd0] sm:$0xff] %vm177_vm1, %v4658_v46  ;;  %v4249_v19 = vpop.f32.mrf.mxu2  ;;  %v5285_v60 = vld [vmem:[#allocation3 + $0x8] sm:$0xff] }
 0x4fd   : > { %v4591_v9 = vpop.f32.mrf.mxu3 }
 0x4fe   : > { %v4286_v62 = vld [vmem:[#allocation3 + $0xe0] sm:$0xff]  ;;  %v3971_v42 = vpop.f32.mrf.mxu1 }
 0x4ff   : > { %v4318_v8 = vadd.f32 %v4286_v62, %v4246_v36  ;;  %4009 = vst.msk [vmem:[#allocation3 + $0xe8] sm:$0xff] %vm177_vm1, %v3971_v42  ;;  %v9635_v22 = vpop.f32.mrf.mxu0  ;;  %v5398_v62 = vld [vmem:[#allocation2 + $0xf2] sm:$0xff] }
 0x500   : > { %v4627_v31 = vld [vmem:[#allocation3 + $0xd8] sm:$0xff]  ;;  %7681 = vmatmul.msk.f32.gmra.mxu2 %vm177_vm1, %v5394_v7 }
 0x501   : > { %v4659_v5 = vadd.f32 %v4627_v31, %v4585_v33  ;;  %4350 = vst.msk [vmem:[#allocation3 + $0xe0] sm:$0xff] %vm177_vm1, %v4318_v8  ;;  %7646 = vmatmul.msk.f32.gmra.mxu1 %vm177_vm1, %v6075_v38  ;;  %v4999_v38 = vadd.f32 %v4967_v53, %v9581_v14  ;;  %v5740_v8 = vld [vmem:[#allocation2 + $0x108] sm:$0xff] }
 0x502   : > { %7715 = vmatmul.msk.f32.gmra.mxu3 %vm177_vm1, %v5736_v2  ;;  %7749 = vmatmul.msk.f32.gmra.mxu0 %vm177_vm1, %v6078_v41  ;;  %v4968_v63 = vld [vmem:[#allocation3 + $0xd0] sm:$0xff]  ;;  %v6082_v7 = vld [vmem:[#allocation2 + $0x109] sm:$0xff] }
 0x503   : > { %4691 = vst.msk [vmem:[#allocation3 + $0xd8] sm:$0xff] %vm177_vm1, %v4659_v5  ;;  %v4252_v37 = vpop.f32.mrf.mxu2  ;;  %v5000_v44 = vadd.f32 %v4968_v63, %v9591_v32 }
 0x504   : > { %5031 = vst.msk [vmem:[#allocation3 + $0xc8] sm:$0xff] %vm177_vm1, %v4999_v38  ;;  %v5742_v38 = vld [vmem:[#allocation2 + $0x120] sm:$0xff] }
 0x505   : > { %v4594_v27 = vpop.f32.mrf.mxu3  ;;  %5032 = vst.msk [vmem:[#allocation3 + $0xd0] sm:$0xff] %vm177_vm1, %v5000_v44 }
 0x506   : > { %v4287_v18 = vld [vmem:[#allocation3 + $0xe8] sm:$0xff]  ;;  %v3974_v1 = vpop.f32.mrf.mxu1 }
 0x507   : > { %v4319_v26 = vadd.f32 %v4287_v18, %v4249_v19  ;;  %4010 = vst.msk [vmem:[#allocation3 + $0xf0] sm:$0xff] %vm177_vm1, %v3974_v1  ;;  %v9648_v10 = vpop.f32.mrf.mxu0 }
 0x508   : > { %v4628_v54 = vld [vmem:[#allocation3 + $0xe0] sm:$0xff]  ;;  %7682 = vmatmul.msk.f32.gmra.mxu2 %vm177_vm1, %v5395_v25 }
 0x509   : > { %v4660_v15 = vadd.f32 %v4628_v54, %v4588_v21  ;;  %4351 = vst.msk [vmem:[#allocation3 + $0xe8] sm:$0xff] %vm177_vm1, %v4319_v26  ;;  %7647 = vmatmul.msk.f32.gmra.mxu1 %vm177_vm1, %v6076_v16  ;;  %v5397_v21 = vld [vmem:[#allocation2 + $0xe2] sm:$0xff]  ;;  %v5741_v54 = vld [vmem:[#allocation2 + $0x110] sm:$0xff] }
 0x50a   : > { %7716 = vmatmul.msk.f32.gmra.mxu3 %vm177_vm1, %v5737_v39  ;;  %7750 = vmatmul.msk.f32.gmra.mxu0 %vm177_vm1, %v6079_v52  ;;  %v6083_v25 = vld [vmem:[#allocation2 + $0x111] sm:$0xff] }
 0x50b   : > { %4692 = vst.msk [vmem:[#allocation3 + $0xe0] sm:$0xff] %vm177_vm1, %v4660_v15  ;;  %v4255_v34 = vpop.f32.mrf.mxu2 }
 0x50d   : > { %v4597_v23 = vpop.f32.mrf.mxu3 }
 0x50e   : > { %v4288_v35 = vld [vmem:[#allocation3 + $0xf0] sm:$0xff]  ;;  %v3977_v49 = vpop.f32.mrf.mxu1 }
 0x50f   : > { %v4320_v50 = vadd.f32 %v4288_v35, %v4252_v37  ;;  %4011 = vst.msk [vmem:[#allocation3 + $0xf8] sm:$0xff] %vm177_vm1, %v3977_v49  ;;  %v9663_v17 = vpop.f32.mrf.mxu0  ;;  %v5400_v35 = vld [vmem:[#allocation2 + $0x10a] sm:$0xff] }
 0x510   : > { %v4629_v51 = vld [vmem:[#allocation3 + $0xe8] sm:$0xff]  ;;  %7683 = vmatmul.msk.f32.gmra.mxu2 %vm177_vm1, %v5396_v45  ;;  %v6084_v45 = vld [vmem:[#allocation2 + $0x121] sm:$0xff] }
 0x511   : > { %v4661_v33 = vadd.f32 %v4629_v51, %v4591_v9  ;;  %4352 = vst.msk [vmem:[#allocation3 + $0xf0] sm:$0xff] %vm177_vm1, %v4320_v50  ;;  %7648 = vmatmul.msk.f32.gmra.mxu1 %vm177_vm1, %v6077_v56  ;;  %v4969_v56 = vld [vmem:[#allocation3 + $0xd8] sm:$0xff] }
 0x512   : > { %7717 = vmatmul.msk.f32.gmra.mxu3 %vm177_vm1, %v5738_v40  ;;  %7751 = vmatmul.msk.f32.gmra.mxu0 %vm177_vm1, %v6080_v47  ;;  %v5001_v9 = vadd.f32 %v4969_v56, %v9602_v29  ;;  %v4970_v37 = vld [vmem:[#allocation3 + $0xe0] sm:$0xff]  ;;  %v5744_v56 = vld [vmem:[#allocation2 + $0x138] sm:$0xff] }
 0x513   : > { %4693 = vst.msk [vmem:[#allocation3 + $0xe8] sm:$0xff] %vm177_vm1, %v4661_v33  ;;  %v5530_v14 = vpop.f32.mrf.mxu2  ;;  %v5002_v18 = vadd.f32 %v4970_v37, %v9613_v30  ;;  %v5745_v37 = vld [vmem:[#allocation2 + $0x140] sm:$0xff] }
 0x514   : > { %5033 = vst.msk [vmem:[#allocation3 + $0xd8] sm:$0xff] %vm177_vm1, %v5001_v9 }
 0x515   : > { %v9666_v48 = vpop.f32.mrf.mxu3  ;;  %5034 = vst.msk [vmem:[#allocation3 + $0xe0] sm:$0xff] %vm177_vm1, %v5002_v18 }
 0x516   : > { %v4289_v43 = vld [vmem:[#allocation3 + $0xf8] sm:$0xff]  ;;  %v5188_v58 = vpop.f32.mrf.mxu1 }
 0x517   : > { %v4321_v16 = vadd.f32 %v4289_v43, %v4255_v34  ;;  %v5316_v36 = vadd.f32 %v5284_v12, %v5188_v58  ;;  %v9677_v32 = vpop.f32.mrf.mxu0  ;;  %v5401_v12 = vld [vmem:[#allocation2 + $0x112] sm:$0xff] }
 0x518   : > { %v4630_v0 = vld [vmem:[#allocation3 + $0xf0] sm:$0xff]  ;;  %7684 = vmatmul.msk.f32.gmra.mxu2 %vm177_vm1, %v5397_v21 }
 0x519   : > { %v4662_v57 = vadd.f32 %v4630_v0, %v4594_v27  ;;  %4353 = vst.msk [vmem:[#allocation3 + $0xf8] sm:$0xff] %vm177_vm1, %v4321_v16  ;;  %7649 = vmatmul.msk.f32.gmra.mxu1 %vm177_vm1, %v6078_v41  ;;  %v5286_v41 = vld [vmem:[#allocation3 + $0x10] sm:$0xff]  ;;  %v6085_v0 = vld [vmem:[#allocation2 + $0x129] sm:$0xff] }
 0x51a   : > { %5348 = vst.msk [vmem:[#allocation3] sm:$0xff] %vm177_vm1, %v5316_v36  ;;  %7718 = vmatmul.msk.f32.gmra.mxu3 %vm177_vm1, %v5739_v13  ;;  %7752 = vmatmul.msk.f32.gmra.mxu0 %vm177_vm1, %v6081_v55  ;;  %v4971_v49 = vld [vmem:[#allocation3 + $0xe8] sm:$0xff] }
 0x51b   : > { %4694 = vst.msk [vmem:[#allocation3 + $0xf0] sm:$0xff] %vm177_vm1, %v4662_v57  ;;  %v5533_v4 = vpop.f32.mrf.mxu2  ;;  %v5003_v51 = vadd.f32 %v4971_v49, %v9624_v20  ;;  %v5743_v20 = vld [vmem:[#allocation2 + $0x128] sm:$0xff] }
 0x51d   : > { %v9679_v6 = vpop.f32.mrf.mxu3  ;;  %5035 = vst.msk [vmem:[#allocation3 + $0xe8] sm:$0xff] %vm177_vm1, %v5003_v51 }
 0x51e   : > { %v5191_v46 = vpop.f32.mrf.mxu1 }
 0x51f   : > { %v5317_v19 = vadd.f32 %v5285_v60, %v5191_v46  ;;  %v9692_v27 = vpop.f32.mrf.mxu0  ;;  %v5402_v60 = vld [vmem:[#allocation2 + $0x122] sm:$0xff] }
 0x520   : > { %v4631_v11 = vld [vmem:[#allocation3 + $0xf8] sm:$0xff]  ;;  %7685 = vmatmul.msk.f32.gmra.mxu2 %vm177_vm1, %v5398_v62 }
 0x521   : > { %v4663_v42 = vadd.f32 %v4631_v11, %v4597_v23  ;;  %v5626_v24 = vld [vmem:[#allocation3] sm:$0xff]  ;;  %5349 = vst.msk [vmem:[#allocation3 + $0x8] sm:$0xff] %vm177_vm1, %v5317_v19  ;;  %7650 = vmatmul.msk.f32.gmra.mxu1 %vm177_vm1, %v6079_v52  ;;  %v5287_v52 = vld [vmem:[#allocation3 + $0x18] sm:$0xff]  ;;  %v9732_v11 = vld [vmem:[#allocation2 + $0x139] sm:$0xff] }
 0x522   : > { %v5658_v31 = vadd.f32 %v5626_v24, %v5530_v14  ;;  %7719 = vmatmul.msk.f32.gmra.mxu3 %vm177_vm1, %v5740_v8  ;;  %7753 = vmatmul.msk.f32.gmra.mxu0 %vm177_vm1, %v6082_v7  ;;  %v5288_v14 = vld [vmem:[#allocation3 + $0x20] sm:$0xff]  ;;  %v4972_v63 = vld [vmem:[#allocation3 + $0xf0] sm:$0xff] }
 0x523   : > { %4695 = vst.msk [vmem:[#allocation3 + $0xf8] sm:$0xff] %vm177_vm1, %v4663_v42  ;;  %v5536_v29 = vpop.f32.mrf.mxu2  ;;  %v5004_v36 = vadd.f32 %v4972_v63, %v9635_v22  ;;  %v5405_v63 = vld [vmem:[#allocation2 + $0x142] sm:$0xff] }
 0x524   : > { %5690 = vst.msk [vmem:[#allocation3] sm:$0xff] %vm177_vm1, %v5658_v31 }
 0x525   : > { %v9690_v5 = vpop.f32.mrf.mxu3  ;;  %5036 = vst.msk [vmem:[#allocation3 + $0xf0] sm:$0xff] %vm177_vm1, %v5004_v36 }
 0x526   : > { %v5194_v2 = vpop.f32.mrf.mxu1 }
 0x527   : > { %v5318_v59 = vadd.f32 %v5286_v41, %v5194_v2  ;;  %v9704_v50 = vpop.f32.mrf.mxu0  ;;  %v5403_v41 = vld [vmem:[#allocation2 + $0x12a] sm:$0xff] }
 0x528   : > { %v5627_v1 = vld [vmem:[#allocation3 + $0x8] sm:$0xff]  ;;  %7686 = vmatmul.msk.f32.gmra.mxu2 %vm177_vm1, %v5399_v3 }
 0x529   : > { %v5659_v26 = vadd.f32 %v5627_v1, %v5533_v4  ;;  %5350 = vst.msk [vmem:[#allocation3 + $0x10] sm:$0xff] %vm177_vm1, %v5318_v59  ;;  %7651 = vmatmul.msk.f32.gmra.mxu1 %vm177_vm1, %v6080_v47  ;;  %v9749_v59 = vld [vmem:[#allocation2 + $0x141] sm:$0xff] }
 0x52a   : > { %7720 = vmatmul.msk.f32.gmra.mxu3 %vm177_vm1, %v5741_v54  ;;  %7754 = vmatmul.msk.f32.gmra.mxu0 %vm177_vm1, %v6083_v25  ;;  %v4973_v19 = vld [vmem:[#allocation3 + $0xf8] sm:$0xff] }
 0x52b   : > { %5691 = vst.msk [vmem:[#allocation3 + $0x8] sm:$0xff] %vm177_vm1, %v5659_v26  ;;  %v5539_v30 = vpop.f32.mrf.mxu2  ;;  %v5968_v9 = vld [vmem:[#allocation3] sm:$0xff]  ;;  %v5005_v62 = vadd.f32 %v4973_v19, %v9648_v10 }
 0x52c   : > { %v6000_v42 = vadd.f32 %v5968_v9, %v9666_v48 }
 0x52d   : > { %v9702_v15 = vpop.f32.mrf.mxu3  ;;  %5037 = vst.msk [vmem:[#allocation3 + $0xf8] sm:$0xff] %vm177_vm1, %v5005_v62 }
 0x52e   : > { %v5197_v39 = vpop.f32.mrf.mxu1  ;;  %6032 = vst.msk [vmem:[#allocation3] sm:$0xff] %vm177_vm1, %v6000_v42 }
 0x52f   : > { %v5319_v34 = vadd.f32 %v5287_v52, %v5197_v39  ;;  %v9722_v21 = vpop.f32.mrf.mxu0  ;;  %v5291_v39 = vld [vmem:[#allocation3 + $0x38] sm:$0xff] }
 0x530   : > { %v5628_v23 = vld [vmem:[#allocation3 + $0x10] sm:$0xff]  ;;  %7687 = vmatmul.msk.f32.gmra.mxu2 %vm177_vm1, %v5400_v35 }
 0x531   : > { %v5660_v53 = vadd.f32 %v5628_v23, %v5536_v29  ;;  %5351 = vst.msk [vmem:[#allocation3 + $0x18] sm:$0xff] %vm177_vm1, %v5319_v34  ;;  %7652 = vmatmul.msk.f32.gmra.mxu1 %vm177_vm1, %v6081_v55  ;;  %v5289_v55 = vld [vmem:[#allocation3 + $0x28] sm:$0xff]  ;;  %v5290_v29 = vld [vmem:[#allocation3 + $0x30] sm:$0xff] }
 0x532   : > { %7721 = vmatmul.msk.f32.gmra.mxu3 %vm177_vm1, %v5742_v38  ;;  %7755 = vmatmul.msk.f32.gmra.mxu0 %vm177_vm1, %v6084_v45  ;;  %v5969_v18 = vld [vmem:[#allocation3 + $0x8] sm:$0xff] }
 0x533   : > { %5692 = vst.msk [vmem:[#allocation3 + $0x10] sm:$0xff] %vm177_vm1, %v5660_v53  ;;  %v5542_v33 = vpop.f32.mrf.mxu2  ;;  %v6001_v1 = vadd.f32 %v5969_v18, %v9679_v6  ;;  %v5404_v35 = vld [vmem:[#allocation2 + $0x13a] sm:$0xff]  ;;  %v6088_v6 = vld [vmem:[#allocation2 + $0x151] sm:$0xff] }
 0x535   : > { %v9714_v40 = vpop.f32.mrf.mxu3  ;;  %v6310_v26 = vld [vmem:[#allocation3] sm:$0xff]  ;;  %6033 = vst.msk [vmem:[#allocation3 + $0x8] sm:$0xff] %vm177_vm1, %v6001_v1 }
 0x536   : > { %v5200_v47 = vpop.f32.mrf.mxu1  ;;  %v6342_v54 = vadd.f32 %v6310_v26, %v9663_v17  ;;  %v5746_v17 = vld [vmem:[#allocation2 + $0x150] sm:$0xff] }
 0x537   : > { %v5320_v43 = vadd.f32 %v5288_v14, %v5200_v47  ;;  %v9740_v8 = vpop.f32.mrf.mxu0  ;;  %v5292_v14 = vld [vmem:[#allocation3 + $0x40] sm:$0xff] }
 0x538   : > { %v5629_v58 = vld [vmem:[#allocation3 + $0x18] sm:$0xff]  ;;  %7688 = vmatmul.msk.f32.gmra.mxu2 %vm177_vm1, %v5401_v12  ;;  %6374 = vst.msk [vmem:[#allocation3] sm:$0xff] %vm177_vm1, %v6342_v54 }
 0x539   : > { %v5661_v16 = vadd.f32 %v5629_v58, %v5539_v30  ;;  %5352 = vst.msk [vmem:[#allocation3 + $0x20] sm:$0xff] %vm177_vm1, %v5320_v43  ;;  %7653 = vmatmul.msk.f32.gmra.mxu1 %vm177_vm1, %v6082_v7 }
 0x53a   : > { %7722 = vmatmul.msk.f32.gmra.mxu3 %vm177_vm1, %v5743_v20  ;;  %7756 = vmatmul.msk.f32.gmra.mxu0 %vm177_vm1, %v6085_v0  ;;  %v5970_v53 = vld [vmem:[#allocation3 + $0x10] sm:$0xff] }
 0x53b   : > { %5693 = vst.msk [vmem:[#allocation3 + $0x18] sm:$0xff] %vm177_vm1, %v5661_v16  ;;  %v5545_v44 = vpop.f32.mrf.mxu2  ;;  %v6002_v38 = vadd.f32 %v5970_v53, %v9690_v5  ;;  %v6089_v5 = vld [vmem:[#allocation2 + $0x159] sm:$0xff] }
 0x53d   : > { %v9726_v57 = vpop.f32.mrf.mxu3  ;;  %6034 = vst.msk [vmem:[#allocation3 + $0x10] sm:$0xff] %vm177_vm1, %v6002_v38 }
 0x53e   : > { %v5203_v13 = vpop.f32.mrf.mxu1 }
 0x53f   : > { %v5321_v4 = vadd.f32 %v5289_v55, %v5203_v13  ;;  %v9759_v52 = vpop.f32.mrf.mxu0 }
 0x540   : > { %v5630_v46 = vld [vmem:[#allocation3 + $0x20] sm:$0xff]  ;;  %7689 = vmatmul.msk.f32.gmra.mxu2 %vm177_vm1, %v5402_v60 }
 0x541   : > { %v5662_v22 = vadd.f32 %v5630_v46, %v5542_v33  ;;  %5353 = vst.msk [vmem:[#allocation3 + $0x28] sm:$0xff] %vm177_vm1, %v5321_v4  ;;  %7654 = vmatmul.msk.f32.gmra.mxu1 %vm177_vm1, %v6083_v25  ;;  %v5293_v46 = vld [vmem:[#allocation3 + $0x48] sm:$0xff] }
 0x542   : > { %7723 = vmatmul.msk.f32.gmra.mxu3 %vm177_vm1, %v5744_v56  ;;  %7757 = vmatmul.msk.f32.gmra.mxu0 %vm177_vm1, %v9732_v11  ;;  %v5971_v36 = vld [vmem:[#allocation3 + $0x18] sm:$0xff]  ;;  %v5406_v56 = vld [vmem:[#allocation2 + $0x152] sm:$0xff] }
 0x543   : > { %5694 = vst.msk [vmem:[#allocation3 + $0x20] sm:$0xff] %vm177_vm1, %v5662_v22  ;;  %v5548_v24 = vpop.f32.mrf.mxu2 }
 0x544   : > { %v6312_v13 = vld [vmem:[#allocation3 + $0x10] sm:$0xff] }
 0x545   : > { %v9742_v31 = vpop.f32.mrf.mxu3  ;;  %v6344_v55 = vadd.f32 %v6312_v13, %v9692_v27  ;;  %v5297_v13 = vld [vmem:[#allocation3 + $0x68] sm:$0xff] }
 0x546   : > { %v5206_v7 = vpop.f32.mrf.mxu1 }
 0x547   : > { %v5322_v2 = vadd.f32 %v5290_v29, %v5206_v7  ;;  %v9774_v16 = vpop.f32.mrf.mxu0  ;;  %6376 = vst.msk [vmem:[#allocation3 + $0x10] sm:$0xff] %vm177_vm1, %v6344_v55 }
 0x548   : > { %v5631_v10 = vld [vmem:[#allocation3 + $0x28] sm:$0xff]  ;;  %7690 = vmatmul.msk.f32.gmra.mxu2 %vm177_vm1, %v5403_v41 }
 0x549   : > { %v5663_v48 = vadd.f32 %v5631_v10, %v5545_v44  ;;  %5354 = vst.msk [vmem:[#allocation3 + $0x30] sm:$0xff] %vm177_vm1, %v5322_v2  ;;  %7655 = vmatmul.msk.f32.gmra.mxu1 %vm177_vm1, %v6084_v45  ;;  %v6311_v45 = vld [vmem:[#allocation3 + $0x8] sm:$0xff]  ;;  %v5294_v2 = vld [vmem:[#allocation3 + $0x50] sm:$0xff] }
 0x54a   : > { %7724 = vmatmul.msk.f32.gmra.mxu3 %vm177_vm1, %v5745_v37  ;;  %7758 = vmatmul.msk.f32.gmra.mxu0 %vm177_vm1, %v9749_v59  ;;  %v6343_v33 = vadd.f32 %v6311_v45, %v9677_v32  ;;  %v5747_v32 = vld [vmem:[#allocation2 + $0x158] sm:$0xff]  ;;  %v5972_v27 = vld [vmem:[#allocation3 + $0x20] sm:$0xff] }
 0x54b   : > { %5695 = vst.msk [vmem:[#allocation3 + $0x28] sm:$0xff] %vm177_vm1, %v5663_v48  ;;  %v5551_v3 = vpop.f32.mrf.mxu2  ;;  %v6004_v62 = vadd.f32 %v5972_v27, %v9714_v40  ;;  %v5407_v48 = vld [vmem:[#allocation2 + $0x15a] sm:$0xff]  ;;  %v5749_v40 = vld [vmem:[#allocation2 + $0x170] sm:$0xff] }
 0x54c   : > { %6375 = vst.msk [vmem:[#allocation3 + $0x8] sm:$0xff] %vm177_vm1, %v6343_v33  ;;  %v5296_v33 = vld [vmem:[#allocation3 + $0x60] sm:$0xff] }
 0x54d   : > { %v9757_v25 = vpop.f32.mrf.mxu3  ;;  %6036 = vst.msk [vmem:[#allocation3 + $0x20] sm:$0xff] %vm177_vm1, %v6004_v62 }
 0x54e   : > { %v5209_v30 = vpop.f32.mrf.mxu1 }
 0x54f   : > { %v5323_v34 = vadd.f32 %v5291_v39, %v5209_v30  ;;  %v5295_v39 = vld [vmem:[#allocation3 + $0x58] sm:$0xff] }
 0x550   : > { %v5632_v23 = vld [vmem:[#allocation3 + $0x30] sm:$0xff]  ;;  %7691 = vmatmul.msk.f32.gmra.mxu2 %vm177_vm1, %v5404_v35  ;;  %v5408_v35 = vld [vmem:[#allocation2 + $0x16a] sm:$0xff] }
 0x551   : > { %v5664_v49 = vadd.f32 %v5632_v23, %v5548_v24  ;;  %5355 = vst.msk [vmem:[#allocation3 + $0x38] sm:$0xff] %vm177_vm1, %v5323_v34  ;;  %7656 = vmatmul.msk.f32.gmra.mxu1 %vm177_vm1, %v6085_v0  ;;  %v6003_v0 = vadd.f32 %v5971_v36, %v9702_v15  ;;  %v5748_v15 = vld [vmem:[#allocation2 + $0x168] sm:$0xff] }
 0x552   : > { %7725 = vmatmul.msk.f32.gmra.mxu3 %vm177_vm1, %v5746_v17  ;;  %7759 = vmatmul.msk.f32.gmra.mxu0 %vm177_vm1, %v6088_v6 }
 0x553   : > { %5696 = vst.msk [vmem:[#allocation3 + $0x30] sm:$0xff] %vm177_vm1, %v5664_v49  ;;  %v5554_v51 = vpop.f32.mrf.mxu2 }
 0x554   : > { %6035 = vst.msk [vmem:[#allocation3 + $0x18] sm:$0xff] %vm177_vm1, %v6003_v0  ;;  %v6314_v1 = vld [vmem:[#allocation3 + $0x20] sm:$0xff] }
 0x555   : > { %v9772_v12 = vpop.f32.mrf.mxu3  ;;  %v6346_v54 = vadd.f32 %v6314_v1, %v9722_v21  ;;  %v6092_v21 = vld [vmem:[#allocation2 + $0x181] sm:$0xff] }
 0x556   : > { %v5212_v47 = vpop.f32.mrf.mxu1 }
 0x557   : > { %v5324_v43 = vadd.f32 %v5292_v14, %v5212_v47  ;;  %6378 = vst.msk [vmem:[#allocation3 + $0x20] sm:$0xff] %vm177_vm1, %v6346_v54 }
 0x558   : > { %v5633_v58 = vld [vmem:[#allocation3 + $0x38] sm:$0xff]  ;;  %7692 = vmatmul.msk.f32.gmra.mxu2 %vm177_vm1, %v5405_v63  ;;  %v5409_v63 = vld [vmem:[#allocation2 + $0x172] sm:$0xff] }
 0x559   : > { %v5665_v20 = vadd.f32 %v5633_v58, %v5551_v3  ;;  %5356 = vst.msk [vmem:[#allocation3 + $0x40] sm:$0xff] %vm177_vm1, %v5324_v43  ;;  %7657 = vmatmul.msk.f32.gmra.mxu1 %vm177_vm1, %v9732_v11  ;;  %v9794_v11 = vpop.f32.mrf.mxu0 }
 0x55a   : > { %7726 = vmatmul.msk.f32.gmra.mxu3 %vm177_vm1, %v5747_v32  ;;  %7760 = vmatmul.msk.f32.gmra.mxu0 %vm177_vm1, %v6089_v5  ;;  %v5974_v17 = vld [vmem:[#allocation3 + $0x30] sm:$0xff] }
 0x55b   : > { %5697 = vst.msk [vmem:[#allocation3 + $0x38] sm:$0xff] %vm177_vm1, %v5665_v20  ;;  %v5557_v44 = vpop.f32.mrf.mxu2  ;;  %v6313_v24 = vld [vmem:[#allocation3 + $0x18] sm:$0xff]  ;;  %v6006_v53 = vadd.f32 %v5974_v17, %v9742_v31 }
 0x55c   : > { %v6345_v7 = vadd.f32 %v6313_v24, %v9704_v50  ;;  %v5973_v50 = vld [vmem:[#allocation3 + $0x28] sm:$0xff]  ;;  %v5751_v31 = vld [vmem:[#allocation2 + $0x188] sm:$0xff] }
 0x55d   : > { %v9791_v9 = vpop.f32.mrf.mxu3  ;;  %v6005_v3 = vadd.f32 %v5973_v50, %v9726_v57  ;;  %v5750_v57 = vld [vmem:[#allocation2 + $0x180] sm:$0xff]  ;;  %6038 = vst.msk [vmem:[#allocation3 + $0x30] sm:$0xff] %vm177_vm1, %v6006_v53 }
 0x55e   : > { %v5215_v4 = vpop.f32.mrf.mxu1  ;;  %6377 = vst.msk [vmem:[#allocation3 + $0x18] sm:$0xff] %vm177_vm1, %v6345_v7 }
 0x55f   : > { %v5325_v60 = vadd.f32 %v5293_v46, %v5215_v4  ;;  %6037 = vst.msk [vmem:[#allocation3 + $0x28] sm:$0xff] %vm177_vm1, %v6005_v3 }
 0x560   : > { %v5634_v22 = vld [vmem:[#allocation3 + $0x40] sm:$0xff]  ;;  %7693 = vmatmul.msk.f32.gmra.mxu2 %vm177_vm1, %v5406_v56 }
 0x561   : > { %v5666_v19 = vadd.f32 %v5634_v22, %v5554_v51  ;;  %5357 = vst.msk [vmem:[#allocation3 + $0x48] sm:$0xff] %vm177_vm1, %v5325_v60  ;;  %7658 = vmatmul.msk.f32.gmra.mxu1 %vm177_vm1, %v9749_v59  ;;  %v9813_v26 = vpop.f32.mrf.mxu0  ;;  %v5410_v60 = vld [vmem:[#allocation2 + $0x182] sm:$0xff] }
 0x562   : > { %7727 = vmatmul.msk.f32.gmra.mxu3 %vm177_vm1, %v5748_v15  ;;  %7761 = vmatmul.msk.f32.gmra.mxu0 %vm177_vm1, %v9219_v61 }
 0x563   : > { %5698 = vst.msk [vmem:[#allocation3 + $0x40] sm:$0xff] %vm177_vm1, %v5666_v19  ;;  %v5560_v42 = vpop.f32.mrf.mxu2 }
 0x564   : > { %v6316_v36 = vld [vmem:[#allocation3 + $0x30] sm:$0xff] }
 0x565   : > { %v9810_v59 = vpop.f32.mrf.mxu3  ;;  %v6348_v55 = vadd.f32 %v6316_v36, %v9759_v52  ;;  %v6094_v52 = vld [vmem:[#allocation2 + $0x199] sm:$0xff] }
 0x566   : > { %v5218_v29 = vpop.f32.mrf.mxu1  ;;  %v6315_v38 = vld [vmem:[#allocation3 + $0x28] sm:$0xff] }
 0x567   : > { %v5326_v10 = vadd.f32 %v5294_v2, %v5218_v29  ;;  %v6347_v47 = vadd.f32 %v6315_v38, %v9740_v8  ;;  %v6093_v8 = vld [vmem:[#allocation2 + $0x189] sm:$0xff]  ;;  %6380 = vst.msk [vmem:[#allocation3 + $0x30] sm:$0xff] %vm177_vm1, %v6348_v55  ;;  %v6406_v38 = vld [vmem:[#allocation2 + $0x32] sm:$0xff]  ;;  %v5302_v55 = vld [vmem:[#allocation3 + $0x90] sm:$0xff] }
 0x568   : > { %v5635_v41 = vld [vmem:[#allocation3 + $0x48] sm:$0xff]  ;;  %7694 = vmatmul.msk.f32.gmra.mxu2 %vm177_vm1, %v5407_v48  ;;  %v9857_v2 = vld [vmem:[#allocation2 + $0x18a] sm:$0xff]  ;;  %v6095_v48 = vld [vmem:[#allocation2 + $0x1a1] sm:$0xff] }
 0x569   : > { %v5667_v37 = vadd.f32 %v5635_v41, %v5557_v44  ;;  %5358 = vst.msk [vmem:[#allocation3 + $0x50] sm:$0xff] %vm177_vm1, %v5326_v10  ;;  %7659 = vmatmul.msk.f32.gmra.mxu1 %vm177_vm1, %v6088_v6  ;;  %v9829_v14 = vpop.f32.mrf.mxu0 }
 0x56a   : > { %7728 = vmatmul.msk.f32.gmra.mxu3 %vm177_vm1, %v5749_v40  ;;  %7762 = vmatmul.msk.f32.gmra.mxu0 %vm177_vm1, %v9221_v28  ;;  %6379 = vst.msk [vmem:[#allocation3 + $0x28] sm:$0xff] %vm177_vm1, %v6347_v47  ;;  %v5976_v15 = vld [vmem:[#allocation3 + $0x40] sm:$0xff] }
 0x56b   : > { %5699 = vst.msk [vmem:[#allocation3 + $0x48] sm:$0xff] %vm177_vm1, %v5667_v37  ;;  %v5563_v18 = vpop.f32.mrf.mxu2  ;;  %v6008_v27 = vadd.f32 %v5976_v15, %v9772_v12  ;;  %v5753_v12 = vld [vmem:[#allocation2 + $0x1a0] sm:$0xff] }
 0x56d   : > { %v9825_v51 = vpop.f32.mrf.mxu3  ;;  %6040 = vst.msk [vmem:[#allocation3 + $0x40] sm:$0xff] %vm177_vm1, %v6008_v27 }
 0x56e   : > { %v5221_v30 = vpop.f32.mrf.mxu1 }
 0x56f   : > { %v5327_v34 = vadd.f32 %v5295_v39, %v5221_v30 }
 0x570   : > { %v5636_v23 = vld [vmem:[#allocation3 + $0x50] sm:$0xff]  ;;  %7695 = vmatmul.msk.f32.gmra.mxu2 %vm177_vm1, %v5408_v35 }
 0x571   : > { %v5668_v49 = vadd.f32 %v5636_v23, %v5560_v42  ;;  %5359 = vst.msk [vmem:[#allocation3 + $0x58] sm:$0xff] %vm177_vm1, %v5327_v34  ;;  %7660 = vmatmul.msk.f32.gmra.mxu1 %vm177_vm1, %v6089_v5  ;;  %v5975_v5 = vld [vmem:[#allocation3 + $0x38] sm:$0xff]  ;;  %v9845_v22 = vpop.f32.mrf.mxu0  ;;  %v5298_v42 = vld [vmem:[#allocation3 + $0x70] sm:$0xff] }
 0x572   : > { %7729 = vmatmul.msk.f32.gmra.mxu3 %vm177_vm1, %v5750_v57  ;;  %7763 = vmatmul.msk.f32.gmra.mxu0 %vm177_vm1, %v6092_v21  ;;  %v6007_v0 = vadd.f32 %v5975_v5, %v9757_v25  ;;  %v5752_v25 = vld [vmem:[#allocation2 + $0x198] sm:$0xff] }
 0x573   : > { %5700 = vst.msk [vmem:[#allocation3 + $0x50] sm:$0xff] %vm177_vm1, %v5668_v49  ;;  %v5566_v6 = vpop.f32.mrf.mxu2  ;;  %v5977_v40 = vld [vmem:[#allocation3 + $0x48] sm:$0xff] }
 0x574   : > { %6039 = vst.msk [vmem:[#allocation3 + $0x38] sm:$0xff] %vm177_vm1, %v6007_v0  ;;  %v6318_v1 = vld [vmem:[#allocation3 + $0x40] sm:$0xff]  ;;  %v6009_v3 = vadd.f32 %v5977_v40, %v9791_v9  ;;  %v6407_v5 = vld [vmem:[#allocation2 + $0x3a] sm:$0xff] }
 0x575   : > { %v9842_v4 = vpop.f32.mrf.mxu3  ;;  %v6350_v30 = vadd.f32 %v6318_v1, %v9794_v11  ;;  %v5300_v11 = vld [vmem:[#allocation3 + $0x80] sm:$0xff] }
 0x576   : > { %v5224_v45 = vpop.f32.mrf.mxu1  ;;  %6041 = vst.msk [vmem:[#allocation3 + $0x48] sm:$0xff] %vm177_vm1, %v6009_v3 }
 0x577   : > { %v5328_v43 = vadd.f32 %v5296_v33, %v5224_v45  ;;  %6382 = vst.msk [vmem:[#allocation3 + $0x40] sm:$0xff] %vm177_vm1, %v6350_v30 }
 0x578   : > { %v5637_v58 = vld [vmem:[#allocation3 + $0x58] sm:$0xff]  ;;  %7696 = vmatmul.msk.f32.gmra.mxu2 %vm177_vm1, %v5409_v63  ;;  %v5301_v63 = vld [vmem:[#allocation3 + $0x88] sm:$0xff] }
 0x579   : > { %v5669_v20 = vadd.f32 %v5637_v58, %v5563_v18  ;;  %5360 = vst.msk [vmem:[#allocation3 + $0x60] sm:$0xff] %vm177_vm1, %v5328_v43  ;;  %7661 = vmatmul.msk.f32.gmra.mxu1 %vm177_vm1, %v9219_v61  ;;  %v5299_v18 = vld [vmem:[#allocation3 + $0x78] sm:$0xff] }
 0x57a   : > { %7730 = vmatmul.msk.f32.gmra.mxu3 %vm177_vm1, %v5751_v31  ;;  %7764 = vmatmul.msk.f32.gmra.mxu0 %vm177_vm1, %v6093_v8  ;;  %v5978_v9 = vld [vmem:[#allocation3 + $0x50] sm:$0xff] }
 0x57b   : > { %5701 = vst.msk [vmem:[#allocation3 + $0x58] sm:$0xff] %vm177_vm1, %v5669_v20  ;;  %v5569_v32 = vpop.f32.mrf.mxu2  ;;  %v6317_v24 = vld [vmem:[#allocation3 + $0x38] sm:$0xff] }
 0x57d   : > { %v9863_v41 = vpop.f32.mrf.mxu3 }
 0x57e   : > { %v5227_v44 = vpop.f32.mrf.mxu1 }
 0x57f   : > { %v5329_v61 = vadd.f32 %v5297_v13, %v5227_v44 }
 0x580   : > { %v5638_v46 = vld [vmem:[#allocation3 + $0x60] sm:$0xff]  ;;  %7697 = vmatmul.msk.f32.gmra.mxu2 %vm177_vm1, %v5410_v60 }
 0x581   : > { %v5670_v56 = vadd.f32 %v5638_v46, %v5566_v6  ;;  %5361 = vst.msk [vmem:[#allocation3 + $0x68] sm:$0xff] %vm177_vm1, %v5329_v61  ;;  %7662 = vmatmul.msk.f32.gmra.mxu1 %vm177_vm1, %v9221_v28  ;;  %v6349_v28 = vadd.f32 %v6317_v24, %v9774_v16  ;;  %v9867_v16 = vpop.f32.mrf.mxu0  ;;  %v6319_v6 = vld [vmem:[#allocation3 + $0x48] sm:$0xff] }
 0x582   : > { %7731 = vmatmul.msk.f32.gmra.mxu3 %vm177_vm1, %v5752_v25  ;;  %7765 = vmatmul.msk.f32.gmra.mxu0 %vm177_vm1, %v6094_v52  ;;  %v6351_v45 = vadd.f32 %v6319_v6, %v9813_v26  ;;  %v5979_v43 = vld [vmem:[#allocation3 + $0x58] sm:$0xff] }
 0x583   : > { %5702 = vst.msk [vmem:[#allocation3 + $0x60] sm:$0xff] %vm177_vm1, %v5670_v56  ;;  %v5572_v19 = vpop.f32.mrf.mxu2  ;;  %v6011_v20 = vadd.f32 %v5979_v43, %v9825_v51  ;;  %v6408_v25 = vld [vmem:[#allocation2 + $0x4a] sm:$0xff] }
 0x584   : > { %6381 = vst.msk [vmem:[#allocation3 + $0x38] sm:$0xff] %vm177_vm1, %v6349_v28  ;;  %v6409_v28 = vld [vmem:[#allocation2 + $0x52] sm:$0xff] }
 0x585   : > { %v9878_v23 = vpop.f32.mrf.mxu3  ;;  %6383 = vst.msk [vmem:[#allocation3 + $0x48] sm:$0xff] %vm177_vm1, %v6351_v45 }
 0x586   : > { %v5230_v62 = vpop.f32.mrf.mxu1  ;;  %6043 = vst.msk [vmem:[#allocation3 + $0x58] sm:$0xff] %vm177_vm1, %v6011_v20 }
 0x587   : > { %v5330_v7 = vadd.f32 %v5298_v42, %v5230_v62  ;;  %v5303_v62 = vld [vmem:[#allocation3 + $0x98] sm:$0xff] }
 0x588   : > { %v5639_v29 = vld [vmem:[#allocation3 + $0x68] sm:$0xff]  ;;  %7698 = vmatmul.msk.f32.gmra.mxu2 %vm177_vm1, %v9857_v2 }
 0x589   : > { %v5671_v10 = vadd.f32 %v5639_v29, %v5569_v32  ;;  %5362 = vst.msk [vmem:[#allocation3 + $0x70] sm:$0xff] %vm177_vm1, %v5330_v7  ;;  %7663 = vmatmul.msk.f32.gmra.mxu1 %vm177_vm1, %v6092_v21  ;;  %v9880_v49 = vpop.f32.mrf.mxu0  ;;  %v6010_v21 = vadd.f32 %v5978_v9, %v9810_v59 }
 0x58a   : > { %7732 = vmatmul.msk.f32.gmra.mxu3 %vm177_vm1, %v5753_v12  ;;  %7766 = vmatmul.msk.f32.gmra.mxu0 %vm177_vm1, %v6095_v48  ;;  %v5980_v44 = vld [vmem:[#allocation3 + $0x60] sm:$0xff] }
 0x58b   : > { %5703 = vst.msk [vmem:[#allocation3 + $0x68] sm:$0xff] %vm177_vm1, %v5671_v10  ;;  %v5575_v37 = vpop.f32.mrf.mxu2  ;;  %v6012_v61 = vadd.f32 %v5980_v44, %v9842_v4 }
 0x58c   : > { %6042 = vst.msk [vmem:[#allocation3 + $0x50] sm:$0xff] %vm177_vm1, %v6010_v21 }
 0x58d   : > { %v9889_v59 = vpop.f32.mrf.mxu3  ;;  %v6321_v60 = vld [vmem:[#allocation3 + $0x58] sm:$0xff]  ;;  %6044 = vst.msk [vmem:[#allocation3 + $0x60] sm:$0xff] %vm177_vm1, %v6012_v61 }
 0x58e   : > { %v5233_v50 = vpop.f32.mrf.mxu1  ;;  %v6353_v52 = vadd.f32 %v6321_v60, %v9845_v22 }
 0x58f   : > { %v5331_v54 = vadd.f32 %v5299_v18, %v5233_v50  ;;  %v5304_v18 = vld [vmem:[#allocation3 + $0xa0] sm:$0xff] }
 0x590   : > { %v5640_v39 = vld [vmem:[#allocation3 + $0x70] sm:$0xff]  ;;  %6385 = vst.msk [vmem:[#allocation3 + $0x58] sm:$0xff] %vm177_vm1, %v6353_v52 }
 0x591   : > { %v5672_v34 = vadd.f32 %v5640_v39, %v5572_v19  ;;  %5363 = vst.msk [vmem:[#allocation3 + $0x78] sm:$0xff] %vm177_vm1, %v5331_v54  ;;  %7664 = vmatmul.msk.f32.gmra.mxu1 %vm177_vm1, %v6093_v8  ;;  %v9892_v26 = vpop.f32.mrf.mxu0  ;;  %v6410_v54 = vld [vmem:[#allocation2 + $0x62] sm:$0xff] }
 0x592   : > { %v5981_v42 = vld [vmem:[#allocation3 + $0x68] sm:$0xff] }
 0x593   : > { %5704 = vst.msk [vmem:[#allocation3 + $0x70] sm:$0xff] %vm177_vm1, %v5672_v34  ;;  %v5578_v35 = vpop.f32.mrf.mxu2  ;;  %v6320_v8 = vld [vmem:[#allocation3 + $0x50] sm:$0xff]  ;;  %v6013_v10 = vadd.f32 %v5981_v42, %v9863_v41 }
 0x594   : > { %v6352_v36 = vadd.f32 %v6320_v8, %v9829_v14  ;;  %v6322_v7 = vld [vmem:[#allocation3 + $0x60] sm:$0xff] }
 0x595   : > { %v9901_v14 = vpop.f32.mrf.mxu3  ;;  %v6354_v29 = vadd.f32 %v6322_v7, %v9867_v16  ;;  %6045 = vst.msk [vmem:[#allocation3 + $0x68] sm:$0xff] %vm177_vm1, %v6013_v10 }
 0x596   : > { %v5236_v57 = vpop.f32.mrf.mxu1  ;;  %6384 = vst.msk [vmem:[#allocation3 + $0x50] sm:$0xff] %vm177_vm1, %v6352_v36 }
 0x597   : > { %v5332_v17 = vadd.f32 %v5300_v11, %v5236_v57  ;;  %6386 = vst.msk [vmem:[#allocation3 + $0x60] sm:$0xff] %vm177_vm1, %v6354_v29 }
 0x598   : > { %v5641_v53 = vld [vmem:[#allocation3 + $0x78] sm:$0xff] }
 0x599   : > { %v5673_v33 = vadd.f32 %v5641_v53, %v5575_v37  ;;  %5364 = vst.msk [vmem:[#allocation3 + $0x80] sm:$0xff] %vm177_vm1, %v5332_v17  ;;  %7769 = vmatmul.msk.f32.vlgmr.msra.gmra.mxu1 %vm177_vm1, %v6406_v38  ;;  %v9905_v19 = vpop.f32.mrf.mxu0  ;;  %v6411_v38 = vld [vmem:[#allocation2 + $0x6a] sm:$0xff] }
 0x59a   : > { %v5982_v16 = vld [vmem:[#allocation3 + $0x70] sm:$0xff] }
 0x59b   : > { %5705 = vst.msk [vmem:[#allocation3 + $0x78] sm:$0xff] %vm177_vm1, %v5673_v33  ;;  %v5581_v47 = vpop.f32.mrf.mxu2  ;;  %v6014_v41 = vadd.f32 %v5982_v16, %v9878_v23  ;;  %v5305_v23 = vld [vmem:[#allocation3 + $0xa8] sm:$0xff] }
 0x59c   : > { %v6323_v39 = vld [vmem:[#allocation3 + $0x68] sm:$0xff] }
 0x59d   : > { %v5923_v48 = vpop.f32.mrf.mxu3  ;;  %6046 = vst.msk [vmem:[#allocation3 + $0x70] sm:$0xff] %vm177_vm1, %v6014_v41  ;;  %v6355_v9 = vadd.f32 %v6323_v39, %v9880_v49 }
 0x59e   : > { %v5239_v58 = vpop.f32.mrf.mxu1 }
 0x59f   : > { %v5333_v31 = vadd.f32 %v5301_v63, %v5239_v58  ;;  %6387 = vst.msk [vmem:[#allocation3 + $0x68] sm:$0xff] %vm177_vm1, %v6355_v9 }
 0x5a0   : > { %v5642_v32 = vld [vmem:[#allocation3 + $0x80] sm:$0xff] }
 0x5a1   : > { %v5674_v0 = vadd.f32 %v5642_v32, %v5578_v35  ;;  %5365 = vst.msk [vmem:[#allocation3 + $0x88] sm:$0xff] %vm177_vm1, %v5333_v31  ;;  %7770 = vmatmul.msk.f32.gmra.mxu1 %vm177_vm1, %v6407_v5  ;;  %v9916_v37 = vpop.f32.mrf.mxu0  ;;  %v6412_v5 = vld [vmem:[#allocation2 + $0x7a] sm:$0xff] }
 0x5a2   : > { %v5983_v21 = vld [vmem:[#allocation3 + $0x78] sm:$0xff] }
 0x5a3   : > { %5706 = vst.msk [vmem:[#allocation3 + $0x80] sm:$0xff] %vm177_vm1, %v5674_v0  ;;  %v5584_v51 = vpop.f32.mrf.mxu2  ;;  %v6015_v6 = vadd.f32 %v5983_v21, %v9889_v59  ;;  %v5306_v59 = vld [vmem:[#allocation3 + $0xb0] sm:$0xff] }
 0x5a4   : > { %v6324_v33 = vld [vmem:[#allocation3 + $0x70] sm:$0xff] }
 0x5a5   : > { %v5926_v34 = vpop.f32.mrf.mxu3  ;;  %v6356_v49 = vadd.f32 %v6324_v33, %v9892_v26  ;;  %6047 = vst.msk [vmem:[#allocation3 + $0x78] sm:$0xff] %vm177_vm1, %v6015_v6 }
 0x5a6   : > { %v5242_v13 = vpop.f32.mrf.mxu1 }
 0x5a7   : > { %v5334_v46 = vadd.f32 %v5302_v55, %v5242_v13  ;;  %6388 = vst.msk [vmem:[#allocation3 + $0x70] sm:$0xff] %vm177_vm1, %v6356_v49  ;;  %v5307_v13 = vld [vmem:[#allocation3 + $0xb8] sm:$0xff] }
 0x5a8   : > { %v5643_v56 = vld [vmem:[#allocation3 + $0x88] sm:$0xff] }
 0x5a9   : > { %v5675_v15 = vadd.f32 %v5643_v56, %v5581_v47  ;;  %5366 = vst.msk [vmem:[#allocation3 + $0x90] sm:$0xff] %vm177_vm1, %v5334_v46  ;;  %7771 = vmatmul.msk.f32.gmra.mxu1 %vm177_vm1, %v6408_v25  ;;  %v9926_v57 = vpop.f32.mrf.mxu0  ;;  %v6413_v56 = vld [vmem:[#allocation2 + $0x82] sm:$0xff] }
 0x5aa   : > { %v5984_v63 = vld [vmem:[#allocation3 + $0x80] sm:$0xff] }
 0x5ab   : > { %5707 = vst.msk [vmem:[#allocation3 + $0x88] sm:$0xff] %vm177_vm1, %v5675_v15  ;;  %v5587_v4 = vpop.f32.mrf.mxu2  ;;  %v6016_v8 = vadd.f32 %v5984_v63, %v9901_v14 }
 0x5ac   : > { %v6325_v26 = vld [vmem:[#allocation3 + $0x78] sm:$0xff] }
 0x5ad   : > { %v5929_v43 = vpop.f32.mrf.mxu3  ;;  %v6357_v0 = vadd.f32 %v6325_v26, %v9905_v19  ;;  %6048 = vst.msk [vmem:[#allocation3 + $0x80] sm:$0xff] %vm177_vm1, %v6016_v8 }
 0x5ae   : > { %v5245_v27 = vpop.f32.mrf.mxu1 }
 0x5af   : > { %v5335_v24 = vadd.f32 %v5303_v62, %v5245_v27  ;;  %6389 = vst.msk [vmem:[#allocation3 + $0x78] sm:$0xff] %vm177_vm1, %v6357_v0  ;;  %v5308_v62 = vld [vmem:[#allocation3 + $0xc0] sm:$0xff] }
 0x5b0   : > { %v5644_v22 = vld [vmem:[#allocation3 + $0x90] sm:$0xff] }
 0x5b1   : > { %v5676_v12 = vadd.f32 %v5644_v22, %v5584_v51  ;;  %5367 = vst.msk [vmem:[#allocation3 + $0x98] sm:$0xff] %vm177_vm1, %v5335_v24  ;;  %7772 = vmatmul.msk.f32.gmra.mxu1 %vm177_vm1, %v6409_v28  ;;  %v6268_v20 = vpop.f32.mrf.mxu0  ;;  %v6414_v28 = vld [vmem:[#allocation2 + $0x92] sm:$0xff] }
 0x5b2   : > { %v5985_v55 = vld [vmem:[#allocation3 + $0x88] sm:$0xff] }
 0x5b3   : > { %5708 = vst.msk [vmem:[#allocation3 + $0x90] sm:$0xff] %vm177_vm1, %v5676_v12  ;;  %v5590_v40 = vpop.f32.mrf.mxu2  ;;  %v6017_v46 = vadd.f32 %v5985_v55, %v5923_v48 }
 0x5b4   : > { %v6326_v19 = vld [vmem:[#allocation3 + $0x80] sm:$0xff] }
 0x5b5   : > { %v5932_v60 = vpop.f32.mrf.mxu3  ;;  %v6358_v15 = vadd.f32 %v6326_v19, %v9916_v37  ;;  %6049 = vst.msk [vmem:[#allocation3 + $0x88] sm:$0xff] %vm177_vm1, %v6017_v46 }
 0x5b6   : > { %v5248_v50 = vpop.f32.mrf.mxu1 }
 0x5b7   : > { %v5336_v1 = vadd.f32 %v5304_v18, %v5248_v50  ;;  %6390 = vst.msk [vmem:[#allocation3 + $0x80] sm:$0xff] %vm177_vm1, %v6358_v15  ;;  %v5309_v18 = vld [vmem:[#allocation3 + $0xc8] sm:$0xff] }
 0x5b8   : > { %v5645_v3 = vld [vmem:[#allocation3 + $0x98] sm:$0xff] }
 0x5b9   : > { %v5677_v30 = vadd.f32 %v5645_v3, %v5587_v4  ;;  %5368 = vst.msk [vmem:[#allocation3 + $0xa0] sm:$0xff] %vm177_vm1, %v5336_v1  ;;  %7773 = vmatmul.msk.f32.gmra.mxu1 %vm177_vm1, %v6410_v54  ;;  %v6271_v25 = vpop.f32.mrf.mxu0  ;;  %v6415_v54 = vld [vmem:[#allocation2 + $0x9a] sm:$0xff] }
 0x5ba   : > { %v5986_v42 = vld [vmem:[#allocation3 + $0x90] sm:$0xff] }
 0x5bb   : > { %5709 = vst.msk [vmem:[#allocation3 + $0x98] sm:$0xff] %vm177_vm1, %v5677_v30  ;;  %v5593_v35 = vpop.f32.mrf.mxu2  ;;  %v6018_v7 = vadd.f32 %v5986_v42, %v5926_v34 }
 0x5bc   : > { %v6327_v10 = vld [vmem:[#allocation3 + $0x88] sm:$0xff] }
 0x5bd   : > { %v5935_v12 = vpop.f32.mrf.mxu3  ;;  %v6359_v48 = vadd.f32 %v6327_v10, %v9926_v57  ;;  %6050 = vst.msk [vmem:[#allocation3 + $0x90] sm:$0xff] %vm177_vm1, %v6018_v7 }
 0x5be   : > { %v5251_v11 = vpop.f32.mrf.mxu1 }
 0x5bf   : > { %v5337_v17 = vadd.f32 %v5305_v23, %v5251_v11  ;;  %6391 = vst.msk [vmem:[#allocation3 + $0x88] sm:$0xff] %vm177_vm1, %v6359_v48  ;;  %v5310_v23 = vld [vmem:[#allocation3 + $0xd0] sm:$0xff] }
 0x5c0   : > { %v5646_v53 = vld [vmem:[#allocation3 + $0xa0] sm:$0xff] }
 0x5c1   : > { %v5678_v45 = vadd.f32 %v5646_v53, %v5590_v40  ;;  %5369 = vst.msk [vmem:[#allocation3 + $0xa8] sm:$0xff] %vm177_vm1, %v5337_v17  ;;  %7774 = vmatmul.msk.f32.gmra.mxu1 %vm177_vm1, %v6411_v38  ;;  %v6274_v37 = vpop.f32.mrf.mxu0  ;;  %v6416_v38 = vld [vmem:[#allocation2 + $0xaa] sm:$0xff] }
 0x5c2   : > { %v5987_v16 = vld [vmem:[#allocation3 + $0x98] sm:$0xff] }
 0x5c3   : > { %5710 = vst.msk [vmem:[#allocation3 + $0xa0] sm:$0xff] %vm177_vm1, %v5678_v45  ;;  %v5596_v47 = vpop.f32.mrf.mxu2  ;;  %v6019_v41 = vadd.f32 %v5987_v16, %v5929_v43 }
 0x5c4   : > { %v6328_v39 = vld [vmem:[#allocation3 + $0x90] sm:$0xff] }
 0x5c5   : > { %v6360_v34 = vadd.f32 %v6328_v39, %v6268_v20  ;;  %6051 = vst.msk [vmem:[#allocation3 + $0x98] sm:$0xff] %vm177_vm1, %v6019_v41 }
 0x5c6   : > { %v5254_v58 = vpop.f32.mrf.mxu1 }
 0x5c7   : > { %v5338_v31 = vadd.f32 %v5306_v59, %v5254_v58  ;;  %6392 = vst.msk [vmem:[#allocation3 + $0x90] sm:$0xff] %vm177_vm1, %v6360_v34  ;;  %v5311_v58 = vld [vmem:[#allocation3 + $0xd8] sm:$0xff] }
 0x5c8   : > { %v5647_v32 = vld [vmem:[#allocation3 + $0xa8] sm:$0xff] }
 0x5c9   : > { %v5679_v36 = vadd.f32 %v5647_v32, %v5593_v35  ;;  %5370 = vst.msk [vmem:[#allocation3 + $0xb0] sm:$0xff] %vm177_vm1, %v5338_v31  ;;  %7775 = vmatmul.msk.f32.gmra.mxu1 %vm177_vm1, %v6412_v5  ;;  %v5938_v35 = vpop.f32.mrf.mxu3  ;;  %v6277_v9 = vpop.f32.mrf.mxu0  ;;  %v6417_v5 = vld [vmem:[#allocation2 + $0xb2] sm:$0xff] }
 0x5ca   : > { %v5988_v21 = vld [vmem:[#allocation3 + $0xa0] sm:$0xff] }
 0x5cb   : > { %5711 = vst.msk [vmem:[#allocation3 + $0xa8] sm:$0xff] %vm177_vm1, %v5679_v36  ;;  %v5599_v51 = vpop.f32.mrf.mxu2  ;;  %v6020_v6 = vadd.f32 %v5988_v21, %v5932_v60 }
 0x5cc   : > { %v6329_v33 = vld [vmem:[#allocation3 + $0x98] sm:$0xff] }
 0x5cd   : > { %v6361_v49 = vadd.f32 %v6329_v33, %v6271_v25  ;;  %6052 = vst.msk [vmem:[#allocation3 + $0xa0] sm:$0xff] %vm177_vm1, %v6020_v6 }
 0x5ce   : > { %v5257_v44 = vpop.f32.mrf.mxu1 }
 0x5cf   : > { %v5339_v61 = vadd.f32 %v5307_v13, %v5257_v44  ;;  %6393 = vst.msk [vmem:[#allocation3 + $0x98] sm:$0xff] %vm177_vm1, %v6361_v49  ;;  %v5312_v44 = vld [vmem:[#allocation3 + $0xe0] sm:$0xff] }
 0x5d0   : > { %v5648_v14 = vld [vmem:[#allocation3 + $0xb0] sm:$0xff] }
 0x5d1   : > { %v5680_v52 = vadd.f32 %v5648_v14, %v5596_v47  ;;  %5371 = vst.msk [vmem:[#allocation3 + $0xb8] sm:$0xff] %vm177_vm1, %v5339_v61  ;;  %7776 = vmatmul.msk.f32.gmra.mxu1 %vm177_vm1, %v6413_v56  ;;  %v5941_v47 = vpop.f32.mrf.mxu3  ;;  %v6280_v63 = vpop.f32.mrf.mxu0  ;;  %v6418_v14 = vld [vmem:[#allocation2 + $0xc2] sm:$0xff] }
 0x5d2   : > { %v5989_v59 = vld [vmem:[#allocation3 + $0xa8] sm:$0xff] }
 0x5d3   : > { %5712 = vst.msk [vmem:[#allocation3 + $0xb0] sm:$0xff] %vm177_vm1, %v5680_v52  ;;  %v5602_v4 = vpop.f32.mrf.mxu2  ;;  %v6021_v31 = vadd.f32 %v5989_v59, %v5935_v12 }
 0x5d4   : > { %v6330_v26 = vld [vmem:[#allocation3 + $0xa0] sm:$0xff] }
 0x5d5   : > { %v6362_v0 = vadd.f32 %v6330_v26, %v6274_v37  ;;  %6053 = vst.msk [vmem:[#allocation3 + $0xa8] sm:$0xff] %vm177_vm1, %v6021_v31 }
 0x5d6   : > { %v5260_v27 = vpop.f32.mrf.mxu1 }
 0x5d7   : > { %v5340_v24 = vadd.f32 %v5308_v62, %v5260_v27  ;;  %6394 = vst.msk [vmem:[#allocation3 + $0xa0] sm:$0xff] %vm177_vm1, %v6362_v0  ;;  %v5313_v27 = vld [vmem:[#allocation3 + $0xe8] sm:$0xff] }
 0x5d8   : > { %v5649_v22 = vld [vmem:[#allocation3 + $0xb8] sm:$0xff] }
 0x5d9   : > { %v5681_v29 = vadd.f32 %v5649_v22, %v5599_v51  ;;  %5372 = vst.msk [vmem:[#allocation3 + $0xc0] sm:$0xff] %vm177_vm1, %v5340_v24  ;;  %7777 = vmatmul.msk.f32.gmra.mxu1 %vm177_vm1, %v6414_v28  ;;  %v5944_v46 = vpop.f32.mrf.mxu3  ;;  %v6283_v56 = vpop.f32.mrf.mxu0  ;;  %v6419_v22 = vld [vmem:[#allocation2 + $0xca] sm:$0xff] }
 0x5da   : > { %v5990_v13 = vld [vmem:[#allocation3 + $0xb0] sm:$0xff] }
 0x5db   : > { %5713 = vst.msk [vmem:[#allocation3 + $0xb8] sm:$0xff] %vm177_vm1, %v5681_v29  ;;  %v5605_v40 = vpop.f32.mrf.mxu2  ;;  %v6022_v61 = vadd.f32 %v5990_v13, %v5938_v35 }
 0x5dc   : > { %v6331_v52 = vld [vmem:[#allocation3 + $0xa8] sm:$0xff] }
 0x5dd   : > { %v6363_v15 = vadd.f32 %v6331_v52, %v6277_v9  ;;  %6054 = vst.msk [vmem:[#allocation3 + $0xb0] sm:$0xff] %vm177_vm1, %v6022_v61  ;;  %v6654_v52 = vld [vmem:[#allocation3 + $0x10] sm:$0xff] }
 0x5de   : > { %v5263_v50 = vpop.f32.mrf.mxu1 }
 0x5df   : > { %v5341_v1 = vadd.f32 %v5309_v18, %v5263_v50  ;;  %6395 = vst.msk [vmem:[#allocation3 + $0xa8] sm:$0xff] %vm177_vm1, %v6363_v15  ;;  %v5314_v50 = vld [vmem:[#allocation3 + $0xf0] sm:$0xff] }
 0x5e0   : > { %v5650_v3 = vld [vmem:[#allocation3 + $0xc0] sm:$0xff] }
 0x5e1   : > { %v5682_v30 = vadd.f32 %v5650_v3, %v5602_v4  ;;  %5373 = vst.msk [vmem:[#allocation3 + $0xc8] sm:$0xff] %vm177_vm1, %v5341_v1  ;;  %7778 = vmatmul.msk.f32.gmra.mxu1 %vm177_vm1, %v6415_v54  ;;  %v5947_v10 = vpop.f32.mrf.mxu3  ;;  %v6286_v48 = vpop.f32.mrf.mxu0  ;;  %v6420_v3 = vld [vmem:[#allocation2 + $0xda] sm:$0xff] }
 0x5e2   : > { %v5991_v62 = vld [vmem:[#allocation3 + $0xb8] sm:$0xff] }
 0x5e3   : > { %5714 = vst.msk [vmem:[#allocation3 + $0xc0] sm:$0xff] %vm177_vm1, %v5682_v30  ;;  %v5608_v57 = vpop.f32.mrf.mxu2  ;;  %v6023_v24 = vadd.f32 %v5991_v62, %v5941_v47 }
 0x5e4   : > { %v6332_v29 = vld [vmem:[#allocation3 + $0xb0] sm:$0xff] }
 0x5e5   : > { %v6364_v12 = vadd.f32 %v6332_v29, %v6280_v63  ;;  %6055 = vst.msk [vmem:[#allocation3 + $0xb8] sm:$0xff] %vm177_vm1, %v6023_v24 }
 0x5e6   : > { %v5266_v11 = vpop.f32.mrf.mxu1 }
 0x5e7   : > { %v5342_v17 = vadd.f32 %v5310_v23, %v5266_v11  ;;  %6396 = vst.msk [vmem:[#allocation3 + $0xb0] sm:$0xff] %vm177_vm1, %v6364_v12  ;;  %v5315_v11 = vld [vmem:[#allocation3 + $0xf8] sm:$0xff] }
 0x5e8   : > { %v5651_v53 = vld [vmem:[#allocation3 + $0xc8] sm:$0xff] }
 0x5e9   : > { %v5683_v45 = vadd.f32 %v5651_v53, %v5605_v40  ;;  %5374 = vst.msk [vmem:[#allocation3 + $0xd0] sm:$0xff] %vm177_vm1, %v5342_v17  ;;  %7779 = vmatmul.msk.f32.gmra.mxu1 %vm177_vm1, %v6416_v38  ;;  %v5950_v34 = vpop.f32.mrf.mxu3  ;;  %v6289_v35 = vpop.f32.mrf.mxu0  ;;  %v6421_v53 = vld [vmem:[#allocation2 + $0xe2] sm:$0xff] }
 0x5ea   : > { %v5992_v18 = vld [vmem:[#allocation3 + $0xc0] sm:$0xff] }
 0x5eb   : > { %5715 = vst.msk [vmem:[#allocation3 + $0xc8] sm:$0xff] %vm177_vm1, %v5683_v45  ;;  %v5611_v32 = vpop.f32.mrf.mxu2  ;;  %v6024_v1 = vadd.f32 %v5992_v18, %v5944_v46  ;;  %v6423_v46 = vld [vmem:[#allocation2 + $0xfa] sm:$0xff] }
 0x5ec   : > { %v6333_v30 = vld [vmem:[#allocation3 + $0xb8] sm:$0xff] }
 0x5ed   : > { %v6365_v39 = vadd.f32 %v6333_v30, %v6283_v56  ;;  %6056 = vst.msk [vmem:[#allocation3 + $0xc0] sm:$0xff] %vm177_vm1, %v6024_v1  ;;  %v6656_v1 = vld [vmem:[#allocation3 + $0x20] sm:$0xff]  ;;  %v6426_v30 = vld [vmem:[#allocation2 + $0x122] sm:$0xff] }
 0x5ee   : > { %v5269_v43 = vpop.f32.mrf.mxu1 }
 0x5ef   : > { %v5343_v20 = vadd.f32 %v5311_v58, %v5269_v43  ;;  %6397 = vst.msk [vmem:[#allocation3 + $0xb8] sm:$0xff] %vm177_vm1, %v6365_v39  ;;  %v6652_v43 = vld [vmem:[#allocation3] sm:$0xff] }
 0x5f0   : > { %v5652_v8 = vld [vmem:[#allocation3 + $0xd0] sm:$0xff] }
 0x5f1   : > { %v5684_v36 = vadd.f32 %v5652_v8, %v5608_v57  ;;  %5375 = vst.msk [vmem:[#allocation3 + $0xd8] sm:$0xff] %vm177_vm1, %v5343_v20  ;;  %7780 = vmatmul.msk.f32.gmra.mxu1 %vm177_vm1, %v6417_v5  ;;  %v5953_v49 = vpop.f32.mrf.mxu3  ;;  %v6292_v59 = vpop.f32.mrf.mxu0 }
 0x5f2   : > { %v5993_v23 = vld [vmem:[#allocation3 + $0xc8] sm:$0xff] }
 0x5f3   : > { %5716 = vst.msk [vmem:[#allocation3 + $0xd0] sm:$0xff] %vm177_vm1, %v5684_v36  ;;  %v5614_v19 = vpop.f32.mrf.mxu2  ;;  %v6025_v17 = vadd.f32 %v5993_v23, %v5947_v10 }
 0x5f4   : > { %v6334_v45 = vld [vmem:[#allocation3 + $0xc0] sm:$0xff] }
 0x5f5   : > { %v6366_v33 = vadd.f32 %v6334_v45, %v6286_v48  ;;  %6057 = vst.msk [vmem:[#allocation3 + $0xc8] sm:$0xff] %vm177_vm1, %v6025_v17  ;;  %v6425_v48 = vld [vmem:[#allocation2 + $0x112] sm:$0xff] }
 0x5f6   : > { %v5272_v51 = vpop.f32.mrf.mxu1 }
 0x5f7   : > { %v5344_v55 = vadd.f32 %v5312_v44, %v5272_v51  ;;  %6398 = vst.msk [vmem:[#allocation3 + $0xc0] sm:$0xff] %vm177_vm1, %v6366_v33  ;;  %v6653_v51 = vld [vmem:[#allocation3 + $0x8] sm:$0xff]  ;;  %v6658_v33 = vld [vmem:[#allocation3 + $0x30] sm:$0xff] }
 0x5f8   : > { %v5653_v60 = vld [vmem:[#allocation3 + $0xd8] sm:$0xff] }
 0x5f9   : > { %v5685_v25 = vadd.f32 %v5653_v60, %v5611_v32  ;;  %5376 = vst.msk [vmem:[#allocation3 + $0xe0] sm:$0xff] %vm177_vm1, %v5344_v55  ;;  %7781 = vmatmul.msk.f32.gmra.mxu1 %vm177_vm1, %v6418_v14  ;;  %v6422_v32 = vld [vmem:[#allocation2 + $0xf2] sm:$0xff]  ;;  %v5956_v61 = vpop.f32.mrf.mxu3  ;;  %v6295_v60 = vpop.f32.mrf.mxu0 }
 0x5fa   : > { %v5994_v58 = vld [vmem:[#allocation3 + $0xd0] sm:$0xff] }
 0x5fb   : > { %5717 = vst.msk [vmem:[#allocation3 + $0xd8] sm:$0xff] %vm177_vm1, %v5685_v25  ;;  %v5617_v37 = vpop.f32.mrf.mxu2  ;;  %v6026_v20 = vadd.f32 %v5994_v58, %v5950_v34 }
 0x5fc   : > { %v6335_v36 = vld [vmem:[#allocation3 + $0xc8] sm:$0xff] }
 0x5fd   : > { %v6367_v26 = vadd.f32 %v6335_v36, %v6289_v35  ;;  %6058 = vst.msk [vmem:[#allocation3 + $0xd0] sm:$0xff] %vm177_vm1, %v6026_v20  ;;  %v6659_v20 = vld [vmem:[#allocation3 + $0x38] sm:$0xff] }
 0x5fe   : > { %v5275_v4 = vpop.f32.mrf.mxu1 }
 0x5ff   : > { %v5345_v42 = vadd.f32 %v5313_v27, %v5275_v4  ;;  %6399 = vst.msk [vmem:[#allocation3 + $0xc8] sm:$0xff] %vm177_vm1, %v6367_v26  ;;  %v6424_v27 = vld [vmem:[#allocation2 + $0x10a] sm:$0xff]  ;;  %v6430_v26 = vld [vmem:[#allocation2 + $0x152] sm:$0xff] }
 0x600   : > { %v5654_v7 = vld [vmem:[#allocation3 + $0xe0] sm:$0xff] }
 0x601   : > { %v5686_v28 = vadd.f32 %v5654_v7, %v5614_v19  ;;  %5377 = vst.msk [vmem:[#allocation3 + $0xe8] sm:$0xff] %vm177_vm1, %v5345_v42  ;;  %7782 = vmatmul.msk.f32.gmra.mxu1 %vm177_vm1, %v6419_v22  ;;  %v5959_v42 = vpop.f32.mrf.mxu3  ;;  %v6298_v7 = vpop.f32.mrf.mxu0 }
 0x602   : > { %v5995_v44 = vld [vmem:[#allocation3 + $0xd8] sm:$0xff] }
 0x603   : > { %5718 = vst.msk [vmem:[#allocation3 + $0xe0] sm:$0xff] %vm177_vm1, %v5686_v28  ;;  %v5620_v9 = vpop.f32.mrf.mxu2  ;;  %v6027_v55 = vadd.f32 %v5995_v44, %v5953_v49  ;;  %v6655_v28 = vld [vmem:[#allocation3 + $0x18] sm:$0xff] }
 0x604   : > { %v6336_v14 = vld [vmem:[#allocation3 + $0xd0] sm:$0xff] }
 0x605   : > { %v6368_v56 = vadd.f32 %v6336_v14, %v6292_v59  ;;  %6059 = vst.msk [vmem:[#allocation3 + $0xd8] sm:$0xff] %vm177_vm1, %v6027_v55 }
 0x606   : > { %v5278_v40 = vpop.f32.mrf.mxu1 }
 0x607   : > { %v5346_v16 = vadd.f32 %v5314_v50, %v5278_v40  ;;  %6400 = vst.msk [vmem:[#allocation3 + $0xd0] sm:$0xff] %vm177_vm1, %v6368_v56  ;;  %v6663_v56 = vld [vmem:[#allocation3 + $0x58] sm:$0xff] }
 0x608   : > { %v5655_v41 = vld [vmem:[#allocation3 + $0xe8] sm:$0xff] }
 0x609   : > { %v5687_v54 = vadd.f32 %v5655_v41, %v5617_v37  ;;  %5378 = vst.msk [vmem:[#allocation3 + $0xf0] sm:$0xff] %vm177_vm1, %v5346_v16  ;;  %7783 = vmatmul.msk.f32.gmra.mxu1 %vm177_vm1, %v6420_v3  ;;  %v5962_v50 = vpop.f32.mrf.mxu3  ;;  %v6301_v18 = vpop.f32.mrf.mxu0 }
 0x60a   : > { %v5996_v19 = vld [vmem:[#allocation3 + $0xe0] sm:$0xff] }
 0x60b   : > { %5719 = vst.msk [vmem:[#allocation3 + $0xe8] sm:$0xff] %vm177_vm1, %v5687_v54  ;;  %v5623_v31 = vpop.f32.mrf.mxu2  ;;  %v6028_v4 = vadd.f32 %v5996_v19, %v5956_v61  ;;  %v6662_v61 = vld [vmem:[#allocation3 + $0x50] sm:$0xff] }
 0x60c   : > { %v6337_v62 = vld [vmem:[#allocation3 + $0xd8] sm:$0xff] }
 0x60d   : > { %v6369_v24 = vadd.f32 %v6337_v62, %v6295_v60  ;;  %6060 = vst.msk [vmem:[#allocation3 + $0xe0] sm:$0xff] %vm177_vm1, %v6028_v4  ;;  %v6432_v60 = vld [vmem:[#allocation2 + $0x16a] sm:$0xff] }
 0x60e   : > { %v5281_v57 = vpop.f32.mrf.mxu1 }
 0x60f   : > { %v5347_v21 = vadd.f32 %v5315_v11, %v5281_v57  ;;  %6401 = vst.msk [vmem:[#allocation3 + $0xd8] sm:$0xff] %vm177_vm1, %v6369_v24  ;;  %v6657_v57 = vld [vmem:[#allocation3 + $0x28] sm:$0xff] }
 0x610   : > { %v5656_v6 = vld [vmem:[#allocation3 + $0xf0] sm:$0xff] }
 0x611   : > { %v5688_v38 = vadd.f32 %v5656_v6, %v5620_v9  ;;  %5379 = vst.msk [vmem:[#allocation3 + $0xf8] sm:$0xff] %vm177_vm1, %v5347_v21  ;;  %7784 = vmatmul.msk.f32.gmra.mxu1 %vm177_vm1, %v6421_v53  ;;  %v5965_v35 = vpop.f32.mrf.mxu3  ;;  %v6304_v23 = vpop.f32.mrf.mxu0  ;;  %v6427_v6 = vld [vmem:[#allocation2 + $0x12a] sm:$0xff] }
 0x612   : > { %v5997_v29 = vld [vmem:[#allocation3 + $0xe8] sm:$0xff] }
 0x613   : > { %5720 = vst.msk [vmem:[#allocation3 + $0xf0] sm:$0xff] %vm177_vm1, %v5688_v38  ;;  %v6029_v12 = vadd.f32 %v5997_v29, %v5959_v42  ;;  %v6665_v42 = vld [vmem:[#allocation3 + $0x68] sm:$0xff] }
 0x614   : > { %v6338_v37 = vld [vmem:[#allocation3 + $0xe0] sm:$0xff]  ;;  %v6436_v29 = vld [vmem:[#allocation2 + $0x19a] sm:$0xff] }
 0x615   : > { %v6370_v40 = vadd.f32 %v6338_v37, %v6298_v7  ;;  %6061 = vst.msk [vmem:[#allocation3 + $0xe8] sm:$0xff] %vm177_vm1, %v6029_v12  ;;  %v6667_v12 = vld [vmem:[#allocation3 + $0x78] sm:$0xff] }
 0x616   : > { %v6556_v47 = vpop.f32.mrf.mxu1  ;;  %v6437_v37 = vld [vmem:[#allocation2 + $0x1a2] sm:$0xff] }
 0x617   : > { %v6684_v63 = vadd.f32 %v6652_v43, %v6556_v47  ;;  %6402 = vst.msk [vmem:[#allocation3 + $0xe0] sm:$0xff] %vm177_vm1, %v6370_v40  ;;  %v6428_v47 = vld [vmem:[#allocation2 + $0x13a] sm:$0xff] }
 0x618   : > { %v5657_v8 = vld [vmem:[#allocation3 + $0xf8] sm:$0xff] }
 0x619   : > { %v5689_v5 = vadd.f32 %v5657_v8, %v5623_v31  ;;  %6716 = vst.msk [vmem:[#allocation3] sm:$0xff] %vm177_vm1, %v6684_v63  ;;  %7785 = vmatmul.msk.f32.gmra.mxu1 %vm177_vm1, %v6422_v32  ;;  %v6307_v43 = vpop.f32.mrf.mxu0  ;;  %v6429_v8 = vld [vmem:[#allocation2 + $0x142] sm:$0xff] }
 0x61a   : > { %v5998_v41 = vld [vmem:[#allocation3 + $0xf0] sm:$0xff] }
 0x61b   : > { %5721 = vst.msk [vmem:[#allocation3 + $0xf8] sm:$0xff] %vm177_vm1, %v5689_v5  ;;  %v6030_v54 = vadd.f32 %v5998_v41, %v5962_v50  ;;  %v6660_v5 = vld [vmem:[#allocation3 + $0x40] sm:$0xff] }
 0x61c   : > { %v6339_v39 = vld [vmem:[#allocation3 + $0xe8] sm:$0xff]  ;;  %v6668_v50 = vld [vmem:[#allocation3 + $0x80] sm:$0xff] }
 0x61d   : > { %v6371_v34 = vadd.f32 %v6339_v39, %v6301_v18  ;;  %6062 = vst.msk [vmem:[#allocation3 + $0xf0] sm:$0xff] %vm177_vm1, %v6030_v54  ;;  %v6671_v39 = vld [vmem:[#allocation3 + $0x98] sm:$0xff] }
 0x61e   : > { %v6559_v0 = vpop.f32.mrf.mxu1 }
 0x61f   : > { %v6685_v13 = vadd.f32 %v6653_v51, %v6559_v0  ;;  %6403 = vst.msk [vmem:[#allocation3 + $0xe8] sm:$0xff] %vm177_vm1, %v6371_v34  ;;  %v6661_v51 = vld [vmem:[#allocation3 + $0x48] sm:$0xff] }
 0x621   : > { %6717 = vst.msk [vmem:[#allocation3 + $0x8] sm:$0xff] %vm177_vm1, %v6685_v13  ;;  %7786 = vmatmul.msk.f32.gmra.mxu1 %vm177_vm1, %v6423_v46  ;;  %v6431_v13 = vld [vmem:[#allocation2 + $0x15a] sm:$0xff] }
 0x622   : > { %v5999_v11 = vld [vmem:[#allocation3 + $0xf8] sm:$0xff] }
 0x623   : > { %v6031_v17 = vadd.f32 %v5999_v11, %v5965_v35 }
 0x624   : > { %v6340_v53 = vld [vmem:[#allocation3 + $0xf0] sm:$0xff] }
 0x625   : > { %v6372_v38 = vadd.f32 %v6340_v53, %v6304_v23  ;;  %6063 = vst.msk [vmem:[#allocation3 + $0xf8] sm:$0xff] %vm177_vm1, %v6031_v17  ;;  %v6673_v23 = vld [vmem:[#allocation3 + $0xa8] sm:$0xff] }
 0x626   : > { %v6562_v25 = vpop.f32.mrf.mxu1 }
 0x627   : > { %v6686_v15 = vadd.f32 %v6654_v52, %v6562_v25  ;;  %6404 = vst.msk [vmem:[#allocation3 + $0xf0] sm:$0xff] %vm177_vm1, %v6372_v38  ;;  %v6433_v52 = vld [vmem:[#allocation2 + $0x172] sm:$0xff] }
 0x629   : > { %6718 = vst.msk [vmem:[#allocation3 + $0x10] sm:$0xff] %vm177_vm1, %v6686_v15  ;;  %7787 = vmatmul.msk.f32.gmra.mxu1 %vm177_vm1, %v6424_v27  ;;  %v6664_v15 = vld [vmem:[#allocation3 + $0x60] sm:$0xff]  ;;  %v6434_v27 = vld [vmem:[#allocation2 + $0x182] sm:$0xff] }
 0x62c   : > { %v6341_v58 = vld [vmem:[#allocation3 + $0xf8] sm:$0xff] }
 0x62d   : > { %v6373_v59 = vadd.f32 %v6341_v58, %v6307_v43  ;;  %v6676_v43 = vld [vmem:[#allocation3 + $0xc0] sm:$0xff] }
 0x62e   : > { %v6565_v22 = vpop.f32.mrf.mxu1  ;;  %v10047_v58 = vld [vmem:[#allocation3] sm:$0xff] }
 0x62f   : > { %v6687_v10 = vadd.f32 %v6655_v28, %v6565_v22  ;;  %6405 = vst.msk [vmem:[#allocation3 + $0xf8] sm:$0xff] %vm177_vm1, %v6373_v59  ;;  %v6666_v22 = vld [vmem:[#allocation3 + $0x70] sm:$0xff] }
 0x631   : > { %6719 = vst.msk [vmem:[#allocation3 + $0x18] sm:$0xff] %vm177_vm1, %v6687_v10  ;;  %7788 = vmatmul.msk.f32.gmra.mxu1 %vm177_vm1, %v6425_v48 }
 0x636   : > { %v6568_v16 = vpop.f32.mrf.mxu1 }
 0x637   : > { %v6688_v3 = vadd.f32 %v6656_v1, %v6568_v16  ;;  %v6669_v16 = vld [vmem:[#allocation3 + $0x88] sm:$0xff] }
 0x639   : > { %6720 = vst.msk [vmem:[#allocation3 + $0x20] sm:$0xff] %vm177_vm1, %v6688_v3  ;;  %7789 = vmatmul.msk.f32.gmra.mxu1 %vm177_vm1, %v6426_v30  ;;  %v6670_v3 = vld [vmem:[#allocation3 + $0x90] sm:$0xff] }
 0x63e   : > { %v6571_v9 = vpop.f32.mrf.mxu1 }
 0x63f   : > { %v6689_v21 = vadd.f32 %v6657_v57, %v6571_v9  ;;  %v6672_v9 = vld [vmem:[#allocation3 + $0xa0] sm:$0xff] }
 0x641   : > { %6721 = vst.msk [vmem:[#allocation3 + $0x28] sm:$0xff] %vm177_vm1, %v6689_v21  ;;  %7790 = vmatmul.msk.f32.gmra.mxu1 %vm177_vm1, %v6427_v6  ;;  %v6674_v6 = vld [vmem:[#allocation3 + $0xb0] sm:$0xff] }
 0x646   : > { %v6574_v45 = vpop.f32.mrf.mxu1 }
 0x647   : > { %v6690_v49 = vadd.f32 %v6658_v33, %v6574_v45  ;;  %v6675_v45 = vld [vmem:[#allocation3 + $0xb8] sm:$0xff] }
 0x649   : > { %6722 = vst.msk [vmem:[#allocation3 + $0x30] sm:$0xff] %vm177_vm1, %v6690_v49  ;;  %7791 = vmatmul.msk.f32.gmra.mxu1 %vm177_vm1, %v6428_v47  ;;  %v10045_v49 = vld [vmem:[#allocation3 + $0x8] sm:$0xff] }
 0x64e   : > { %v6577_v63 = vpop.f32.mrf.mxu1 }
 0x64f   : > { %v6691_v31 = vadd.f32 %v6659_v20, %v6577_v63  ;;  %v10049_v63 = vld [vmem:[#allocation3 + $0x10] sm:$0xff]  ;;  %v6850_v20 = vmul.f32 %v10045_v49, %v10045_v49 }
 0x651   : > { %6723 = vst.msk [vmem:[#allocation3 + $0x38] sm:$0xff] %vm177_vm1, %v6691_v31  ;;  %7792 = vmatmul.msk.f32.gmra.mxu1 %vm177_vm1, %v6429_v8  ;;  %v6849_v31 = vmul.f32 %v10047_v58, %v10047_v58  ;;  %v10056_v8 = vld [vmem:[#allocation3 + $0x18] sm:$0xff] }
 0x656   : > { %v6580_v32 = vpop.f32.mrf.mxu1 }
 0x657   : > { %v6692_v36 = vadd.f32 %v6660_v5, %v6580_v32  ;;  %v6781_v32 = vsel %vm177_vm1, %v10045_v49, 0.0  ;;  %v6851_v5 = vmul.f32 %v10049_v63, %v10049_v63 }
 0x659   : > { %6724 = vst.msk [vmem:[#allocation3 + $0x40] sm:$0xff] %vm177_vm1, %v6692_v36  ;;  %7793 = vmatmul.msk.f32.gmra.mxu1 %vm177_vm1, %v6430_v26  ;;  %v10062_v36 = vld [vmem:[#allocation3 + $0x20] sm:$0xff]  ;;  %v6780_v26 = vsel %vm177_vm1, %v10047_v58, 0.0 }
 0x65e   : > { %v6583_v0 = vpop.f32.mrf.mxu1 }
 0x65f   : > { %v6693_v44 = vadd.f32 %v6661_v51, %v6583_v0  ;;  %v6882_v0 = vsel %vm177_vm1, %v6850_v20, 0.0  ;;  %v6783_v51 = vsel %vm177_vm1, %v10049_v63, 0.0 }
 0x661   : > { %6725 = vst.msk [vmem:[#allocation3 + $0x48] sm:$0xff] %vm177_vm1, %v6693_v44  ;;  %7794 = vmatmul.msk.f32.gmra.mxu1 %vm177_vm1, %v6431_v13  ;;  %v6852_v44 = vmul.f32 %v10056_v8, %v10056_v8  ;;  %v6881_v13 = vsel %vm177_vm1, %v6849_v31, 0.0 }
 0x666   : > { %v6586_v55 = vpop.f32.mrf.mxu1 }
 0x667   : > { %v6694_v46 = vadd.f32 %v6662_v61, %v6586_v55  ;;  %v6782_v55 = vadd.f32 %v6781_v32, %v6780_v26  ;;  %v10072_v61 = vld [vmem:[#allocation3 + $0x28] sm:$0xff] }
 0x669   : > { %6726 = vst.msk [vmem:[#allocation3 + $0x50] sm:$0xff] %vm177_vm1, %v6694_v46  ;;  %7795 = vmatmul.msk.f32.gmra.mxu1 %vm177_vm1, %v6432_v60  ;;  %v6677_v60 = vld [vmem:[#allocation3 + $0xc8] sm:$0xff] }
 0x66e   : > { %v6589_v14 = vpop.f32.mrf.mxu1 }
 0x66f   : > { %v6695_v25 = vadd.f32 %v6663_v56, %v6589_v14  ;;  %v6884_v14 = vsel %vm177_vm1, %v6851_v5, 0.0  ;;  %v6785_v56 = vsel %vm177_vm1, %v10056_v8, 0.0 }
 0x671   : > { %6727 = vst.msk [vmem:[#allocation3 + $0x58] sm:$0xff] %vm177_vm1, %v6695_v25  ;;  %7796 = vmatmul.msk.f32.gmra.mxu1 %vm177_vm1, %v6433_v52  ;;  %v6853_v25 = vmul.f32 %v10062_v36, %v10062_v36 }
 0x676   : > { %v6592_v19 = vpop.f32.mrf.mxu1 }
 0x677   : > { %v6696_v4 = vadd.f32 %v6664_v15, %v6592_v19  ;;  %v6883_v19 = vadd.f32 %v6882_v0, %v6881_v13  ;;  %v6784_v15 = vadd.f32 %v6783_v51, %v6782_v55 }
 0x679   : > { %6728 = vst.msk [vmem:[#allocation3 + $0x60] sm:$0xff] %vm177_vm1, %v6696_v4  ;;  %7797 = vmatmul.msk.f32.gmra.mxu1 %vm177_vm1, %v6434_v27  ;;  %v10079_v4 = vld [vmem:[#allocation3 + $0x30] sm:$0xff]  ;;  %v6886_v27 = vsel %vm177_vm1, %v6852_v44, 0.0  ;;  %v6679_v44 = vld [vmem:[#allocation3 + $0xd8] sm:$0xff] }
 0x67e   : > { %v6595_v62 = vpop.f32.mrf.mxu1 }
 0x67f   : > { %v6697_v24 = vadd.f32 %v6665_v42, %v6595_v62  ;;  %v6787_v62 = vsel %vm177_vm1, %v10062_v36, 0.0  ;;  %v6854_v42 = vmul.f32 %v10072_v61, %v10072_v61 }
 0x681   : > { %6729 = vst.msk [vmem:[#allocation3 + $0x68] sm:$0xff] %vm177_vm1, %v6697_v24  ;;  %7798 = vmatmul.msk.f32.gmra.mxu1 %vm177_vm1, %v9857_v2  ;;  %v6885_v24 = vadd.f32 %v6884_v14, %v6883_v19 }
 0x686   : > { %v6598_v7 = vpop.f32.mrf.mxu1 }
 0x687   : > { %v6698_v28 = vadd.f32 %v6666_v22, %v6598_v7  ;;  %v6786_v7 = vadd.f32 %v6785_v56, %v6784_v15  ;;  %v10087_v22 = vld [vmem:[#allocation3 + $0x38] sm:$0xff] }
 0x688   : > { %v10130_v0 = vld [vmem:[#allocation3 + $0x68] sm:$0xff] }
 0x689   : > { %6730 = vst.msk [vmem:[#allocation3 + $0x70] sm:$0xff] %vm177_vm1, %v6698_v28  ;;  %7799 = vmatmul.msk.f32.gmra.mxu1 %vm177_vm1, %v6436_v29  ;;  %v6888_v28 = vsel %vm177_vm1, %v6853_v25, 0.0  ;;  %v6789_v29 = vsel %vm177_vm1, %v10072_v61, 0.0  ;;  %v6862_v15 = vmul.f32 %v10130_v0, %v10130_v0 }
 0x68e   : > { %v6601_v10 = vpop.f32.mrf.mxu1 }
 0x68f   : > { %v6699_v48 = vadd.f32 %v6667_v12, %v6601_v10  ;;  %v6855_v10 = vmul.f32 %v10079_v4, %v10079_v4  ;;  %v6887_v12 = vadd.f32 %v6886_v27, %v6885_v24 }
 0x690   : > { %v10137_v25 = vld [vmem:[#allocation3 + $0x70] sm:$0xff] }
 0x691   : > { %6731 = vst.msk [vmem:[#allocation3 + $0x78] sm:$0xff] %vm177_vm1, %v6699_v48  ;;  %7800 = vmatmul.msk.f32.gmra.mxu1 %vm177_vm1, %v6437_v37  ;;  %v6788_v48 = vadd.f32 %v6787_v62, %v6786_v7  ;;  %v10094_v37 = vld [vmem:[#allocation3 + $0x40] sm:$0xff]  ;;  %v6805_v7 = vsel %vm177_vm1, %v10130_v0, 0.0 }
 0x696   : > { %v6604_v40 = vpop.f32.mrf.mxu1 }
 0x697   : > { %v6700_v18 = vadd.f32 %v6668_v50, %v6604_v40  ;;  %v6890_v40 = vsel %vm177_vm1, %v6854_v42, 0.0  ;;  %v6791_v50 = vsel %vm177_vm1, %v10079_v4, 0.0 }
 0x698   : > { %v10145_v42 = vld [vmem:[#allocation3 + $0x78] sm:$0xff] }
 0x699   : > { %6732 = vst.msk [vmem:[#allocation3 + $0x80] sm:$0xff] %vm177_vm1, %v6700_v18  ;;  %v6856_v18 = vmul.f32 %v10087_v22, %v10087_v22 }
 0x69e   : > { %v6607_v2 = vpop.f32.mrf.mxu1 }
 0x69f   : > { %v6701_v1 = vadd.f32 %v6669_v16, %v6607_v2  ;;  %v6889_v2 = vadd.f32 %v6888_v28, %v6887_v12  ;;  %v6790_v16 = vadd.f32 %v6789_v29, %v6788_v48  ;;  %v6863_v28 = vmul.f32 %v10137_v25, %v10137_v25 }
 0x6a0   : > { %v10152_v12 = vld [vmem:[#allocation3 + $0x80] sm:$0xff]  ;;  %v6906_v48 = vsel %vm177_vm1, %v6862_v15, 0.0 }
 0x6a1   : > { %6733 = vst.msk [vmem:[#allocation3 + $0x88] sm:$0xff] %vm177_vm1, %v6701_v1  ;;  %v10101_v1 = vld [vmem:[#allocation3 + $0x48] sm:$0xff] }
 0x6a6   : > { %v6610_v41 = vpop.f32.mrf.mxu1 }
 0x6a7   : > { %v6702_v54 = vadd.f32 %v6670_v3, %v6610_v41  ;;  %v6678_v3 = vld [vmem:[#allocation3 + $0xd0] sm:$0xff] }
 0x6a9   : > { %6734 = vst.msk [vmem:[#allocation3 + $0x90] sm:$0xff] %vm177_vm1, %v6702_v54  ;;  %v6892_v54 = vsel %vm177_vm1, %v6855_v10, 0.0 }
 0x6ae   : > { %v6613_v30 = vpop.f32.mrf.mxu1 }
 0x6af   : > { %v6703_v34 = vadd.f32 %v6671_v39, %v6613_v30  ;;  %v6793_v30 = vsel %vm177_vm1, %v10087_v22, 0.0  ;;  %v6857_v39 = vmul.f32 %v10094_v37, %v10094_v37 }
 0x6b1   : > { %6735 = vst.msk [vmem:[#allocation3 + $0x98] sm:$0xff] %vm177_vm1, %v6703_v34 }
 0x6b6   : > { %v6616_v35 = vpop.f32.mrf.mxu1 }
 0x6b7   : > { %v6704_v57 = vadd.f32 %v6672_v9, %v6616_v35  ;;  %v6891_v35 = vadd.f32 %v6890_v40, %v6889_v2  ;;  %v6792_v9 = vadd.f32 %v6791_v50, %v6790_v16  ;;  %v6807_v40 = vsel %vm177_vm1, %v10137_v25, 0.0  ;;  %v10159_v16 = vld [vmem:[#allocation3 + $0x88] sm:$0xff] }
 0x6b8   : > { %v6864_v50 = vmul.f32 %v10145_v42, %v10145_v42 }
 0x6b9   : > { %6736 = vst.msk [vmem:[#allocation3 + $0xa0] sm:$0xff] %vm177_vm1, %v6704_v57  ;;  %v10108_v57 = vld [vmem:[#allocation3 + $0x50] sm:$0xff] }
 0x6ba   : > { %v6799_v31 = vsel %vm177_vm1, %v10108_v57, 0.0 }
 0x6be   : > { %v6619_v11 = vpop.f32.mrf.mxu1 }
 0x6bf   : > { %v6705_v21 = vadd.f32 %v6673_v23, %v6619_v11  ;;  %v6894_v11 = vsel %vm177_vm1, %v6856_v18, 0.0  ;;  %v6795_v23 = vsel %vm177_vm1, %v10094_v37, 0.0 }
 0x6c1   : > { %6737 = vst.msk [vmem:[#allocation3 + $0xa8] sm:$0xff] %vm177_vm1, %v6705_v21  ;;  %v6858_v21 = vmul.f32 %v10101_v1, %v10101_v1 }
 0x6c3   : > { %v6898_v20 = vsel %vm177_vm1, %v6858_v21, 0.0  ;;  %v6811_v21 = vsel %vm177_vm1, %v10152_v12, 0.0 }
 0x6c6   : > { %v6622_v17 = vpop.f32.mrf.mxu1 }
 0x6c7   : > { %v6706_v53 = vadd.f32 %v6674_v6, %v6622_v17  ;;  %v6893_v17 = vadd.f32 %v6892_v54, %v6891_v35  ;;  %v6794_v6 = vadd.f32 %v6793_v30, %v6792_v9  ;;  %v6908_v54 = vsel %vm177_vm1, %v6863_v28, 0.0 }
 0x6c8   : > { %v6809_v30 = vsel %vm177_vm1, %v10145_v42, 0.0 }
 0x6c9   : > { %6738 = vst.msk [vmem:[#allocation3 + $0xb0] sm:$0xff] %vm177_vm1, %v6706_v53  ;;  %v10116_v53 = vld [vmem:[#allocation3 + $0x58] sm:$0xff] }
 0x6ca   : > { %v6860_v32 = vmul.f32 %v10116_v53, %v10116_v53  ;;  %v6801_v55 = vsel %vm177_vm1, %v10116_v53, 0.0 }
 0x6ce   : > { %v6625_v38 = vpop.f32.mrf.mxu1 }
 0x6cf   : > { %v6707_v33 = vadd.f32 %v6675_v45, %v6625_v38  ;;  %v6896_v38 = vsel %vm177_vm1, %v6857_v39, 0.0  ;;  %v6797_v45 = vsel %vm177_vm1, %v10101_v1, 0.0  ;;  %v6865_v39 = vmul.f32 %v10152_v12, %v10152_v12 }
 0x6d1   : > { %6739 = vst.msk [vmem:[#allocation3 + $0xb8] sm:$0xff] %vm177_vm1, %v6707_v33  ;;  %v6859_v33 = vmul.f32 %v10108_v57, %v10108_v57 }
 0x6d3   : > { %v6900_v13 = vsel %vm177_vm1, %v6859_v33, 0.0  ;;  %v6912_v33 = vsel %vm177_vm1, %v6865_v39, 0.0 }
 0x6d6   : > { %v6628_v47 = vpop.f32.mrf.mxu1 }
 0x6d7   : > { %v6708_v59 = vadd.f32 %v6676_v43, %v6628_v47  ;;  %v6895_v47 = vadd.f32 %v6894_v11, %v6893_v17  ;;  %v6796_v43 = vadd.f32 %v6795_v23, %v6794_v6  ;;  %v10166_v11 = vld [vmem:[#allocation3 + $0x90] sm:$0xff]  ;;  %v6910_v23 = vsel %vm177_vm1, %v6864_v50, 0.0 }
 0x6d8   : > { %v6866_v17 = vmul.f32 %v10159_v16, %v10159_v16 }
 0x6d9   : > { %6740 = vst.msk [vmem:[#allocation3 + $0xc0] sm:$0xff] %vm177_vm1, %v6708_v59  ;;  %v10123_v59 = vld [vmem:[#allocation3 + $0x60] sm:$0xff]  ;;  %v6897_v5 = vadd.f32 %v6896_v38, %v6895_v47  ;;  %v6798_v26 = vadd.f32 %v6797_v45, %v6796_v43  ;;  %v10174_v45 = vld [vmem:[#allocation3 + $0x98] sm:$0xff]  ;;  %v6813_v47 = vsel %vm177_vm1, %v10159_v16, 0.0  ;;  %v6867_v43 = vmul.f32 %v10166_v11, %v10166_v11 }
 0x6da   : > { %v6803_v19 = vsel %vm177_vm1, %v10123_v59, 0.0 }
 0x6db   : > { %v6899_v14 = vadd.f32 %v6898_v20, %v6897_v5  ;;  %v6800_v56 = vadd.f32 %v6799_v31, %v6798_v26  ;;  %v6914_v5 = vsel %vm177_vm1, %v6866_v17, 0.0  ;;  %v6815_v26 = vsel %vm177_vm1, %v10166_v11, 0.0 }
 0x6dd   : > { %v6901_v27 = vadd.f32 %v6900_v13, %v6899_v14  ;;  %v6802_v62 = vadd.f32 %v6801_v55, %v6800_v56  ;;  %v10188_v55 = vld [vmem:[#allocation3 + $0xa8] sm:$0xff]  ;;  %v6916_v14 = vsel %vm177_vm1, %v6867_v43, 0.0  ;;  %v6817_v56 = vsel %vm177_vm1, %v10174_v45, 0.0 }
 0x6de   : > { %v6631_v46 = vpop.f32.mrf.mxu1  ;;  %v6870_v28 = vmul.f32 %v10188_v55, %v10188_v55  ;;  %v6821_v50 = vsel %vm177_vm1, %v10188_v55, 0.0 }
 0x6df   : > { %v6709_v52 = vadd.f32 %v6677_v60, %v6631_v46  ;;  %v6861_v46 = vmul.f32 %v10123_v59, %v10123_v59  ;;  %v6804_v10 = vadd.f32 %v6803_v19, %v6802_v62  ;;  %v10195_v62 = vld [vmem:[#allocation3 + $0xb0] sm:$0xff] }
 0x6e1   : > { %6741 = vst.msk [vmem:[#allocation3 + $0xc8] sm:$0xff] %vm177_vm1, %v6709_v52  ;;  %v6902_v52 = vsel %vm177_vm1, %v6860_v32, 0.0  ;;  %v6904_v24 = vsel %vm177_vm1, %v6861_v46, 0.0  ;;  %v6806_v2 = vadd.f32 %v6805_v7, %v6804_v10  ;;  %v10181_v32 = vld [vmem:[#allocation3 + $0xa0] sm:$0xff] }
 0x6e2   : > { %v6903_v29 = vadd.f32 %v6902_v52, %v6901_v27  ;;  %v6869_v52 = vmul.f32 %v10181_v32, %v10181_v32  ;;  %v6819_v7 = vsel %vm177_vm1, %v10181_v32, 0.0 }
 0x6e3   : > { %v6808_v9 = vadd.f32 %v6807_v40, %v6806_v2 }
 0x6e4   : > { %v6905_v18 = vadd.f32 %v6904_v24, %v6903_v29  ;;  %v6920_v40 = vsel %vm177_vm1, %v6869_v52, 0.0 }
 0x6e5   : > { %v6810_v38 = vadd.f32 %v6809_v30, %v6808_v9  ;;  %v6823_v30 = vsel %vm177_vm1, %v10195_v62, 0.0 }
 0x6e6   : > { %v6634_v41 = vpop.f32.mrf.mxu1  ;;  %v6907_v35 = vadd.f32 %v6906_v48, %v6905_v18  ;;  %v10203_v48 = vld [vmem:[#allocation3 + $0xb8] sm:$0xff]  ;;  %v6871_v18 = vmul.f32 %v10195_v62, %v10195_v62 }
 0x6e7   : > { %v6710_v34 = vadd.f32 %v6678_v3, %v6634_v41  ;;  %v6680_v3 = vld [vmem:[#allocation3 + $0xe0] sm:$0xff]  ;;  %v6812_v31 = vadd.f32 %v6811_v21, %v6810_v38  ;;  %v6872_v39 = vmul.f32 %v10203_v48, %v10203_v48  ;;  %v6682_v21 = vld [vmem:[#allocation3 + $0xf0] sm:$0xff] }
 0x6e8   : > { %v6909_v6 = vadd.f32 %v6908_v54, %v6907_v35  ;;  %v6922_v54 = vsel %vm177_vm1, %v6870_v28, 0.0  ;;  %v10217_v9 = vld [vmem:[#allocation3 + $0xc8] sm:$0xff]  ;;  %v6924_v17 = vsel %vm177_vm1, %v6871_v18, 0.0 }
 0x6e9   : > { %6742 = vst.msk [vmem:[#allocation3 + $0xd0] sm:$0xff] %vm177_vm1, %v6710_v34  ;;  %v6814_v13 = vadd.f32 %v6813_v47, %v6812_v31  ;;  %v6926_v31 = vsel %vm177_vm1, %v6872_v39, 0.0 }
 0x6ea   : > { %v6911_v20 = vadd.f32 %v6910_v23, %v6909_v6  ;;  %v6825_v6 = vsel %vm177_vm1, %v10203_v48, 0.0 }
 0x6eb   : > { %v6816_v27 = vadd.f32 %v6815_v26, %v6814_v13  ;;  %v6874_v26 = vmul.f32 %v10217_v9, %v10217_v9 }
 0x6ed   : > { %v6818_v10 = vadd.f32 %v6817_v56, %v6816_v27 }
 0x6ee   : > { %v6637_v51 = vpop.f32.mrf.mxu1 }
 0x6ef   : > { %v6711_v60 = vadd.f32 %v6679_v44, %v6637_v51  ;;  %v6868_v51 = vmul.f32 %v10174_v45, %v10174_v45  ;;  %v6913_v44 = vadd.f32 %v6912_v33, %v6911_v20 }
 0x6f0   : > { %v10224_v20 = vld [vmem:[#allocation3 + $0xd0] sm:$0xff] }
 0x6f1   : > { %6743 = vst.msk [vmem:[#allocation3 + $0xd8] sm:$0xff] %vm177_vm1, %v6711_v60  ;;  %v6681_v60 = vld [vmem:[#allocation3 + $0xe8] sm:$0xff]  ;;  %v6915_v15 = vadd.f32 %v6914_v5, %v6913_v44  ;;  %v6918_v24 = vsel %vm177_vm1, %v6868_v51, 0.0  ;;  %v6831_v27 = vsel %vm177_vm1, %v10224_v20, 0.0 }
 0x6f3   : > { %v6917_v29 = vadd.f32 %v6916_v14, %v6915_v15  ;;  %v6875_v14 = vmul.f32 %v10224_v20, %v10224_v20  ;;  %v6930_v15 = vsel %vm177_vm1, %v6874_v26, 0.0 }
 0x6f5   : > { %v6919_v2 = vadd.f32 %v6918_v24, %v6917_v29 }
 0x6f6   : > { %v6640_v41 = vpop.f32.mrf.mxu1 }
 0x6f7   : > { %v6712_v34 = vadd.f32 %v6680_v3, %v6640_v41  ;;  %v6820_v41 = vadd.f32 %v6819_v7, %v6818_v10  ;;  %v10210_v3 = vld [vmem:[#allocation3 + $0xc0] sm:$0xff] }
 0x6f8   : > { %v6873_v38 = vmul.f32 %v10210_v3, %v10210_v3  ;;  %v6827_v5 = vsel %vm177_vm1, %v10210_v3, 0.0  ;;  %v10232_v13 = vld [vmem:[#allocation3 + $0xd8] sm:$0xff] }
 0x6f9   : > { %6744 = vst.msk [vmem:[#allocation3 + $0xe0] sm:$0xff] %vm177_vm1, %v6712_v34  ;;  %v6921_v34 = vadd.f32 %v6920_v40, %v6919_v2  ;;  %v6822_v35 = vadd.f32 %v6821_v50, %v6820_v41  ;;  %v6876_v24 = vmul.f32 %v10232_v13, %v10232_v13  ;;  %v6683_v40 = vld [vmem:[#allocation3 + $0xf8] sm:$0xff]  ;;  %v6932_v50 = vsel %vm177_vm1, %v6875_v14, 0.0 }
 0x6fa   : > { %v6833_v18 = vsel %vm177_vm1, %v10232_v13, 0.0 }
 0x6fb   : > { %v6923_v47 = vadd.f32 %v6922_v54, %v6921_v34  ;;  %v6824_v43 = vadd.f32 %v6823_v30, %v6822_v35  ;;  %v6934_v34 = vsel %vm177_vm1, %v6876_v24, 0.0 }
 0x6fd   : > { %v6925_v51 = vadd.f32 %v6924_v17, %v6923_v47  ;;  %v6826_v44 = vadd.f32 %v6825_v6, %v6824_v43 }
 0x6fe   : > { %v6643_v46 = vpop.f32.mrf.mxu1 }
 0x6ff   : > { %v6713_v19 = vadd.f32 %v6681_v60, %v6643_v46  ;;  %v6928_v46 = vsel %vm177_vm1, %v6873_v38, 0.0  ;;  %v6829_v60 = vsel %vm177_vm1, %v10217_v9, 0.0  ;;  %v6927_v56 = vadd.f32 %v6926_v31, %v6925_v51 }
 0x700   : > { %v6828_v52 = vadd.f32 %v6827_v5, %v6826_v44 }
 0x701   : > { %6745 = vst.msk [vmem:[#allocation3 + $0xe8] sm:$0xff] %vm177_vm1, %v6713_v19  ;;  %v10239_v19 = vld [vmem:[#allocation3 + $0xe0] sm:$0xff]  ;;  %v6929_v7 = vadd.f32 %v6928_v46, %v6927_v56 }
 0x702   : > { %v6830_v28 = vadd.f32 %v6829_v60, %v6828_v52  ;;  %v6877_v2 = vmul.f32 %v10239_v19, %v10239_v19  ;;  %v6835_v35 = vsel %vm177_vm1, %v10239_v19, 0.0 }
 0x703   : > { %v6931_v54 = vadd.f32 %v6930_v15, %v6929_v7 }
 0x704   : > { %v6832_v30 = vadd.f32 %v6831_v27, %v6830_v28  ;;  %v6936_v6 = vsel %vm177_vm1, %v6877_v2, 0.0 }
 0x706   : > { %v6646_v23 = vpop.f32.mrf.mxu1  ;;  %v6834_v17 = vadd.f32 %v6833_v18, %v6832_v30 }
 0x707   : > { %v6714_v33 = vadd.f32 %v6682_v21, %v6646_v23  ;;  %v6933_v21 = vadd.f32 %v6932_v50, %v6931_v54 }
 0x708   : > { %v10246_v29 = vld [vmem:[#allocation3 + $0xe8] sm:$0xff]  ;;  %v6836_v43 = vadd.f32 %v6835_v35, %v6834_v17 }
 0x709   : > { %6746 = vst.msk [vmem:[#allocation3 + $0xf0] sm:$0xff] %vm177_vm1, %v6714_v33  ;;  %v6878_v23 = vmul.f32 %v10246_v29, %v10246_v29  ;;  %v6837_v38 = vsel %vm177_vm1, %v10246_v29, 0.0  ;;  %v6935_v47 = vadd.f32 %v6934_v34, %v6933_v21 }
 0x70a   : > { %v6838_v51 = vadd.f32 %v6837_v38, %v6836_v43 }
 0x70b   : > { %v6938_v31 = vsel %vm177_vm1, %v6878_v23, 0.0  ;;  %v6937_v26 = vadd.f32 %v6936_v6, %v6935_v47 }
 0x70d   : > { %v6939_v46 = vadd.f32 %v6938_v31, %v6937_v26 }
 0x70e   : > { %v6649_v10 = vpop.f32.mrf.mxu1 }
 0x70f   : > { %v6715_v41 = vadd.f32 %v6683_v40, %v6649_v10 }
 0x710   : > { %v10253_v39 = vld [vmem:[#allocation3 + $0xf0] sm:$0xff] }
 0x711   : > { %6747 = vst.msk [vmem:[#allocation3 + $0xf8] sm:$0xff] %vm177_vm1, %v6715_v41  ;;  %v6879_v33 = vmul.f32 %v10253_v39, %v10253_v39  ;;  %v6839_v5 = vsel %vm177_vm1, %v10253_v39, 0.0 }
 0x712   : > { %v6840_v60 = vadd.f32 %v6839_v5, %v6838_v51 }
 0x713   : > { %v6940_v44 = vsel %vm177_vm1, %v6879_v33, 0.0 }
 0x714   : > { %v6941_v15 = vadd.f32 %v6940_v44, %v6939_v46 }
 0x718   : > { %v10270_v14 = vld [vmem:[#allocation3 + $0xf8] sm:$0xff] }
 0x719   : > { %v6841_v56 = vsel %vm177_vm1, %v10270_v14, 0.0  ;;  %v6880_v52 = vmul.f32 %v10270_v14, %v10270_v14 }
 0x71a   : > { %v6842_v27 = vadd.f32 %v6841_v56, %v6840_v60 }
 0x71b   : > { %v6942_v24 = vsel %vm177_vm1, %v6880_v52, 0.0 }
 0x71c   : > { %v6843_v7 = vrot.slane %v6842_v27, 4  ;;  %v6943_v28 = vadd.f32 %v6942_v24, %v6941_v15 }
 0x71e   : > { %v6844_v10 = vadd.f32 %v6843_v7, %v6842_v27  ;;  %v6944_v40 = vrot.slane %v6943_v28, 4 }
 0x720   : > { %v6845_v50 = vrot.slane %v6844_v10, 2  ;;  %v6945_v18 = vadd.f32 %v6944_v40, %v6943_v28  ;;  %v7032_v40 = vld [vmem:[%s7876_s22 + $0x10] sm:$0xff] }
 0x722   : > { %v6846_v2 = vadd.f32 %v6845_v50, %v6844_v10  ;;  %v6946_v41 = vrot.slane %v6945_v18, 2  ;;  %v7031_v10 = vld [vmem:[%s7876_s22 + $0x8] sm:$0xff]  ;;  %v7033_v50 = vld [vmem:[%s7876_s22 + $0x18] sm:$0xff] }
 0x724   : > { %v6847_v54 = vrot.slane %v6846_v2, 1  ;;  %v6947_v30 = vadd.f32 %v6946_v41, %v6945_v18 }
 0x726   : > { %v6848_v34 = vadd.f32 %v6847_v54, %v6846_v2  ;;  %v6948_v35 = vrot.slane %v6947_v30, 1  ;;  %v7035_v54 = vld [vmem:[%s7876_s22 + $0x28] sm:$0xff] }
 0x728   : > { %v6949_v23 = vadd.f32 %v6948_v35, %v6947_v30  ;;  %v10277_v21 = vmul.f32 0.00390625, %v6848_v34 }
 0x72a   : > { %v6951_v17 = vmul.f32 0.00390625, %v6949_v23  ;;  %v6952_v6 = vmul.f32 %v10277_v21, %v10277_v21  ;;  %v6966_v60 = vsub.f32 %v10047_v58, %v10277_v21  ;;  %v6967_v56 = vsub.f32 %v10045_v49, %v10277_v21 }
 0x72b   : > { %v6968_v52 = vsub.f32 %v10049_v63, %v10277_v21  ;;  %v6969_v15 = vsub.f32 %v10056_v8, %v10277_v21  ;;  %v6970_v27 = vsub.f32 %v10062_v36, %v10277_v21  ;;  %v6971_v49 = vsub.f32 %v10072_v61, %v10277_v21  ;;  %v7030_v63 = vld [vmem:[%s7876_s22] sm:$0xff] }
 0x72c   : > { %v6953_v38 = vsub.f32 %v6951_v17, %v6952_v6  ;;  %v6972_v8 = vsub.f32 %v10079_v4, %v10277_v21  ;;  %v6973_v61 = vsub.f32 %v10087_v22, %v10277_v21  ;;  %v6974_v18 = vsub.f32 %v10094_v37, %v10277_v21  ;;  %v7034_v4 = vld [vmem:[%s7876_s22 + $0x20] sm:$0xff]  ;;  %v7036_v17 = vld [vmem:[%s7876_s22 + $0x30] sm:$0xff] }
 0x72d   : > { %v6975_v23 = vsub.f32 %v10101_v1, %v10277_v21  ;;  %v6976_v6 = vsub.f32 %v10108_v57, %v10277_v21  ;;  %v6977_v1 = vsub.f32 %v10116_v53, %v10277_v21  ;;  %v6978_v57 = vsub.f32 %v10123_v59, %v10277_v21 }
 0x72e   : > { %v6954_v33 = vmax.f32 %v6953_v38, 0.0  ;;  %v6979_v53 = vsub.f32 %v10130_v0, %v10277_v21  ;;  %v6980_v59 = vsub.f32 %v10137_v25, %v10277_v21  ;;  %v6981_v0 = vsub.f32 %v10145_v42, %v10277_v21 }
 0x72f   : > { %v6982_v25 = vsub.f32 %v10152_v12, %v10277_v21  ;;  %v6983_v42 = vsub.f32 %v10159_v16, %v10277_v21  ;;  %v6984_v12 = vsub.f32 %v10166_v11, %v10277_v21  ;;  %v6985_v16 = vsub.f32 %v10174_v45, %v10277_v21 }
 0x730   : > { %v6955_v47 = vadd.f32 1e-05, %v6954_v33  ;;  %v7037_v33 = vld [vmem:[%s7876_s22 + $0x38] sm:$0xff]  ;;  %v6986_v11 = vsub.f32 %v10181_v32, %v10277_v21  ;;  %v6987_v45 = vsub.f32 %v10188_v55, %v10277_v21  ;;  %v6988_v32 = vsub.f32 %v10195_v62, %v10277_v21 }
 0x731   : > { %v6989_v55 = vsub.f32 %v10203_v48, %v10277_v21  ;;  %v6990_v62 = vsub.f32 %v10210_v3, %v10277_v21  ;;  %v6991_v48 = vsub.f32 %v10217_v9, %v10277_v21  ;;  %v6992_v3 = vsub.f32 %v10224_v20, %v10277_v21 }
 0x732   : > { %7817 = vrsqrt.f32 %v6955_v47  ;;  %vm6962_vm7 = vweird.f32 %v6955_v47  ;;  %v6993_v9 = vsub.f32 %v10232_v13, %v10277_v21  ;;  %v6994_v20 = vsub.f32 %v10239_v19, %v10277_v21 }
 0x733   : > { %v6995_v13 = vsub.f32 %v10246_v29, %v10277_v21  ;;  %v6996_v19 = vsub.f32 %v10253_v39, %v10277_v21  ;;  %v6997_v29 = vsub.f32 %v10270_v14, %v10277_v21  ;;  %v7060_v21 = vld [vmem:[%s7876_s22 + $0xf0] sm:$0xff] }
 0x738   : > { %v7818_v43 = vpop.eup %7817 }
 0x739   : > { %v6957_v31 = vmul.f32 %v7818_v43, %v6955_v47  ;;  %vm6963_vm6 = vweird.f32 %v7818_v43 }
 0x73a   : > { %vm6964_vm8 = vmor %vm6962_vm7, %vm6963_vm6 }
 0x73b   : > { %v6958_v5 = vmul.f32 %v7818_v43, %v6957_v31  ;;  %v7038_v31 = vld [vmem:[%s7876_s22 + $0x40] sm:$0xff] }
 0x73d   : > { %v6959_v26 = vmul.f32 0.5, %v6958_v5 }
 0x73f   : > { %v6960_v51 = vsub.f32 1.5, %v6959_v26 }
 0x741   : > { %v6961_v44 = vmul.f32 %v7818_v43, %v6960_v51  ;;  %v7039_v51 = vld [vmem:[%s7876_s22 + $0x48] sm:$0xff] }
 0x743   : > { %v10281_v46 = vsel %vm6964_vm8, %v7818_v43, %v6961_v44 }
 0x744   : > { %v6998_v24 = vmul.f32 %v6966_v60, %v10281_v46  ;;  %v6999_v7 = vmul.f32 %v6967_v56, %v10281_v46  ;;  %v7000_v58 = vmul.f32 %v6968_v52, %v10281_v46  ;;  %v7001_v28 = vmul.f32 %v6969_v15, %v10281_v46  ;;  %v7040_v56 = vld [vmem:[%s7876_s22 + $0x50] sm:$0xff] }
 0x745   : > { %v7002_v36 = vmul.f32 %v6970_v27, %v10281_v46  ;;  %v7003_v2 = vmul.f32 %v6971_v49, %v10281_v46  ;;  %v7004_v41 = vmul.f32 %v6972_v8, %v10281_v46  ;;  %v7005_v22 = vmul.f32 %v6973_v61, %v10281_v46  ;;  %v7041_v27 = vld [vmem:[%s7876_s22 + $0x58] sm:$0xff]  ;;  %v7044_v8 = vld [vmem:[%s7876_s22 + $0x70] sm:$0xff] }
 0x746   : > { %v7062_v30 = vadd.f32 %v7030_v63, %v6998_v24  ;;  %v7063_v34 = vadd.f32 %v7031_v10, %v6999_v7  ;;  %v7064_v35 = vadd.f32 %v7032_v40, %v7000_v58  ;;  %v7065_v37 = vadd.f32 %v7033_v50, %v7001_v28  ;;  %v7042_v58 = vld [vmem:[%s7876_s22 + $0x60] sm:$0xff]  ;;  %v7043_v63 = vld [vmem:[%s7876_s22 + $0x68] sm:$0xff]  ;;  %v7045_v61 = vld [vmem:[%s7876_s22 + $0x78] sm:$0xff] }
 0x747   : > { %v7006_v38 = vmul.f32 %v6974_v18, %v10281_v46  ;;  %v7066_v47 = vadd.f32 %v7034_v4, %v7002_v36  ;;  %v7007_v43 = vmul.f32 %v6975_v23, %v10281_v46  ;;  %v7067_v5 = vadd.f32 %v7035_v54, %v7003_v2  ;;  %v7046_v4 = vld [vmem:[%s7876_s22 + $0x80] sm:$0xff]  ;;  %v7048_v23 = vld [vmem:[%s7876_s22 + $0x90] sm:$0xff] }
 0x748   : > { %7094 = vst.msk [vmem:[%s10311_s29] sm:$0xff] %vm177_vm1, %v7062_v30  ;;  %v7008_v26 = vmul.f32 %v6976_v6, %v10281_v46  ;;  %v7068_v44 = vadd.f32 %v7036_v17, %v7004_v41  ;;  %v7009_v60 = vmul.f32 %v6977_v1, %v10281_v46  ;;  %v7069_v52 = vadd.f32 %v7037_v33, %v7005_v22  ;;  %v7047_v30 = vld [vmem:[%s7876_s22 + $0x88] sm:$0xff]  ;;  %v7050_v33 = vld [vmem:[%s7876_s22 + $0xa0] sm:$0xff] }
 0x749   : > { %7095 = vst.msk [vmem:[%s10311_s29 + $0x8] sm:$0xff] %vm177_vm1, %v7063_v34  ;;  %v7010_v15 = vmul.f32 %v6978_v57, %v10281_v46  ;;  %v7070_v24 = vadd.f32 %v7038_v31, %v7006_v38  ;;  %v7011_v7 = vmul.f32 %v6979_v53, %v10281_v46  ;;  %v7071_v49 = vadd.f32 %v7039_v51, %v7007_v43  ;;  %v7051_v43 = vld [vmem:[%s7876_s22 + $0xa8] sm:$0xff]  ;;  %v7052_v57 = vld [vmem:[%s7876_s22 + $0xb0] sm:$0xff] }
 0x74a   : > { %7096 = vst.msk [vmem:[%s10311_s29 + $0x10] sm:$0xff] %vm177_vm1, %v7064_v35  ;;  %v7012_v28 = vmul.f32 %v6980_v59, %v10281_v46  ;;  %v7072_v10 = vadd.f32 %v7040_v56, %v7008_v26  ;;  %v7013_v40 = vmul.f32 %v6981_v0, %v10281_v46  ;;  %v7073_v36 = vadd.f32 %v7041_v27, %v7009_v60  ;;  %v7054_v56 = vld [vmem:[%s7876_s22 + $0xc0] sm:$0xff]  ;;  %v7056_v0 = vld [vmem:[%s7876_s22 + $0xd0] sm:$0xff] }
 0x74b   : > { %7097 = vst.msk [vmem:[%s10311_s29 + $0x18] sm:$0xff] %vm177_vm1, %v7065_v37  ;;  %v7014_v50 = vmul.f32 %v6982_v25, %v10281_v46  ;;  %v7074_v18 = vadd.f32 %v7042_v58, %v7010_v15  ;;  %v7015_v2 = vmul.f32 %v6983_v42, %v10281_v46  ;;  %v7075_v41 = vadd.f32 %v7043_v63, %v7011_v7  ;;  %v7049_v37 = vld [vmem:[%s7876_s22 + $0x98] sm:$0xff]  ;;  %v7055_v15 = vld [vmem:[%s7876_s22 + $0xc8] sm:$0xff]  ;;  %v7058_v63 = vld [vmem:[%s7876_s22 + $0xe0] sm:$0xff] }
 0x74c   : > { %7098 = vst.msk [vmem:[%s10311_s29 + $0x20] sm:$0xff] %vm177_vm1, %v7066_v47  ;;  %v7016_v54 = vmul.f32 %v6984_v12, %v10281_v46  ;;  %v7076_v34 = vadd.f32 %v7044_v8, %v7012_v28  ;;  %v7017_v35 = vmul.f32 %v6985_v16, %v10281_v46  ;;  %v7077_v22 = vadd.f32 %v7045_v61, %v7013_v40  ;;  %v7059_v42 = vld [vmem:[%s7876_s22 + $0xe8] sm:$0xff] }
 0x74d   : > { %7099 = vst.msk [vmem:[%s10311_s29 + $0x28] sm:$0xff] %vm177_vm1, %v7067_v5  ;;  %v7018_v17 = vmul.f32 %v6986_v11, %v10281_v46  ;;  %v7078_v6 = vadd.f32 %v7046_v4, %v7014_v50  ;;  %v7019_v38 = vmul.f32 %v6987_v45, %v10281_v46  ;;  %v7079_v47 = vadd.f32 %v7047_v30, %v7015_v2 }
 0x74e   : > { %7100 = vst.msk [vmem:[%s10311_s29 + $0x30] sm:$0xff] %vm177_vm1, %v7068_v44  ;;  %v7020_v1 = vmul.f32 %v6988_v32, %v10281_v46  ;;  %v7080_v31 = vadd.f32 %v7048_v23, %v7016_v54  ;;  %v7021_v5 = vmul.f32 %v6989_v55, %v10281_v46  ;;  %v7081_v26 = vadd.f32 %v7049_v37, %v7017_v35  ;;  %v7053_v44 = vld [vmem:[%s7876_s22 + $0xb8] sm:$0xff] }
 0x74f   : > { %7101 = vst.msk [vmem:[%s10311_s29 + $0x38] sm:$0xff] %vm177_vm1, %v7069_v52  ;;  %v7022_v51 = vmul.f32 %v6990_v62, %v10281_v46  ;;  %v7082_v53 = vadd.f32 %v7050_v33, %v7018_v17  ;;  %v7023_v60 = vmul.f32 %v6991_v48, %v10281_v46  ;;  %v7083_v52 = vadd.f32 %v7051_v43, %v7019_v38 }
 0x750   : > { %7102 = vst.msk [vmem:[%s10311_s29 + $0x40] sm:$0xff] %vm177_vm1, %v7070_v24  ;;  %v7024_v59 = vmul.f32 %v6992_v3, %v10281_v46  ;;  %v7084_v27 = vadd.f32 %v7052_v57, %v7020_v1  ;;  %v7025_v24 = vmul.f32 %v6993_v9, %v10281_v46  ;;  %v7085_v7 = vadd.f32 %v7053_v44, %v7021_v5 }
 0x751   : > { %7103 = vst.msk [vmem:[%s10311_s29 + $0x48] sm:$0xff] %vm177_vm1, %v7071_v49  ;;  %v7026_v58 = vmul.f32 %v6994_v20, %v10281_v46  ;;  %v7057_v49 = vld [vmem:[%s7876_s22 + $0xd8] sm:$0xff]  ;;  %v7086_v25 = vadd.f32 %v7054_v56, %v7022_v51  ;;  %v7027_v28 = vmul.f32 %v6995_v13, %v10281_v46  ;;  %v7028_v39 = vmul.f32 %v6996_v19, %v10281_v46 }
 0x752   : > { %7104 = vst.msk [vmem:[%s10311_s29 + $0x50] sm:$0xff] %vm177_vm1, %v7072_v10  ;;  %v7087_v10 = vadd.f32 %v7055_v15, %v7023_v60  ;;  %v7088_v40 = vadd.f32 %v7056_v0, %v7024_v59  ;;  %v7029_v14 = vmul.f32 %v6997_v29, %v10281_v46  ;;  %v7089_v8 = vadd.f32 %v7057_v49, %v7025_v24 }
 0x753   : > { %7105 = vst.msk [vmem:[%s10311_s29 + $0x58] sm:$0xff] %vm177_vm1, %v7073_v36  ;;  %v7061_v36 = vld [vmem:[%s7876_s22 + $0xf8] sm:$0xff]  ;;  %v7090_v12 = vadd.f32 %v7058_v63, %v7026_v58  ;;  %v7091_v50 = vadd.f32 %v7059_v42, %v7027_v28  ;;  %v7092_v61 = vadd.f32 %v7060_v21, %v7028_v39 }
 0x754   : > { %7106 = vst.msk [vmem:[%s10311_s29 + $0x60] sm:$0xff] %vm177_vm1, %v7074_v18  ;;  %v7093_v18 = vadd.f32 %v7061_v36, %v7029_v14 }
 0x755   : > { %7107 = vst.msk [vmem:[%s10311_s29 + $0x68] sm:$0xff] %vm177_vm1, %v7075_v41 }
 0x756   : > { %7108 = vst.msk [vmem:[%s10311_s29 + $0x70] sm:$0xff] %vm177_vm1, %v7076_v34 }
 0x757   : > { %7109 = vst.msk [vmem:[%s10311_s29 + $0x78] sm:$0xff] %vm177_vm1, %v7077_v22 }
 0x758   : > { %7110 = vst.msk [vmem:[%s10311_s29 + $0x80] sm:$0xff] %vm177_vm1, %v7078_v6 }
 0x759   : > { %7111 = vst.msk [vmem:[%s10311_s29 + $0x88] sm:$0xff] %vm177_vm1, %v7079_v47 }
 0x75a   : > { %7112 = vst.msk [vmem:[%s10311_s29 + $0x90] sm:$0xff] %vm177_vm1, %v7080_v31 }
 0x75b   : > { %7113 = vst.msk [vmem:[%s10311_s29 + $0x98] sm:$0xff] %vm177_vm1, %v7081_v26 }
 0x75c   : > { %7114 = vst.msk [vmem:[%s10311_s29 + $0xa0] sm:$0xff] %vm177_vm1, %v7082_v53 }
 0x75d   : > { %7115 = vst.msk [vmem:[%s10311_s29 + $0xa8] sm:$0xff] %vm177_vm1, %v7083_v52 }
 0x75e   : > { %7116 = vst.msk [vmem:[%s10311_s29 + $0xb0] sm:$0xff] %vm177_vm1, %v7084_v27 }
 0x75f   : > { %7117 = vst.msk [vmem:[%s10311_s29 + $0xb8] sm:$0xff] %vm177_vm1, %v7085_v7 }
 0x760   : > { %7118 = vst.msk [vmem:[%s10311_s29 + $0xc0] sm:$0xff] %vm177_vm1, %v7086_v25 }
 0x761   : > { %7119 = vst.msk [vmem:[%s10311_s29 + $0xc8] sm:$0xff] %vm177_vm1, %v7087_v10 }
 0x762   : > { %7120 = vst.msk [vmem:[%s10311_s29 + $0xd0] sm:$0xff] %vm177_vm1, %v7088_v40 }
 0x763   : > { %7121 = vst.msk [vmem:[%s10311_s29 + $0xd8] sm:$0xff] %vm177_vm1, %v7089_v8 }
 0x764   : > { %7122 = vst.msk [vmem:[%s10311_s29 + $0xe0] sm:$0xff] %vm177_vm1, %v7090_v12 }
 0x765   : > { %7123 = vst.msk [vmem:[%s10311_s29 + $0xe8] sm:$0xff] %vm177_vm1, %v7091_v50 }
 0x766   : > { %7124 = vst.msk [vmem:[%s10311_s29 + $0xf0] sm:$0xff] %vm177_vm1, %v7092_v61 }
 0x767   : > { %7125 = vst.msk [vmem:[%s10311_s29 + $0xf8] sm:$0xff] %vm177_vm1, %v7093_v18 }
 0x768 PF: > { %s12_s9 = sadd.s32 1, %s7825_s9  }
 0x769   : > { %p9_p4 = scmp.ge.s32.totalorder %s12_s9, 4  }
 0x76b   :  { %11 = sbr.rel (!%p9_p4) target bundleno = 1 (0x1), region = 79 }

</bundles_post_ra>
